<compile_context>
chip_gen: v6e
topology: v6e:2x2x1
jax: 0.10.0
libtpu: 0.0.40
codegen_flags: <defaults>
</compile_context>

<pallas_src>
import functools

import jax
import jax.numpy as jnp
from jax.experimental import pallas as pl
from jax.experimental.pallas import tpu as pltpu


_TM_MAX = 1024          # row tile for the conv matmuls
_VMEM_LIMIT = 32 * 1024 * 1024   # fits the v7x scoped default too

_CONV_CFG = [
    ("conv1", 3, 1, 1),   # (name, kernel, stride, pad)
    ("conv2", 4, 2, 1),
    ("conv3", 4, 2, 1),
    ("conv4", 4, 2, 1),
]


# ----------------------------------------------------------------------------
# Pallas kernels
# ----------------------------------------------------------------------------
def _make_conv_bn_lrelu_kernel(inv_m, tm, eps=1e-5, slope=0.1):
    """Fused conv-matmul + training-mode BatchNorm + LeakyReLU, 2-phase grid."""

    def kernel(p_ref, w_ref, g_ref, b_ref, o_ref,
               y_scr, sum_scr, ssq_scr, scale_scr, shift_scr):
        ph = pl.program_id(0)        # 0: matmul+stats, 1: normalize
        i = pl.program_id(1)         # M tile
        row = pl.multiple_of(i * tm, tm)

        @pl.when(ph == 0)
        def _matmul_stats():
            @pl.when(i == 0)
            def _init():
                sum_scr[...] = jnp.zeros_like(sum_scr)
                ssq_scr[...] = jnp.zeros_like(ssq_scr)

            y = jnp.dot(p_ref[...], w_ref[...],
                        preferred_element_type=jnp.float32)
            y_scr[pl.ds(row, tm), :] = y                 # stays fp32 in VMEM
            sum_scr[...] += jnp.sum(y, axis=0, keepdims=True)
            ssq_scr[...] += jnp.sum(y * y, axis=0, keepdims=True)

        @pl.when(ph == 1)
        def _bn_lrelu():
            @pl.when(i == 0)
            def _coeffs():
                mean = sum_scr[...] * inv_m
                var = jnp.maximum(ssq_scr[...] * inv_m - mean * mean, 0.0)
                scale = g_ref[...] * jax.lax.rsqrt(var + eps)
                scale_scr[...] = scale
                shift_scr[...] = b_ref[...] - mean * scale

            z = y_scr[pl.ds(row, tm), :] * scale_scr[...] + shift_scr[...]
            o_ref[...] = jnp.maximum(z, slope * z).astype(o_ref.dtype)

    return kernel


def _newton_recip(x):
    # EUP approximate reciprocal + one Newton step (~fp32 accuracy).
    r = pl.reciprocal(x, approx=True)
    return r * (2.0 - x * r)


def _make_head_kernel(num_classes):
    def kernel(x_ref, w1_ref, b1_ref, w2_ref, b2_ref, o_ref):
        # x: (N, F) bf16, w1: (F, 1024) bf16, w2: (1024, 128) bf16 block-diag.
        h = jnp.dot(x_ref[...], w1_ref[...], preferred_element_type=jnp.float32)
        h = jnp.maximum(h + b1_ref[...], 0.0)                      # ReLU
        z = jnp.dot(h.astype(w2_ref.dtype), w2_ref[...],
                    preferred_element_type=jnp.float32) + b2_ref[...]

        n, o = z.shape
        lane = jax.lax.broadcasted_iota(jnp.int32, (n, o), 1)

        # Adversarial head: sigmoid (exact divide; robust to exp overflow).
        sig = 1.0 / (1.0 + jnp.exp(-z))

        # Aux head: masked softmax over lanes 1..num_classes.
        lab_mask = (lane >= 1) & (lane <= num_classes)
        zm = jnp.where(lab_mask, z, jnp.float32(-1e30))
        m = jnp.max(zm, axis=-1, keepdims=True)
        e = jnp.where(lab_mask, jnp.exp(zm - m), 0.0)
        soft = e * _newton_recip(jnp.sum(e, axis=-1, keepdims=True))

        # Lane-dense output slab: col 0 sigmoid, cols 1..nc softmax, rest 0.
        o_ref[...] = jnp.where(lane == 0, sig, soft)

    return kernel


# ----------------------------------------------------------------------------
# Pallas wrappers
# ----------------------------------------------------------------------------
def _conv_bn_lrelu(patches, wk, gamma, beta, tm, true_m):
    Mp, Kp = patches.shape
    C = wk.shape[1]
    nt = Mp // tm
    kernel = _make_conv_bn_lrelu_kernel(1.0 / float(true_m), tm)
    return pl.pallas_call(
        kernel,
        out_shape=jax.ShapeDtypeStruct((Mp, C), jnp.bfloat16),
        grid=(2, nt),
        in_specs=[
            # phase 1 re-pins tile 0 so the patch DMA isn't repeated.
            pl.BlockSpec((tm, Kp), lambda ph, i: (i * (1 - ph), 0)),
            pl.BlockSpec((Kp, C), lambda ph, i: (0, 0)),   # weight resident
            pl.BlockSpec((1, C), lambda ph, i: (0, 0)),    # gamma
            pl.BlockSpec((1, C), lambda ph, i: (0, 0)),    # beta
        ],
        out_specs=pl.BlockSpec((tm, C), lambda ph, i: (i, 0)),
        scratch_shapes=[
            pltpu.VMEM((Mp, C), jnp.float32),   # fp32 y, resident across phases
            pltpu.VMEM((1, C), jnp.float32),    # sum
            pltpu.VMEM((1, C), jnp.float32),    # sum of squares
            pltpu.VMEM((1, C), jnp.float32),    # BN scale
            pltpu.VMEM((1, C), jnp.float32),    # BN shift
        ],
        compiler_params=pltpu.CompilerParams(
            # stats accumulate across the M axis -> must stay sequential
            dimension_semantics=("arbitrary", "arbitrary"),
            vmem_limit_bytes=_VMEM_LIMIT),
    )(patches, wk, gamma, beta)


def _fused_heads(feat, w1, b1, w2, b2, num_classes):
    N, F = feat.shape
    H2 = w1.shape[1]
    O = w2.shape[1]
    return pl.pallas_call(
        _make_head_kernel(num_classes),
        out_shape=jax.ShapeDtypeStruct((N, O), jnp.float32),
        grid=(1,),
        in_specs=[
            pl.BlockSpec((N, F), lambda i: (0, 0)),
            pl.BlockSpec((F, H2), lambda i: (0, 0)),
            pl.BlockSpec((1, H2), lambda i: (0, 0)),
            pl.BlockSpec((H2, O), lambda i: (0, 0)),
            pl.BlockSpec((1, O), lambda i: (0, 0)),
        ],
        out_specs=pl.BlockSpec((N, O), lambda i: (0, 0)),
        compiler_params=pltpu.CompilerParams(
            dimension_semantics=("arbitrary",),
            vmem_limit_bytes=_VMEM_LIMIT),
    )(feat, w1, b1, w2, b2)


# ----------------------------------------------------------------------------
# JAX glue
# ----------------------------------------------------------------------------
def _round_up(x, m):
    return ((x + m - 1) // m) * m


def im2col_nhwc(x, kh, kw, stride, pad):
    # x: (N, H, W, C) -> (N*Ho*Wo, kh*kw*C), feature order = (kh, kw, C)
    # TODO(synk): move inside the conv kernel (shifted VMEM slices) to avoid
    #             the k*k HBM duplication at real batch sizes.
    N, H, W, C = x.shape
    xp = jnp.pad(x, ((0, 0), (pad, pad), (pad, pad), (0, 0)))
    Ho = (H + 2 * pad - kh) // stride + 1
    Wo = (W + 2 * pad - kw) // stride + 1
    cols = []
    for i in range(kh):
        for j in range(kw):
            cols.append(xp[:, i:i + stride * Ho:stride, j:j + stride * Wo:stride, :])
    patches = jnp.concatenate(cols, axis=-1)            # (N, Ho, Wo, kh*kw*C)
    return patches.reshape(N * Ho * Wo, kh * kw * C), Ho, Wo


def _row_tile(M):
    if M <= _TM_MAX:
        return M, M
    return _TM_MAX, _round_up(M, _TM_MAX)


def conv_bn_lrelu_layer(x_nhwc, wk, gamma, beta, k, stride, pad):
    """Conv2d (bias cancelled by BN) -> BatchNorm2d(train stats) -> LeakyReLU(0.1)."""
    N = x_nhwc.shape[0]
    Cout = wk.shape[1]

    patches, Ho, Wo = im2col_nhwc(x_nhwc, k, k, stride, pad)
    M, K = patches.shape
    Kp = wk.shape[0]                                   # already padded in prep
    if Kp != K:
        patches = jnp.pad(patches, ((0, 0), (0, Kp - K)))
    tm, Mp = _row_tile(M)
    if Mp != M:
        patches = jnp.pad(patches, ((0, Mp - M), (0, 0)))   # zero rows: stats use true M
    patches = patches.astype(jnp.bfloat16)

    out = _conv_bn_lrelu(patches, wk, gamma, beta, tm, true_m=M)
    return out[:M].reshape(N, Ho, Wo, Cout)


def prepare_params(params, input_shape=(3, 16, 16), num_classes=10):
    """One-time parameter preprocessing (runs OUTSIDE the jitted forward)."""
    Cin, H, W = input_shape
    prep = {}
    cin = Cin
    for name, k, _s, _p in _CONV_CFG:
        w, _bias, gamma, beta = params[name]           # conv bias cancelled by BN
        cout = w.shape[0]
        K = k * k * cin
        Kp = _round_up(K, 32)
        wk = w.transpose(2, 3, 1, 0).reshape(K, cout)  # (kh, kw, Cin, Cout) flatten
        if Kp != K:
            wk = jnp.pad(wk, ((0, Kp - K), (0, 0)))
        prep[name] = (wk.astype(jnp.bfloat16),
                      gamma[None, :].astype(jnp.float32),
                      beta[None, :].astype(jnp.float32))
        cin = cout

    # Heads: permute W1 columns from NCHW-flatten to NHWC-flatten order and
    # pack both heads (adv + aux) into one W1 / block-diagonal W2.
    H4, W4, C = H // 8, W // 8, cin
    aw1, ab1, aw2, ab2 = params["adv"]
    xw1, xb1, xw2, xb2 = params["aux"]

    def permute_w1(w1):
        return w1.reshape(-1, C, H4, W4).transpose(2, 3, 1, 0).reshape(H4 * W4 * C, -1)

    w1cat = jnp.concatenate([permute_w1(aw1), permute_w1(xw1)], axis=1)   # (F, 1024)
    b1cat = jnp.concatenate([ab1, xb1])[None, :]                          # (1, 1024)

    Hh = aw1.shape[0]
    O = _round_up(1 + num_classes, 128)                # lane-dense output slab
    w2blk = jnp.zeros((2 * Hh, O), jnp.float32)
    w2blk = w2blk.at[:Hh, 0:1].set(aw2.T)              # adv head -> column 0
    w2blk = w2blk.at[Hh:, 1:1 + num_classes].set(xw2.T)   # aux head -> columns 1..nc
    b2 = jnp.zeros((1, O), jnp.float32)
    b2 = b2.at[0, 0].set(ab2[0])
    b2 = b2.at[0, 1:1 + num_classes].set(xb2)

    prep["head"] = (w1cat.astype(jnp.bfloat16), b1cat.astype(jnp.float32),
                    w2blk.astype(jnp.bfloat16), b2.astype(jnp.float32))
    return prep


# ----------------------------------------------------------------------------
# Full forward pass
# ----------------------------------------------------------------------------
def discriminator_cifar_forward(x, prep, *, num_classes):
    """x: (N, C, H, W) float32 (PyTorch layout). Returns (validity, label)."""
    N = x.shape[0]

    # Single layout change; stay NHWC (bf16 at the MXU boundary) afterwards.
    cur = jnp.transpose(x, (0, 2, 3, 1)).astype(jnp.bfloat16)

    for name, k, s, p in _CONV_CFG:
        wk, gamma, beta = prep[name]
        cur = conv_bn_lrelu_layer(cur, wk, gamma, beta, k, s, p)

    _, H4, W4, C = cur.shape
    feat = cur.reshape(N, H4 * W4 * C)       # NHWC flatten (head W1 permuted to match)

    w1, b1, w2, b2 = prep["head"]
    out = _fused_heads(feat, w1, b1, w2, b2, num_classes)
    validity = out[:, :1]
    label = out[:, 1:1 + num_classes]
    return validity, label


# ----------------------------------------------------------------------------
# Deterministic parameter construction (PyTorch layouts)
# ----------------------------------------------------------------------------
def make_params(key, input_shape=(3, 16, 16), num_classes=10, nc=128):
    Cin, H, W = input_shape
    feat = nc * (H // 8) * (W // 8)
    keys = jax.random.split(key, 24)
    ki = iter(keys)

    def conv_params(cin, cout, k):
        w = jax.random.normal(next(ki), (cout, cin, k, k), jnp.float32) * 0.05
        b = jax.random.normal(next(ki), (cout,), jnp.float32) * 0.01   # cancelled by BN
        gamma = 1.0 + 0.1 * jax.random.normal(next(ki), (cout,), jnp.float32)
        beta = 0.1 * jax.random.normal(next(ki), (cout,), jnp.float32)
        return (w, b, gamma, beta)

    def linear_params(fin, fout):
        w = jax.random.normal(next(ki), (fout, fin), jnp.float32) * 0.02
        b = 0.01 * jax.random.normal(next(ki), (fout,), jnp.float32)
        return w, b

    params = {
        "conv1": conv_params(Cin, nc, 3),
        "conv2": conv_params(nc, nc, 4),
        "conv3": conv_params(nc, nc, 4),
        "conv4": conv_params(nc, nc, 4),
    }
    aw1, ab1 = linear_params(feat, 512)
    aw2, ab2 = linear_params(512, 1)
    xw1, xb1 = linear_params(feat, 512)
    xw2, xb2 = linear_params(512, num_classes)
    params["adv"] = (aw1, ab1, aw2, ab2)
    params["aux"] = (xw1, xb1, xw2, xb2)
    return params


if __name__ == "__main__":
    key = jax.random.PRNGKey(0)
    kx, kp = jax.random.split(key)

    # Small shapes consistent with the module: batch=2, C=3, 16x16 spatial,
    # 10 classes (128*(16//8)*(16//8) = 512 flattened features).
    N, C, H, W = 2, 3, 16, 16
    num_classes = 10
    x = jax.random.normal(kx, (N, C, H, W), jnp.float32)
    params = make_params(kp, input_shape=(C, H, W), num_classes=num_classes)

    # Parameter preprocessing hoisted out of the per-call forward.
    prep = prepare_params(params, input_shape=(C, H, W), num_classes=num_classes)

    fwd = jax.jit(functools.partial(discriminator_cifar_forward,
                                    num_classes=num_classes))
    validity, label = fwd(x, prep)
    validity = jax.block_until_ready(validity)
    label = jax.block_until_ready(label)

    assert validity.shape == (N, 1)
    assert label.shape == (N, num_classes)
    assert bool(jnp.all(jnp.isfinite(validity))) and bool(jnp.all(jnp.isfinite(label)))
    assert bool(jnp.all((validity >= 0.0) & (validity <= 1.0)))
    assert bool(jnp.allclose(jnp.sum(label, axis=1), 1.0, atol=1e-4))

    print("KERNEL_OK")
</pallas_src>

<mosaic_0001>
module attributes {stable_mosaic.version = 11 : i64} {
  func.func @kernel(%arg0: i32, %arg1: i32, %arg2: memref<512x32xbf16, #tpu.memory_space<vmem>>, %arg3: memref<32x128xbf16, #tpu.memory_space<vmem>>, %arg4: memref<1x128xf32, #tpu.memory_space<vmem>>, %arg5: memref<1x128xf32, #tpu.memory_space<vmem>>, %arg6: memref<512x128xbf16, #tpu.memory_space<vmem>>, %arg7: memref<512x128xf32, #tpu.memory_space<vmem>>, %arg8: memref<1x128xf32, #tpu.memory_space<vmem>>, %arg9: memref<1x128xf32, #tpu.memory_space<vmem>>, %arg10: memref<1x128xf32, #tpu.memory_space<vmem>>, %arg11: memref<1x128xf32, #tpu.memory_space<vmem>>) attributes {dimension_semantics = [#tpu.dimension_semantics<arbitrary>, #tpu.dimension_semantics<arbitrary>], iteration_bounds = array<i64: 2, 1>, scalar_prefetch = 0 : i64, scratch_operands = 5 : i64, tpu.core_type = #tpu.core_type<tc>, window_params = [{transform_indices = @transform_0, window_bounds = array<i64: 512, 32>}, {pipeline_mode = #tpu.pipeline_mode<synchronous>, transform_indices = @transform_1, window_bounds = array<i64: 32, 128>}, {pipeline_mode = #tpu.pipeline_mode<synchronous>, transform_indices = @transform_2, window_bounds = array<i64: 1, 128>}, {pipeline_mode = #tpu.pipeline_mode<synchronous>, transform_indices = @transform_3, window_bounds = array<i64: 1, 128>}, {transform_indices = @transform_4, window_bounds = array<i64: 512, 128>}]} {
    %c512_i32 = arith.constant 512 : i32
    %0 = arith.muli %arg1, %c512_i32 : i32
    %1 = tpu.assume_multiple %0, 512 : i32
    %c0_i32 = arith.constant 0 : i32
    %2 = arith.cmpi eq, %arg0, %c0_i32 : i32
    %3 = arith.extui %2 : i1 to i32
    %c0_i32_0 = arith.constant 0 : i32
    %4 = arith.cmpi ne, %3, %c0_i32_0 : i32
    scf.if %4 {
      %c0_i32_2 = arith.constant 0 : i32
      %8 = arith.cmpi eq, %arg1, %c0_i32_2 : i32
      %9 = arith.extui %8 : i1 to i32
      %c0_i32_3 = arith.constant 0 : i32
      %10 = arith.cmpi ne, %9, %c0_i32_3 : i32
      scf.if %10 {
        %cst_18 = arith.constant 0.000000e+00 : f32
        %27 = vector.broadcast %cst_18 : f32 to vector<1x128xf32>
        %c0_19 = arith.constant 0 : index
        %c0_20 = arith.constant 0 : index
        %28 = vector.load %arg8[%c0_19, %c0_20] : memref<1x128xf32, #tpu.memory_space<vmem>>, vector<1x128xf32>
        tpu.vector_store %arg8[%c0_19, %c0_20], %27 {strides = array<i32>} : memref<1x128xf32, #tpu.memory_space<vmem>>, vector<1x128xf32>,
        %cst_21 = arith.constant 0.000000e+00 : f32
        %29 = vector.broadcast %cst_21 : f32 to vector<1x128xf32>
        %c0_22 = arith.constant 0 : index
        %c0_23 = arith.constant 0 : index
        %30 = vector.load %arg9[%c0_22, %c0_23] : memref<1x128xf32, #tpu.memory_space<vmem>>, vector<1x128xf32>
        tpu.vector_store %arg9[%c0_22, %c0_23], %29 {strides = array<i32>} : memref<1x128xf32, #tpu.memory_space<vmem>>, vector<1x128xf32>,
      } else {
      }
      %c0 = arith.constant 0 : index
      %c0_4 = arith.constant 0 : index
      %11 = vector.load %arg2[%c0, %c0_4] : memref<512x32xbf16, #tpu.memory_space<vmem>>, vector<512x32xbf16>
      %c0_5 = arith.constant 0 : index
      %c0_6 = arith.constant 0 : index
      %12 = vector.load %arg3[%c0_5, %c0_6] : memref<32x128xbf16, #tpu.memory_space<vmem>>, vector<32x128xbf16>
      %cst = arith.constant dense<0.000000e+00> : vector<512x128xf32>
      %13 = tpu.matmul %11, %12, %cst {dimension_numbers = #tpu.dot_dimension_numbers<[1], [0], [0], [1], [0, 0, 1, 1], [], []>} : vector<512x32xbf16>, vector<32x128xbf16>, vector<512x128xf32> -> vector<512x128xf32>
      %14 = arith.index_cast %1 : i32 to index
      %c0_7 = arith.constant 0 : index
      %15 = vector.load %arg7[%14, %c0_7] : memref<512x128xf32, #tpu.memory_space<vmem>>, vector<512x128xf32>
      tpu.vector_store %arg7[%14, %c0_7], %13 {strides = array<i32>} : memref<512x128xf32, #tpu.memory_space<vmem>>, vector<512x128xf32>,
      %c0_8 = arith.constant 0 : index
      %c0_9 = arith.constant 0 : index
      %16 = vector.load %arg8[%c0_8, %c0_9] : memref<1x128xf32, #tpu.memory_space<vmem>>, vector<1x128xf32>
      %cst_10 = arith.constant dense<0.000000e+00> : vector<128xf32>
      %17 = vector.multi_reduction <add>, %13, %cst_10 [0] : vector<512x128xf32> to vector<128xf32>
      %18 = vector.shape_cast %17 : vector<128xf32> to vector<1x128xf32>
      %19 = arith.addf %16, %18 : vector<1x128xf32>
      %c0_11 = arith.constant 0 : index
      %c0_12 = arith.constant 0 : index
      %20 = vector.load %arg8[%c0_11, %c0_12] : memref<1x128xf32, #tpu.memory_space<vmem>>, vector<1x128xf32>
      tpu.vector_store %arg8[%c0_11, %c0_12], %19 {strides = array<i32>} : memref<1x128xf32, #tpu.memory_space<vmem>>, vector<1x128xf32>,
      %c0_13 = arith.constant 0 : index
      %c0_14 = arith.constant 0 : index
      %21 = vector.load %arg9[%c0_13, %c0_14] : memref<1x128xf32, #tpu.memory_space<vmem>>, vector<1x128xf32>
      %22 = arith.mulf %13, %13 : vector<512x128xf32>
      %cst_15 = arith.constant dense<0.000000e+00> : vector<128xf32>
      %23 = vector.multi_reduction <add>, %22, %cst_15 [0] : vector<512x128xf32> to vector<128xf32>
      %24 = vector.shape_cast %23 : vector<128xf32> to vector<1x128xf32>
      %25 = arith.addf %21, %24 : vector<1x128xf32>
      %c0_16 = arith.constant 0 : index
      %c0_17 = arith.constant 0 : index
      %26 = vector.load %arg9[%c0_16, %c0_17] : memref<1x128xf32, #tpu.memory_space<vmem>>, vector<1x128xf32>
      tpu.vector_store %arg9[%c0_16, %c0_17], %25 {strides = array<i32>} : memref<1x128xf32, #tpu.memory_space<vmem>>, vector<1x128xf32>,
    } else {
    }
    %c1_i32 = arith.constant 1 : i32
    %5 = arith.cmpi eq, %arg0, %c1_i32 : i32
    %6 = arith.extui %5 : i1 to i32
    %c0_i32_1 = arith.constant 0 : i32
    %7 = arith.cmpi ne, %6, %c0_i32_1 : i32
    scf.if %7 {
      %c0_i32_2 = arith.constant 0 : i32
      %8 = arith.cmpi eq, %arg1, %c0_i32_2 : i32
      %9 = arith.extui %8 : i1 to i32
      %c0_i32_3 = arith.constant 0 : i32
      %10 = arith.cmpi ne, %9, %c0_i32_3 : i32
      scf.if %10 {
        %c0_10 = arith.constant 0 : index
        %c0_11 = arith.constant 0 : index
        %24 = vector.load %arg8[%c0_10, %c0_11] : memref<1x128xf32, #tpu.memory_space<vmem>>, vector<1x128xf32>
        %cst_12 = arith.constant 0.001953125 : f32
        %25 = vector.broadcast %cst_12 : f32 to vector<1x128xf32>
        %26 = arith.mulf %24, %25 : vector<1x128xf32>
        %c0_13 = arith.constant 0 : index
        %c0_14 = arith.constant 0 : index
        %27 = vector.load %arg9[%c0_13, %c0_14] : memref<1x128xf32, #tpu.memory_space<vmem>>, vector<1x128xf32>
        %cst_15 = arith.constant 0.001953125 : f32
        %28 = vector.broadcast %cst_15 : f32 to vector<1x128xf32>
        %29 = arith.mulf %27, %28 : vector<1x128xf32>
        %30 = arith.mulf %26, %26 : vector<1x128xf32>
        %31 = arith.subf %29, %30 : vector<1x128xf32>
        %cst_16 = arith.constant 0.000000e+00 : f32
        %32 = vector.broadcast %cst_16 : f32 to vector<1x128xf32>
        %33 = arith.maximumf %31, %32 : vector<1x128xf32>
        %c0_17 = arith.constant 0 : index
        %c0_18 = arith.constant 0 : index
        %34 = vector.load %arg4[%c0_17, %c0_18] : memref<1x128xf32, #tpu.memory_space<vmem>>, vector<1x128xf32>
        %cst_19 = arith.constant 9.99999974E-6 : f32
        %35 = vector.broadcast %cst_19 : f32 to vector<1x128xf32>
        %36 = arith.addf %33, %35 : vector<1x128xf32>
        %37 = math.rsqrt %36 : vector<1x128xf32>
        %38 = arith.mulf %34, %37 : vector<1x128xf32>
        %c0_20 = arith.constant 0 : index
        %c0_21 = arith.constant 0 : index
        %39 = vector.load %arg10[%c0_20, %c0_21] : memref<1x128xf32, #tpu.memory_space<vmem>>, vector<1x128xf32>
        tpu.vector_store %arg10[%c0_20, %c0_21], %38 {strides = array<i32>} : memref<1x128xf32, #tpu.memory_space<vmem>>, vector<1x128xf32>,
        %c0_22 = arith.constant 0 : index
        %c0_23 = arith.constant 0 : index
        %40 = vector.load %arg5[%c0_22, %c0_23] : memref<1x128xf32, #tpu.memory_space<vmem>>, vector<1x128xf32>
        %41 = arith.mulf %26, %38 : vector<1x128xf32>
        %42 = arith.subf %40, %41 : vector<1x128xf32>
        %c0_24 = arith.constant 0 : index
        %c0_25 = arith.constant 0 : index
        %43 = vector.load %arg11[%c0_24, %c0_25] : memref<1x128xf32, #tpu.memory_space<vmem>>, vector<1x128xf32>
        tpu.vector_store %arg11[%c0_24, %c0_25], %42 {strides = array<i32>} : memref<1x128xf32, #tpu.memory_space<vmem>>, vector<1x128xf32>,
      } else {
      }
      %11 = arith.index_cast %1 : i32 to index
      %c0 = arith.constant 0 : index
      %12 = vector.load %arg7[%11, %c0] : memref<512x128xf32, #tpu.memory_space<vmem>>, vector<512x128xf32>
      %c0_4 = arith.constant 0 : index
      %c0_5 = arith.constant 0 : index
      %13 = vector.load %arg10[%c0_4, %c0_5] : memref<1x128xf32, #tpu.memory_space<vmem>>, vector<1x128xf32>
      %14 = vector.broadcast %13 : vector<1x128xf32> to vector<512x128xf32>
      %15 = arith.mulf %12, %14 : vector<512x128xf32>
      %c0_6 = arith.constant 0 : index
      %c0_7 = arith.constant 0 : index
      %16 = vector.load %arg11[%c0_6, %c0_7] : memref<1x128xf32, #tpu.memory_space<vmem>>, vector<1x128xf32>
      %17 = vector.broadcast %16 : vector<1x128xf32> to vector<512x128xf32>
      %18 = arith.addf %15, %17 : vector<512x128xf32>
      %cst = arith.constant 1.000000e-01 : f32
      %19 = vector.broadcast %cst : f32 to vector<512x128xf32>
      %20 = arith.mulf %19, %18 : vector<512x128xf32>
      %21 = arith.maximumf %18, %20 : vector<512x128xf32>
      %22 = arith.truncf %21 : vector<512x128xf32> to vector<512x128xbf16>
      %c0_8 = arith.constant 0 : index
      %c0_9 = arith.constant 0 : index
      %23 = vector.load %arg6[%c0_8, %c0_9] : memref<512x128xbf16, #tpu.memory_space<vmem>>, vector<512x128xbf16>
      tpu.vector_store %arg6[%c0_8, %c0_9], %22 {strides = array<i32>} : memref<512x128xbf16, #tpu.memory_space<vmem>>, vector<512x128xbf16>,
    } else {
    }
    return
  }
  func.func @transform_0(%arg0: i32, %arg1: i32) -> (i32, i32) {
    %c1_i32 = arith.constant 1 : i32
    %0 = arith.subi %c1_i32, %arg0 : i32
    %1 = arith.muli %arg1, %0 : i32
    %c0_i32 = arith.constant 0 : i32
    %c0_i32_0 = arith.constant 0 : i32
    return %1, %c0_i32 : i32, i32
  }
  func.func @transform_1(%arg0: i32, %arg1: i32) -> (i32, i32) {
    %c0_i32 = arith.constant 0 : i32
    %c0_i32_0 = arith.constant 0 : i32
    %c0_i32_1 = arith.constant 0 : i32
    return %c0_i32, %c0_i32_0 : i32, i32
  }
  func.func @transform_2(%arg0: i32, %arg1: i32) -> (i32, i32) {
    %c0_i32 = arith.constant 0 : i32
    %c0_i32_0 = arith.constant 0 : i32
    %c0_i32_1 = arith.constant 0 : i32
    return %c0_i32, %c0_i32_0 : i32, i32
  }
  func.func @transform_3(%arg0: i32, %arg1: i32) -> (i32, i32) {
    %c0_i32 = arith.constant 0 : i32
    %c0_i32_0 = arith.constant 0 : i32
    %c0_i32_1 = arith.constant 0 : i32
    return %c0_i32, %c0_i32_0 : i32, i32
  }
  func.func @transform_4(%arg0: i32, %arg1: i32) -> (i32, i32) {
    %c0_i32 = arith.constant 0 : i32
    %c0_i32_0 = arith.constant 0 : i32
    return %arg1, %c0_i32 : i32, i32
  }
}

module attributes {stable_mosaic.version = 11 : i64} {
  func.func @kernel(%arg0: i32, %arg1: i32, %arg2: memref<128x2048xbf16, #tpu.memory_space<vmem>>, %arg3: memref<2048x128xbf16, #tpu.memory_space<vmem>>, %arg4: memref<1x128xf32, #tpu.memory_space<vmem>>, %arg5: memref<1x128xf32, #tpu.memory_space<vmem>>, %arg6: memref<128x128xbf16, #tpu.memory_space<vmem>>, %arg7: memref<128x128xf32, #tpu.memory_space<vmem>>, %arg8: memref<1x128xf32, #tpu.memory_space<vmem>>, %arg9: memref<1x128xf32, #tpu.memory_space<vmem>>, %arg10: memref<1x128xf32, #tpu.memory_space<vmem>>, %arg11: memref<1x128xf32, #tpu.memory_space<vmem>>) attributes {dimension_semantics = [#tpu.dimension_semantics<arbitrary>, #tpu.dimension_semantics<arbitrary>], iteration_bounds = array<i64: 2, 1>, scalar_prefetch = 0 : i64, scratch_operands = 5 : i64, tpu.core_type = #tpu.core_type<tc>, window_params = [{transform_indices = @transform_0, window_bounds = array<i64: 128, 2048>}, {pipeline_mode = #tpu.pipeline_mode<synchronous>, transform_indices = @transform_1, window_bounds = array<i64: 2048, 128>}, {pipeline_mode = #tpu.pipeline_mode<synchronous>, transform_indices = @transform_2, window_bounds = array<i64: 1, 128>}, {pipeline_mode = #tpu.pipeline_mode<synchronous>, transform_indices = @transform_3, window_bounds = array<i64: 1, 128>}, {transform_indices = @transform_4, window_bounds = array<i64: 128, 128>}]} {
    %c128_i32 = arith.constant 128 : i32
    %0 = arith.muli %arg1, %c128_i32 : i32
    %1 = tpu.assume_multiple %0, 128 : i32
    %c0_i32 = arith.constant 0 : i32
    %2 = arith.cmpi eq, %arg0, %c0_i32 : i32
    %3 = arith.extui %2 : i1 to i32
    %c0_i32_0 = arith.constant 0 : i32
    %4 = arith.cmpi ne, %3, %c0_i32_0 : i32
    scf.if %4 {
      %c0_i32_2 = arith.constant 0 : i32
      %8 = arith.cmpi eq, %arg1, %c0_i32_2 : i32
      %9 = arith.extui %8 : i1 to i32
      %c0_i32_3 = arith.constant 0 : i32
      %10 = arith.cmpi ne, %9, %c0_i32_3 : i32
      scf.if %10 {
        %cst_18 = arith.constant 0.000000e+00 : f32
        %27 = vector.broadcast %cst_18 : f32 to vector<1x128xf32>
        %c0_19 = arith.constant 0 : index
        %c0_20 = arith.constant 0 : index
        %28 = vector.load %arg8[%c0_19, %c0_20] : memref<1x128xf32, #tpu.memory_space<vmem>>, vector<1x128xf32>
        tpu.vector_store %arg8[%c0_19, %c0_20], %27 {strides = array<i32>} : memref<1x128xf32, #tpu.memory_space<vmem>>, vector<1x128xf32>,
        %cst_21 = arith.constant 0.000000e+00 : f32
        %29 = vector.broadcast %cst_21 : f32 to vector<1x128xf32>
        %c0_22 = arith.constant 0 : index
        %c0_23 = arith.constant 0 : index
        %30 = vector.load %arg9[%c0_22, %c0_23] : memref<1x128xf32, #tpu.memory_space<vmem>>, vector<1x128xf32>
        tpu.vector_store %arg9[%c0_22, %c0_23], %29 {strides = array<i32>} : memref<1x128xf32, #tpu.memory_space<vmem>>, vector<1x128xf32>,
      } else {
      }
      %c0 = arith.constant 0 : index
      %c0_4 = arith.constant 0 : index
      %11 = vector.load %arg2[%c0, %c0_4] : memref<128x2048xbf16, #tpu.memory_space<vmem>>, vector<128x2048xbf16>
      %c0_5 = arith.constant 0 : index
      %c0_6 = arith.constant 0 : index
      %12 = vector.load %arg3[%c0_5, %c0_6] : memref<2048x128xbf16, #tpu.memory_space<vmem>>, vector<2048x128xbf16>
      %cst = arith.constant dense<0.000000e+00> : vector<128x128xf32>
      %13 = tpu.matmul %11, %12, %cst {dimension_numbers = #tpu.dot_dimension_numbers<[1], [0], [0], [1], [0, 0, 1, 1], [], []>} : vector<128x2048xbf16>, vector<2048x128xbf16>, vector<128x128xf32> -> vector<128x128xf32>
      %14 = arith.index_cast %1 : i32 to index
      %c0_7 = arith.constant 0 : index
      %15 = vector.load %arg7[%14, %c0_7] : memref<128x128xf32, #tpu.memory_space<vmem>>, vector<128x128xf32>
      tpu.vector_store %arg7[%14, %c0_7], %13 {strides = array<i32>} : memref<128x128xf32, #tpu.memory_space<vmem>>, vector<128x128xf32>,
      %c0_8 = arith.constant 0 : index
      %c0_9 = arith.constant 0 : index
      %16 = vector.load %arg8[%c0_8, %c0_9] : memref<1x128xf32, #tpu.memory_space<vmem>>, vector<1x128xf32>
      %cst_10 = arith.constant dense<0.000000e+00> : vector<128xf32>
      %17 = vector.multi_reduction <add>, %13, %cst_10 [0] : vector<128x128xf32> to vector<128xf32>
      %18 = vector.shape_cast %17 : vector<128xf32> to vector<1x128xf32>
      %19 = arith.addf %16, %18 : vector<1x128xf32>
      %c0_11 = arith.constant 0 : index
      %c0_12 = arith.constant 0 : index
      %20 = vector.load %arg8[%c0_11, %c0_12] : memref<1x128xf32, #tpu.memory_space<vmem>>, vector<1x128xf32>
      tpu.vector_store %arg8[%c0_11, %c0_12], %19 {strides = array<i32>} : memref<1x128xf32, #tpu.memory_space<vmem>>, vector<1x128xf32>,
      %c0_13 = arith.constant 0 : index
      %c0_14 = arith.constant 0 : index
      %21 = vector.load %arg9[%c0_13, %c0_14] : memref<1x128xf32, #tpu.memory_space<vmem>>, vector<1x128xf32>
      %22 = arith.mulf %13, %13 : vector<128x128xf32>
      %cst_15 = arith.constant dense<0.000000e+00> : vector<128xf32>
      %23 = vector.multi_reduction <add>, %22, %cst_15 [0] : vector<128x128xf32> to vector<128xf32>
      %24 = vector.shape_cast %23 : vector<128xf32> to vector<1x128xf32>
      %25 = arith.addf %21, %24 : vector<1x128xf32>
      %c0_16 = arith.constant 0 : index
      %c0_17 = arith.constant 0 : index
      %26 = vector.load %arg9[%c0_16, %c0_17] : memref<1x128xf32, #tpu.memory_space<vmem>>, vector<1x128xf32>
      tpu.vector_store %arg9[%c0_16, %c0_17], %25 {strides = array<i32>} : memref<1x128xf32, #tpu.memory_space<vmem>>, vector<1x128xf32>,
    } else {
    }
    %c1_i32 = arith.constant 1 : i32
    %5 = arith.cmpi eq, %arg0, %c1_i32 : i32
    %6 = arith.extui %5 : i1 to i32
    %c0_i32_1 = arith.constant 0 : i32
    %7 = arith.cmpi ne, %6, %c0_i32_1 : i32
    scf.if %7 {
      %c0_i32_2 = arith.constant 0 : i32
      %8 = arith.cmpi eq, %arg1, %c0_i32_2 : i32
      %9 = arith.extui %8 : i1 to i32
      %c0_i32_3 = arith.constant 0 : i32
      %10 = arith.cmpi ne, %9, %c0_i32_3 : i32
      scf.if %10 {
        %c0_10 = arith.constant 0 : index
        %c0_11 = arith.constant 0 : index
        %24 = vector.load %arg8[%c0_10, %c0_11] : memref<1x128xf32, #tpu.memory_space<vmem>>, vector<1x128xf32>
        %cst_12 = arith.constant 7.812500e-03 : f32
        %25 = vector.broadcast %cst_12 : f32 to vector<1x128xf32>
        %26 = arith.mulf %24, %25 : vector<1x128xf32>
        %c0_13 = arith.constant 0 : index
        %c0_14 = arith.constant 0 : index
        %27 = vector.load %arg9[%c0_13, %c0_14] : memref<1x128xf32, #tpu.memory_space<vmem>>, vector<1x128xf32>
        %cst_15 = arith.constant 7.812500e-03 : f32
        %28 = vector.broadcast %cst_15 : f32 to vector<1x128xf32>
        %29 = arith.mulf %27, %28 : vector<1x128xf32>
        %30 = arith.mulf %26, %26 : vector<1x128xf32>
        %31 = arith.subf %29, %30 : vector<1x128xf32>
        %cst_16 = arith.constant 0.000000e+00 : f32
        %32 = vector.broadcast %cst_16 : f32 to vector<1x128xf32>
        %33 = arith.maximumf %31, %32 : vector<1x128xf32>
        %c0_17 = arith.constant 0 : index
        %c0_18 = arith.constant 0 : index
        %34 = vector.load %arg4[%c0_17, %c0_18] : memref<1x128xf32, #tpu.memory_space<vmem>>, vector<1x128xf32>
        %cst_19 = arith.constant 9.99999974E-6 : f32
        %35 = vector.broadcast %cst_19 : f32 to vector<1x128xf32>
        %36 = arith.addf %33, %35 : vector<1x128xf32>
        %37 = math.rsqrt %36 : vector<1x128xf32>
        %38 = arith.mulf %34, %37 : vector<1x128xf32>
        %c0_20 = arith.constant 0 : index
        %c0_21 = arith.constant 0 : index
        %39 = vector.load %arg10[%c0_20, %c0_21] : memref<1x128xf32, #tpu.memory_space<vmem>>, vector<1x128xf32>
        tpu.vector_store %arg10[%c0_20, %c0_21], %38 {strides = array<i32>} : memref<1x128xf32, #tpu.memory_space<vmem>>, vector<1x128xf32>,
        %c0_22 = arith.constant 0 : index
        %c0_23 = arith.constant 0 : index
        %40 = vector.load %arg5[%c0_22, %c0_23] : memref<1x128xf32, #tpu.memory_space<vmem>>, vector<1x128xf32>
        %41 = arith.mulf %26, %38 : vector<1x128xf32>
        %42 = arith.subf %40, %41 : vector<1x128xf32>
        %c0_24 = arith.constant 0 : index
        %c0_25 = arith.constant 0 : index
        %43 = vector.load %arg11[%c0_24, %c0_25] : memref<1x128xf32, #tpu.memory_space<vmem>>, vector<1x128xf32>
        tpu.vector_store %arg11[%c0_24, %c0_25], %42 {strides = array<i32>} : memref<1x128xf32, #tpu.memory_space<vmem>>, vector<1x128xf32>,
      } else {
      }
      %11 = arith.index_cast %1 : i32 to index
      %c0 = arith.constant 0 : index
      %12 = vector.load %arg7[%11, %c0] : memref<128x128xf32, #tpu.memory_space<vmem>>, vector<128x128xf32>
      %c0_4 = arith.constant 0 : index
      %c0_5 = arith.constant 0 : index
      %13 = vector.load %arg10[%c0_4, %c0_5] : memref<1x128xf32, #tpu.memory_space<vmem>>, vector<1x128xf32>
      %14 = vector.broadcast %13 : vector<1x128xf32> to vector<128x128xf32>
      %15 = arith.mulf %12, %14 : vector<128x128xf32>
      %c0_6 = arith.constant 0 : index
      %c0_7 = arith.constant 0 : index
      %16 = vector.load %arg11[%c0_6, %c0_7] : memref<1x128xf32, #tpu.memory_space<vmem>>, vector<1x128xf32>
      %17 = vector.broadcast %16 : vector<1x128xf32> to vector<128x128xf32>
      %18 = arith.addf %15, %17 : vector<128x128xf32>
      %cst = arith.constant 1.000000e-01 : f32
      %19 = vector.broadcast %cst : f32 to vector<128x128xf32>
      %20 = arith.mulf %19, %18 : vector<128x128xf32>
      %21 = arith.maximumf %18, %20 : vector<128x128xf32>
      %22 = arith.truncf %21 : vector<128x128xf32> to vector<128x128xbf16>
      %c0_8 = arith.constant 0 : index
      %c0_9 = arith.constant 0 : index
      %23 = vector.load %arg6[%c0_8, %c0_9] : memref<128x128xbf16, #tpu.memory_space<vmem>>, vector<128x128xbf16>
      tpu.vector_store %arg6[%c0_8, %c0_9], %22 {strides = array<i32>} : memref<128x128xbf16, #tpu.memory_space<vmem>>, vector<128x128xbf16>,
    } else {
    }
    return
  }
  func.func @transform_0(%arg0: i32, %arg1: i32) -> (i32, i32) {
    %c1_i32 = arith.constant 1 : i32
    %0 = arith.subi %c1_i32, %arg0 : i32
    %1 = arith.muli %arg1, %0 : i32
    %c0_i32 = arith.constant 0 : i32
    %c0_i32_0 = arith.constant 0 : i32
    return %1, %c0_i32 : i32, i32
  }
  func.func @transform_1(%arg0: i32, %arg1: i32) -> (i32, i32) {
    %c0_i32 = arith.constant 0 : i32
    %c0_i32_0 = arith.constant 0 : i32
    %c0_i32_1 = arith.constant 0 : i32
    return %c0_i32, %c0_i32_0 : i32, i32
  }
  func.func @transform_2(%arg0: i32, %arg1: i32) -> (i32, i32) {
    %c0_i32 = arith.constant 0 : i32
    %c0_i32_0 = arith.constant 0 : i32
    %c0_i32_1 = arith.constant 0 : i32
    return %c0_i32, %c0_i32_0 : i32, i32
  }
  func.func @transform_3(%arg0: i32, %arg1: i32) -> (i32, i32) {
    %c0_i32 = arith.constant 0 : i32
    %c0_i32_0 = arith.constant 0 : i32
    %c0_i32_1 = arith.constant 0 : i32
    return %c0_i32, %c0_i32_0 : i32, i32
  }
  func.func @transform_4(%arg0: i32, %arg1: i32) -> (i32, i32) {
    %c0_i32 = arith.constant 0 : i32
    %c0_i32_0 = arith.constant 0 : i32
    return %arg1, %c0_i32 : i32, i32
  }
}

module attributes {stable_mosaic.version = 11 : i64} {
  func.func @kernel(%arg0: i32, %arg1: i32, %arg2: memref<32x2048xbf16, #tpu.memory_space<vmem>>, %arg3: memref<2048x128xbf16, #tpu.memory_space<vmem>>, %arg4: memref<1x128xf32, #tpu.memory_space<vmem>>, %arg5: memref<1x128xf32, #tpu.memory_space<vmem>>, %arg6: memref<32x128xbf16, #tpu.memory_space<vmem>>, %arg7: memref<32x128xf32, #tpu.memory_space<vmem>>, %arg8: memref<1x128xf32, #tpu.memory_space<vmem>>, %arg9: memref<1x128xf32, #tpu.memory_space<vmem>>, %arg10: memref<1x128xf32, #tpu.memory_space<vmem>>, %arg11: memref<1x128xf32, #tpu.memory_space<vmem>>) attributes {dimension_semantics = [#tpu.dimension_semantics<arbitrary>, #tpu.dimension_semantics<arbitrary>], iteration_bounds = array<i64: 2, 1>, scalar_prefetch = 0 : i64, scratch_operands = 5 : i64, tpu.core_type = #tpu.core_type<tc>, window_params = [{transform_indices = @transform_0, window_bounds = array<i64: 32, 2048>}, {pipeline_mode = #tpu.pipeline_mode<synchronous>, transform_indices = @transform_1, window_bounds = array<i64: 2048, 128>}, {pipeline_mode = #tpu.pipeline_mode<synchronous>, transform_indices = @transform_2, window_bounds = array<i64: 1, 128>}, {pipeline_mode = #tpu.pipeline_mode<synchronous>, transform_indices = @transform_3, window_bounds = array<i64: 1, 128>}, {transform_indices = @transform_4, window_bounds = array<i64: 32, 128>}]} {
    %c32_i32 = arith.constant 32 : i32
    %0 = arith.muli %arg1, %c32_i32 : i32
    %1 = tpu.assume_multiple %0, 32 : i32
    %c0_i32 = arith.constant 0 : i32
    %2 = arith.cmpi eq, %arg0, %c0_i32 : i32
    %3 = arith.extui %2 : i1 to i32
    %c0_i32_0 = arith.constant 0 : i32
    %4 = arith.cmpi ne, %3, %c0_i32_0 : i32
    scf.if %4 {
      %c0_i32_2 = arith.constant 0 : i32
      %8 = arith.cmpi eq, %arg1, %c0_i32_2 : i32
      %9 = arith.extui %8 : i1 to i32
      %c0_i32_3 = arith.constant 0 : i32
      %10 = arith.cmpi ne, %9, %c0_i32_3 : i32
      scf.if %10 {
        %cst_18 = arith.constant 0.000000e+00 : f32
        %27 = vector.broadcast %cst_18 : f32 to vector<1x128xf32>
        %c0_19 = arith.constant 0 : index
        %c0_20 = arith.constant 0 : index
        %28 = vector.load %arg8[%c0_19, %c0_20] : memref<1x128xf32, #tpu.memory_space<vmem>>, vector<1x128xf32>
        tpu.vector_store %arg8[%c0_19, %c0_20], %27 {strides = array<i32>} : memref<1x128xf32, #tpu.memory_space<vmem>>, vector<1x128xf32>,
        %cst_21 = arith.constant 0.000000e+00 : f32
        %29 = vector.broadcast %cst_21 : f32 to vector<1x128xf32>
        %c0_22 = arith.constant 0 : index
        %c0_23 = arith.constant 0 : index
        %30 = vector.load %arg9[%c0_22, %c0_23] : memref<1x128xf32, #tpu.memory_space<vmem>>, vector<1x128xf32>
        tpu.vector_store %arg9[%c0_22, %c0_23], %29 {strides = array<i32>} : memref<1x128xf32, #tpu.memory_space<vmem>>, vector<1x128xf32>,
      } else {
      }
      %c0 = arith.constant 0 : index
      %c0_4 = arith.constant 0 : index
      %11 = vector.load %arg2[%c0, %c0_4] : memref<32x2048xbf16, #tpu.memory_space<vmem>>, vector<32x2048xbf16>
      %c0_5 = arith.constant 0 : index
      %c0_6 = arith.constant 0 : index
      %12 = vector.load %arg3[%c0_5, %c0_6] : memref<2048x128xbf16, #tpu.memory_space<vmem>>, vector<2048x128xbf16>
      %cst = arith.constant dense<0.000000e+00> : vector<32x128xf32>
      %13 = tpu.matmul %11, %12, %cst {dimension_numbers = #tpu.dot_dimension_numbers<[1], [0], [0], [1], [0, 0, 1, 1], [], []>} : vector<32x2048xbf16>, vector<2048x128xbf16>, vector<32x128xf32> -> vector<32x128xf32>
      %14 = arith.index_cast %1 : i32 to index
      %c0_7 = arith.constant 0 : index
      %15 = vector.load %arg7[%14, %c0_7] : memref<32x128xf32, #tpu.memory_space<vmem>>, vector<32x128xf32>
      tpu.vector_store %arg7[%14, %c0_7], %13 {strides = array<i32>} : memref<32x128xf32, #tpu.memory_space<vmem>>, vector<32x128xf32>,
      %c0_8 = arith.constant 0 : index
      %c0_9 = arith.constant 0 : index
      %16 = vector.load %arg8[%c0_8, %c0_9] : memref<1x128xf32, #tpu.memory_space<vmem>>, vector<1x128xf32>
      %cst_10 = arith.constant dense<0.000000e+00> : vector<128xf32>
      %17 = vector.multi_reduction <add>, %13, %cst_10 [0] : vector<32x128xf32> to vector<128xf32>
      %18 = vector.shape_cast %17 : vector<128xf32> to vector<1x128xf32>
      %19 = arith.addf %16, %18 : vector<1x128xf32>
      %c0_11 = arith.constant 0 : index
      %c0_12 = arith.constant 0 : index
      %20 = vector.load %arg8[%c0_11, %c0_12] : memref<1x128xf32, #tpu.memory_space<vmem>>, vector<1x128xf32>
      tpu.vector_store %arg8[%c0_11, %c0_12], %19 {strides = array<i32>} : memref<1x128xf32, #tpu.memory_space<vmem>>, vector<1x128xf32>,
      %c0_13 = arith.constant 0 : index
      %c0_14 = arith.constant 0 : index
      %21 = vector.load %arg9[%c0_13, %c0_14] : memref<1x128xf32, #tpu.memory_space<vmem>>, vector<1x128xf32>
      %22 = arith.mulf %13, %13 : vector<32x128xf32>
      %cst_15 = arith.constant dense<0.000000e+00> : vector<128xf32>
      %23 = vector.multi_reduction <add>, %22, %cst_15 [0] : vector<32x128xf32> to vector<128xf32>
      %24 = vector.shape_cast %23 : vector<128xf32> to vector<1x128xf32>
      %25 = arith.addf %21, %24 : vector<1x128xf32>
      %c0_16 = arith.constant 0 : index
      %c0_17 = arith.constant 0 : index
      %26 = vector.load %arg9[%c0_16, %c0_17] : memref<1x128xf32, #tpu.memory_space<vmem>>, vector<1x128xf32>
      tpu.vector_store %arg9[%c0_16, %c0_17], %25 {strides = array<i32>} : memref<1x128xf32, #tpu.memory_space<vmem>>, vector<1x128xf32>,
    } else {
    }
    %c1_i32 = arith.constant 1 : i32
    %5 = arith.cmpi eq, %arg0, %c1_i32 : i32
    %6 = arith.extui %5 : i1 to i32
    %c0_i32_1 = arith.constant 0 : i32
    %7 = arith.cmpi ne, %6, %c0_i32_1 : i32
    scf.if %7 {
      %c0_i32_2 = arith.constant 0 : i32
      %8 = arith.cmpi eq, %arg1, %c0_i32_2 : i32
      %9 = arith.extui %8 : i1 to i32
      %c0_i32_3 = arith.constant 0 : i32
      %10 = arith.cmpi ne, %9, %c0_i32_3 : i32
      scf.if %10 {
        %c0_10 = arith.constant 0 : index
        %c0_11 = arith.constant 0 : index
        %24 = vector.load %arg8[%c0_10, %c0_11] : memref<1x128xf32, #tpu.memory_space<vmem>>, vector<1x128xf32>
        %cst_12 = arith.constant 3.125000e-02 : f32
        %25 = vector.broadcast %cst_12 : f32 to vector<1x128xf32>
        %26 = arith.mulf %24, %25 : vector<1x128xf32>
        %c0_13 = arith.constant 0 : index
        %c0_14 = arith.constant 0 : index
        %27 = vector.load %arg9[%c0_13, %c0_14] : memref<1x128xf32, #tpu.memory_space<vmem>>, vector<1x128xf32>
        %cst_15 = arith.constant 3.125000e-02 : f32
        %28 = vector.broadcast %cst_15 : f32 to vector<1x128xf32>
        %29 = arith.mulf %27, %28 : vector<1x128xf32>
        %30 = arith.mulf %26, %26 : vector<1x128xf32>
        %31 = arith.subf %29, %30 : vector<1x128xf32>
        %cst_16 = arith.constant 0.000000e+00 : f32
        %32 = vector.broadcast %cst_16 : f32 to vector<1x128xf32>
        %33 = arith.maximumf %31, %32 : vector<1x128xf32>
        %c0_17 = arith.constant 0 : index
        %c0_18 = arith.constant 0 : index
        %34 = vector.load %arg4[%c0_17, %c0_18] : memref<1x128xf32, #tpu.memory_space<vmem>>, vector<1x128xf32>
        %cst_19 = arith.constant 9.99999974E-6 : f32
        %35 = vector.broadcast %cst_19 : f32 to vector<1x128xf32>
        %36 = arith.addf %33, %35 : vector<1x128xf32>
        %37 = math.rsqrt %36 : vector<1x128xf32>
        %38 = arith.mulf %34, %37 : vector<1x128xf32>
        %c0_20 = arith.constant 0 : index
        %c0_21 = arith.constant 0 : index
        %39 = vector.load %arg10[%c0_20, %c0_21] : memref<1x128xf32, #tpu.memory_space<vmem>>, vector<1x128xf32>
        tpu.vector_store %arg10[%c0_20, %c0_21], %38 {strides = array<i32>} : memref<1x128xf32, #tpu.memory_space<vmem>>, vector<1x128xf32>,
        %c0_22 = arith.constant 0 : index
        %c0_23 = arith.constant 0 : index
        %40 = vector.load %arg5[%c0_22, %c0_23] : memref<1x128xf32, #tpu.memory_space<vmem>>, vector<1x128xf32>
        %41 = arith.mulf %26, %38 : vector<1x128xf32>
        %42 = arith.subf %40, %41 : vector<1x128xf32>
        %c0_24 = arith.constant 0 : index
        %c0_25 = arith.constant 0 : index
        %43 = vector.load %arg11[%c0_24, %c0_25] : memref<1x128xf32, #tpu.memory_space<vmem>>, vector<1x128xf32>
        tpu.vector_store %arg11[%c0_24, %c0_25], %42 {strides = array<i32>} : memref<1x128xf32, #tpu.memory_space<vmem>>, vector<1x128xf32>,
      } else {
      }
      %11 = arith.index_cast %1 : i32 to index
      %c0 = arith.constant 0 : index
      %12 = vector.load %arg7[%11, %c0] : memref<32x128xf32, #tpu.memory_space<vmem>>, vector<32x128xf32>
      %c0_4 = arith.constant 0 : index
      %c0_5 = arith.constant 0 : index
      %13 = vector.load %arg10[%c0_4, %c0_5] : memref<1x128xf32, #tpu.memory_space<vmem>>, vector<1x128xf32>
      %14 = vector.broadcast %13 : vector<1x128xf32> to vector<32x128xf32>
      %15 = arith.mulf %12, %14 : vector<32x128xf32>
      %c0_6 = arith.constant 0 : index
      %c0_7 = arith.constant 0 : index
      %16 = vector.load %arg11[%c0_6, %c0_7] : memref<1x128xf32, #tpu.memory_space<vmem>>, vector<1x128xf32>
      %17 = vector.broadcast %16 : vector<1x128xf32> to vector<32x128xf32>
      %18 = arith.addf %15, %17 : vector<32x128xf32>
      %cst = arith.constant 1.000000e-01 : f32
      %19 = vector.broadcast %cst : f32 to vector<32x128xf32>
      %20 = arith.mulf %19, %18 : vector<32x128xf32>
      %21 = arith.maximumf %18, %20 : vector<32x128xf32>
      %22 = arith.truncf %21 : vector<32x128xf32> to vector<32x128xbf16>
      %c0_8 = arith.constant 0 : index
      %c0_9 = arith.constant 0 : index
      %23 = vector.load %arg6[%c0_8, %c0_9] : memref<32x128xbf16, #tpu.memory_space<vmem>>, vector<32x128xbf16>
      tpu.vector_store %arg6[%c0_8, %c0_9], %22 {strides = array<i32>} : memref<32x128xbf16, #tpu.memory_space<vmem>>, vector<32x128xbf16>,
    } else {
    }
    return
  }
  func.func @transform_0(%arg0: i32, %arg1: i32) -> (i32, i32) {
    %c1_i32 = arith.constant 1 : i32
    %0 = arith.subi %c1_i32, %arg0 : i32
    %1 = arith.muli %arg1, %0 : i32
    %c0_i32 = arith.constant 0 : i32
    %c0_i32_0 = arith.constant 0 : i32
    return %1, %c0_i32 : i32, i32
  }
  func.func @transform_1(%arg0: i32, %arg1: i32) -> (i32, i32) {
    %c0_i32 = arith.constant 0 : i32
    %c0_i32_0 = arith.constant 0 : i32
    %c0_i32_1 = arith.constant 0 : i32
    return %c0_i32, %c0_i32_0 : i32, i32
  }
  func.func @transform_2(%arg0: i32, %arg1: i32) -> (i32, i32) {
    %c0_i32 = arith.constant 0 : i32
    %c0_i32_0 = arith.constant 0 : i32
    %c0_i32_1 = arith.constant 0 : i32
    return %c0_i32, %c0_i32_0 : i32, i32
  }
  func.func @transform_3(%arg0: i32, %arg1: i32) -> (i32, i32) {
    %c0_i32 = arith.constant 0 : i32
    %c0_i32_0 = arith.constant 0 : i32
    %c0_i32_1 = arith.constant 0 : i32
    return %c0_i32, %c0_i32_0 : i32, i32
  }
  func.func @transform_4(%arg0: i32, %arg1: i32) -> (i32, i32) {
    %c0_i32 = arith.constant 0 : i32
    %c0_i32_0 = arith.constant 0 : i32
    return %arg1, %c0_i32 : i32, i32
  }
}

module attributes {stable_mosaic.version = 11 : i64} {
  func.func @kernel(%arg0: i32, %arg1: i32, %arg2: memref<8x2048xbf16, #tpu.memory_space<vmem>>, %arg3: memref<2048x128xbf16, #tpu.memory_space<vmem>>, %arg4: memref<1x128xf32, #tpu.memory_space<vmem>>, %arg5: memref<1x128xf32, #tpu.memory_space<vmem>>, %arg6: memref<8x128xbf16, #tpu.memory_space<vmem>>, %arg7: memref<8x128xf32, #tpu.memory_space<vmem>>, %arg8: memref<1x128xf32, #tpu.memory_space<vmem>>, %arg9: memref<1x128xf32, #tpu.memory_space<vmem>>, %arg10: memref<1x128xf32, #tpu.memory_space<vmem>>, %arg11: memref<1x128xf32, #tpu.memory_space<vmem>>) attributes {dimension_semantics = [#tpu.dimension_semantics<arbitrary>, #tpu.dimension_semantics<arbitrary>], iteration_bounds = array<i64: 2, 1>, scalar_prefetch = 0 : i64, scratch_operands = 5 : i64, tpu.core_type = #tpu.core_type<tc>, window_params = [{transform_indices = @transform_0, window_bounds = array<i64: 8, 2048>}, {pipeline_mode = #tpu.pipeline_mode<synchronous>, transform_indices = @transform_1, window_bounds = array<i64: 2048, 128>}, {pipeline_mode = #tpu.pipeline_mode<synchronous>, transform_indices = @transform_2, window_bounds = array<i64: 1, 128>}, {pipeline_mode = #tpu.pipeline_mode<synchronous>, transform_indices = @transform_3, window_bounds = array<i64: 1, 128>}, {transform_indices = @transform_4, window_bounds = array<i64: 8, 128>}]} {
    %c8_i32 = arith.constant 8 : i32
    %0 = arith.muli %arg1, %c8_i32 : i32
    %1 = tpu.assume_multiple %0, 8 : i32
    %c0_i32 = arith.constant 0 : i32
    %2 = arith.cmpi eq, %arg0, %c0_i32 : i32
    %3 = arith.extui %2 : i1 to i32
    %c0_i32_0 = arith.constant 0 : i32
    %4 = arith.cmpi ne, %3, %c0_i32_0 : i32
    scf.if %4 {
      %c0_i32_2 = arith.constant 0 : i32
      %8 = arith.cmpi eq, %arg1, %c0_i32_2 : i32
      %9 = arith.extui %8 : i1 to i32
      %c0_i32_3 = arith.constant 0 : i32
      %10 = arith.cmpi ne, %9, %c0_i32_3 : i32
      scf.if %10 {
        %cst_18 = arith.constant 0.000000e+00 : f32
        %27 = vector.broadcast %cst_18 : f32 to vector<1x128xf32>
        %c0_19 = arith.constant 0 : index
        %c0_20 = arith.constant 0 : index
        %28 = vector.load %arg8[%c0_19, %c0_20] : memref<1x128xf32, #tpu.memory_space<vmem>>, vector<1x128xf32>
        tpu.vector_store %arg8[%c0_19, %c0_20], %27 {strides = array<i32>} : memref<1x128xf32, #tpu.memory_space<vmem>>, vector<1x128xf32>,
        %cst_21 = arith.constant 0.000000e+00 : f32
        %29 = vector.broadcast %cst_21 : f32 to vector<1x128xf32>
        %c0_22 = arith.constant 0 : index
        %c0_23 = arith.constant 0 : index
        %30 = vector.load %arg9[%c0_22, %c0_23] : memref<1x128xf32, #tpu.memory_space<vmem>>, vector<1x128xf32>
        tpu.vector_store %arg9[%c0_22, %c0_23], %29 {strides = array<i32>} : memref<1x128xf32, #tpu.memory_space<vmem>>, vector<1x128xf32>,
      } else {
      }
      %c0 = arith.constant 0 : index
      %c0_4 = arith.constant 0 : index
      %11 = vector.load %arg2[%c0, %c0_4] : memref<8x2048xbf16, #tpu.memory_space<vmem>>, vector<8x2048xbf16>
      %c0_5 = arith.constant 0 : index
      %c0_6 = arith.constant 0 : index
      %12 = vector.load %arg3[%c0_5, %c0_6] : memref<2048x128xbf16, #tpu.memory_space<vmem>>, vector<2048x128xbf16>
      %cst = arith.constant dense<0.000000e+00> : vector<8x128xf32>
      %13 = tpu.matmul %11, %12, %cst {dimension_numbers = #tpu.dot_dimension_numbers<[1], [0], [0], [1], [0, 0, 1, 1], [], []>} : vector<8x2048xbf16>, vector<2048x128xbf16>, vector<8x128xf32> -> vector<8x128xf32>
      %14 = arith.index_cast %1 : i32 to index
      %c0_7 = arith.constant 0 : index
      %15 = vector.load %arg7[%14, %c0_7] : memref<8x128xf32, #tpu.memory_space<vmem>>, vector<8x128xf32>
      tpu.vector_store %arg7[%14, %c0_7], %13 {strides = array<i32>} : memref<8x128xf32, #tpu.memory_space<vmem>>, vector<8x128xf32>,
      %c0_8 = arith.constant 0 : index
      %c0_9 = arith.constant 0 : index
      %16 = vector.load %arg8[%c0_8, %c0_9] : memref<1x128xf32, #tpu.memory_space<vmem>>, vector<1x128xf32>
      %cst_10 = arith.constant dense<0.000000e+00> : vector<128xf32>
      %17 = vector.multi_reduction <add>, %13, %cst_10 [0] : vector<8x128xf32> to vector<128xf32>
      %18 = vector.shape_cast %17 : vector<128xf32> to vector<1x128xf32>
      %19 = arith.addf %16, %18 : vector<1x128xf32>
      %c0_11 = arith.constant 0 : index
      %c0_12 = arith.constant 0 : index
      %20 = vector.load %arg8[%c0_11, %c0_12] : memref<1x128xf32, #tpu.memory_space<vmem>>, vector<1x128xf32>
      tpu.vector_store %arg8[%c0_11, %c0_12], %19 {strides = array<i32>} : memref<1x128xf32, #tpu.memory_space<vmem>>, vector<1x128xf32>,
      %c0_13 = arith.constant 0 : index
      %c0_14 = arith.constant 0 : index
      %21 = vector.load %arg9[%c0_13, %c0_14] : memref<1x128xf32, #tpu.memory_space<vmem>>, vector<1x128xf32>
      %22 = arith.mulf %13, %13 : vector<8x128xf32>
      %cst_15 = arith.constant dense<0.000000e+00> : vector<128xf32>
      %23 = vector.multi_reduction <add>, %22, %cst_15 [0] : vector<8x128xf32> to vector<128xf32>
      %24 = vector.shape_cast %23 : vector<128xf32> to vector<1x128xf32>
      %25 = arith.addf %21, %24 : vector<1x128xf32>
      %c0_16 = arith.constant 0 : index
      %c0_17 = arith.constant 0 : index
      %26 = vector.load %arg9[%c0_16, %c0_17] : memref<1x128xf32, #tpu.memory_space<vmem>>, vector<1x128xf32>
      tpu.vector_store %arg9[%c0_16, %c0_17], %25 {strides = array<i32>} : memref<1x128xf32, #tpu.memory_space<vmem>>, vector<1x128xf32>,
    } else {
    }
    %c1_i32 = arith.constant 1 : i32
    %5 = arith.cmpi eq, %arg0, %c1_i32 : i32
    %6 = arith.extui %5 : i1 to i32
    %c0_i32_1 = arith.constant 0 : i32
    %7 = arith.cmpi ne, %6, %c0_i32_1 : i32
    scf.if %7 {
      %c0_i32_2 = arith.constant 0 : i32
      %8 = arith.cmpi eq, %arg1, %c0_i32_2 : i32
      %9 = arith.extui %8 : i1 to i32
      %c0_i32_3 = arith.constant 0 : i32
      %10 = arith.cmpi ne, %9, %c0_i32_3 : i32
      scf.if %10 {
        %c0_10 = arith.constant 0 : index
        %c0_11 = arith.constant 0 : index
        %24 = vector.load %arg8[%c0_10, %c0_11] : memref<1x128xf32, #tpu.memory_space<vmem>>, vector<1x128xf32>
        %cst_12 = arith.constant 1.250000e-01 : f32
        %25 = vector.broadcast %cst_12 : f32 to vector<1x128xf32>
        %26 = arith.mulf %24, %25 : vector<1x128xf32>
        %c0_13 = arith.constant 0 : index
        %c0_14 = arith.constant 0 : index
        %27 = vector.load %arg9[%c0_13, %c0_14] : memref<1x128xf32, #tpu.memory_space<vmem>>, vector<1x128xf32>
        %cst_15 = arith.constant 1.250000e-01 : f32
        %28 = vector.broadcast %cst_15 : f32 to vector<1x128xf32>
        %29 = arith.mulf %27, %28 : vector<1x128xf32>
        %30 = arith.mulf %26, %26 : vector<1x128xf32>
        %31 = arith.subf %29, %30 : vector<1x128xf32>
        %cst_16 = arith.constant 0.000000e+00 : f32
        %32 = vector.broadcast %cst_16 : f32 to vector<1x128xf32>
        %33 = arith.maximumf %31, %32 : vector<1x128xf32>
        %c0_17 = arith.constant 0 : index
        %c0_18 = arith.constant 0 : index
        %34 = vector.load %arg4[%c0_17, %c0_18] : memref<1x128xf32, #tpu.memory_space<vmem>>, vector<1x128xf32>
        %cst_19 = arith.constant 9.99999974E-6 : f32
        %35 = vector.broadcast %cst_19 : f32 to vector<1x128xf32>
        %36 = arith.addf %33, %35 : vector<1x128xf32>
        %37 = math.rsqrt %36 : vector<1x128xf32>
        %38 = arith.mulf %34, %37 : vector<1x128xf32>
        %c0_20 = arith.constant 0 : index
        %c0_21 = arith.constant 0 : index
        %39 = vector.load %arg10[%c0_20, %c0_21] : memref<1x128xf32, #tpu.memory_space<vmem>>, vector<1x128xf32>
        tpu.vector_store %arg10[%c0_20, %c0_21], %38 {strides = array<i32>} : memref<1x128xf32, #tpu.memory_space<vmem>>, vector<1x128xf32>,
        %c0_22 = arith.constant 0 : index
        %c0_23 = arith.constant 0 : index
        %40 = vector.load %arg5[%c0_22, %c0_23] : memref<1x128xf32, #tpu.memory_space<vmem>>, vector<1x128xf32>
        %41 = arith.mulf %26, %38 : vector<1x128xf32>
        %42 = arith.subf %40, %41 : vector<1x128xf32>
        %c0_24 = arith.constant 0 : index
        %c0_25 = arith.constant 0 : index
        %43 = vector.load %arg11[%c0_24, %c0_25] : memref<1x128xf32, #tpu.memory_space<vmem>>, vector<1x128xf32>
        tpu.vector_store %arg11[%c0_24, %c0_25], %42 {strides = array<i32>} : memref<1x128xf32, #tpu.memory_space<vmem>>, vector<1x128xf32>,
      } else {
      }
      %11 = arith.index_cast %1 : i32 to index
      %c0 = arith.constant 0 : index
      %12 = vector.load %arg7[%11, %c0] : memref<8x128xf32, #tpu.memory_space<vmem>>, vector<8x128xf32>
      %c0_4 = arith.constant 0 : index
      %c0_5 = arith.constant 0 : index
      %13 = vector.load %arg10[%c0_4, %c0_5] : memref<1x128xf32, #tpu.memory_space<vmem>>, vector<1x128xf32>
      %14 = vector.broadcast %13 : vector<1x128xf32> to vector<8x128xf32>
      %15 = arith.mulf %12, %14 : vector<8x128xf32>
      %c0_6 = arith.constant 0 : index
      %c0_7 = arith.constant 0 : index
      %16 = vector.load %arg11[%c0_6, %c0_7] : memref<1x128xf32, #tpu.memory_space<vmem>>, vector<1x128xf32>
      %17 = vector.broadcast %16 : vector<1x128xf32> to vector<8x128xf32>
      %18 = arith.addf %15, %17 : vector<8x128xf32>
      %cst = arith.constant 1.000000e-01 : f32
      %19 = vector.broadcast %cst : f32 to vector<8x128xf32>
      %20 = arith.mulf %19, %18 : vector<8x128xf32>
      %21 = arith.maximumf %18, %20 : vector<8x128xf32>
      %22 = arith.truncf %21 : vector<8x128xf32> to vector<8x128xbf16>
      %c0_8 = arith.constant 0 : index
      %c0_9 = arith.constant 0 : index
      %23 = vector.load %arg6[%c0_8, %c0_9] : memref<8x128xbf16, #tpu.memory_space<vmem>>, vector<8x128xbf16>
      tpu.vector_store %arg6[%c0_8, %c0_9], %22 {strides = array<i32>} : memref<8x128xbf16, #tpu.memory_space<vmem>>, vector<8x128xbf16>,
    } else {
    }
    return
  }
  func.func @transform_0(%arg0: i32, %arg1: i32) -> (i32, i32) {
    %c1_i32 = arith.constant 1 : i32
    %0 = arith.subi %c1_i32, %arg0 : i32
    %1 = arith.muli %arg1, %0 : i32
    %c0_i32 = arith.constant 0 : i32
    %c0_i32_0 = arith.constant 0 : i32
    return %1, %c0_i32 : i32, i32
  }
  func.func @transform_1(%arg0: i32, %arg1: i32) -> (i32, i32) {
    %c0_i32 = arith.constant 0 : i32
    %c0_i32_0 = arith.constant 0 : i32
    %c0_i32_1 = arith.constant 0 : i32
    return %c0_i32, %c0_i32_0 : i32, i32
  }
  func.func @transform_2(%arg0: i32, %arg1: i32) -> (i32, i32) {
    %c0_i32 = arith.constant 0 : i32
    %c0_i32_0 = arith.constant 0 : i32
    %c0_i32_1 = arith.constant 0 : i32
    return %c0_i32, %c0_i32_0 : i32, i32
  }
  func.func @transform_3(%arg0: i32, %arg1: i32) -> (i32, i32) {
    %c0_i32 = arith.constant 0 : i32
    %c0_i32_0 = arith.constant 0 : i32
    %c0_i32_1 = arith.constant 0 : i32
    return %c0_i32, %c0_i32_0 : i32, i32
  }
  func.func @transform_4(%arg0: i32, %arg1: i32) -> (i32, i32) {
    %c0_i32 = arith.constant 0 : i32
    %c0_i32_0 = arith.constant 0 : i32
    return %arg1, %c0_i32 : i32, i32
  }
}

module attributes {stable_mosaic.version = 11 : i64} {
  func.func @kernel(%arg0: i32, %arg1: memref<2x512xbf16, #tpu.memory_space<vmem>>, %arg2: memref<512x1024xbf16, #tpu.memory_space<vmem>>, %arg3: memref<1x1024xf32, #tpu.memory_space<vmem>>, %arg4: memref<1024x128xbf16, #tpu.memory_space<vmem>>, %arg5: memref<1x128xf32, #tpu.memory_space<vmem>>, %arg6: memref<2x128xf32, #tpu.memory_space<vmem>>) attributes {dimension_semantics = [#tpu.dimension_semantics<arbitrary>], iteration_bounds = array<i64: 1>, scalar_prefetch = 0 : i64, scratch_operands = 0 : i64, tpu.core_type = #tpu.core_type<tc>, window_params = [{pipeline_mode = #tpu.pipeline_mode<synchronous>, transform_indices = @transform_0, window_bounds = array<i64: 2, 512>}, {pipeline_mode = #tpu.pipeline_mode<synchronous>, transform_indices = @transform_1, window_bounds = array<i64: 512, 1024>}, {pipeline_mode = #tpu.pipeline_mode<synchronous>, transform_indices = @transform_2, window_bounds = array<i64: 1, 1024>}, {pipeline_mode = #tpu.pipeline_mode<synchronous>, transform_indices = @transform_3, window_bounds = array<i64: 1024, 128>}, {pipeline_mode = #tpu.pipeline_mode<synchronous>, transform_indices = @transform_4, window_bounds = array<i64: 1, 128>}, {pipeline_mode = #tpu.pipeline_mode<synchronous>, transform_indices = @transform_5, window_bounds = array<i64: 2, 128>}]} {
    %c0 = arith.constant 0 : index
    %c0_0 = arith.constant 0 : index
    %0 = vector.load %arg1[%c0, %c0_0] : memref<2x512xbf16, #tpu.memory_space<vmem>>, vector<2x512xbf16>
    %c0_1 = arith.constant 0 : index
    %c0_2 = arith.constant 0 : index
    %1 = vector.load %arg2[%c0_1, %c0_2] : memref<512x1024xbf16, #tpu.memory_space<vmem>>, vector<512x1024xbf16>
    %cst = arith.constant dense<0.000000e+00> : vector<2x1024xf32>
    %2 = tpu.matmul %0, %1, %cst {dimension_numbers = #tpu.dot_dimension_numbers<[1], [0], [0], [1], [0, 0, 1, 1], [], []>} : vector<2x512xbf16>, vector<512x1024xbf16>, vector<2x1024xf32> -> vector<2x1024xf32>
    %c0_3 = arith.constant 0 : index
    %c0_4 = arith.constant 0 : index
    %3 = vector.load %arg3[%c0_3, %c0_4] : memref<1x1024xf32, #tpu.memory_space<vmem>>, vector<1x1024xf32>
    %4 = vector.broadcast %3 : vector<1x1024xf32> to vector<2x1024xf32>
    %5 = arith.addf %2, %4 : vector<2x1024xf32>
    %cst_5 = arith.constant 0.000000e+00 : f32
    %6 = vector.broadcast %cst_5 : f32 to vector<2x1024xf32>
    %7 = arith.maximumf %5, %6 : vector<2x1024xf32>
    %8 = arith.truncf %7 : vector<2x1024xf32> to vector<2x1024xbf16>
    %c0_6 = arith.constant 0 : index
    %c0_7 = arith.constant 0 : index
    %9 = vector.load %arg4[%c0_6, %c0_7] : memref<1024x128xbf16, #tpu.memory_space<vmem>>, vector<1024x128xbf16>
    %cst_8 = arith.constant dense<0.000000e+00> : vector<2x128xf32>
    %10 = tpu.matmul %8, %9, %cst_8 {dimension_numbers = #tpu.dot_dimension_numbers<[1], [0], [0], [1], [0, 0, 1, 1], [], []>} : vector<2x1024xbf16>, vector<1024x128xbf16>, vector<2x128xf32> -> vector<2x128xf32>
    %c0_9 = arith.constant 0 : index
    %c0_10 = arith.constant 0 : index
    %11 = vector.load %arg5[%c0_9, %c0_10] : memref<1x128xf32, #tpu.memory_space<vmem>>, vector<1x128xf32>
    %12 = vector.broadcast %11 : vector<1x128xf32> to vector<2x128xf32>
    %13 = arith.addf %10, %12 : vector<2x128xf32>
    %14 = tpu.iota {dimensions = array<i32: 1>} : vector<2x128xi32>
    %cst_11 = arith.constant 0.000000e+00 : f32
    %15 = vector.broadcast %cst_11 : f32 to vector<2x128xf32>
    %16 = arith.subf %15, %13 : vector<2x128xf32>
    %17 = math.exp %16 : vector<2x128xf32>
    %cst_12 = arith.constant 1.000000e+00 : f32
    %18 = vector.broadcast %cst_12 : f32 to vector<2x128xf32>
    %19 = arith.addf %18, %17 : vector<2x128xf32>
    %cst_13 = arith.constant 1.000000e+00 : f32
    %20 = vector.broadcast %cst_13 : f32 to vector<2x128xf32>
    %21 = arith.divf %20, %19 : vector<2x128xf32>
    %c1_i32 = arith.constant 1 : i32
    %22 = vector.broadcast %c1_i32 : i32 to vector<2x128xi32>
    %23 = arith.cmpi sge, %14, %22 : vector<2x128xi32>
    %c10_i32 = arith.constant 10 : i32
    %24 = vector.broadcast %c10_i32 : i32 to vector<2x128xi32>
    %25 = arith.cmpi sle, %14, %24 : vector<2x128xi32>
    %26 = arith.andi %23, %25 : vector<2x128xi1>
    %cst_14 = arith.constant -1.000000e+30 : f32
    %27 = vector.broadcast %cst_14 : f32 to vector<2x128xf32>
    %28 = arith.select %26, %13, %27 : vector<2x128xi1>, vector<2x128xf32>
    %cst_15 = arith.constant dense<0xFF800000> : vector<2xf32>
    %29 = vector.multi_reduction <maximumf>, %28, %cst_15 [1] : vector<2x128xf32> to vector<2xf32>
    %30 = vector.shape_cast %29 : vector<2xf32> to vector<2x1xf32>
    %31 = vector.broadcast %30 : vector<2x1xf32> to vector<2x128xf32>
    %32 = arith.subf %28, %31 : vector<2x128xf32>
    %33 = math.exp %32 : vector<2x128xf32>
    %cst_16 = arith.constant 0.000000e+00 : f32
    %34 = vector.broadcast %cst_16 : f32 to vector<2x128xf32>
    %35 = arith.select %26, %33, %34 : vector<2x128xi1>, vector<2x128xf32>
    %cst_17 = arith.constant dense<0.000000e+00> : vector<2xf32>
    %36 = vector.multi_reduction <add>, %35, %cst_17 [1] : vector<2x128xf32> to vector<2xf32>
    %37 = vector.shape_cast %36 : vector<2xf32> to vector<2x1xf32>
    %38 = tpu.reciprocal %37 {approx = true} : vector<2x1xf32> -> vector<2x1xf32>
    %39 = arith.mulf %37, %38 : vector<2x1xf32>
    %cst_18 = arith.constant 2.000000e+00 : f32
    %40 = vector.broadcast %cst_18 : f32 to vector<2x1xf32>
    %41 = arith.subf %40, %39 : vector<2x1xf32>
    %42 = arith.mulf %38, %41 : vector<2x1xf32>
    %43 = vector.broadcast %42 : vector<2x1xf32> to vector<2x128xf32>
    %44 = arith.mulf %35, %43 : vector<2x128xf32>
    %c0_i32 = arith.constant 0 : i32
    %45 = vector.broadcast %c0_i32 : i32 to vector<2x128xi32>
    %46 = arith.cmpi eq, %14, %45 : vector<2x128xi32>
    %47 = arith.select %46, %21, %44 : vector<2x128xi1>, vector<2x128xf32>
    %c0_19 = arith.constant 0 : index
    %c0_20 = arith.constant 0 : index
    %48 = vector.load %arg6[%c0_19, %c0_20] : memref<2x128xf32, #tpu.memory_space<vmem>>, vector<2x128xf32>
    tpu.vector_store %arg6[%c0_19, %c0_20], %47 {strides = array<i32>} : memref<2x128xf32, #tpu.memory_space<vmem>>, vector<2x128xf32>,
    return
  }
  func.func @transform_0(%arg0: i32) -> (i32, i32) {
    %c0_i32 = arith.constant 0 : i32
    %c0_i32_0 = arith.constant 0 : i32
    %c0_i32_1 = arith.constant 0 : i32
    return %c0_i32, %c0_i32_0 : i32, i32
  }
  func.func @transform_1(%arg0: i32) -> (i32, i32) {
    %c0_i32 = arith.constant 0 : i32
    %c0_i32_0 = arith.constant 0 : i32
    %c0_i32_1 = arith.constant 0 : i32
    return %c0_i32, %c0_i32_0 : i32, i32
  }
  func.func @transform_2(%arg0: i32) -> (i32, i32) {
    %c0_i32 = arith.constant 0 : i32
    %c0_i32_0 = arith.constant 0 : i32
    %c0_i32_1 = arith.constant 0 : i32
    return %c0_i32, %c0_i32_0 : i32, i32
  }
  func.func @transform_3(%arg0: i32) -> (i32, i32) {
    %c0_i32 = arith.constant 0 : i32
    %c0_i32_0 = arith.constant 0 : i32
    %c0_i32_1 = arith.constant 0 : i32
    return %c0_i32, %c0_i32_0 : i32, i32
  }
  func.func @transform_4(%arg0: i32) -> (i32, i32) {
    %c0_i32 = arith.constant 0 : i32
    %c0_i32_0 = arith.constant 0 : i32
    %c0_i32_1 = arith.constant 0 : i32
    return %c0_i32, %c0_i32_0 : i32, i32
  }
  func.func @transform_5(%arg0: i32) -> (i32, i32) {
    %c0_i32 = arith.constant 0 : i32
    %c0_i32_0 = arith.constant 0 : i32
    %c0_i32_1 = arith.constant 0 : i32
    return %c0_i32, %c0_i32_0 : i32, i32
  }
}

</mosaic_0001>

<bundles_post_ra>
// kernel: discriminator_cifar_forward.5
= control target key start
LH: loop header
LB: loop body
LE: loop exit
PB: predicated region body
PF: predicated region fallthrough
CT: control target
= control target key end

     0   :  { %s2498_s15 = smov 0   ;;  %s2500_s16 = smov 0   ;;  %s3089_s0 = inlined_call_operand.vmem [shape: bf16[512,32], index: 0, kind: input, shape index: {}]   ;;  %s3090_s1 = inlined_call_operand.vmem [shape: bf16[32,128], index: 1, kind: input, shape index: {}]   ;;  %s3091_s2 = inlined_call_operand.vmem [shape: f32[1,128], index: 2, kind: input, shape index: {}]   ;;  %s3092_s3 = inlined_call_operand.vmem [shape: f32[1,128], index: 3, kind: input, shape index: {}]   ;;  %s3093_s4 = inlined_call_operand.vmem [shape: bf16[512,128], index: 4, kind: output, shape index: {}]  }
   0x1   :  { %s2502_s17 = smov 0  }
   0x2 LB: > { %s26_s18 = sadd.s32 1, %s2466_s16  ;;  %p1887_p0 = scmp.ge.s32.totalorder %s2470_s17, 1  ;;  %s2470_s17 = sphi %s2502_s17, %s14_s17   ;;  %s2466_s16 = sphi %s2500_s16, %s3095_s16   ;;  %s2462_s15 = sphi %s2498_s15, %s3094_s15  }
   0x3   : > { %p28_p1 = scmp.ge.s32.totalorder %s26_s18, 2  ;;  %p183_p2 = scmp.lt.s32.totalorder %s2470_s17, 3 }
   0x5   : > { %s3097_s18 = smov (%p28_p1, %s26_s18), 0  ;;  %p184_p3 = pnand %p1887_p0, %p183_p2 }
   0x6   : > { %p1888_p4 = scmp.ne.s32.totalorder (!%p184_p3), %s2462_s15, 0 }
   0x7   : > { %187 = sbr.rel (%p184_p3) target bundleno = 488 (0x1e8), region = 36 }
   0xc   : > { %232 = sbr.rel (%p1888_p4) target bundleno = 368 (0x170), region = 40 }
  0x11   : > { %v2412_v0 = vld [vmem:[%s3090_s1 + $0x8] sm:$0xff]   ;;  %v2413_v1 = vld [vmem:[%s3090_s1] sm:$0xff]   ;;  %vm479_vm0 = vcmask 261120   ;;  %v2416_v4 = vld [vmem:[%s3089_s0 + $0x10] sm:$0xff]   ;;  %v2472_v35 = vmov 0.0  }
  0x12   : > { %2315 = vmatprep.subr.bf16.mxu0 %v2412_v0  ;;  %v2414_v2 = vld [vmem:[%s3089_s0] sm:$0xff]   ;;  %2383 = vmatprep.subr.bf16.mxu1 %v2412_v0  ;;  %v2415_v3 = vld [vmem:[%s3089_s0 + $0x8] sm:$0xff]   ;;  %v2417_v5 = vld [vmem:[%s3089_s0 + $0x18] sm:$0xff]   ;;  %237 = vst [vmem:[#allocation3] sm:$0x1] %v2472_v35 }
  0x13   : > { %2316 = vmatpush3.bf16.msra.mxu0 %v2412_v0  ;;  %2385 = vmatpush3.bf16.msra.mxu1 %v2412_v0  ;;  %v2418_v6 = vld [vmem:[%s3089_s0 + $0x20] sm:$0xff]   ;;  %v2431_v8 = vld [vmem:[%s3089_s0 + $0x88] sm:$0xff]   ;;  %v2432_v9 = vld [vmem:[%s3089_s0 + $0x90] sm:$0xff]   ;;  %238 = vst [vmem:[#allocation4] sm:$0x1] %v2472_v35 }
  0x14   : > { %2317 = vmatprep.subr.bf16.mxu0 %v2413_v1  ;;  %2319 = vmatprep.mubr.msk.bf16.mxu0 %vm479_vm0, %v2414_v2  ;;  %v2430_v7 = vld [vmem:[%s3089_s0 + $0x80] sm:$0xff]   ;;  %v2419_v10 = vld [vmem:[%s3089_s0 + $0x28] sm:$0xff]   ;;  %v2420_v11 = vld [vmem:[%s3089_s0 + $0x30] sm:$0xff]  }
  0x15   : > { %2384 = vmatprep.subr.bf16.mxu1 %v2413_v1  ;;  %2351 = vmatprep.mubr.msk.bf16.mxu1 %vm479_vm0, %v2430_v7  ;;  %v2433_v12 = vld [vmem:[%s3089_s0 + $0x98] sm:$0xff]   ;;  %v2434_v13 = vld [vmem:[%s3089_s0 + $0xa0] sm:$0xff]   ;;  %v2435_v16 = vld [vmem:[%s3089_s0 + $0xa8] sm:$0xff]  }
  0x16   : > { %v2421_v14 = vld [vmem:[%s3089_s0 + $0x38] sm:$0xff]   ;;  %v2422_v15 = vld [vmem:[%s3089_s0 + $0x40] sm:$0xff]   ;;  %v2436_v17 = vld [vmem:[%s3089_s0 + $0xb0] sm:$0xff]  }
  0x17   : > { %2318 = vmatpush3.bf16.msra.mxu0 %v2413_v1  ;;  %2386 = vmatpush3.bf16.msra.mxu1 %v2413_v1  ;;  %v2423_v18 = vld [vmem:[%s3089_s0 + $0x48] sm:$0xff]   ;;  %v2424_v19 = vld [vmem:[%s3089_s0 + $0x50] sm:$0xff]   ;;  %v2437_v20 = vld [vmem:[%s3089_s0 + $0xb8] sm:$0xff]  }
  0x18   : > { %v2438_v21 = vld [vmem:[%s3089_s0 + $0xc0] sm:$0xff]   ;;  %v2425_v22 = vld [vmem:[%s3089_s0 + $0x58] sm:$0xff]   ;;  %v2439_v24 = vld [vmem:[%s3089_s0 + $0xc8] sm:$0xff]  }
  0x19   : > { %v2426_v23 = vld [vmem:[%s3089_s0 + $0x60] sm:$0xff]   ;;  %v2440_v25 = vld [vmem:[%s3089_s0 + $0xd0] sm:$0xff]   ;;  %v2427_v26 = vld [vmem:[%s3089_s0 + $0x68] sm:$0xff]  }
  0x1a   : > { %2320 = vmatmul.mubr.msk.bf16.vlgmr.msra.gmra.mxu0 %vm479_vm0, %v2415_v3  ;;  %2352 = vmatmul.mubr.msk.bf16.vlgmr.msra.gmra.mxu1 %vm479_vm0, %v2431_v8  ;;  %v2428_v27 = vld [vmem:[%s3089_s0 + $0x70] sm:$0xff]   ;;  %v2441_v28 = vld [vmem:[%s3089_s0 + $0xd8] sm:$0xff]   ;;  %v2442_v29 = vld [vmem:[%s3089_s0 + $0xe0] sm:$0xff]  }
  0x1b   : > { %2323 = vmatprep.mubr.msk.bf16.mxu0 %vm479_vm0, %v2416_v4  ;;  %2355 = vmatprep.mubr.msk.bf16.mxu1 %vm479_vm0, %v2432_v9  ;;  %v2429_v30 = vld [vmem:[%s3089_s0 + $0x78] sm:$0xff]   ;;  %v2443_v31 = vld [vmem:[%s3089_s0 + $0xe8] sm:$0xff]   ;;  %v2444_v32 = vld [vmem:[%s3089_s0 + $0xf0] sm:$0xff]  }
  0x1c   : > { %v2445_v33 = vld [vmem:[%s3089_s0 + $0xf8] sm:$0xff]  }
  0x22   : > { %2324 = vmatmul.mubr.msk.bf16.gmra.mxu0 %vm479_vm0, %v2417_v5  ;;  %2356 = vmatmul.mubr.msk.bf16.gmra.mxu1 %vm479_vm0, %v2433_v12 }
  0x23   : > { %2327 = vmatprep.mubr.msk.bf16.mxu0 %vm479_vm0, %v2418_v6  ;;  %2359 = vmatprep.mubr.msk.bf16.mxu1 %vm479_vm0, %v2434_v13 }
  0x2a   : > { %2328 = vmatmul.mubr.msk.bf16.gmra.mxu0 %vm479_vm0, %v2419_v10  ;;  %2360 = vmatmul.mubr.msk.bf16.gmra.mxu1 %vm479_vm0, %v2435_v16 }
  0x2b   : > { %2331 = vmatprep.mubr.msk.bf16.mxu0 %vm479_vm0, %v2420_v11  ;;  %2363 = vmatprep.mubr.msk.bf16.mxu1 %vm479_vm0, %v2436_v17 }
  0x32   : > { %2332 = vmatmul.mubr.msk.bf16.gmra.mxu0 %vm479_vm0, %v2421_v14  ;;  %2364 = vmatmul.mubr.msk.bf16.gmra.mxu1 %vm479_vm0, %v2437_v20 }
  0x33   : > { %2335 = vmatprep.mubr.msk.bf16.mxu0 %vm479_vm0, %v2422_v15  ;;  %2367 = vmatprep.mubr.msk.bf16.mxu1 %vm479_vm0, %v2438_v21 }
  0x3a   : > { %2336 = vmatmul.mubr.msk.bf16.gmra.mxu0 %vm479_vm0, %v2423_v18  ;;  %2368 = vmatmul.mubr.msk.bf16.gmra.mxu1 %vm479_vm0, %v2439_v24 }
  0x3b   : > { %2339 = vmatprep.mubr.msk.bf16.mxu0 %vm479_vm0, %v2424_v19  ;;  %2371 = vmatprep.mubr.msk.bf16.mxu1 %vm479_vm0, %v2440_v25 }
  0x42   : > { %2340 = vmatmul.mubr.msk.bf16.gmra.mxu0 %vm479_vm0, %v2425_v22  ;;  %2372 = vmatmul.mubr.msk.bf16.gmra.mxu1 %vm479_vm0, %v2441_v28 }
  0x43   : > { %2343 = vmatprep.mubr.msk.bf16.mxu0 %vm479_vm0, %v2426_v23  ;;  %2375 = vmatprep.mubr.msk.bf16.mxu1 %vm479_vm0, %v2442_v29 }
  0x4a   : > { %2344 = vmatmul.mubr.msk.bf16.gmra.mxu0 %vm479_vm0, %v2427_v26  ;;  %2376 = vmatmul.mubr.msk.bf16.gmra.mxu1 %vm479_vm0, %v2443_v31 }
  0x4b   : > { %2347 = vmatprep.mubr.msk.bf16.mxu0 %vm479_vm0, %v2428_v27  ;;  %2379 = vmatprep.mubr.msk.bf16.mxu1 %vm479_vm0, %v2444_v32 }
  0x52   : > { %2348 = vmatmul.mubr.msk.bf16.gmra.mxu0 %vm479_vm0, %v2429_v30  ;;  %2380 = vmatmul.mubr.msk.bf16.gmra.mxu1 %vm479_vm0, %v2445_v33 }
  0xda   : > { %v2321_v34 = vpop.f32.mrf.mxu0  ;;  %v2653_v50 = vpop.f32.mrf.mxu1 }
  0xdb   : > { %868 = vst [vmem:[#allocation2 + $0xd8] sm:$0xff] %v2321_v34  ;;  %v1005_v43 = vmul.f32 %v2321_v34, %v2321_v34  ;;  %900 = vst [vmem:[#allocation2 + $0x100] sm:$0xff] %v2653_v50 }
  0xdc   : > { %v610_v36 = vpop.f32.mrf.mxu0  ;;  %v2656_v55 = vpop.f32.mrf.mxu1 }
  0xdd   : > { %866 = vst [vmem:[#allocation2 + $0xb0] sm:$0xff] %v610_v36  ;;  %v1003_v39 = vmul.f32 %v610_v36, %v610_v36  ;;  %898 = vst [vmem:[#allocation2 + $0x148] sm:$0xff] %v2656_v55 }
  0xde   : > { %v2322_v37 = vpop.f32.mrf.mxu0  ;;  %v2659_v60 = vpop.f32.mrf.mxu1 }
  0xdf   : > { %869 = vst [vmem:[#allocation2 + $0x18] sm:$0xff] %v2322_v37  ;;  %v1006_v47 = vmul.f32 %v2322_v37, %v2322_v37  ;;  %901 = vst [vmem:[#allocation2 + $0xc8] sm:$0xff] %v2659_v60 }
  0xe0   : > { %v613_v38 = vpop.f32.mrf.mxu0  ;;  %v2662_v1 = vpop.f32.mrf.mxu1 }
  0xe1   : > { %867 = vst [vmem:[#allocation2 + $0x1b0] sm:$0xff] %v613_v38  ;;  %v931_v40 = vadd.f32 %v613_v38, %v610_v36  ;;  %v1004_v41 = vmul.f32 %v613_v38, %v613_v38  ;;  %899 = vst [vmem:[#allocation2 + $0x1d0] sm:$0xff] %v2662_v1 }
  0xe2   : > { %v2325_v42 = vpop.f32.mrf.mxu0  ;;  %v2665_v6 = vpop.f32.mrf.mxu1 }
  0xe3   : > { %v932_v44 = vadd.f32 %v2321_v34, %v931_v40  ;;  %v1067_v45 = vadd.f32 %v1004_v41, %v1003_v39  ;;  %872 = vst [vmem:[#allocation2 + $0x130] sm:$0xff] %v2325_v42  ;;  %v1009_v62 = vmul.f32 %v2325_v42, %v2325_v42  ;;  %904 = vst [vmem:[#allocation2 + $0x20] sm:$0xff] %v2665_v6 }
  0xe4   : > { %v626_v46 = vpop.f32.mrf.mxu0  ;;  %v2668_v11 = vpop.f32.mrf.mxu1 }
  0xe5   : > { %v1068_v48 = vadd.f32 %v1067_v45, %v1005_v43  ;;  %870 = vst [vmem:[#allocation2 + $0x50] sm:$0xff] %v626_v46  ;;  %v933_v49 = vadd.f32 %v2322_v37, %v932_v44  ;;  %v1007_v53 = vmul.f32 %v626_v46, %v626_v46  ;;  %902 = vst [vmem:[#allocation2 + $0x40] sm:$0xff] %v2668_v11 }
  0xe6   : > { %v2326_v51 = vpop.f32.mrf.mxu0  ;;  %v2671_v16 = vpop.f32.mrf.mxu1 }
  0xe7   : > { %v934_v52 = vadd.f32 %v933_v49, %v626_v46  ;;  %v1069_v54 = vadd.f32 %v1068_v48, %v1006_v47  ;;  %873 = vst [vmem:[#allocation2 + $0x48] sm:$0xff] %v2326_v51  ;;  %v1010_v3 = vmul.f32 %v2326_v51, %v2326_v51  ;;  %905 = vst [vmem:[#allocation2 + $0x128] sm:$0xff] %v2671_v16 }
  0xe8   : > { %v629_v56 = vpop.f32.mrf.mxu0  ;;  %v2674_v21 = vpop.f32.mrf.mxu1 }
  0xe9   : > { %v1070_v57 = vadd.f32 %v1069_v54, %v1007_v53  ;;  %871 = vst [vmem:[#allocation2 + $0x168] sm:$0xff] %v629_v56  ;;  %v935_v58 = vadd.f32 %v934_v52, %v629_v56  ;;  %v1008_v59 = vmul.f32 %v629_v56, %v629_v56  ;;  %903 = vst [vmem:[#allocation2 + $0x1f8] sm:$0xff] %v2674_v21 }
  0xea   : > { %v2329_v61 = vpop.f32.mrf.mxu0  ;;  %v2677_v26 = vpop.f32.mrf.mxu1 }
  0xeb   : > { %v936_v63 = vadd.f32 %v2325_v42, %v935_v58  ;;  %v1071_v0 = vadd.f32 %v1070_v57, %v1008_v59  ;;  %876 = vst [vmem:[#allocation2 + $0x118] sm:$0xff] %v2329_v61  ;;  %v1013_v18 = vmul.f32 %v2329_v61, %v2329_v61  ;;  %908 = vst [vmem:[#allocation2 + $0xe8] sm:$0xff] %v2677_v26 }
  0xec   : > { %v642_v2 = vpop.f32.mrf.mxu0  ;;  %v2680_v31 = vpop.f32.mrf.mxu1 }
  0xed   : > { %v1072_v4 = vadd.f32 %v1071_v0, %v1009_v62  ;;  %874 = vst [vmem:[#allocation2 + $0x180] sm:$0xff] %v642_v2  ;;  %v937_v5 = vadd.f32 %v2326_v51, %v936_v63  ;;  %v1011_v9 = vmul.f32 %v642_v2, %v642_v2  ;;  %906 = vst [vmem:[#allocation2 + $0x1a0] sm:$0xff] %v2680_v31 }
  0xee   : > { %v2330_v7 = vpop.f32.mrf.mxu0  ;;  %v2683_v36 = vpop.f32.mrf.mxu1 }
  0xef   : > { %v938_v8 = vadd.f32 %v937_v5, %v642_v2  ;;  %v1073_v10 = vadd.f32 %v1072_v4, %v1010_v3  ;;  %877 = vst [vmem:[#allocation2 + $0x98] sm:$0xff] %v2330_v7  ;;  %v1014_v23 = vmul.f32 %v2330_v7, %v2330_v7  ;;  %909 = vst [vmem:[#allocation2 + $0x78] sm:$0xff] %v2683_v36 }
  0xf0   : > { %v645_v12 = vpop.f32.mrf.mxu0  ;;  %v2686_v41 = vpop.f32.mrf.mxu1 }
  0xf1   : > { %v1074_v13 = vadd.f32 %v1073_v10, %v1011_v9  ;;  %875 = vst [vmem:[#allocation2 + $0x110] sm:$0xff] %v645_v12  ;;  %v939_v14 = vadd.f32 %v938_v8, %v645_v12  ;;  %v1012_v15 = vmul.f32 %v645_v12, %v645_v12  ;;  %907 = vst [vmem:[#allocation2 + $0x1f0] sm:$0xff] %v2686_v41 }
  0xf2   : > { %v2333_v17 = vpop.f32.mrf.mxu0  ;;  %v2689_v46 = vpop.f32.mrf.mxu1 }
  0xf3   : > { %v940_v19 = vadd.f32 %v2329_v61, %v939_v14  ;;  %v1075_v20 = vadd.f32 %v1074_v13, %v1012_v15  ;;  %880 = vst [vmem:[#allocation2 + $0x108] sm:$0xff] %v2333_v17  ;;  %v1017_v38 = vmul.f32 %v2333_v17, %v2333_v17  ;;  %912 = vst [vmem:[#allocation2 + $0x1d8] sm:$0xff] %v2689_v46 }
  0xf4   : > { %v658_v22 = vpop.f32.mrf.mxu0  ;;  %v2692_v52 = vpop.f32.mrf.mxu1 }
  0xf5   : > { %v1076_v24 = vadd.f32 %v1075_v20, %v1013_v18  ;;  %878 = vst [vmem:[#allocation2 + $0x120] sm:$0xff] %v658_v22  ;;  %v941_v25 = vadd.f32 %v2330_v7, %v940_v19  ;;  %v1015_v29 = vmul.f32 %v658_v22, %v658_v22  ;;  %910 = vst [vmem:[#allocation2 + $0x70] sm:$0xff] %v2692_v52 }
  0xf6   : > { %v2334_v27 = vpop.f32.mrf.mxu0  ;;  %v2695_v58 = vpop.f32.mrf.mxu1 }
  0xf7   : > { %v942_v28 = vadd.f32 %v941_v25, %v658_v22  ;;  %v1077_v30 = vadd.f32 %v1076_v24, %v1014_v23  ;;  %881 = vst [vmem:[#allocation2 + $0x60] sm:$0xff] %v2334_v27  ;;  %v1018_v43 = vmul.f32 %v2334_v27, %v2334_v27  ;;  %913 = vst [vmem:[#allocation2 + $0xd0] sm:$0xff] %v2695_v58 }
  0xf8   : > { %v661_v32 = vpop.f32.mrf.mxu0  ;;  %v2698_v0 = vpop.f32.mrf.mxu1 }
  0xf9   : > { %v1078_v33 = vadd.f32 %v1077_v30, %v1015_v29  ;;  %879 = vst [vmem:[#allocation2 + $0x150] sm:$0xff] %v661_v32  ;;  %v943_v34 = vadd.f32 %v942_v28, %v661_v32  ;;  %v1016_v35 = vmul.f32 %v661_v32, %v661_v32  ;;  %911 = vst [vmem:[#allocation2 + $0x90] sm:$0xff] %v2698_v0 }
  0xfa   : > { %v2337_v37 = vpop.f32.mrf.mxu0  ;;  %v2701_v7 = vpop.f32.mrf.mxu1 }
  0xfb   : > { %v944_v39 = vadd.f32 %v2333_v17, %v943_v34  ;;  %v1079_v40 = vadd.f32 %v1078_v33, %v1016_v35  ;;  %884 = vst [vmem:[#allocation2 + $0x138] sm:$0xff] %v2337_v37  ;;  %v1021_v61 = vmul.f32 %v2337_v37, %v2337_v37  ;;  %916 = vst [vmem:[#allocation2 + $0xa8] sm:$0xff] %v2701_v7 }
  0xfc   : > { %v674_v42 = vpop.f32.mrf.mxu0  ;;  %v2704_v13 = vpop.f32.mrf.mxu1 }
  0xfd   : > { %v1080_v44 = vadd.f32 %v1079_v40, %v1017_v38  ;;  %882 = vst [vmem:[#allocation2 + $0xe0] sm:$0xff] %v674_v42  ;;  %v945_v45 = vadd.f32 %v2334_v27, %v944_v39  ;;  %v1019_v49 = vmul.f32 %v674_v42, %v674_v42  ;;  %914 = vst [vmem:[#allocation2 + $0xb8] sm:$0xff] %v2704_v13 }
  0xfe   : > { %v2338_v47 = vpop.f32.mrf.mxu0  ;;  %v2707_v19 = vpop.f32.mrf.mxu1 }
  0xff   : > { %v946_v48 = vadd.f32 %v945_v45, %v674_v42  ;;  %v1081_v51 = vadd.f32 %v1080_v44, %v1018_v43  ;;  %885 = vst [vmem:[#allocation2 + $0x140] sm:$0xff] %v2338_v47  ;;  %v1022_v3 = vmul.f32 %v2338_v47, %v2338_v47  ;;  %917 = vst [vmem:[#allocation2 + $0x1c8] sm:$0xff] %v2707_v19 }
 0x100   : > { %v677_v53 = vpop.f32.mrf.mxu0  ;;  %v2710_v25 = vpop.f32.mrf.mxu1 }
 0x101   : > { %v1082_v54 = vadd.f32 %v1081_v51, %v1019_v49  ;;  %883 = vst [vmem:[#allocation2 + $0x188] sm:$0xff] %v677_v53  ;;  %v947_v56 = vadd.f32 %v946_v48, %v677_v53  ;;  %v1020_v57 = vmul.f32 %v677_v53, %v677_v53  ;;  %915 = vst [vmem:[#allocation2 + $0x88] sm:$0xff] %v2710_v25 }
 0x102   : > { %v2341_v59 = vpop.f32.mrf.mxu0  ;;  %v2713_v32 = vpop.f32.mrf.mxu1 }
 0x103   : > { %v948_v62 = vadd.f32 %v2337_v37, %v947_v56  ;;  %v1083_v63 = vadd.f32 %v1082_v54, %v1020_v57  ;;  %888 = vst [vmem:[#allocation2 + $0x1b8] sm:$0xff] %v2341_v59  ;;  %v1025_v22 = vmul.f32 %v2341_v59, %v2341_v59  ;;  %920 = vst [vmem:[#allocation2 + $0x68] sm:$0xff] %v2713_v32 }
 0x104   : > { %v690_v2 = vpop.f32.mrf.mxu0  ;;  %v2716_v38 = vpop.f32.mrf.mxu1 }
 0x105   : > { %v1084_v4 = vadd.f32 %v1083_v63, %v1021_v61  ;;  %886 = vst [vmem:[#allocation2 + $0x80] sm:$0xff] %v690_v2  ;;  %v949_v5 = vadd.f32 %v2338_v47, %v948_v62  ;;  %v1023_v10 = vmul.f32 %v690_v2, %v690_v2  ;;  %918 = vst [vmem:[#allocation2 + $0x170] sm:$0xff] %v2716_v38 }
 0x106   : > { %v2342_v8 = vpop.f32.mrf.mxu0  ;;  %v2719_v44 = vpop.f32.mrf.mxu1 }
 0x107   : > { %v950_v9 = vadd.f32 %v949_v5, %v690_v2  ;;  %v1085_v12 = vadd.f32 %v1084_v4, %v1022_v3  ;;  %889 = vst [vmem:[#allocation2 + $0x28] sm:$0xff] %v2342_v8  ;;  %v1026_v28 = vmul.f32 %v2342_v8, %v2342_v8  ;;  %921 = vst [vmem:[#allocation2 + $0x190] sm:$0xff] %v2719_v44 }
 0x108   : > { %v693_v14 = vpop.f32.mrf.mxu0  ;;  %v2722_v51 = vpop.f32.mrf.mxu1 }
 0x109   : > { %v1086_v15 = vadd.f32 %v1085_v12, %v1023_v10  ;;  %887 = vst [vmem:[#allocation2 + $0x1a8] sm:$0xff] %v693_v14  ;;  %v951_v17 = vadd.f32 %v950_v9, %v693_v14  ;;  %v1024_v18 = vmul.f32 %v693_v14, %v693_v14  ;;  %919 = vst [vmem:[#allocation2 + $0x178] sm:$0xff] %v2722_v51 }
 0x10a   : > { %v2345_v20 = vpop.f32.mrf.mxu0 }
 0x10b   : > { %v952_v23 = vadd.f32 %v2341_v59, %v951_v17  ;;  %v1087_v24 = vadd.f32 %v1086_v15, %v1024_v18  ;;  %892 = vst [vmem:[#allocation2 + $0x160] sm:$0xff] %v2345_v20  ;;  %v1029_v47 = vmul.f32 %v2345_v20, %v2345_v20  ;;  %v2725_v59 = vpop.f32.mrf.mxu1 }
 0x10c   : > { %v706_v27 = vpop.f32.mrf.mxu0  ;;  %924 = vst [vmem:[#allocation2 + $0xc0] sm:$0xff] %v2725_v59 }
 0x10d   : > { %v1088_v29 = vadd.f32 %v1087_v24, %v1025_v22  ;;  %890 = vst [vmem:[#allocation2 + $0x1e8] sm:$0xff] %v706_v27  ;;  %v953_v30 = vadd.f32 %v2342_v8, %v952_v23  ;;  %v1027_v35 = vmul.f32 %v706_v27, %v706_v27  ;;  %v2728_v3 = vpop.f32.mrf.mxu1  ;;  %v1035_v24 = vmul.f32 %v2656_v55, %v2656_v55 }
 0x10e   : > { %v2346_v33 = vpop.f32.mrf.mxu0  ;;  %922 = vst [vmem:[#allocation2 + $0x198] sm:$0xff] %v2728_v3 }
 0x10f   : > { %v954_v34 = vadd.f32 %v953_v30, %v706_v27  ;;  %v1089_v37 = vadd.f32 %v1088_v29, %v1026_v28  ;;  %893 = vst [vmem:[#allocation2 + $0x30] sm:$0xff] %v2346_v33  ;;  %v1030_v54 = vmul.f32 %v2346_v33, %v2346_v33  ;;  %v2731_v10 = vpop.f32.mrf.mxu1 }
 0x110   : > { %v709_v39 = vpop.f32.mrf.mxu0  ;;  %925 = vst [vmem:[#allocation2 + $0x1c0] sm:$0xff] %v2731_v10 }
 0x111   : > { %v1090_v40 = vadd.f32 %v1089_v37, %v1027_v35  ;;  %891 = vst [vmem:[#allocation2 + $0xf8] sm:$0xff] %v709_v39  ;;  %v955_v42 = vadd.f32 %v954_v34, %v709_v39  ;;  %v1028_v43 = vmul.f32 %v709_v39, %v709_v39  ;;  %v2734_v17 = vpop.f32.mrf.mxu1  ;;  %v1037_v37 = vmul.f32 %v2653_v50, %v2653_v50 }
 0x112   : > { %v2349_v45 = vpop.f32.mrf.mxu0  ;;  %923 = vst [vmem:[#allocation2 + $0x38] sm:$0xff] %v2734_v17 }
 0x113   : > { %v956_v48 = vadd.f32 %v2345_v20, %v955_v42  ;;  %v1091_v49 = vadd.f32 %v1090_v40, %v1028_v43  ;;  %896 = vst [vmem:[#allocation2 + $0xf0] sm:$0xff] %v2349_v45  ;;  %v1033_v12 = vmul.f32 %v2349_v45, %v2349_v45  ;;  %v2737_v23 = vpop.f32.mrf.mxu1  ;;  %v1038_v42 = vmul.f32 %v2659_v60, %v2659_v60 }
 0x114   : > { %v722_v53 = vpop.f32.mrf.mxu0  ;;  %928 = vst [vmem:[#allocation2 + $0x58] sm:$0xff] %v2737_v23 }
 0x115   : > { %v1092_v56 = vadd.f32 %v1091_v49, %v1029_v47  ;;  %894 = vst [vmem:[#allocation2 + $0x1e0] sm:$0xff] %v722_v53  ;;  %v957_v57 = vadd.f32 %v2346_v33, %v956_v48  ;;  %v1031_v63 = vmul.f32 %v722_v53, %v722_v53  ;;  %v2743_v29 = vpop.f32.mrf.mxu1  ;;  %v1036_v33 = vmul.f32 %v2662_v1, %v2662_v1 }
 0x116   : > { %v2350_v61 = vpop.f32.mrf.mxu0  ;;  %926 = vst [vmem:[#allocation2 + $0x158] sm:$0xff] %v2743_v29  ;;  %v1039_v47 = vmul.f32 %v2668_v11, %v2668_v11 }
 0x117   : > { %v958_v62 = vadd.f32 %v957_v57, %v722_v53  ;;  %v1093_v2 = vadd.f32 %v1092_v56, %v1030_v54  ;;  %897 = vst [vmem:[#allocation2 + $0x8] sm:$0xff] %v2350_v61  ;;  %v1034_v18 = vmul.f32 %v2350_v61, %v2350_v61  ;;  %v2749_v35 = vpop.f32.mrf.mxu1  ;;  %v1040_v53 = vmul.f32 %v2674_v21, %v2674_v21 }
 0x118   : > { %v725_v4 = vpop.f32.mrf.mxu0  ;;  %929 = vst [vmem:[#allocation2 + $0xa0] sm:$0xff] %v2749_v35  ;;  %v1041_v54 = vmul.f32 %v2665_v6, %v2665_v6 }
 0x119   : > { %v1094_v5 = vadd.f32 %v1093_v2, %v1031_v63  ;;  %895 = vst [vmem:[#allocation2] sm:$0xff] %v725_v4  ;;  %v959_v8 = vadd.f32 %v958_v62, %v725_v4  ;;  %v1032_v9 = vmul.f32 %v725_v4, %v725_v4  ;;  %v2755_v40 = vpop.f32.mrf.mxu1  ;;  %v1043_v63 = vmul.f32 %v2680_v31, %v2680_v31 }
 0x11a   : > { %927 = vst [vmem:[#allocation2 + $0x10] sm:$0xff] %v2755_v40 }
 0x11b   : > { %v960_v14 = vadd.f32 %v2349_v45, %v959_v8  ;;  %v1095_v15 = vadd.f32 %v1094_v5, %v1032_v9  ;;  %v1044_v5 = vmul.f32 %v2686_v41, %v2686_v41 }
 0x11d   : > { %v961_v20 = vadd.f32 %v2350_v61, %v960_v14  ;;  %v1096_v22 = vadd.f32 %v1095_v15, %v1033_v12  ;;  %v1047_v15 = vmul.f32 %v2692_v52, %v2692_v52 }
 0x11f   : > { %v1097_v27 = vadd.f32 %v1096_v22, %v1034_v18  ;;  %v962_v28 = vadd.f32 %v961_v20, %v2656_v55  ;;  %v1048_v22 = vmul.f32 %v2698_v0, %v2698_v0 }
 0x121   : > { %v963_v30 = vadd.f32 %v962_v28, %v2662_v1  ;;  %v1098_v34 = vadd.f32 %v1097_v27, %v1035_v24 }
 0x123   : > { %v964_v39 = vadd.f32 %v2653_v50, %v963_v30  ;;  %v1099_v55 = vadd.f32 %v1098_v34, %v1036_v33  ;;  %v1051_v33 = vmul.f32 %v2704_v13, %v2704_v13 }
 0x125   : > { %v1100_v43 = vadd.f32 %v1099_v55, %v1037_v37  ;;  %v965_v1 = vadd.f32 %v2659_v60, %v964_v39  ;;  %v1042_v60 = vmul.f32 %v2671_v16, %v2671_v16  ;;  %v1052_v39 = vmul.f32 %v2710_v25, %v2710_v25 }
 0x127   : > { %v966_v45 = vadd.f32 %v965_v1, %v2668_v11  ;;  %v1101_v48 = vadd.f32 %v1100_v43, %v1038_v42 }
 0x129   : > { %v1102_v49 = vadd.f32 %v1101_v48, %v1039_v47  ;;  %v967_v50 = vadd.f32 %v966_v45, %v2674_v21  ;;  %v1055_v45 = vmul.f32 %v2716_v38, %v2716_v38 }
 0x12b   : > { %v968_v56 = vadd.f32 %v2665_v6, %v967_v50  ;;  %v1103_v57 = vadd.f32 %v1102_v49, %v1040_v53  ;;  %v1045_v6 = vmul.f32 %v2677_v26, %v2677_v26  ;;  %v1056_v49 = vmul.f32 %v2722_v51, %v2722_v51 }
 0x12d   : > { %v1104_v61 = vadd.f32 %v1103_v57, %v1041_v54  ;;  %v969_v62 = vadd.f32 %v2671_v16, %v968_v56  ;;  %v1046_v16 = vmul.f32 %v2683_v36, %v2683_v36  ;;  %v1059_v57 = vmul.f32 %v2728_v3, %v2728_v3 }
 0x12f   : > { %v970_v11 = vadd.f32 %v969_v62, %v2680_v31  ;;  %v1105_v2 = vadd.f32 %v1104_v61, %v1042_v60  ;;  %v1060_v62 = vmul.f32 %v2734_v17, %v2734_v17 }
 0x131   : > { %v1106_v4 = vadd.f32 %v1105_v2, %v1043_v63  ;;  %v971_v21 = vadd.f32 %v970_v11, %v2686_v41 }
 0x133   : > { %v972_v8 = vadd.f32 %v2677_v26, %v971_v21  ;;  %v1107_v9 = vadd.f32 %v1106_v4, %v1044_v5  ;;  %v1049_v26 = vmul.f32 %v2689_v46, %v2689_v46  ;;  %v1063_v21 = vmul.f32 %v2743_v29, %v2743_v29 }
 0x135   : > { %v1108_v12 = vadd.f32 %v1107_v9, %v1045_v6  ;;  %v973_v14 = vadd.f32 %v2683_v36, %v972_v8  ;;  %v1050_v36 = vmul.f32 %v2695_v58, %v2695_v58  ;;  %v1064_v8 = vmul.f32 %v2755_v40, %v2755_v40 }
 0x137   : > { %v974_v31 = vadd.f32 %v973_v14, %v2692_v52  ;;  %v1109_v18 = vadd.f32 %v1108_v12, %v1046_v16 }
 0x139   : > { %v1110_v20 = vadd.f32 %v1109_v18, %v1047_v15  ;;  %v975_v41 = vadd.f32 %v974_v31, %v2698_v0 }
 0x13b   : > { %v976_v24 = vadd.f32 %v2689_v46, %v975_v41  ;;  %v1111_v27 = vadd.f32 %v1110_v20, %v1048_v22  ;;  %v1053_v46 = vmul.f32 %v2701_v7, %v2701_v7 }
 0x13d   : > { %v1112_v28 = vadd.f32 %v1111_v27, %v1049_v26  ;;  %v977_v30 = vadd.f32 %v2695_v58, %v976_v24  ;;  %v1054_v58 = vmul.f32 %v2707_v19, %v2707_v19  ;;  %v930_v27 = vld [vmem:[#allocation3] sm:$0x1] }
 0x13f   : > { %v978_v52 = vadd.f32 %v977_v30, %v2704_v13  ;;  %v1113_v34 = vadd.f32 %v1112_v28, %v1050_v36  ;;  %v1002_v28 = vld [vmem:[#allocation4] sm:$0x1] }
 0x141   : > { %v1114_v37 = vadd.f32 %v1113_v34, %v1051_v33  ;;  %v979_v0 = vadd.f32 %v978_v52, %v2710_v25 }
 0x143   : > { %v980_v55 = vadd.f32 %v2701_v7, %v979_v0  ;;  %v1115_v42 = vadd.f32 %v1114_v37, %v1052_v39  ;;  %v1057_v7 = vmul.f32 %v2713_v32, %v2713_v32 }
 0x145   : > { %v1116_v43 = vadd.f32 %v1115_v42, %v1053_v46  ;;  %v981_v1 = vadd.f32 %v2707_v19, %v980_v55  ;;  %v1058_v19 = vmul.f32 %v2719_v44, %v2719_v44 }
 0x147   : > { %v982_v13 = vadd.f32 %v981_v1, %v2716_v38  ;;  %v1117_v47 = vadd.f32 %v1116_v43, %v1054_v58 }
 0x149   : > { %v1118_v48 = vadd.f32 %v1117_v47, %v1055_v45  ;;  %v983_v25 = vadd.f32 %v982_v13, %v2722_v51 }
 0x14b   : > { %v984_v50 = vadd.f32 %v2713_v32, %v983_v25  ;;  %v1119_v53 = vadd.f32 %v1118_v48, %v1056_v49  ;;  %v1061_v32 = vmul.f32 %v2725_v59, %v2725_v59 }
 0x14d   : > { %v1120_v54 = vadd.f32 %v1119_v53, %v1057_v7  ;;  %v985_v56 = vadd.f32 %v2719_v44, %v984_v50  ;;  %v1062_v44 = vmul.f32 %v2731_v10, %v2731_v10 }
 0x14f   : > { %v986_v38 = vadd.f32 %v985_v56, %v2728_v3  ;;  %v1121_v60 = vadd.f32 %v1120_v54, %v1058_v19 }
 0x151   : > { %v1122_v61 = vadd.f32 %v1121_v60, %v1059_v57  ;;  %v987_v51 = vadd.f32 %v986_v38, %v2734_v17 }
 0x153   : > { %v988_v11 = vadd.f32 %v2725_v59, %v987_v51  ;;  %v1123_v63 = vadd.f32 %v1122_v61, %v1060_v62  ;;  %v1065_v59 = vmul.f32 %v2737_v23, %v2737_v23 }
 0x155   : > { %v1124_v2 = vadd.f32 %v1123_v63, %v1061_v32  ;;  %v989_v4 = vadd.f32 %v2731_v10, %v988_v11  ;;  %v1066_v10 = vmul.f32 %v2749_v35, %v2749_v35 }
 0x157   : > { %v990_v3 = vadd.f32 %v989_v4, %v2743_v29  ;;  %v1125_v5 = vadd.f32 %v1124_v2, %v1062_v44 }
 0x159   : > { %v1126_v6 = vadd.f32 %v1125_v5, %v1063_v21  ;;  %v991_v17 = vadd.f32 %v990_v3, %v2755_v40 }
 0x15b   : > { %v992_v9 = vadd.f32 %v2737_v23, %v991_v17  ;;  %v1127_v16 = vadd.f32 %v1126_v6, %v1064_v8 }
 0x15d   : > { %v993_v12 = vadd.f32 %v2749_v35, %v992_v9  ;;  %v1128_v14 = vadd.f32 %v1127_v16, %v1065_v59 }
 0x15f   : > { %v994_v29 = vrot.slane %v993_v12, 4  ;;  %v1129_v31 = vadd.f32 %v1128_v14, %v1066_v10 }
 0x161   : > { %v995_v15 = vadd.f32 %v994_v29, %v993_v12  ;;  %v1130_v18 = vrot.slane %v1129_v31, 4 }
 0x163   : > { %v996_v20 = vrot.slane %v995_v15, 2  ;;  %v1131_v41 = vadd.f32 %v1130_v18, %v1129_v31 }
 0x165   : > { %v997_v22 = vadd.f32 %v996_v20, %v995_v15  ;;  %v1132_v40 = vrot.slane %v1131_v41, 2 }
 0x167   : > { %v998_v26 = vrot.slane %v997_v22, 1  ;;  %v1133_v24 = vadd.f32 %v1132_v40, %v1131_v41 }
 0x169   : > { %v999_v36 = vadd.f32 %v998_v26, %v997_v22  ;;  %v1134_v23 = vrot.slane %v1133_v24, 1 }
 0x16b   : > { %v1000_v30 = vadd.f32 %v999_v36, %v930_v27  ;;  %v1135_v52 = vadd.f32 %v1134_v23, %v1133_v24 }
 0x16d   : > { %1001 = vst [vmem:[#allocation3] sm:$0x1] %v1000_v30  ;;  %v1136_v33 = vadd.f32 %v1135_v52, %v1002_v28 }
 0x16f   : > { %1137 = vst [vmem:[#allocation4] sm:$0x1] %v1136_v33 }
 0x170 PF: > { %p1955_p5 = scmp.ne.s32.totalorder %s2462_s15, 1 }
 0x172   : > { %1141 = sbr.rel (%p1955_p5) target bundleno = 488 (0x1e8), region = 48 }
 0x177   : > { %v1146_v35 = vld [vmem:[#allocation3] sm:$0x1]  ;;  %v1148_v34 = vld [vmem:[#allocation4] sm:$0x1]  ;;  %v1163_v48 = vld [vmem:[#allocation2 + $0xb0] sm:$0xff] }
 0x178   : > { %v1147_v37 = vmul.f32 0.001953125, %v1146_v35  ;;  %v1149_v0 = vmul.f32 0.001953125, %v1148_v34  ;;  %v1153_v58 = vld [vmem:[%s3091_s2] sm:$0x1]  ;;  %v1164_v25 = vld [vmem:[#allocation2 + $0x1b0] sm:$0xff]  ;;  %v1165_v49 = vld [vmem:[#allocation2 + $0xd8] sm:$0xff] }
 0x179   : > { %v1158_v13 = vld [vmem:[%s3092_s3] sm:$0x1]  ;;  %v1166_v7 = vld [vmem:[#allocation2 + $0x18] sm:$0xff]  ;;  %v1167_v50 = vld [vmem:[#allocation2 + $0x50] sm:$0xff] }
 0x17a   : > { %v1150_v39 = vmul.f32 %v1147_v37, %v1147_v37  ;;  %v1168_v53 = vld [vmem:[#allocation2 + $0x168] sm:$0xff]  ;;  %v1169_v19 = vld [vmem:[#allocation2 + $0x130] sm:$0xff]  ;;  %v1171_v56 = vld [vmem:[#allocation2 + $0x180] sm:$0xff] }
 0x17b   : > { %v1170_v54 = vld [vmem:[#allocation2 + $0x48] sm:$0xff]  ;;  %v1172_v38 = vld [vmem:[#allocation2 + $0x110] sm:$0xff]  ;;  %v1173_v57 = vld [vmem:[#allocation2 + $0x118] sm:$0xff] }
 0x17c   : > { %v1151_v46 = vsub.f32 %v1149_v0, %v1150_v39  ;;  %v1174_v61 = vld [vmem:[#allocation2 + $0x98] sm:$0xff]  ;;  %v1175_v51 = vld [vmem:[#allocation2 + $0x120] sm:$0xff]  ;;  %v1176_v44 = vld [vmem:[#allocation2 + $0x150] sm:$0xff] }
 0x17d   : > { %v1177_v2 = vld [vmem:[#allocation2 + $0x108] sm:$0xff]  ;;  %v1178_v4 = vld [vmem:[#allocation2 + $0x60] sm:$0xff] }
 0x17e   : > { %v1152_v55 = vmax.f32 %v1151_v46, 0.0 }
 0x180   : > { %v1154_v42 = vadd.f32 1e-05, %v1152_v55 }
 0x182   : > { %2446 = vrsqrt.f32 %v1154_v42 }
 0x18f   : > { %v2447_v43 = vpop.eup %2446 }
 0x190   : > { %v1156_v1 = vmul.f32 %v2447_v43, %v1153_v58 }
 0x192   : > { %1157 = vst [vmem:[#allocation5] sm:$0x1] %v1156_v1  ;;  %v1159_v45 = vmul.f32 %v1156_v1, %v1147_v37 }
 0x194   : > { %v1160_v47 = vsub.f32 %v1158_v13, %v1159_v45 }
 0x196   : > { %1161 = vst [vmem:[#allocation6] sm:$0x1] %v1160_v47 }
 0x199   : > { %v2852_v60 = vld [vmem:[#allocation5] ss:$0 sm:$0xff] }
 0x19a   : > { %v1234_v62 = vmul.f32 %v2852_v60, %v1163_v48  ;;  %v1235_v32 = vmul.f32 %v2852_v60, %v1164_v25  ;;  %v1236_v11 = vmul.f32 %v2852_v60, %v1165_v49  ;;  %v1237_v63 = vmul.f32 %v2852_v60, %v1166_v7 }
 0x19b   : > { %v1238_v3 = vmul.f32 %v2852_v60, %v1167_v50  ;;  %v1239_v21 = vmul.f32 %v2852_v60, %v1168_v53  ;;  %v1240_v5 = vmul.f32 %v2852_v60, %v1169_v19  ;;  %v1241_v6 = vmul.f32 %v2852_v60, %v1170_v54  ;;  %v1179_v19 = vld [vmem:[#allocation2 + $0xe0] sm:$0xff] }
 0x19c   : > { %v1242_v17 = vmul.f32 %v2852_v60, %v1171_v56  ;;  %v1243_v8 = vmul.f32 %v2852_v60, %v1172_v38  ;;  %v1244_v59 = vmul.f32 %v2852_v60, %v1173_v57  ;;  %v1245_v9 = vmul.f32 %v2852_v60, %v1174_v61  ;;  %v1180_v61 = vld [vmem:[#allocation2 + $0x188] sm:$0xff] }
 0x19d   : > { %v2866_v16 = vld [vmem:[#allocation6] ss:$0 sm:$0xff]  ;;  %v1246_v10 = vmul.f32 %v2852_v60, %v1175_v51  ;;  %v1247_v12 = vmul.f32 %v2852_v60, %v1176_v44  ;;  %v1248_v14 = vmul.f32 %v2852_v60, %v1177_v2  ;;  %v1249_v29 = vmul.f32 %v2852_v60, %v1178_v4 }
 0x19e   : > { %v1305_v31 = vadd.f32 %v2866_v16, %v1234_v62  ;;  %v1306_v15 = vadd.f32 %v2866_v16, %v1235_v32  ;;  %v1307_v18 = vadd.f32 %v2866_v16, %v1236_v11  ;;  %v1308_v20 = vadd.f32 %v2866_v16, %v1237_v63  ;;  %v1181_v63 = vld [vmem:[#allocation2 + $0x138] sm:$0xff] }
 0x19f   : > { %v1309_v41 = vadd.f32 %v2866_v16, %v1238_v3  ;;  %v1310_v22 = vadd.f32 %v2866_v16, %v1239_v21  ;;  %v1311_v40 = vadd.f32 %v2866_v16, %v1240_v5  ;;  %v1312_v26 = vadd.f32 %v2866_v16, %v1241_v6  ;;  %v1182_v21 = vld [vmem:[#allocation2 + $0x140] sm:$0xff] }
 0x1a0   : > { %v1369_v24 = vmul.f32 0.1, %v1305_v31  ;;  %v1370_v27 = vmul.f32 0.1, %v1306_v15  ;;  %v1371_v36 = vmul.f32 0.1, %v1307_v18  ;;  %v1313_v23 = vadd.f32 %v2866_v16, %v1242_v17 }
 0x1a1   : > { %v1372_v28 = vmul.f32 0.1, %v1308_v20  ;;  %v1373_v30 = vmul.f32 0.1, %v1309_v41  ;;  %v1374_v52 = vmul.f32 0.1, %v1310_v22  ;;  %v1314_v33 = vadd.f32 %v2866_v16, %v1243_v8 }
 0x1a2   : > { %v1433_v35 = vmax.f32 %v1305_v31, %v1369_v24  ;;  %v1434_v34 = vmax.f32 %v1306_v15, %v1370_v27  ;;  %v1435_v37 = vmax.f32 %v1307_v18, %v1371_v36  ;;  %v1375_v0 = vmul.f32 0.1, %v1311_v40  ;;  %v1186_v27 = vld [vmem:[#allocation2 + $0x28] sm:$0xff] }
 0x1a3   : > { %v1436_v39 = vmax.f32 %v1308_v20, %v1372_v28  ;;  %v1437_v46 = vmax.f32 %v1309_v41, %v1373_v30  ;;  %v1438_v55 = vmax.f32 %v1310_v22, %v1374_v52  ;;  %v1376_v42 = vmul.f32 0.1, %v1312_v26  ;;  %v1185_v41 = vld [vmem:[#allocation2 + $0x1b8] sm:$0xff]  ;;  %v1187_v52 = vld [vmem:[#allocation2 + $0x1e8] sm:$0xff] }
 0x1a4   : > { %v2093_v58 = vpack.c.bf16 %v1434_v34, %v1433_v35  ;;  %v1439_v43 = vmax.f32 %v1311_v40, %v1375_v0  ;;  %v1377_v1 = vmul.f32 0.1, %v1313_v23  ;;  %v1378_v13 = vmul.f32 0.1, %v1314_v33 }
 0x1a5   : > { %v2098_v45 = vpack.c.bf16 %v1436_v39, %v1435_v37  ;;  %v2103_v47 = vpack.c.bf16 %v1438_v55, %v1437_v46  ;;  %v1440_v48 = vmax.f32 %v1312_v26, %v1376_v42  ;;  %v1315_v25 = vadd.f32 %v2866_v16, %v1244_v59  ;;  %v1183_v59 = vld [vmem:[#allocation2 + $0x80] sm:$0xff]  ;;  %v1188_v42 = vld [vmem:[#allocation2 + $0xf8] sm:$0xff] }
 0x1a6   : > { %2094 = vst [vmem:[%s3093_s4] sm:$0xff] %v2093_v58   ;;  %v1441_v49 = vmax.f32 %v1313_v23, %v1377_v1  ;;  %v1442_v7 = vmax.f32 %v1314_v33, %v1378_v13  ;;  %v1316_v50 = vadd.f32 %v2866_v16, %v1245_v9  ;;  %v1317_v53 = vadd.f32 %v2866_v16, %v1246_v10 }
 0x1a7   : > { %2250 = vst [vmem:[%s3093_s4 + $0x8] sm:$0xff] %v2098_v45   ;;  %2251 = vst [vmem:[%s3093_s4 + $0x10] sm:$0xff] %v2103_v47   ;;  %v2108_v54 = vpack.c.bf16 %v1440_v48, %v1439_v43  ;;  %v1379_v56 = vmul.f32 0.1, %v1315_v25  ;;  %v1318_v38 = vadd.f32 %v2866_v16, %v1247_v12  ;;  %v1319_v57 = vadd.f32 %v2866_v16, %v1248_v14  ;;  %v1189_v45 = vld [vmem:[#allocation2 + $0x160] sm:$0xff] }
 0x1a8   : > { %v2113_v51 = vpack.c.bf16 %v1442_v7, %v1441_v49  ;;  %v1380_v62 = vmul.f32 0.1, %v1316_v50  ;;  %v1381_v32 = vmul.f32 0.1, %v1317_v53  ;;  %v1320_v11 = vadd.f32 %v2866_v16, %v1249_v29  ;;  %v1184_v29 = vld [vmem:[#allocation2 + $0x1a8] sm:$0xff]  ;;  %v1190_v7 = vld [vmem:[#allocation2 + $0x30] sm:$0xff] }
 0x1a9   : > { %2252 = vst [vmem:[%s3093_s4 + $0x18] sm:$0xff] %v2108_v54   ;;  %v1443_v44 = vmax.f32 %v1315_v25, %v1379_v56  ;;  %v1382_v2 = vmul.f32 0.1, %v1318_v38  ;;  %v1383_v4 = vmul.f32 0.1, %v1319_v57  ;;  %v1250_v3 = vmul.f32 %v2852_v60, %v1179_v19  ;;  %v1191_v56 = vld [vmem:[#allocation2 + $0x1e0] sm:$0xff] }
 0x1aa   : > { %2253 = vst [vmem:[%s3093_s4 + $0x20] sm:$0xff] %v2113_v51   ;;  %v1444_v5 = vmax.f32 %v1316_v50, %v1380_v62  ;;  %v1445_v6 = vmax.f32 %v1317_v53, %v1381_v32  ;;  %v1384_v17 = vmul.f32 0.1, %v1320_v11  ;;  %v1251_v8 = vmul.f32 %v2852_v60, %v1180_v61  ;;  %v1192_v62 = vld [vmem:[#allocation2] sm:$0xff] }
 0x1ab   : > { %v1446_v9 = vmax.f32 %v1318_v38, %v1382_v2  ;;  %v1447_v10 = vmax.f32 %v1319_v57, %v1383_v4  ;;  %v1321_v12 = vadd.f32 %v2866_v16, %v1250_v3  ;;  %v1252_v14 = vmul.f32 %v2852_v60, %v1181_v63  ;;  %v1193_v2 = vld [vmem:[#allocation2 + $0xf0] sm:$0xff] }
 0x1ac   : > { %v2118_v31 = vpack.c.bf16 %v1444_v5, %v1443_v44  ;;  %v1448_v15 = vmax.f32 %v1320_v11, %v1384_v17  ;;  %v1322_v18 = vadd.f32 %v2866_v16, %v1251_v8  ;;  %v1253_v20 = vmul.f32 %v2852_v60, %v1182_v21 }
 0x1ad   : > { %v2123_v22 = vpack.c.bf16 %v1446_v9, %v1445_v6  ;;  %v1385_v40 = vmul.f32 0.1, %v1321_v12  ;;  %v1323_v26 = vadd.f32 %v2866_v16, %v1252_v14  ;;  %v1254_v24 = vmul.f32 %v2852_v60, %v1183_v59  ;;  %v1194_v6 = vld [vmem:[#allocation2 + $0x8] sm:$0xff] }
 0x1ae   : > { %2254 = vst [vmem:[%s3093_s4 + $0x28] sm:$0xff] %v2118_v31   ;;  %v2128_v36 = vpack.c.bf16 %v1448_v15, %v1447_v10  ;;  %v1386_v23 = vmul.f32 0.1, %v1322_v18  ;;  %v1324_v28 = vadd.f32 %v2866_v16, %v1253_v20  ;;  %v1255_v30 = vmul.f32 %v2852_v60, %v1184_v29  ;;  %v1195_v10 = vld [vmem:[#allocation2 + $0x148] sm:$0xff] }
 0x1af   : > { %2255 = vst [vmem:[%s3093_s4 + $0x30] sm:$0xff] %v2123_v22   ;;  %v1449_v33 = vmax.f32 %v1321_v12, %v1385_v40  ;;  %v1387_v35 = vmul.f32 0.1, %v1323_v26  ;;  %v1325_v34 = vadd.f32 %v2866_v16, %v1254_v24  ;;  %v1256_v37 = vmul.f32 %v2852_v60, %v1185_v41  ;;  %v1196_v22 = vld [vmem:[#allocation2 + $0x1d0] sm:$0xff] }
 0x1b0   : > { %2256 = vst [vmem:[%s3093_s4 + $0x38] sm:$0xff] %v2128_v36   ;;  %v1450_v0 = vmax.f32 %v1322_v18, %v1386_v23  ;;  %v1388_v39 = vmul.f32 0.1, %v1324_v28  ;;  %v1326_v46 = vadd.f32 %v2866_v16, %v1255_v30  ;;  %v1257_v55 = vmul.f32 %v2852_v60, %v1186_v27  ;;  %v1197_v36 = vld [vmem:[#allocation2 + $0x100] sm:$0xff] }
 0x1b1   : > { %v1451_v58 = vmax.f32 %v1323_v26, %v1387_v35  ;;  %v1389_v43 = vmul.f32 0.1, %v1325_v34  ;;  %v1327_v1 = vadd.f32 %v2866_v16, %v1256_v37  ;;  %v1258_v13 = vmul.f32 %v2852_v60, %v1187_v52 }
 0x1b2   : > { %v2133_v47 = vpack.c.bf16 %v1450_v0, %v1449_v33  ;;  %v1452_v48 = vmax.f32 %v1324_v28, %v1388_v39  ;;  %v1390_v25 = vmul.f32 0.1, %v1326_v46  ;;  %v1328_v49 = vadd.f32 %v2866_v16, %v1257_v55  ;;  %v1198_v33 = vld [vmem:[#allocation2 + $0xc8] sm:$0xff]  ;;  %v1199_v39 = vld [vmem:[#allocation2 + $0x40] sm:$0xff] }
 0x1b3   : > { %v1453_v50 = vmax.f32 %v1325_v34, %v1389_v43  ;;  %v1391_v53 = vmul.f32 0.1, %v1327_v1  ;;  %v1259_v19 = vmul.f32 %v2852_v60, %v1188_v42  ;;  %v1329_v54 = vadd.f32 %v2866_v16, %v1258_v13  ;;  %v1200_v43 = vld [vmem:[#allocation2 + $0x1f8] sm:$0xff] }
 0x1b4   : > { %2257 = vst [vmem:[%s3093_s4 + $0x40] sm:$0xff] %v2133_v47   ;;  %v2138_v38 = vpack.c.bf16 %v1452_v48, %v1451_v58  ;;  %v1454_v57 = vmax.f32 %v1326_v46, %v1390_v25  ;;  %v1392_v61 = vmul.f32 0.1, %v1328_v49  ;;  %v1260_v51 = vmul.f32 %v2852_v60, %v1189_v45  ;;  %v1201_v48 = vld [vmem:[#allocation2 + $0x20] sm:$0xff] }
 0x1b5   : > { %v1455_v32 = vmax.f32 %v1327_v1, %v1391_v53  ;;  %v1330_v11 = vadd.f32 %v2866_v16, %v1259_v19  ;;  %v1393_v63 = vmul.f32 0.1, %v1329_v54  ;;  %v1261_v44 = vmul.f32 %v2852_v60, %v1190_v7  ;;  %v1202_v53 = vld [vmem:[#allocation2 + $0x128] sm:$0xff] }
 0x1b6   : > { %2258 = vst [vmem:[%s3093_s4 + $0x48] sm:$0xff] %v2138_v38   ;;  %v2143_v4 = vpack.c.bf16 %v1454_v57, %v1453_v50  ;;  %v1456_v3 = vmax.f32 %v1328_v49, %v1392_v61  ;;  %v1331_v21 = vadd.f32 %v2866_v16, %v1260_v51  ;;  %v1262_v5 = vmul.f32 %v2852_v60, %v1191_v56  ;;  %v1203_v57 = vld [vmem:[#allocation2 + $0x1a0] sm:$0xff] }
 0x1b7   : > { %v1394_v17 = vmul.f32 0.1, %v1330_v11  ;;  %v1457_v8 = vmax.f32 %v1329_v54, %v1393_v63  ;;  %v1332_v59 = vadd.f32 %v2866_v16, %v1261_v44  ;;  %v1263_v9 = vmul.f32 %v2852_v60, %v1192_v62 }
 0x1b8   : > { %2259 = vst [vmem:[%s3093_s4 + $0x50] sm:$0xff] %v2143_v4   ;;  %v2148_v12 = vpack.c.bf16 %v1456_v3, %v1455_v32  ;;  %v1395_v14 = vmul.f32 0.1, %v1331_v21  ;;  %v1333_v29 = vadd.f32 %v2866_v16, %v1262_v5  ;;  %v1264_v31 = vmul.f32 %v2852_v60, %v1193_v2  ;;  %v1204_v4 = vld [vmem:[#allocation2 + $0x1f0] sm:$0xff] }
 0x1b9   : > { %v1458_v15 = vmax.f32 %v1330_v11, %v1394_v17  ;;  %v1396_v18 = vmul.f32 0.1, %v1332_v59  ;;  %v1334_v20 = vadd.f32 %v2866_v16, %v1263_v9  ;;  %v1265_v41 = vmul.f32 %v2852_v60, %v1194_v6  ;;  %v1205_v17 = vld [vmem:[#allocation2 + $0xe8] sm:$0xff] }
 0x1ba   : > { %2260 = vst [vmem:[%s3093_s4 + $0x58] sm:$0xff] %v2148_v12   ;;  %v1459_v40 = vmax.f32 %v1331_v21, %v1395_v14  ;;  %v1397_v26 = vmul.f32 0.1, %v1333_v29  ;;  %v1335_v24 = vadd.f32 %v2866_v16, %v1264_v31  ;;  %v1266_v27 = vmul.f32 %v2852_v60, %v1195_v10  ;;  %v1206_v12 = vld [vmem:[#allocation2 + $0x78] sm:$0xff] }
 0x1bb   : > { %v2153_v23 = vpack.c.bf16 %v1458_v15, %v1457_v8  ;;  %v1460_v28 = vmax.f32 %v1332_v59, %v1396_v18  ;;  %v1398_v30 = vmul.f32 0.1, %v1334_v20  ;;  %v1336_v52 = vadd.f32 %v2866_v16, %v1265_v41  ;;  %v1207_v18 = vld [vmem:[#allocation2 + $0x70] sm:$0xff] }
 0x1bc   : > { %v1461_v35 = vmax.f32 %v1333_v29, %v1397_v26  ;;  %v1399_v34 = vmul.f32 0.1, %v1335_v24  ;;  %v1267_v37 = vmul.f32 %v2852_v60, %v1196_v22  ;;  %v1337_v0 = vadd.f32 %v2866_v16, %v1266_v27  ;;  %v1208_v26 = vld [vmem:[#allocation2 + $0x90] sm:$0xff] }
 0x1bd   : > { %2261 = vst [vmem:[%s3093_s4 + $0x60] sm:$0xff] %v2153_v23   ;;  %v2158_v46 = vpack.c.bf16 %v1460_v28, %v1459_v40  ;;  %v1462_v55 = vmax.f32 %v1334_v20, %v1398_v30  ;;  %v1400_v42 = vmul.f32 0.1, %v1336_v52  ;;  %v1268_v58 = vmul.f32 %v2852_v60, %v1197_v36  ;;  %v1209_v28 = vld [vmem:[#allocation2 + $0x1d8] sm:$0xff] }
 0x1be   : > { %v1463_v1 = vmax.f32 %v1335_v24, %v1399_v34  ;;  %v1338_v13 = vadd.f32 %v2866_v16, %v1267_v37  ;;  %v1401_v45 = vmul.f32 0.1, %v1337_v0  ;;  %v1269_v47 = vmul.f32 %v2852_v60, %v1198_v33  ;;  %v1210_v34 = vld [vmem:[#allocation2 + $0xd0] sm:$0xff] }
 0x1bf   : > { %2262 = vst [vmem:[%s3093_s4 + $0x68] sm:$0xff] %v2158_v46   ;;  %v2163_v25 = vpack.c.bf16 %v1462_v55, %v1461_v35  ;;  %v1464_v49 = vmax.f32 %v1336_v52, %v1400_v42  ;;  %v1339_v7 = vadd.f32 %v2866_v16, %v1268_v58  ;;  %v1270_v50 = vmul.f32 %v2852_v60, %v1199_v39  ;;  %v1211_v55 = vld [vmem:[#allocation2 + $0xb8] sm:$0xff] }
 0x1c0   : > { %v1402_v19 = vmul.f32 0.1, %v1338_v13  ;;  %v1465_v54 = vmax.f32 %v1337_v0, %v1401_v45  ;;  %v1340_v56 = vadd.f32 %v2866_v16, %v1269_v47  ;;  %v1271_v38 = vmul.f32 %v2852_v60, %v1200_v43 }
 0x1c1   : > { %2263 = vst [vmem:[%s3093_s4 + $0x70] sm:$0xff] %v2163_v25   ;;  %v2168_v61 = vpack.c.bf16 %v1464_v49, %v1463_v1  ;;  %v1403_v51 = vmul.f32 0.1, %v1339_v7  ;;  %v1341_v62 = vadd.f32 %v2866_v16, %v1270_v50  ;;  %v1272_v32 = vmul.f32 %v2852_v60, %v1201_v48  ;;  %v1212_v25 = vld [vmem:[#allocation2 + $0x88] sm:$0xff] }
 0x1c2   : > { %v1466_v11 = vmax.f32 %v1338_v13, %v1402_v19  ;;  %v1404_v63 = vmul.f32 0.1, %v1340_v56  ;;  %v1342_v44 = vadd.f32 %v2866_v16, %v1271_v38  ;;  %v1273_v2 = vmul.f32 %v2852_v60, %v1202_v53  ;;  %v1213_v19 = vld [vmem:[#allocation2 + $0xa8] sm:$0xff] }
 0x1c3   : > { %2264 = vst [vmem:[%s3093_s4 + $0x78] sm:$0xff] %v2168_v61   ;;  %v1467_v3 = vmax.f32 %v1339_v7, %v1403_v51  ;;  %v1405_v21 = vmul.f32 0.1, %v1341_v62  ;;  %v1343_v5 = vadd.f32 %v2866_v16, %v1272_v32  ;;  %v1274_v6 = vmul.f32 %v2852_v60, %v1203_v57  ;;  %v1214_v61 = vld [vmem:[#allocation2 + $0x1c8] sm:$0xff] }
 0x1c4   : > { %v2173_v8 = vpack.c.bf16 %v1466_v11, %v1465_v54  ;;  %v1468_v59 = vmax.f32 %v1340_v56, %v1404_v63  ;;  %v1406_v9 = vmul.f32 0.1, %v1342_v44  ;;  %v1344_v10 = vadd.f32 %v2866_v16, %v1273_v2  ;;  %v1215_v63 = vld [vmem:[#allocation2 + $0x170] sm:$0xff] }
 0x1c5   : > { %v1469_v14 = vmax.f32 %v1341_v62, %v1405_v21  ;;  %v1407_v29 = vmul.f32 0.1, %v1343_v5  ;;  %v1275_v31 = vmul.f32 %v2852_v60, %v1204_v4  ;;  %v1345_v15 = vadd.f32 %v2866_v16, %v1274_v6  ;;  %v1216_v21 = vld [vmem:[#allocation2 + $0x178] sm:$0xff] }
 0x1c6   : > { %2265 = vst [vmem:[%s3093_s4 + $0x80] sm:$0xff] %v2173_v8   ;;  %v2178_v20 = vpack.c.bf16 %v1468_v59, %v1467_v3  ;;  %v1470_v41 = vmax.f32 %v1342_v44, %v1406_v9  ;;  %v1408_v22 = vmul.f32 0.1, %v1344_v10  ;;  %v1276_v40 = vmul.f32 %v2852_v60, %v1205_v17  ;;  %v1217_v59 = vld [vmem:[#allocation2 + $0x68] sm:$0xff] }
 0x1c7   : > { %v1471_v24 = vmax.f32 %v1343_v5, %v1407_v29  ;;  %v1346_v27 = vadd.f32 %v2866_v16, %v1275_v31  ;;  %v1409_v36 = vmul.f32 0.1, %v1345_v15  ;;  %v1277_v23 = vmul.f32 %v2852_v60, %v1206_v12  ;;  %v1218_v29 = vld [vmem:[#allocation2 + $0x190] sm:$0xff] }
 0x1c8   : > { %2266 = vst [vmem:[%s3093_s4 + $0x88] sm:$0xff] %v2178_v20   ;;  %v2183_v30 = vpack.c.bf16 %v1470_v41, %v1469_v14  ;;  %v1472_v52 = vmax.f32 %v1344_v10, %v1408_v22  ;;  %v1347_v33 = vadd.f32 %v2866_v16, %v1276_v40  ;;  %v1278_v35 = vmul.f32 %v2852_v60, %v1207_v18  ;;  %v1219_v41 = vld [vmem:[#allocation2 + $0x198] sm:$0xff] }
 0x1c9   : > { %v1410_v37 = vmul.f32 0.1, %v1346_v27  ;;  %v1473_v0 = vmax.f32 %v1345_v15, %v1409_v36  ;;  %v1348_v39 = vadd.f32 %v2866_v16, %v1277_v23  ;;  %v1279_v46 = vmul.f32 %v2852_v60, %v1208_v26 }
 0x1ca   : > { %2267 = vst [vmem:[%s3093_s4 + $0x90] sm:$0xff] %v2183_v30   ;;  %v2188_v42 = vpack.c.bf16 %v1472_v52, %v1471_v24  ;;  %v1411_v58 = vmul.f32 0.1, %v1347_v33  ;;  %v1349_v43 = vadd.f32 %v2866_v16, %v1278_v35  ;;  %v1280_v1 = vmul.f32 %v2852_v60, %v1209_v28  ;;  %v1220_v30 = vld [vmem:[#allocation2 + $0x38] sm:$0xff] }
 0x1cb   : > { %v1474_v13 = vmax.f32 %v1346_v27, %v1410_v37  ;;  %v1412_v45 = vmul.f32 0.1, %v1348_v39  ;;  %v1350_v47 = vadd.f32 %v2866_v16, %v1279_v46  ;;  %v1281_v48 = vmul.f32 %v2852_v60, %v1210_v34  ;;  %v1221_v37 = vld [vmem:[#allocation2 + $0xc0] sm:$0xff] }
 0x1cc   : > { %2268 = vst [vmem:[%s3093_s4 + $0x98] sm:$0xff] %v2188_v42   ;;  %v1475_v49 = vmax.f32 %v1347_v33, %v1411_v58  ;;  %v1413_v7 = vmul.f32 0.1, %v1349_v43  ;;  %v1351_v50 = vadd.f32 %v2866_v16, %v1280_v1  ;;  %v1282_v53 = vmul.f32 %v2852_v60, %v1211_v55  ;;  %v1222_v42 = vld [vmem:[#allocation2 + $0x1c0] sm:$0xff] }
 0x1cd   : > { %v2193_v54 = vpack.c.bf16 %v1474_v13, %v1473_v0  ;;  %v1476_v56 = vmax.f32 %v1348_v39, %v1412_v45  ;;  %v1414_v38 = vmul.f32 0.1, %v1350_v47  ;;  %v1352_v57 = vadd.f32 %v2866_v16, %v1281_v48  ;;  %v1223_v45 = vld [vmem:[#allocation2 + $0x158] sm:$0xff] }
 0x1ce   : > { %v1477_v51 = vmax.f32 %v1349_v43, %v1413_v7  ;;  %v1415_v62 = vmul.f32 0.1, %v1351_v50  ;;  %v1283_v32 = vmul.f32 %v2852_v60, %v1212_v25  ;;  %v1353_v11 = vadd.f32 %v2866_v16, %v1282_v53  ;;  %v1224_v7 = vld [vmem:[#allocation2 + $0x10] sm:$0xff] }
 0x1cf   : > { %2269 = vst [vmem:[%s3093_s4 + $0xa0] sm:$0xff] %v2193_v54   ;;  %v2198_v44 = vpack.c.bf16 %v1476_v56, %v1475_v49  ;;  %v1478_v2 = vmax.f32 %v1350_v47, %v1414_v38  ;;  %v1416_v4 = vmul.f32 0.1, %v1352_v57  ;;  %v1284_v3 = vmul.f32 %v2852_v60, %v1213_v19  ;;  %v1225_v56 = vld [vmem:[#allocation2 + $0x58] sm:$0xff] }
 0x1d0   : > { %v1479_v5 = vmax.f32 %v1351_v50, %v1415_v62  ;;  %v1354_v6 = vadd.f32 %v2866_v16, %v1283_v32  ;;  %v1417_v17 = vmul.f32 0.1, %v1353_v11  ;;  %v1285_v8 = vmul.f32 %v2852_v60, %v1214_v61  ;;  %v1226_v62 = vld [vmem:[#allocation2 + $0xa0] sm:$0xff] }
 0x1d1   : > { %2270 = vst [vmem:[%s3093_s4 + $0xa8] sm:$0xff] %v2198_v44   ;;  %v2203_v9 = vpack.c.bf16 %v1478_v2, %v1477_v51  ;;  %v1480_v10 = vmax.f32 %v1352_v57, %v1416_v4  ;;  %v1355_v12 = vadd.f32 %v2866_v16, %v1284_v3  ;;  %v1286_v14 = vmul.f32 %v2852_v60, %v1215_v63 }
 0x1d2   : > { %v1418_v31 = vmul.f32 0.1, %v1354_v6  ;;  %v1481_v15 = vmax.f32 %v1353_v11, %v1417_v17  ;;  %v1356_v18 = vadd.f32 %v2866_v16, %v1285_v8  ;;  %v1287_v20 = vmul.f32 %v2852_v60, %v1216_v21 }
 0x1d3   : > { %2271 = vst [vmem:[%s3093_s4 + $0xb0] sm:$0xff] %v2203_v9   ;;  %v2208_v22 = vpack.c.bf16 %v1480_v10, %v1479_v5  ;;  %v1419_v40 = vmul.f32 0.1, %v1355_v12  ;;  %v1357_v26 = vadd.f32 %v2866_v16, %v1286_v14  ;;  %v1288_v24 = vmul.f32 %v2852_v60, %v1217_v59 }
 0x1d4   : > { %v1482_v27 = vmax.f32 %v1354_v6, %v1418_v31  ;;  %v1420_v36 = vmul.f32 0.1, %v1356_v18  ;;  %v1358_v23 = vadd.f32 %v2866_v16, %v1287_v20  ;;  %v1289_v28 = vmul.f32 %v2852_v60, %v1218_v29 }
 0x1d5   : > { %2272 = vst [vmem:[%s3093_s4 + $0xb8] sm:$0xff] %v2208_v22   ;;  %v1483_v52 = vmax.f32 %v1355_v12, %v1419_v40  ;;  %v1421_v33 = vmul.f32 0.1, %v1357_v26  ;;  %v1359_v35 = vadd.f32 %v2866_v16, %v1288_v24  ;;  %v1290_v34 = vmul.f32 %v2852_v60, %v1219_v41 }
 0x1d6   : > { %v2213_v0 = vpack.c.bf16 %v1482_v27, %v1481_v15  ;;  %v1484_v39 = vmax.f32 %v1356_v18, %v1420_v36  ;;  %v1422_v46 = vmul.f32 0.1, %v1358_v23  ;;  %v1360_v55 = vadd.f32 %v2866_v16, %v1289_v28 }
 0x1d7   : > { %v1485_v58 = vmax.f32 %v1357_v26, %v1421_v33  ;;  %v1423_v43 = vmul.f32 0.1, %v1359_v35  ;;  %v1291_v1 = vmul.f32 %v2852_v60, %v1220_v30  ;;  %v1361_v13 = vadd.f32 %v2866_v16, %v1290_v34 }
 0x1d8   : > { %2273 = vst [vmem:[%s3093_s4 + $0xc0] sm:$0xff] %v2213_v0   ;;  %v2218_v47 = vpack.c.bf16 %v1484_v39, %v1483_v52  ;;  %v1486_v48 = vmax.f32 %v1358_v23, %v1422_v46  ;;  %v1424_v25 = vmul.f32 0.1, %v1360_v55  ;;  %v1292_v49 = vmul.f32 %v2852_v60, %v1221_v37 }
 0x1d9   : > { %v1487_v50 = vmax.f32 %v1359_v35, %v1423_v43  ;;  %v1362_v53 = vadd.f32 %v2866_v16, %v1291_v1  ;;  %v1425_v19 = vmul.f32 0.1, %v1361_v13  ;;  %v1293_v54 = vmul.f32 %v2852_v60, %v1222_v42 }
 0x1da   : > { %2274 = vst [vmem:[%s3093_s4 + $0xc8] sm:$0xff] %v2218_v47   ;;  %v2223_v38 = vpack.c.bf16 %v1486_v48, %v1485_v58  ;;  %v1488_v57 = vmax.f32 %v1360_v55, %v1424_v25  ;;  %v1363_v61 = vadd.f32 %v2866_v16, %v1292_v49  ;;  %v1294_v51 = vmul.f32 %v2852_v60, %v1223_v45 }
 0x1db   : > { %v1426_v32 = vmul.f32 0.1, %v1362_v53  ;;  %v1489_v11 = vmax.f32 %v1361_v13, %v1425_v19  ;;  %v1364_v63 = vadd.f32 %v2866_v16, %v1293_v54  ;;  %v1295_v44 = vmul.f32 %v2852_v60, %v1224_v7 }
 0x1dc   : > { %2275 = vst [vmem:[%s3093_s4 + $0xd0] sm:$0xff] %v2223_v38   ;;  %v2228_v2 = vpack.c.bf16 %v1488_v57, %v1487_v50  ;;  %v1427_v4 = vmul.f32 0.1, %v1363_v61  ;;  %v1365_v3 = vadd.f32 %v2866_v16, %v1294_v51  ;;  %v1296_v21 = vmul.f32 %v2852_v60, %v1225_v56 }
 0x1dd   : > { %v1490_v5 = vmax.f32 %v1362_v53, %v1426_v32  ;;  %v1428_v6 = vmul.f32 0.1, %v1364_v63  ;;  %v1366_v17 = vadd.f32 %v2866_v16, %v1295_v44  ;;  %v1297_v8 = vmul.f32 %v2852_v60, %v1226_v62 }
 0x1de   : > { %2276 = vst [vmem:[%s3093_s4 + $0xd8] sm:$0xff] %v2228_v2   ;;  %v1491_v59 = vmax.f32 %v1363_v61, %v1427_v4  ;;  %v1429_v9 = vmul.f32 0.1, %v1365_v3  ;;  %v1367_v10 = vadd.f32 %v2866_v16, %v1296_v21 }
 0x1df   : > { %v2233_v12 = vpack.c.bf16 %v1490_v5, %v1489_v11  ;;  %v1492_v14 = vmax.f32 %v1364_v63, %v1428_v6  ;;  %v1430_v29 = vmul.f32 0.1, %v1366_v17  ;;  %v1368_v31 = vadd.f32 %v2866_v16, %v1297_v8 }
 0x1e0   : > { %v1493_v15 = vmax.f32 %v1365_v3, %v1429_v9  ;;  %v1431_v18 = vmul.f32 0.1, %v1367_v10 }
 0x1e1   : > { %2277 = vst [vmem:[%s3093_s4 + $0xe0] sm:$0xff] %v2233_v12   ;;  %v2238_v60 = vpack.c.bf16 %v1492_v14, %v1491_v59  ;;  %v1494_v20 = vmax.f32 %v1366_v17, %v1430_v29  ;;  %v1432_v41 = vmul.f32 0.1, %v1368_v31 }
 0x1e2   : > { %v1495_v22 = vmax.f32 %v1367_v10, %v1431_v18 }
 0x1e3   : > { %2278 = vst [vmem:[%s3093_s4 + $0xe8] sm:$0xff] %v2238_v60   ;;  %v2243_v40 = vpack.c.bf16 %v1494_v20, %v1493_v15  ;;  %v1496_v26 = vmax.f32 %v1368_v31, %v1432_v41 }
 0x1e5   : > { %2279 = vst [vmem:[%s3093_s4 + $0xf0] sm:$0xff] %v2243_v40   ;;  %v2248_v16 = vpack.c.bf16 %v1496_v26, %v1495_v22 }
 0x1e7   : > { %2280 = vst [vmem:[%s3093_s4 + $0xf8] sm:$0xff] %v2248_v16  }
 0x1e8 PF: > { %s14_s17 = sadd.s32 1, %s2470_s17   ;;  %s3094_s15 = smov %s2466_s16 }
 0x1e9   : > { %p11_p6 = scmp.ge.s32.totalorder %s14_s17, 4   ;;  %s3095_s16 = smov %s3097_s18 }
 0x1eb   :  { %13 = sbr.rel (!%p11_p6) target bundleno = 2 (0x2), region = 84 }

// kernel: discriminator_cifar_forward.6
= control target key start
LH: loop header
LB: loop body
LE: loop exit
PB: predicated region body
PF: predicated region fallthrough
CT: control target
= control target key end

     0   :  { %s4221_s15 = smov 0   ;;  %s4223_s16 = smov 0   ;;  %s5329_s0 = inlined_call_operand.vmem [shape: bf16[128,2048], index: 0, kind: input, shape index: {}]   ;;  %s5330_s1 = inlined_call_operand.vmem [shape: bf16[2048,128], index: 1, kind: input, shape index: {}]   ;;  %s5331_s2 = inlined_call_operand.vmem [shape: f32[1,128], index: 2, kind: input, shape index: {}]   ;;  %s5332_s3 = inlined_call_operand.vmem [shape: f32[1,128], index: 3, kind: input, shape index: {}]   ;;  %s5333_s4 = inlined_call_operand.vmem [shape: bf16[128,128], index: 4, kind: output, shape index: {}]  }
   0x1   :  { %s4225_s17 = smov 0  }
   0x2 LB: > { %s26_s18 = sadd.s32 1, %s4189_s16  ;;  %p3160_p0 = scmp.ge.s32.totalorder %s4193_s17, 1  ;;  %s4193_s17 = sphi %s4225_s17, %s14_s17   ;;  %s4189_s16 = sphi %s4223_s16, %s5393_s16   ;;  %s4185_s15 = sphi %s4221_s15, %s5392_s15  }
   0x3   : > { %p28_p1 = scmp.ge.s32.totalorder %s26_s18, 2  ;;  %p184_p2 = scmp.lt.s32.totalorder %s4193_s17, 3 }
   0x5   : > { %s5395_s18 = smov (%p28_p1, %s26_s18), 0  ;;  %p185_p3 = pnand %p3160_p0, %p184_p2 }
   0x6   : > { %p3161_p4 = scmp.ne.s32.totalorder (!%p185_p3), %s4185_s15, 0 }
   0x7   : > { %188 = sbr.rel (%p185_p3) target bundleno = 588 (0x24c), region = 36 }
   0xc   : > { %235 = sbr.rel (%p3161_p4) target bundleno = 523 (0x20b), region = 40 }
  0x11   : > { %v4041_v0 = vld [vmem:[%s5330_s1 + $0x78] sm:$0xff]   ;;  %v4045_v4 = vld [vmem:[%s5330_s1 + $0x70] sm:$0xff]   ;;  %v4049_v8 = vld [vmem:[%s5330_s1 + $0x68] sm:$0xff]  }
  0x12   : > { %v4042_v1 = vld [vmem:[%s5330_s1 + $0xf8] sm:$0xff]   ;;  %3504 = vmatprep.subr.bf16.mxu0 %v4041_v0  ;;  %v4046_v5 = vld [vmem:[%s5330_s1 + $0xf0] sm:$0xff]   ;;  %v4050_v9 = vld [vmem:[%s5330_s1 + $0xe8] sm:$0xff]  }
  0x13   : > { %v4043_v2 = vld [vmem:[%s5330_s1 + $0x38] sm:$0xff]   ;;  %3568 = vmatprep.subr.bf16.mxu1 %v4042_v1  ;;  %v4047_v6 = vld [vmem:[%s5330_s1 + $0x30] sm:$0xff]   ;;  %v4051_v10 = vld [vmem:[%s5330_s1 + $0x28] sm:$0xff]  }
  0x14   : > { %v4044_v3 = vld [vmem:[%s5330_s1 + $0xb8] sm:$0xff]   ;;  %3505 = vmatpush3.bf16.msra.mxu0 %v4043_v2  ;;  %v4048_v7 = vld [vmem:[%s5330_s1 + $0xb0] sm:$0xff]   ;;  %v4052_v11 = vld [vmem:[%s5330_s1 + $0xa8] sm:$0xff]  }
  0x15   : > { %3569 = vmatpush3.bf16.msra.mxu1 %v4044_v3  ;;  %3506 = vmatprep.subr.bf16.mxu0 %v4045_v4  ;;  %v4053_v12 = vld [vmem:[%s5330_s1 + $0x60] sm:$0xff]   ;;  %v4057_v16 = vld [vmem:[%s5330_s1 + $0x58] sm:$0xff]   ;;  %v4061_v20 = vld [vmem:[%s5330_s1 + $0x50] sm:$0xff]  }
  0x16   : > { %3570 = vmatprep.subr.bf16.mxu1 %v4046_v5  ;;  %v4054_v13 = vld [vmem:[%s5330_s1 + $0xe0] sm:$0xff]   ;;  %v4058_v17 = vld [vmem:[%s5330_s1 + $0xd8] sm:$0xff]   ;;  %v4062_v21 = vld [vmem:[%s5330_s1 + $0xd0] sm:$0xff]  }
  0x17   : > { %v4055_v14 = vld [vmem:[%s5330_s1 + $0x20] sm:$0xff]   ;;  %v4059_v18 = vld [vmem:[%s5330_s1 + $0x18] sm:$0xff]   ;;  %v4063_v22 = vld [vmem:[%s5330_s1 + $0x10] sm:$0xff]  }
  0x18   : > { %3507 = vmatpush3.bf16.msra.mxu0 %v4047_v6  ;;  %v4056_v15 = vld [vmem:[%s5330_s1 + $0xa0] sm:$0xff]   ;;  %v4060_v19 = vld [vmem:[%s5330_s1 + $0x98] sm:$0xff]   ;;  %v4064_v23 = vld [vmem:[%s5330_s1 + $0x90] sm:$0xff]  }
  0x19   : > { %3571 = vmatpush3.bf16.msra.mxu1 %v4048_v7  ;;  %3508 = vmatprep.subr.bf16.mxu0 %v4049_v8  ;;  %v4065_v24 = vld [vmem:[%s5330_s1 + $0x48] sm:$0xff]   ;;  %v4069_v28 = vld [vmem:[%s5330_s1 + $0x40] sm:$0xff]   ;;  %v4073_v40 = vld [vmem:[%s5330_s1 + $0x178] sm:$0xff]  }
  0x1a   : > { %3572 = vmatprep.subr.bf16.mxu1 %v4050_v9  ;;  %v4066_v25 = vld [vmem:[%s5330_s1 + $0xc8] sm:$0xff]   ;;  %v4070_v29 = vld [vmem:[%s5330_s1 + $0xc0] sm:$0xff]   ;;  %v4074_v41 = vld [vmem:[%s5330_s1 + $0x138] sm:$0xff]  }
  0x1b   : > { %v4067_v26 = vld [vmem:[%s5330_s1 + $0x8] sm:$0xff]   ;;  %v4071_v30 = vld [vmem:[%s5330_s1] sm:$0xff]   ;;  %v4075_v42 = vld [vmem:[%s5330_s1 + $0x1f8] sm:$0xff]  }
  0x1c   : > { %3509 = vmatpush3.bf16.msra.mxu0 %v4051_v10  ;;  %v4068_v27 = vld [vmem:[%s5330_s1 + $0x88] sm:$0xff]   ;;  %v4072_v31 = vld [vmem:[%s5330_s1 + $0x80] sm:$0xff]   ;;  %v4076_v43 = vld [vmem:[%s5330_s1 + $0x1b8] sm:$0xff]  }
  0x1d   : > { %3573 = vmatpush3.bf16.msra.mxu1 %v4052_v11  ;;  %3510 = vmatprep.subr.bf16.mxu0 %v4053_v12  ;;  %v242_v32 = vld [vmem:[%s5329_s0] sm:$0xff]  ;;  %v243_v34 = vld [vmem:[%s5329_s0 + $0x8] sm:$0xff]  ;;  %v4077_v50 = vld [vmem:[%s5330_s1 + $0x170] sm:$0xff]  }
  0x1e   : > { %3574 = vmatprep.subr.bf16.mxu1 %v4054_v13  ;;  %v250_v33 = vld [vmem:[%s5329_s0 + $0x40] sm:$0xff]  ;;  %v251_v37 = vld [vmem:[%s5329_s0 + $0x48] sm:$0xff]  ;;  %v4078_v52 = vld [vmem:[%s5330_s1 + $0x130] sm:$0xff]  }
  0x1f   : > { %v3162_v35 = vcombine.low %v242_v32, %v250_v33  ;;  %v3163_v36 = vcombine.high %v242_v32, %v250_v33  ;;  %v3164_v38 = vcombine.low %v243_v34, %v251_v37  ;;  %v3165_v39 = vcombine.high %v243_v34, %v251_v37  ;;  %v258_v44 = vld [vmem:[%s5329_s0 + $0x80] sm:$0xff]  ;;  %v259_v47 = vld [vmem:[%s5329_s0 + $0x88] sm:$0xff]  ;;  %v4079_v54 = vld [vmem:[%s5330_s1 + $0x1f0] sm:$0xff]  }
  0x20   : > { %3511 = vmatpush3.bf16.msra.mxu0 %v4055_v14  ;;  %v266_v45 = vld [vmem:[%s5329_s0 + $0xc0] sm:$0xff]  ;;  %v267_v48 = vld [vmem:[%s5329_s0 + $0xc8] sm:$0xff]  ;;  %v4080_v55 = vld [vmem:[%s5330_s1 + $0x1b0] sm:$0xff]  }
  0x21   : > { %3575 = vmatpush3.bf16.msra.mxu1 %v4056_v15  ;;  %3512 = vmatprep.subr.bf16.mxu0 %v4057_v16  ;;  %v3179_v46 = vcombine.high %v258_v44, %v266_v45  ;;  %v3181_v49 = vcombine.high %v259_v47, %v267_v48  ;;  %v3178_v51 = vcombine.low %v258_v44, %v266_v45  ;;  %v274_v56 = vld [vmem:[%s5329_s0 + $0x100] sm:$0xff]  ;;  %v275_v58 = vld [vmem:[%s5329_s0 + $0x108] sm:$0xff]  ;;  %v4095_v32 = vld [vmem:[%s5330_s1 + $0x1d0] sm:$0xff]  }
  0x22   : > { %3576 = vmatprep.subr.bf16.mxu1 %v4058_v17  ;;  %2066 = vmatprep.mubr.bf16.mxu0 %v3163_v36  ;;  %v3180_v53 = vcombine.low %v259_v47, %v267_v48  ;;  %v282_v57 = vld [vmem:[%s5329_s0 + $0x140] sm:$0xff]  ;;  %v283_v59 = vld [vmem:[%s5329_s0 + $0x148] sm:$0xff]  ;;  %v4096_v33 = vld [vmem:[%s5330_s1 + $0x190] sm:$0xff]  }
  0x23   : > { %2163 = vmatprep.mubr.bf16.mxu1 %v3165_v39  ;;  %v3195_v60 = vcombine.high %v274_v56, %v282_v57  ;;  %v3197_v61 = vcombine.high %v275_v58, %v283_v59  ;;  %v4081_v62 = vld [vmem:[%s5330_s1 + $0x168] sm:$0xff]   ;;  %v3194_v2 = vcombine.low %v274_v56, %v282_v57  ;;  %v290_v3 = vld [vmem:[%s5329_s0 + $0x180] sm:$0xff]  ;;  %v3196_v6 = vcombine.low %v275_v58, %v283_v59  ;;  %v4105_v56 = vld [vmem:[%s5330_s1 + $0x278] sm:$0xff]  }
  0x24   : > { %3513 = vmatpush3.bf16.msra.mxu0 %v4059_v18  ;;  %v4082_v63 = vld [vmem:[%s5330_s1 + $0x128] sm:$0xff]   ;;  %v298_v4 = vld [vmem:[%s5329_s0 + $0x1c0] sm:$0xff]  ;;  %v4089_v18 = vld [vmem:[%s5330_s1 + $0x158] sm:$0xff]  }
  0x25   : > { %3577 = vmatpush3.bf16.msra.mxu1 %v4060_v19  ;;  %3514 = vmatprep.subr.bf16.mxu0 %v4061_v20  ;;  %v4083_v0 = vld [vmem:[%s5330_s1 + $0x1e8] sm:$0xff]   ;;  %v3211_v7 = vcombine.high %v290_v3, %v298_v4  ;;  %v4085_v10 = vld [vmem:[%s5330_s1 + $0x160] sm:$0xff]   ;;  %v3210_v19 = vcombine.low %v290_v3, %v298_v4  ;;  %v4090_v20 = vld [vmem:[%s5330_s1 + $0x118] sm:$0xff]  }
  0x26   : > { %3578 = vmatprep.subr.bf16.mxu1 %v4062_v21  ;;  %v4084_v1 = vld [vmem:[%s5330_s1 + $0x1a8] sm:$0xff]   ;;  %v4086_v11 = vld [vmem:[%s5330_s1 + $0x120] sm:$0xff]   ;;  %v4107_v58 = vld [vmem:[%s5330_s1 + $0x2f8] sm:$0xff]  }
  0x27   : > { %v291_v5 = vld [vmem:[%s5329_s0 + $0x188] sm:$0xff]  ;;  %v4087_v12 = vld [vmem:[%s5330_s1 + $0x1e0] sm:$0xff]   ;;  %v253_v3 = vld [vmem:[%s5329_s0 + $0x58] sm:$0xff] }
  0x28   : > { %3515 = vmatpush3.bf16.msra.mxu0 %v4063_v22  ;;  %v299_v8 = vld [vmem:[%s5329_s0 + $0x1c8] sm:$0xff]  ;;  %v4088_v13 = vld [vmem:[%s5330_s1 + $0x1a0] sm:$0xff]  }
  0x29   : > { %3579 = vmatpush3.bf16.msra.mxu1 %v4064_v23  ;;  %3516 = vmatprep.subr.bf16.mxu0 %v4065_v24  ;;  %v3213_v9 = vcombine.high %v291_v5, %v299_v8  ;;  %v306_v14 = vld [vmem:[%s5329_s0 + $0x200] sm:$0xff]  ;;  %v307_v16 = vld [vmem:[%s5329_s0 + $0x208] sm:$0xff]  ;;  %v3212_v21 = vcombine.low %v291_v5, %v299_v8  ;;  %v4091_v23 = vld [vmem:[%s5330_s1 + $0x1d8] sm:$0xff]  }
  0x2a   : > { %3580 = vmatprep.subr.bf16.mxu1 %v4066_v25  ;;  %v314_v15 = vld [vmem:[%s5329_s0 + $0x240] sm:$0xff]  ;;  %v315_v17 = vld [vmem:[%s5329_s0 + $0x248] sm:$0xff]  ;;  %v4092_v25 = vld [vmem:[%s5330_s1 + $0x198] sm:$0xff]  }
  0x2b   : > { %v3227_v22 = vcombine.high %v306_v14, %v314_v15  ;;  %v3229_v24 = vcombine.high %v307_v16, %v315_v17  ;;  %v3226_v34 = vcombine.low %v306_v14, %v314_v15  ;;  %v4098_v39 = vld [vmem:[%s5330_s1 + $0x108] sm:$0xff]   ;;  %v4102_v48 = vld [vmem:[%s5330_s1 + $0x100] sm:$0xff]   ;;  %v260_v8 = vld [vmem:[%s5329_s0 + $0x90] sm:$0xff] }
  0x2c   : > { %3517 = vmatpush3.bf16.msra.mxu0 %v4067_v26  ;;  %v322_v26 = vld [vmem:[%s5329_s0 + $0x280] sm:$0xff]  ;;  %v339_v44 = vld [vmem:[%s5329_s0 + $0x308] sm:$0xff]  ;;  %v4108_v15 = vld [vmem:[%s5330_s1 + $0x2b8] sm:$0xff]  }
  0x2d   : > { %3581 = vmatpush3.bf16.msra.mxu1 %v4068_v27  ;;  %3518 = vmatprep.subr.bf16.mxu0 %v4069_v28  ;;  %v330_v27 = vld [vmem:[%s5329_s0 + $0x2c0] sm:$0xff]  ;;  %v4093_v28 = vld [vmem:[%s5330_s1 + $0x150] sm:$0xff]   ;;  %v347_v45 = vld [vmem:[%s5329_s0 + $0x348] sm:$0xff] }
  0x2e   : > { %3582 = vmatprep.subr.bf16.mxu1 %v4070_v29  ;;  %v323_v29 = vld [vmem:[%s5329_s0 + $0x288] sm:$0xff]  ;;  %v3243_v36 = vcombine.high %v322_v26, %v330_v27  ;;  %v3242_v47 = vcombine.low %v322_v26, %v330_v27 }
  0x2f   : > { %v355_v57 = vld [vmem:[%s5329_s0 + $0x388] sm:$0xff] }
  0x30   : > { %3519 = vmatpush3.bf16.msra.mxu0 %v4071_v30  ;;  %v331_v30 = vld [vmem:[%s5329_s0 + $0x2c8] sm:$0xff] }
  0x31   : > { %3583 = vmatpush3.bf16.msra.mxu1 %v4072_v31  ;;  %3632 = vmatprep.subr.bf16.mxu0 %v4073_v40  ;;  %v4094_v31 = vld [vmem:[%s5330_s1 + $0x110] sm:$0xff]   ;;  %v3245_v37 = vcombine.high %v323_v29, %v331_v30  ;;  %v4099_v40 = vld [vmem:[%s5330_s1 + $0x1c8] sm:$0xff]  }
  0x32   : > { %3696 = vmatprep.subr.bf16.mxu1 %v4075_v42  ;;  %v346_v42 = vld [vmem:[%s5329_s0 + $0x340] sm:$0xff]  ;;  %v363_v59 = vld [vmem:[%s5329_s0 + $0x3c8] sm:$0xff] }
  0x33   : > { %2067 = vmatmul.mubr.bf16.vlgmr.msra.gmra.mxu0 %v3162_v35  ;;  %v3228_v35 = vcombine.low %v307_v16, %v315_v17  ;;  %v3276_v5 = vcombine.low %v355_v57, %v363_v59  ;;  %v4109_v17 = vld [vmem:[%s5330_s1 + $0x270] sm:$0xff]   ;;  %v4113_v26 = vld [vmem:[%s5330_s1 + $0x268] sm:$0xff]  }
  0x34   : > { %2164 = vmatmul.mubr.bf16.vlgmr.msra.gmra.mxu1 %v3164_v38  ;;  %3633 = vmatpush3.bf16.msra.mxu0 %v4074_v41  ;;  %v4097_v38 = vld [vmem:[%s5330_s1 + $0x148] sm:$0xff]   ;;  %v338_v41 = vld [vmem:[%s5329_s0 + $0x300] sm:$0xff] }
  0x35   : > { %3697 = vmatpush3.bf16.msra.mxu1 %v4076_v43  ;;  %2074 = vmatprep.mubr.bf16.mxu0 %v3179_v46  ;;  %v4100_v43 = vld [vmem:[%s5330_s1 + $0x188] sm:$0xff]   ;;  %v4101_v46 = vld [vmem:[%s5330_s1 + $0x140] sm:$0xff]  }
  0x36   : > { %2171 = vmatprep.mubr.bf16.mxu1 %v3181_v49  ;;  %3634 = vmatprep.subr.bf16.mxu0 %v4077_v50  ;;  %v3244_v49 = vcombine.low %v323_v29, %v331_v30  ;;  %v3259_v50 = vcombine.high %v338_v41, %v346_v42  ;;  %v4115_v27 = vld [vmem:[%s5330_s1 + $0x2e8] sm:$0xff]  }
  0x37   : > { %3698 = vmatprep.subr.bf16.mxu1 %v4079_v54  ;;  %v354_v54 = vld [vmem:[%s5329_s0 + $0x380] sm:$0xff] }
  0x38   : > { %3635 = vmatpush3.bf16.msra.mxu0 %v4078_v52  ;;  %v3261_v52 = vcombine.high %v339_v44, %v347_v45 }
  0x39   : > { %3699 = vmatpush3.bf16.msra.mxu1 %v4080_v55  ;;  %3636 = vmatprep.subr.bf16.mxu0 %v4081_v62  ;;  %v362_v55 = vld [vmem:[%s5329_s0 + $0x3c0] sm:$0xff] }
  0x3a   : > { %3700 = vmatprep.subr.bf16.mxu1 %v4083_v0  ;;  %v3275_v62 = vcombine.high %v354_v54, %v362_v55  ;;  %v244_v0 = vld [vmem:[%s5329_s0 + $0x10] sm:$0xff]  ;;  %v3274_v4 = vcombine.low %v354_v54, %v362_v55  ;;  %v309_v54 = vld [vmem:[%s5329_s0 + $0x218] sm:$0xff] }
  0x3b   : > { %2075 = vmatmul.mubr.bf16.gmra.mxu0 %v3178_v51  ;;  %v4103_v51 = vld [vmem:[%s5330_s1 + $0x1c0] sm:$0xff]   ;;  %v317_v55 = vld [vmem:[%s5329_s0 + $0x258] sm:$0xff] }
  0x3c   : > { %2172 = vmatmul.mubr.bf16.gmra.mxu1 %v3180_v53  ;;  %2082 = vmatprep.mubr.bf16.mxu0 %v3195_v60  ;;  %v4104_v53 = vld [vmem:[%s5330_s1 + $0x180] sm:$0xff]   ;;  %v3258_v60 = vcombine.low %v338_v41, %v346_v42  ;;  %v4121_v42 = vld [vmem:[%s5330_s1 + $0x258] sm:$0xff]  }
  0x3d   : > { %2179 = vmatprep.mubr.bf16.mxu1 %v3197_v61  ;;  %3637 = vmatpush3.bf16.msra.mxu0 %v4082_v63  ;;  %v3260_v61 = vcombine.low %v339_v44, %v347_v45  ;;  %v3277_v63 = vcombine.high %v355_v57, %v363_v59  ;;  %v4120_v41 = vld [vmem:[%s5330_s1 + $0x2a0] sm:$0xff]   ;;  %v4123_v44 = vld [vmem:[%s5330_s1 + $0x2d8] sm:$0xff]   ;;  %v4128_v57 = vld [vmem:[%s5330_s1 + $0x290] sm:$0xff]  }
  0x3e   : > { %3701 = vmatpush3.bf16.msra.mxu1 %v4084_v1  ;;  %3638 = vmatprep.subr.bf16.mxu0 %v4085_v10  ;;  %v252_v1 = vld [vmem:[%s5329_s0 + $0x50] sm:$0xff] }
  0x3f   : > { %3702 = vmatprep.subr.bf16.mxu1 %v4087_v12  ;;  %v3166_v10 = vcombine.low %v244_v0, %v252_v1  ;;  %v261_v12 = vld [vmem:[%s5329_s0 + $0x98] sm:$0xff] }
  0x41   : > { %3639 = vmatpush3.bf16.msra.mxu0 %v4086_v11  ;;  %v4106_v11 = vld [vmem:[%s5330_s1 + $0x238] sm:$0xff]  }
  0x42   : > { %3703 = vmatpush3.bf16.msra.mxu1 %v4088_v13  ;;  %3640 = vmatprep.subr.bf16.mxu0 %v4089_v18  ;;  %v269_v13 = vld [vmem:[%s5329_s0 + $0xd8] sm:$0xff] }
  0x43   : > { %2083 = vmatmul.mubr.bf16.gmra.mxu0 %v3194_v2  ;;  %3704 = vmatprep.subr.bf16.mxu1 %v4091_v23  ;;  %v245_v2 = vld [vmem:[%s5329_s0 + $0x18] sm:$0xff]  ;;  %v3185_v18 = vcombine.high %v261_v12, %v269_v13  ;;  %v284_v23 = vld [vmem:[%s5329_s0 + $0x150] sm:$0xff]  ;;  %v3184_v29 = vcombine.low %v261_v12, %v269_v13  ;;  %v3232_v13 = vcombine.low %v309_v54, %v317_v55 }
  0x44   : > { %2180 = vmatmul.mubr.bf16.gmra.mxu1 %v3196_v6  ;;  %2090 = vmatprep.mubr.bf16.mxu0 %v3211_v7  ;;  %v3167_v6 = vcombine.high %v244_v0, %v252_v1  ;;  %v3169_v7 = vcombine.high %v245_v2, %v253_v3  ;;  %v3168_v14 = vcombine.low %v245_v2, %v253_v3  ;;  %v4130_v0 = vld [vmem:[%s5330_s1 + $0x208] sm:$0xff]   ;;  %v4133_v2 = vld [vmem:[%s5330_s1 + $0x240] sm:$0xff]   ;;  %v324_v3 = vld [vmem:[%s5329_s0 + $0x290] sm:$0xff] }
  0x45   : > { %2187 = vmatprep.mubr.bf16.mxu1 %v3213_v9  ;;  %3641 = vmatpush3.bf16.msra.mxu0 %v4090_v20  ;;  %v268_v9 = vld [vmem:[%s5329_s0 + $0xd0] sm:$0xff]  ;;  %v4132_v1 = vld [vmem:[%s5330_s1 + $0x288] sm:$0xff]   ;;  %v4139_v12 = vld [vmem:[%s5330_s1 + $0x3f8] sm:$0xff]  }
  0x46   : > { %3705 = vmatpush3.bf16.msra.mxu1 %v4092_v25  ;;  %3642 = vmatprep.subr.bf16.mxu0 %v4093_v28  ;;  %v3183_v16 = vcombine.high %v260_v8, %v268_v9  ;;  %v4111_v20 = vld [vmem:[%s5330_s1 + $0x2f0] sm:$0xff]   ;;  %v285_v25 = vld [vmem:[%s5329_s0 + $0x158] sm:$0xff]  ;;  %v3182_v28 = vcombine.low %v260_v8, %v268_v9  ;;  %v4134_v8 = vld [vmem:[%s5330_s1 + $0x200] sm:$0xff]  }
  0x47   : > { %3706 = vmatprep.subr.bf16.mxu1 %v4095_v32  ;;  %v4114_v32 = vld [vmem:[%s5330_s1 + $0x228] sm:$0xff]   ;;  %v4136_v9 = vld [vmem:[%s5330_s1 + $0x280] sm:$0xff]  }
  0x49   : > { %3643 = vmatpush3.bf16.msra.mxu0 %v4094_v31 }
  0x4a   : > { %3707 = vmatpush3.bf16.msra.mxu1 %v4096_v33  ;;  %3644 = vmatprep.subr.bf16.mxu0 %v4097_v38  ;;  %v4116_v33 = vld [vmem:[%s5330_s1 + $0x2a8] sm:$0xff]   ;;  %v293_v38 = vld [vmem:[%s5329_s0 + $0x198] sm:$0xff] }
  0x4b   : > { %2091 = vmatmul.mubr.bf16.gmra.mxu0 %v3210_v19  ;;  %3708 = vmatprep.subr.bf16.mxu1 %v4099_v40  ;;  %v4110_v19 = vld [vmem:[%s5330_s1 + $0x230] sm:$0xff]   ;;  %v4118_v40 = vld [vmem:[%s5330_s1 + $0x220] sm:$0xff]  }
  0x4c   : > { %2188 = vmatmul.mubr.bf16.gmra.mxu1 %v3212_v21  ;;  %2098 = vmatprep.mubr.bf16.mxu0 %v3227_v22  ;;  %v4112_v21 = vld [vmem:[%s5330_s1 + $0x2b0] sm:$0xff]  }
  0x4d   : > { %2195 = vmatprep.mubr.bf16.mxu1 %v3229_v24  ;;  %3645 = vmatpush3.bf16.msra.mxu0 %v4098_v39  ;;  %v276_v22 = vld [vmem:[%s5329_s0 + $0x110] sm:$0xff]  ;;  %v277_v24 = vld [vmem:[%s5329_s0 + $0x118] sm:$0xff] }
  0x4e   : > { %3709 = vmatpush3.bf16.msra.mxu1 %v4100_v43  ;;  %3646 = vmatprep.subr.bf16.mxu0 %v4101_v46  ;;  %v3199_v30 = vcombine.high %v276_v22, %v284_v23  ;;  %v3201_v31 = vcombine.high %v277_v24, %v285_v25  ;;  %v301_v39 = vld [vmem:[%s5329_s0 + $0x1d8] sm:$0xff]  ;;  %v3198_v43 = vcombine.low %v276_v22, %v284_v23 }
  0x4f   : > { %3710 = vmatprep.subr.bf16.mxu1 %v4103_v51  ;;  %v3200_v45 = vcombine.low %v277_v24, %v285_v25  ;;  %v308_v51 = vld [vmem:[%s5329_s0 + $0x210] sm:$0xff] }
  0x50   : > { %v356_v24 = vld [vmem:[%s5329_s0 + $0x390] sm:$0xff] }
  0x51   : > { %3647 = vmatpush3.bf16.msra.mxu0 %v4102_v48  ;;  %v3217_v48 = vcombine.high %v293_v38, %v301_v39  ;;  %v364_v25 = vld [vmem:[%s5329_s0 + $0x3d0] sm:$0xff] }
  0x52   : > { %3711 = vmatpush3.bf16.msra.mxu1 %v4104_v53  ;;  %3760 = vmatprep.subr.bf16.mxu0 %v4105_v56  ;;  %v316_v53 = vld [vmem:[%s5329_s0 + $0x250] sm:$0xff] }
  0x53   : > { %2099 = vmatmul.mubr.bf16.gmra.mxu0 %v3226_v34  ;;  %3824 = vmatprep.subr.bf16.mxu1 %v4107_v58  ;;  %v4117_v34 = vld [vmem:[%s5330_s1 + $0x260] sm:$0xff]   ;;  %v4126_v56 = vld [vmem:[%s5330_s1 + $0x210] sm:$0xff]   ;;  %v4129_v58 = vld [vmem:[%s5330_s1 + $0x248] sm:$0xff]  }
  0x54   : > { %2196 = vmatmul.mubr.bf16.gmra.mxu1 %v3228_v35  ;;  %2106 = vmatprep.mubr.bf16.mxu0 %v3243_v36  ;;  %v292_v35 = vld [vmem:[%s5329_s0 + $0x190] sm:$0xff] }
  0x55   : > { %2203 = vmatprep.mubr.bf16.mxu1 %v3245_v37  ;;  %v300_v36 = vld [vmem:[%s5329_s0 + $0x1d0] sm:$0xff]  ;;  %v4119_v37 = vld [vmem:[%s5330_s1 + $0x2e0] sm:$0xff]  }
  0x56   : > { %v3215_v46 = vcombine.high %v292_v35, %v300_v36  ;;  %v3214_v59 = vcombine.low %v292_v35, %v300_v36  ;;  %v255_v35 = vld [vmem:[%s5329_s0 + $0x68] sm:$0xff]  ;;  %v3278_v36 = vcombine.low %v356_v24, %v364_v25 }
  0x5b   : > { %2107 = vmatmul.mubr.bf16.gmra.mxu0 %v3242_v47  ;;  %v4122_v47 = vld [vmem:[%s5330_s1 + $0x218] sm:$0xff]  }
  0x5c   : > { %2204 = vmatmul.mubr.bf16.gmra.mxu1 %v3244_v49  ;;  %2114 = vmatprep.mubr.bf16.mxu0 %v3259_v50  ;;  %v4124_v49 = vld [vmem:[%s5330_s1 + $0x298] sm:$0xff]   ;;  %v4125_v50 = vld [vmem:[%s5330_s1 + $0x250] sm:$0xff]  }
  0x5d   : > { %2211 = vmatprep.mubr.bf16.mxu1 %v3261_v52  ;;  %v4127_v52 = vld [vmem:[%s5330_s1 + $0x2d0] sm:$0xff]  }
  0x63   : > { %2115 = vmatmul.mubr.bf16.gmra.mxu0 %v3258_v60  ;;  %v4131_v60 = vld [vmem:[%s5330_s1 + $0x2c8] sm:$0xff]  }
  0x64   : > { %2212 = vmatmul.mubr.bf16.gmra.mxu1 %v3260_v61  ;;  %2122 = vmatprep.mubr.bf16.mxu0 %v3275_v62  ;;  %v3216_v61 = vcombine.low %v293_v38, %v301_v39  ;;  %v3231_v62 = vcombine.high %v308_v51, %v316_v53 }
  0x65   : > { %2219 = vmatprep.mubr.bf16.mxu1 %v3277_v63  ;;  %v3233_v63 = vcombine.high %v309_v54, %v317_v55  ;;  %v278_v54 = vld [vmem:[%s5329_s0 + $0x120] sm:$0xff] }
  0x66   : > { %v286_v55 = vld [vmem:[%s5329_s0 + $0x160] sm:$0xff] }
  0x6b   : > { %2123 = vmatmul.mubr.bf16.gmra.mxu0 %v3274_v4  ;;  %v332_v4 = vld [vmem:[%s5329_s0 + $0x2d0] sm:$0xff] }
  0x6c   : > { %2220 = vmatmul.mubr.bf16.gmra.mxu1 %v3276_v5  ;;  %2260 = vmatprep.mubr.bf16.mxu0 %v3167_v6  ;;  %v4135_v5 = vld [vmem:[%s5330_s1 + $0x2c0] sm:$0xff]   ;;  %v325_v6 = vld [vmem:[%s5329_s0 + $0x298] sm:$0xff] }
  0x6d   : > { %2357 = vmatprep.mubr.bf16.mxu1 %v3169_v7  ;;  %v333_v7 = vld [vmem:[%s5329_s0 + $0x2d8] sm:$0xff] }
  0x73   : > { %2261 = vmatmul.mubr.bf16.vlgmr.msra.gmra.mxu0 %v3166_v10  ;;  %v4137_v10 = vld [vmem:[%s5330_s1 + $0x378] sm:$0xff]  }
  0x74   : > { %2358 = vmatmul.mubr.bf16.vlgmr.msra.gmra.mxu1 %v3168_v14  ;;  %3761 = vmatpush3.bf16.msra.mxu0 %v4106_v11  ;;  %v3230_v11 = vcombine.low %v308_v51, %v316_v53  ;;  %v3247_v14 = vcombine.high %v324_v3, %v332_v4  ;;  %v4143_v51 = vld [vmem:[%s5330_s1 + $0x3f0] sm:$0xff]  }
  0x75   : > { %3825 = vmatpush3.bf16.msra.mxu1 %v4108_v15  ;;  %2268 = vmatprep.mubr.bf16.mxu0 %v3183_v16  ;;  %v3249_v15 = vcombine.high %v325_v6, %v333_v7  ;;  %v340_v16 = vld [vmem:[%s5329_s0 + $0x310] sm:$0xff] }
  0x76   : > { %2365 = vmatprep.mubr.bf16.mxu1 %v3185_v18  ;;  %3762 = vmatprep.subr.bf16.mxu0 %v4109_v17  ;;  %v348_v17 = vld [vmem:[%s5329_s0 + $0x350] sm:$0xff]  ;;  %v341_v18 = vld [vmem:[%s5329_s0 + $0x318] sm:$0xff] }
  0x77   : > { %3826 = vmatprep.subr.bf16.mxu1 %v4111_v20  ;;  %v3246_v20 = vcombine.low %v324_v3, %v332_v4  ;;  %v3263_v22 = vcombine.high %v340_v16, %v348_v17  ;;  %v4144_v53 = vld [vmem:[%s5330_s1 + $0x3b0] sm:$0xff]   ;;  %v4151_v3 = vld [vmem:[%s5330_s1 + $0x3e0] sm:$0xff]  }
  0x78   : > { %3763 = vmatpush3.bf16.msra.mxu0 %v4110_v19  ;;  %v349_v19 = vld [vmem:[%s5329_s0 + $0x358] sm:$0xff]  ;;  %v294_v4 = vld [vmem:[%s5329_s0 + $0x1a0] sm:$0xff] }
  0x79   : > { %3827 = vmatpush3.bf16.msra.mxu1 %v4112_v21  ;;  %3764 = vmatprep.subr.bf16.mxu0 %v4113_v26  ;;  %v3248_v21 = vcombine.low %v325_v6, %v333_v7  ;;  %v3265_v23 = vcombine.high %v341_v18, %v349_v19  ;;  %v357_v26 = vld [vmem:[%s5329_s0 + $0x398] sm:$0xff]  ;;  %v295_v6 = vld [vmem:[%s5329_s0 + $0x1a8] sm:$0xff]  ;;  %v4150_v7 = vld [vmem:[%s5330_s1 + $0x320] sm:$0xff]  }
  0x7a   : > { %3828 = vmatprep.subr.bf16.mxu1 %v4115_v27  ;;  %v365_v27 = vld [vmem:[%s5329_s0 + $0x3d8] sm:$0xff] }
  0x7b   : > { %2269 = vmatmul.mubr.bf16.gmra.mxu0 %v3182_v28  ;;  %v3262_v28 = vcombine.low %v340_v16, %v348_v17  ;;  %v4154_v16 = vld [vmem:[%s5330_s1 + $0x318] sm:$0xff]  }
  0x7c   : > { %2366 = vmatmul.mubr.bf16.gmra.mxu1 %v3184_v29  ;;  %2276 = vmatprep.mubr.bf16.mxu0 %v3199_v30  ;;  %v3264_v29 = vcombine.low %v341_v18, %v349_v19  ;;  %v3279_v30 = vcombine.high %v356_v24, %v364_v25  ;;  %v4156_v17 = vld [vmem:[%s5330_s1 + $0x398] sm:$0xff]   ;;  %v4157_v18 = vld [vmem:[%s5330_s1 + $0x350] sm:$0xff]   ;;  %v319_v24 = vld [vmem:[%s5329_s0 + $0x268] sm:$0xff] }
  0x7d   : > { %2373 = vmatprep.mubr.bf16.mxu1 %v3201_v31  ;;  %3765 = vmatpush3.bf16.msra.mxu0 %v4114_v32  ;;  %v3281_v31 = vcombine.high %v357_v26, %v365_v27  ;;  %v246_v32 = vld [vmem:[%s5329_s0 + $0x20] sm:$0xff]  ;;  %v4159_v19 = vld [vmem:[%s5330_s1 + $0x3d0] sm:$0xff]  }
  0x7e   : > { %3829 = vmatpush3.bf16.msra.mxu1 %v4116_v33  ;;  %3766 = vmatprep.subr.bf16.mxu0 %v4117_v34  ;;  %v254_v33 = vld [vmem:[%s5329_s0 + $0x60] sm:$0xff]  ;;  %v247_v34 = vld [vmem:[%s5329_s0 + $0x28] sm:$0xff]  ;;  %v4160_v25 = vld [vmem:[%s5330_s1 + $0x390] sm:$0xff]  }
  0x7f   : > { %3830 = vmatprep.subr.bf16.mxu1 %v4119_v37  ;;  %v3280_v37 = vcombine.low %v357_v26, %v365_v27  ;;  %v3171_v38 = vcombine.high %v246_v32, %v254_v33  ;;  %v3173_v39 = vcombine.high %v247_v34, %v255_v35  ;;  %v4161_v26 = vld [vmem:[%s5330_s1 + $0x348] sm:$0xff]  }
  0x81   : > { %3767 = vmatpush3.bf16.msra.mxu0 %v4118_v40  ;;  %v262_v40 = vld [vmem:[%s5329_s0 + $0xa0] sm:$0xff] }
  0x82   : > { %3831 = vmatpush3.bf16.msra.mxu1 %v4120_v41  ;;  %3768 = vmatprep.subr.bf16.mxu0 %v4121_v42  ;;  %v270_v41 = vld [vmem:[%s5329_s0 + $0xe0] sm:$0xff]  ;;  %v3170_v42 = vcombine.low %v246_v32, %v254_v33  ;;  %v4162_v32 = vld [vmem:[%s5330_s1 + $0x308] sm:$0xff]  }
  0x83   : > { %2277 = vmatmul.mubr.bf16.gmra.mxu0 %v3198_v43  ;;  %3832 = vmatprep.subr.bf16.mxu1 %v4123_v44  ;;  %v263_v43 = vld [vmem:[%s5329_s0 + $0xa8] sm:$0xff] }
  0x84   : > { %2374 = vmatmul.mubr.bf16.gmra.mxu1 %v3200_v45  ;;  %2284 = vmatprep.mubr.bf16.mxu0 %v3215_v46  ;;  %v271_v44 = vld [vmem:[%s5329_s0 + $0xe8] sm:$0xff]  ;;  %v3172_v45 = vcombine.low %v247_v34, %v255_v35  ;;  %v4138_v46 = vld [vmem:[%s5330_s1 + $0x338] sm:$0xff]   ;;  %v4165_v34 = vld [vmem:[%s5330_s1 + $0x340] sm:$0xff]  }
  0x85   : > { %2381 = vmatprep.mubr.bf16.mxu1 %v3217_v48  ;;  %3769 = vmatpush3.bf16.msra.mxu0 %v4122_v47  ;;  %v4140_v47 = vld [vmem:[%s5330_s1 + $0x3b8] sm:$0xff]   ;;  %v3187_v48 = vcombine.high %v262_v40, %v270_v41  ;;  %v4164_v33 = vld [vmem:[%s5330_s1 + $0x388] sm:$0xff]   ;;  %v4167_v35 = vld [vmem:[%s5330_s1 + $0x3c0] sm:$0xff]  }
  0x86   : > { %3833 = vmatpush3.bf16.msra.mxu1 %v4124_v49  ;;  %3770 = vmatprep.subr.bf16.mxu0 %v4125_v50  ;;  %v3189_v49 = vcombine.high %v263_v43, %v271_v44  ;;  %v4141_v50 = vld [vmem:[%s5330_s1 + $0x370] sm:$0xff]  }
  0x87   : > { %3834 = vmatprep.subr.bf16.mxu1 %v4127_v52  ;;  %v4142_v52 = vld [vmem:[%s5330_s1 + $0x330] sm:$0xff]  }
  0x89   : > { %3771 = vmatpush3.bf16.msra.mxu0 %v4126_v56  ;;  %v4145_v56 = vld [vmem:[%s5330_s1 + $0x368] sm:$0xff]  }
  0x8a   : > { %3835 = vmatpush3.bf16.msra.mxu1 %v4128_v57  ;;  %3772 = vmatprep.subr.bf16.mxu0 %v4129_v58  ;;  %v279_v57 = vld [vmem:[%s5329_s0 + $0x128] sm:$0xff] }
  0x8b   : > { %2285 = vmatmul.mubr.bf16.gmra.mxu0 %v3214_v59  ;;  %3836 = vmatprep.subr.bf16.mxu1 %v4131_v60  ;;  %v287_v58 = vld [vmem:[%s5329_s0 + $0x168] sm:$0xff]  ;;  %v3186_v60 = vcombine.low %v262_v40, %v270_v41  ;;  %v4168_v41 = vld [vmem:[%s5330_s1 + $0x380] sm:$0xff]  }
  0x8c   : > { %2382 = vmatmul.mubr.bf16.gmra.mxu1 %v3216_v61  ;;  %2292 = vmatprep.mubr.bf16.mxu0 %v3231_v62  ;;  %v4147_v59 = vld [vmem:[%s5330_s1 + $0x3e8] sm:$0xff]   ;;  %v3188_v61 = vcombine.low %v263_v43, %v271_v44  ;;  %v3203_v62 = vcombine.high %v278_v54, %v286_v55 }
  0x8d   : > { %2389 = vmatprep.mubr.bf16.mxu1 %v3233_v63  ;;  %3773 = vmatpush3.bf16.msra.mxu0 %v4130_v0  ;;  %v3205_v63 = vcombine.high %v279_v57, %v287_v58  ;;  %v4146_v0 = vld [vmem:[%s5330_s1 + $0x328] sm:$0xff]  }
  0x8e   : > { %3837 = vmatpush3.bf16.msra.mxu1 %v4132_v1  ;;  %3774 = vmatprep.subr.bf16.mxu0 %v4133_v2  ;;  %v4148_v1 = vld [vmem:[%s5330_s1 + $0x3a8] sm:$0xff]   ;;  %v4149_v2 = vld [vmem:[%s5330_s1 + $0x360] sm:$0xff]  }
  0x8f   : > { %3838 = vmatprep.subr.bf16.mxu1 %v4135_v5  ;;  %v302_v5 = vld [vmem:[%s5329_s0 + $0x1e0] sm:$0xff]  ;;  %v335_v40 = vld [vmem:[%s5329_s0 + $0x2e8] sm:$0xff] }
  0x90   : > { %v3218_v27 = vcombine.low %v294_v4, %v302_v5 }
  0x91   : > { %3775 = vmatpush3.bf16.msra.mxu0 %v4134_v8  ;;  %v303_v8 = vld [vmem:[%s5329_s0 + $0x1e8] sm:$0xff] }
  0x92   : > { %3839 = vmatpush3.bf16.msra.mxu1 %v4136_v9  ;;  %3888 = vmatprep.subr.bf16.mxu0 %v4137_v10  ;;  %v4152_v9 = vld [vmem:[%s5330_s1 + $0x3a0] sm:$0xff]   ;;  %v4153_v10 = vld [vmem:[%s5330_s1 + $0x358] sm:$0xff]  }
  0x93   : > { %2293 = vmatmul.mubr.bf16.gmra.mxu0 %v3230_v11  ;;  %3952 = vmatprep.subr.bf16.mxu1 %v4139_v12  ;;  %v3202_v11 = vcombine.low %v278_v54, %v286_v55  ;;  %v4155_v12 = vld [vmem:[%s5330_s1 + $0x3d8] sm:$0xff]   ;;  %v358_v54 = vld [vmem:[%s5329_s0 + $0x3a0] sm:$0xff] }
  0x94   : > { %2390 = vmatmul.mubr.bf16.gmra.mxu1 %v3232_v13  ;;  %2300 = vmatprep.mubr.bf16.mxu0 %v3247_v14  ;;  %v3204_v13 = vcombine.low %v279_v57, %v287_v58  ;;  %v3219_v14 = vcombine.high %v294_v4, %v302_v5  ;;  %v366_v55 = vld [vmem:[%s5329_s0 + $0x3e0] sm:$0xff]  ;;  %v367_v57 = vld [vmem:[%s5329_s0 + $0x3e8] sm:$0xff] }
  0x95   : > { %2397 = vmatprep.mubr.bf16.mxu1 %v3249_v15  ;;  %v3221_v15 = vcombine.high %v295_v6, %v303_v8 }
  0x9b   : > { %2301 = vmatmul.mubr.bf16.gmra.mxu0 %v3246_v20  ;;  %v310_v20 = vld [vmem:[%s5329_s0 + $0x220] sm:$0xff] }
  0x9c   : > { %2398 = vmatmul.mubr.bf16.gmra.mxu1 %v3248_v21  ;;  %2308 = vmatprep.mubr.bf16.mxu0 %v3263_v22  ;;  %v318_v21 = vld [vmem:[%s5329_s0 + $0x260] sm:$0xff]  ;;  %v311_v22 = vld [vmem:[%s5329_s0 + $0x228] sm:$0xff] }
  0x9d   : > { %2405 = vmatprep.mubr.bf16.mxu1 %v3265_v23  ;;  %v4158_v23 = vld [vmem:[%s5330_s1 + $0x310] sm:$0xff]   ;;  %v3236_v43 = vcombine.low %v311_v22, %v319_v24 }
  0xa3   : > { %2309 = vmatmul.mubr.bf16.gmra.mxu0 %v3262_v28  ;;  %v4163_v28 = vld [vmem:[%s5330_s1 + $0x3c8] sm:$0xff]  }
  0xa4   : > { %2406 = vmatmul.mubr.bf16.gmra.mxu1 %v3264_v29  ;;  %2316 = vmatprep.mubr.bf16.mxu0 %v3279_v30  ;;  %v3220_v29 = vcombine.low %v295_v6, %v303_v8  ;;  %v3235_v30 = vcombine.high %v310_v20, %v318_v21  ;;  %v264_v6 = vld [vmem:[%s5329_s0 + $0xb0] sm:$0xff]  ;;  %v265_v8 = vld [vmem:[%s5329_s0 + $0xb8] sm:$0xff] }
  0xa5   : > { %2413 = vmatprep.mubr.bf16.mxu1 %v3281_v31  ;;  %v3237_v31 = vcombine.high %v311_v22, %v319_v24  ;;  %v289_v22 = vld [vmem:[%s5329_s0 + $0x178] sm:$0xff] }
  0xab   : > { %2317 = vmatmul.mubr.bf16.gmra.mxu0 %v3278_v36  ;;  %v326_v36 = vld [vmem:[%s5329_s0 + $0x2a0] sm:$0xff] }
  0xac   : > { %2414 = vmatmul.mubr.bf16.gmra.mxu1 %v3280_v37  ;;  %2454 = vmatprep.mubr.bf16.mxu0 %v3171_v38  ;;  %v334_v37 = vld [vmem:[%s5329_s0 + $0x2e0] sm:$0xff] }
  0xad   : > { %2551 = vmatprep.mubr.bf16.mxu1 %v3173_v39  ;;  %v4166_v38 = vld [vmem:[%s5330_s1 + $0x300] sm:$0xff]   ;;  %v327_v39 = vld [vmem:[%s5329_s0 + $0x2a8] sm:$0xff]  ;;  %v3251_v44 = vcombine.high %v326_v36, %v334_v37 }
  0xb3   : > { %2455 = vmatmul.mubr.bf16.vlgmr.msra.gmra.mxu0 %v3170_v42  ;;  %v3234_v42 = vcombine.low %v310_v20, %v318_v21  ;;  %v281_v21 = vld [vmem:[%s5329_s0 + $0x138] sm:$0xff] }
  0xb4   : > { %2552 = vmatmul.mubr.bf16.vlgmr.msra.gmra.mxu1 %v3172_v45  ;;  %3889 = vmatpush3.bf16.msra.mxu0 %v4138_v46  ;;  %v3253_v45 = vcombine.high %v327_v39, %v335_v40  ;;  %v342_v46 = vld [vmem:[%s5329_s0 + $0x320] sm:$0xff] }
  0xb5   : > { %3953 = vmatpush3.bf16.msra.mxu1 %v4140_v47  ;;  %2462 = vmatprep.mubr.bf16.mxu0 %v3187_v48  ;;  %v350_v47 = vld [vmem:[%s5329_s0 + $0x360] sm:$0xff]  ;;  %v343_v48 = vld [vmem:[%s5329_s0 + $0x328] sm:$0xff] }
  0xb6   : > { %2559 = vmatprep.mubr.bf16.mxu1 %v3189_v49  ;;  %3890 = vmatprep.subr.bf16.mxu0 %v4141_v50  ;;  %v351_v49 = vld [vmem:[%s5329_s0 + $0x368] sm:$0xff]  ;;  %v3250_v50 = vcombine.low %v326_v36, %v334_v37  ;;  %v3266_v58 = vcombine.low %v342_v46, %v350_v47 }
  0xb7   : > { %3954 = vmatprep.subr.bf16.mxu1 %v4143_v51  ;;  %v3252_v51 = vcombine.low %v327_v39, %v335_v40  ;;  %v296_v39 = vld [vmem:[%s5329_s0 + $0x1b0] sm:$0xff] }
  0xb8   : > { %3891 = vmatpush3.bf16.msra.mxu0 %v4142_v52  ;;  %v3267_v52 = vcombine.high %v342_v46, %v350_v47  ;;  %v304_v40 = vld [vmem:[%s5329_s0 + $0x1f0] sm:$0xff] }
  0xb9   : > { %3955 = vmatpush3.bf16.msra.mxu1 %v4144_v53  ;;  %3892 = vmatprep.subr.bf16.mxu0 %v4145_v56  ;;  %v3269_v53 = vcombine.high %v343_v48, %v351_v49  ;;  %v359_v56 = vld [vmem:[%s5329_s0 + $0x3a8] sm:$0xff] }
  0xba   : > { %3956 = vmatprep.subr.bf16.mxu1 %v4147_v59  ;;  %v3268_v59 = vcombine.low %v343_v48, %v351_v49  ;;  %v3208_v49 = vcombine.low %v281_v21, %v289_v22 }
  0xbb   : > { %2463 = vmatmul.mubr.bf16.gmra.mxu0 %v3186_v60  ;;  %v3283_v60 = vcombine.high %v358_v54, %v366_v55 }
  0xbc   : > { %2560 = vmatmul.mubr.bf16.gmra.mxu1 %v3188_v61  ;;  %2470 = vmatprep.mubr.bf16.mxu0 %v3203_v62  ;;  %v3285_v61 = vcombine.high %v359_v56, %v367_v57  ;;  %v248_v62 = vld [vmem:[%s5329_s0 + $0x30] sm:$0xff] }
  0xbd   : > { %2567 = vmatprep.mubr.bf16.mxu1 %v3205_v63  ;;  %3893 = vmatpush3.bf16.msra.mxu0 %v4146_v0  ;;  %v256_v63 = vld [vmem:[%s5329_s0 + $0x70] sm:$0xff]  ;;  %v249_v0 = vld [vmem:[%s5329_s0 + $0x38] sm:$0xff] }
  0xbe   : > { %3957 = vmatpush3.bf16.msra.mxu1 %v4148_v1  ;;  %3894 = vmatprep.subr.bf16.mxu0 %v4149_v2  ;;  %v257_v1 = vld [vmem:[%s5329_s0 + $0x78] sm:$0xff]  ;;  %v3282_v2 = vcombine.low %v358_v54, %v366_v55  ;;  %v3175_v4 = vcombine.high %v248_v62, %v256_v63 }
  0xbf   : > { %3958 = vmatprep.subr.bf16.mxu1 %v4151_v3  ;;  %v3284_v3 = vcombine.low %v359_v56, %v367_v57  ;;  %v3177_v5 = vcombine.high %v249_v0, %v257_v1 }
  0xc1   : > { %3895 = vmatpush3.bf16.msra.mxu0 %v4150_v7  ;;  %v272_v7 = vld [vmem:[%s5329_s0 + $0xf0] sm:$0xff] }
  0xc2   : > { %3959 = vmatpush3.bf16.msra.mxu1 %v4152_v9  ;;  %3896 = vmatprep.subr.bf16.mxu0 %v4153_v10  ;;  %v273_v9 = vld [vmem:[%s5329_s0 + $0xf8] sm:$0xff]  ;;  %v3174_v10 = vcombine.low %v248_v62, %v256_v63  ;;  %v320_v62 = vld [vmem:[%s5329_s0 + $0x270] sm:$0xff] }
  0xc3   : > { %2471 = vmatmul.mubr.bf16.gmra.mxu0 %v3202_v11  ;;  %3960 = vmatprep.subr.bf16.mxu1 %v4155_v12  ;;  %v3176_v11 = vcombine.low %v249_v0, %v257_v1  ;;  %v3191_v12 = vcombine.high %v264_v6, %v272_v7  ;;  %v313_v1 = vld [vmem:[%s5329_s0 + $0x238] sm:$0xff] }
  0xc4   : > { %2568 = vmatmul.mubr.bf16.gmra.mxu1 %v3204_v13  ;;  %2478 = vmatprep.mubr.bf16.mxu0 %v3219_v14  ;;  %v3193_v13 = vcombine.high %v265_v8, %v273_v9 }
  0xc5   : > { %2575 = vmatprep.mubr.bf16.mxu1 %v3221_v15  ;;  %3897 = vmatpush3.bf16.msra.mxu0 %v4154_v16 }
  0xc6   : > { %3961 = vmatpush3.bf16.msra.mxu1 %v4156_v17  ;;  %3898 = vmatprep.subr.bf16.mxu0 %v4157_v18  ;;  %v280_v17 = vld [vmem:[%s5329_s0 + $0x130] sm:$0xff] }
  0xc7   : > { %3962 = vmatprep.subr.bf16.mxu1 %v4159_v19  ;;  %v288_v18 = vld [vmem:[%s5329_s0 + $0x170] sm:$0xff] }
  0xc8   : > { %v3206_v47 = vcombine.low %v280_v17, %v288_v18 }
  0xc9   : > { %3899 = vmatpush3.bf16.msra.mxu0 %v4158_v23 }
  0xca   : > { %3963 = vmatpush3.bf16.msra.mxu1 %v4160_v25  ;;  %3900 = vmatprep.subr.bf16.mxu0 %v4161_v26  ;;  %v3190_v25 = vcombine.low %v264_v6, %v272_v7 }
  0xcb   : > { %2479 = vmatmul.mubr.bf16.gmra.mxu0 %v3218_v27  ;;  %3964 = vmatprep.subr.bf16.mxu1 %v4163_v28  ;;  %v3192_v27 = vcombine.low %v265_v8, %v273_v9  ;;  %v3207_v28 = vcombine.high %v280_v17, %v288_v18 }
  0xcc   : > { %2576 = vmatmul.mubr.bf16.gmra.mxu1 %v3220_v29  ;;  %2486 = vmatprep.mubr.bf16.mxu0 %v3235_v30 }
  0xcd   : > { %2583 = vmatprep.mubr.bf16.mxu1 %v3237_v31  ;;  %3901 = vmatpush3.bf16.msra.mxu0 %v4162_v32  ;;  %v3209_v31 = vcombine.high %v281_v21, %v289_v22 }
  0xce   : > { %3965 = vmatpush3.bf16.msra.mxu1 %v4164_v33  ;;  %3902 = vmatprep.subr.bf16.mxu0 %v4165_v34 }
  0xcf   : > { %3966 = vmatprep.subr.bf16.mxu1 %v4167_v35 }
  0xd1   : > { %3903 = vmatpush3.bf16.msra.mxu0 %v4166_v38 }
  0xd2   : > { %3967 = vmatpush3.bf16.msra.mxu1 %v4168_v41 }
  0xd3   : > { %2487 = vmatmul.mubr.bf16.gmra.mxu0 %v3234_v42 }
  0xd4   : > { %2584 = vmatmul.mubr.bf16.gmra.mxu1 %v3236_v43  ;;  %2494 = vmatprep.mubr.bf16.mxu0 %v3251_v44  ;;  %v297_v43 = vld [vmem:[%s5329_s0 + $0x1b8] sm:$0xff] }
  0xd5   : > { %2591 = vmatprep.mubr.bf16.mxu1 %v3253_v45  ;;  %v305_v44 = vld [vmem:[%s5329_s0 + $0x1f8] sm:$0xff] }
  0xd6   : > { %v3224_v7 = vcombine.low %v297_v43, %v305_v44 }
  0xdb   : > { %2495 = vmatmul.mubr.bf16.gmra.mxu0 %v3250_v50  ;;  %v3223_v50 = vcombine.high %v296_v39, %v304_v40 }
  0xdc   : > { %2592 = vmatmul.mubr.bf16.gmra.mxu1 %v3252_v51  ;;  %2502 = vmatprep.mubr.bf16.mxu0 %v3267_v52 }
  0xdd   : > { %2599 = vmatprep.mubr.bf16.mxu1 %v3269_v53  ;;  %v3225_v53 = vcombine.high %v297_v43, %v305_v44  ;;  %v344_v43 = vld [vmem:[%s5329_s0 + $0x330] sm:$0xff] }
  0xde   : > { %v352_v44 = vld [vmem:[%s5329_s0 + $0x370] sm:$0xff] }
  0xe3   : > { %2503 = vmatmul.mubr.bf16.gmra.mxu0 %v3266_v58 }
  0xe4   : > { %2600 = vmatmul.mubr.bf16.gmra.mxu1 %v3268_v59  ;;  %2510 = vmatprep.mubr.bf16.mxu0 %v3283_v60 }
  0xe5   : > { %2607 = vmatprep.mubr.bf16.mxu1 %v3285_v61  ;;  %v312_v61 = vld [vmem:[%s5329_s0 + $0x230] sm:$0xff] }
  0xe6   : > { %v3239_v8 = vcombine.high %v312_v61, %v320_v62 }
  0xeb   : > { %2511 = vmatmul.mubr.bf16.gmra.mxu0 %v3282_v2  ;;  %v321_v2 = vld [vmem:[%s5329_s0 + $0x278] sm:$0xff] }
  0xec   : > { %2608 = vmatmul.mubr.bf16.gmra.mxu1 %v3284_v3  ;;  %2648 = vmatprep.mubr.bf16.mxu0 %v3175_v4 }
  0xed   : > { %2745 = vmatprep.mubr.bf16.mxu1 %v3177_v5  ;;  %v3222_v5 = vcombine.low %v296_v39, %v304_v40 }
  0xf3   : > { %v3520_v14 = vpop.f32.mrf.mxu0  ;;  %2649 = vmatmul.mubr.bf16.vlgmr.msra.gmra.mxu0 %v3174_v10 }
  0xf4   : > { %v3584_v15 = vpop.f32.mrf.mxu1  ;;  %2746 = vmatmul.mubr.bf16.vlgmr.msra.gmra.mxu1 %v3176_v11  ;;  %2656 = vmatprep.mubr.bf16.mxu0 %v3191_v12  ;;  %v3241_v11 = vcombine.high %v313_v1, %v321_v2 }
  0xf5   : > { %v3521_v16 = vpop.f32.mrf.mxu0  ;;  %2753 = vmatprep.mubr.bf16.mxu1 %v3193_v13 }
  0xf6   : > { %v3522_v19 = vadd.f32 %v3521_v16, %v3520_v14  ;;  %v3585_v20 = vpop.f32.mrf.mxu1 }
  0xf7   : > { %v3586_v23 = vadd.f32 %v3585_v20, %v3584_v15  ;;  %v3523_v24 = vpop.f32.mrf.mxu0  ;;  %v336_v20 = vld [vmem:[%s5329_s0 + $0x2f0] sm:$0xff] }
  0xf8   : > { %v3587_v26 = vpop.f32.mrf.mxu1 }
  0xf9   : > { %v4950_v29 = vadd.f32 %v3586_v23, %v3522_v19  ;;  %v3524_v30 = vpop.f32.mrf.mxu0  ;;  %v328_v19 = vld [vmem:[%s5329_s0 + $0x2b0] sm:$0xff]  ;;  %v329_v23 = vld [vmem:[%s5329_s0 + $0x2b8] sm:$0xff] }
  0xfa   : > { %v3525_v32 = vadd.f32 %v3524_v30, %v3523_v24  ;;  %v3588_v33 = vpop.f32.mrf.mxu1  ;;  %v337_v24 = vld [vmem:[%s5329_s0 + $0x2f8] sm:$0xff]  ;;  %v3240_v30 = vcombine.low %v313_v1, %v321_v2 }
  0xfb   : > { %v3589_v34 = vadd.f32 %v3588_v33, %v3587_v26  ;;  %v3526_v35 = vpop.f32.mrf.mxu0  ;;  %2657 = vmatmul.mubr.bf16.gmra.mxu0 %v3190_v25 }
  0xfc   : > { %v3590_v36 = vpop.f32.mrf.mxu1  ;;  %2754 = vmatmul.mubr.bf16.gmra.mxu1 %v3192_v27  ;;  %2664 = vmatprep.mubr.bf16.mxu0 %v3207_v28  ;;  %v3238_v27 = vcombine.low %v312_v61, %v320_v62 }
  0xfd   : > { %v4952_v37 = vadd.f32 %v3589_v34, %v3525_v32  ;;  %v3527_v38 = vpop.f32.mrf.mxu0  ;;  %2761 = vmatprep.mubr.bf16.mxu1 %v3209_v31  ;;  %v3255_v31 = vcombine.high %v328_v19, %v336_v20  ;;  %v3257_v34 = vcombine.high %v329_v23, %v337_v24 }
  0xfe   : > { %v3528_v41 = vadd.f32 %v3527_v38, %v3526_v35  ;;  %v3591_v42 = vpop.f32.mrf.mxu1 }
  0xff   : > { %v3592_v45 = vadd.f32 %v3591_v42, %v3590_v36  ;;  %v3529_v46 = vpop.f32.mrf.mxu0 }
 0x100   : > { %v3593_v48 = vpop.f32.mrf.mxu1 }
 0x101   : > { %v4966_v51 = vadd.f32 %v3592_v45, %v3528_v41  ;;  %v3530_v52 = vpop.f32.mrf.mxu0 }
 0x102   : > { %v3531_v54 = vadd.f32 %v3530_v52, %v3529_v46  ;;  %v3594_v55 = vpop.f32.mrf.mxu1  ;;  %v3254_v52 = vcombine.low %v328_v19, %v336_v20 }
 0x103   : > { %v3595_v56 = vadd.f32 %v3594_v55, %v3593_v48  ;;  %v3532_v57 = vpop.f32.mrf.mxu0  ;;  %2665 = vmatmul.mubr.bf16.gmra.mxu0 %v3206_v47  ;;  %v345_v47 = vld [vmem:[%s5329_s0 + $0x338] sm:$0xff]  ;;  %v3271_v55 = vcombine.high %v344_v43, %v352_v44 }
 0x104   : > { %v3596_v58 = vpop.f32.mrf.mxu1  ;;  %2762 = vmatmul.mubr.bf16.gmra.mxu1 %v3208_v49  ;;  %2672 = vmatprep.mubr.bf16.mxu0 %v3223_v50  ;;  %v353_v48 = vld [vmem:[%s5329_s0 + $0x378] sm:$0xff] }
 0x105   : > { %v4968_v59 = vadd.f32 %v3595_v56, %v3531_v54  ;;  %v3533_v60 = vpop.f32.mrf.mxu0  ;;  %2769 = vmatprep.mubr.bf16.mxu1 %v3225_v53  ;;  %v3256_v54 = vcombine.low %v329_v23, %v337_v24 }
 0x106   : > { %v3534_v63 = vadd.f32 %v3533_v60, %v3532_v57  ;;  %v3597_v0 = vpop.f32.mrf.mxu1 }
 0x107   : > { %v3598_v3 = vadd.f32 %v3597_v0, %v3596_v58  ;;  %v3535_v4 = vpop.f32.mrf.mxu0  ;;  %v3273_v58 = vcombine.high %v345_v47, %v353_v48 }
 0x108   : > { %v3599_v6 = vpop.f32.mrf.mxu1 }
 0x109   : > { %v4982_v9 = vadd.f32 %v3598_v3, %v3534_v63  ;;  %v3536_v10 = vpop.f32.mrf.mxu0  ;;  %v360_v3 = vld [vmem:[%s5329_s0 + $0x3b0] sm:$0xff] }
 0x10a   : > { %v3537_v12 = vadd.f32 %v3536_v10, %v3535_v4  ;;  %v3600_v13 = vpop.f32.mrf.mxu1  ;;  %v368_v4 = vld [vmem:[%s5329_s0 + $0x3f0] sm:$0xff] }
 0x10b   : > { %v3601_v14 = vadd.f32 %v3600_v13, %v3599_v6  ;;  %v3538_v15 = vpop.f32.mrf.mxu0  ;;  %2673 = vmatmul.mubr.bf16.gmra.mxu0 %v3222_v5 }
 0x10c   : > { %v3602_v16 = vpop.f32.mrf.mxu1  ;;  %2770 = vmatmul.mubr.bf16.gmra.mxu1 %v3224_v7  ;;  %2680 = vmatprep.mubr.bf16.mxu0 %v3239_v8  ;;  %v361_v7 = vld [vmem:[%s5329_s0 + $0x3b8] sm:$0xff] }
 0x10d   : > { %v4984_v17 = vadd.f32 %v3601_v14, %v3537_v12  ;;  %v3539_v18 = vpop.f32.mrf.mxu0  ;;  %2777 = vmatprep.mubr.bf16.mxu1 %v3241_v11  ;;  %v369_v8 = vld [vmem:[%s5329_s0 + $0x3f8] sm:$0xff]  ;;  %v3270_v12 = vcombine.low %v344_v43, %v352_v44  ;;  %v3272_v14 = vcombine.low %v345_v47, %v353_v48 }
 0x10e   : > { %v3540_v21 = vadd.f32 %v3539_v18, %v3538_v15  ;;  %v3603_v22 = vpop.f32.mrf.mxu1  ;;  %v3287_v15 = vcombine.high %v360_v3, %v368_v4  ;;  %v3289_v19 = vcombine.high %v361_v7, %v369_v8 }
 0x10f   : > { %v3604_v25 = vadd.f32 %v3603_v22, %v3602_v16  ;;  %v3541_v26 = vpop.f32.mrf.mxu0 }
 0x110   : > { %v3605_v28 = vpop.f32.mrf.mxu1 }
 0x111   : > { %v4998_v32 = vadd.f32 %v3604_v25, %v3540_v21  ;;  %v3542_v33 = vpop.f32.mrf.mxu0 }
 0x112   : > { %v3543_v35 = vadd.f32 %v3542_v33, %v3541_v26  ;;  %v3606_v36 = vpop.f32.mrf.mxu1  ;;  %v3286_v33 = vcombine.low %v360_v3, %v368_v4 }
 0x113   : > { %v3607_v38 = vadd.f32 %v3606_v36, %v3605_v28  ;;  %v3544_v39 = vpop.f32.mrf.mxu0  ;;  %2681 = vmatmul.mubr.bf16.gmra.mxu0 %v3238_v27 }
 0x114   : > { %v3608_v40 = vpop.f32.mrf.mxu1  ;;  %2778 = vmatmul.mubr.bf16.gmra.mxu1 %v3240_v30  ;;  %2688 = vmatprep.mubr.bf16.mxu0 %v3255_v31 }
 0x115   : > { %v5000_v41 = vadd.f32 %v3607_v38, %v3543_v35  ;;  %v3545_v42 = vpop.f32.mrf.mxu0  ;;  %2785 = vmatprep.mubr.bf16.mxu1 %v3257_v34  ;;  %v3288_v35 = vcombine.low %v361_v7, %v369_v8 }
 0x116   : > { %v3546_v45 = vadd.f32 %v3545_v42, %v3544_v39  ;;  %v3609_v46 = vpop.f32.mrf.mxu1 }
 0x117   : > { %v3610_v49 = vadd.f32 %v3609_v46, %v3608_v40  ;;  %v3547_v50 = vpop.f32.mrf.mxu0 }
 0x118   : > { %v3611_v53 = vpop.f32.mrf.mxu1 }
 0x119   : > { %v5014_v56 = vadd.f32 %v3610_v49, %v3546_v45  ;;  %v3548_v57 = vpop.f32.mrf.mxu0 }
 0x11a   : > { %v3549_v60 = vadd.f32 %v3548_v57, %v3547_v50  ;;  %v3612_v61 = vpop.f32.mrf.mxu1 }
 0x11b   : > { %v3613_v62 = vadd.f32 %v3612_v61, %v3611_v53  ;;  %v3550_v63 = vpop.f32.mrf.mxu0  ;;  %2689 = vmatmul.mubr.bf16.gmra.mxu0 %v3254_v52 }
 0x11c   : > { %v3614_v0 = vpop.f32.mrf.mxu1  ;;  %2786 = vmatmul.mubr.bf16.gmra.mxu1 %v3256_v54  ;;  %2696 = vmatprep.mubr.bf16.mxu0 %v3271_v55 }
 0x11d   : > { %v5016_v1 = vadd.f32 %v3613_v62, %v3549_v60  ;;  %v3551_v2 = vpop.f32.mrf.mxu0  ;;  %2793 = vmatprep.mubr.bf16.mxu1 %v3273_v58 }
 0x11e   : > { %v3552_v5 = vadd.f32 %v3551_v2, %v3550_v63  ;;  %v3615_v6 = vpop.f32.mrf.mxu1 }
 0x11f   : > { %v3616_v10 = vadd.f32 %v3615_v6, %v3614_v0  ;;  %v3553_v11 = vpop.f32.mrf.mxu0 }
 0x120   : > { %v3617_v13 = vpop.f32.mrf.mxu1 }
 0x121   : > { %v5030_v16 = vadd.f32 %v3616_v10, %v3552_v5  ;;  %v3554_v18 = vpop.f32.mrf.mxu0 }
 0x122   : > { %v3555_v20 = vadd.f32 %v3554_v18, %v3553_v11  ;;  %v3618_v21 = vpop.f32.mrf.mxu1 }
 0x123   : > { %v3619_v22 = vadd.f32 %v3618_v21, %v3617_v13  ;;  %v3556_v23 = vpop.f32.mrf.mxu0  ;;  %2697 = vmatmul.mubr.bf16.gmra.mxu0 %v3270_v12 }
 0x124   : > { %v3620_v24 = vpop.f32.mrf.mxu1  ;;  %2794 = vmatmul.mubr.bf16.gmra.mxu1 %v3272_v14  ;;  %2704 = vmatprep.mubr.bf16.mxu0 %v3287_v15 }
 0x125   : > { %v5032_v25 = vadd.f32 %v3619_v22, %v3555_v20  ;;  %v3557_v26 = vpop.f32.mrf.mxu0  ;;  %2801 = vmatprep.mubr.bf16.mxu1 %v3289_v19 }
 0x126   : > { %v3558_v27 = vadd.f32 %v3557_v26, %v3556_v23  ;;  %v3621_v28 = vpop.f32.mrf.mxu1 }
 0x127   : > { %v3622_v30 = vadd.f32 %v3621_v28, %v3620_v24  ;;  %v3559_v31 = vpop.f32.mrf.mxu0 }
 0x128   : > { %v3623_v34 = vpop.f32.mrf.mxu1 }
 0x129   : > { %v5034_v36 = vadd.f32 %v3622_v30, %v3558_v27  ;;  %v3560_v38 = vpop.f32.mrf.mxu0 }
 0x12a   : > { %v3561_v39 = vadd.f32 %v3560_v38, %v3559_v31  ;;  %v3624_v40 = vpop.f32.mrf.mxu1 }
 0x12b   : > { %v3625_v42 = vadd.f32 %v3624_v40, %v3623_v34  ;;  %v3562_v43 = vpop.f32.mrf.mxu0  ;;  %2705 = vmatmul.mubr.bf16.gmra.mxu0 %v3286_v33 }
 0x12c   : > { %v3626_v44 = vpop.f32.mrf.mxu1  ;;  %2802 = vmatmul.mubr.bf16.gmra.mxu1 %v3288_v35 }
 0x12d   : > { %v5036_v45 = vadd.f32 %v3625_v42, %v3561_v39  ;;  %v3563_v46 = vpop.f32.mrf.mxu0 }
 0x12e   : > { %v3564_v47 = vadd.f32 %v3563_v46, %v3562_v43  ;;  %v3627_v48 = vpop.f32.mrf.mxu1 }
 0x12f   : > { %v3628_v49 = vadd.f32 %v3627_v48, %v3626_v44  ;;  %v3565_v50 = vpop.f32.mrf.mxu0 }
 0x130   : > { %v3629_v52 = vpop.f32.mrf.mxu1 }
 0x131   : > { %v5038_v53 = vadd.f32 %v3628_v49, %v3564_v47  ;;  %v3566_v54 = vpop.f32.mrf.mxu0 }
 0x132   : > { %v3567_v55 = vadd.f32 %v3566_v54, %v3565_v50  ;;  %v3630_v57 = vpop.f32.mrf.mxu1 }
 0x133   : > { %v3631_v58 = vadd.f32 %v3630_v57, %v3629_v52  ;;  %v3648_v60 = vpop.f32.mrf.mxu0 }
 0x134   : > { %v3712_v61 = vpop.f32.mrf.mxu1 }
 0x135   : > { %v5040_v62 = vadd.f32 %v3631_v58, %v3567_v55  ;;  %v3649_v63 = vpop.f32.mrf.mxu0 }
 0x136   : > { %v3650_v0 = vadd.f32 %v3649_v63, %v3648_v60  ;;  %v3713_v2 = vpop.f32.mrf.mxu1 }
 0x137   : > { %v3714_v3 = vadd.f32 %v3713_v2, %v3712_v61  ;;  %v3651_v4 = vpop.f32.mrf.mxu0 }
 0x138   : > { %v2263_v5 = vadd.f32 %v3650_v0, %v4950_v29  ;;  %v3715_v6 = vpop.f32.mrf.mxu1 }
 0x139   : > { %v3652_v7 = vpop.f32.mrf.mxu0 }
 0x13a   : > { %v5043_v8 = vadd.f32 %v3714_v3, %v2263_v5  ;;  %v3653_v10 = vadd.f32 %v3652_v7, %v3651_v4  ;;  %v3716_v11 = vpop.f32.mrf.mxu1 }
 0x13b   : > { %v3717_v12 = vadd.f32 %v3716_v11, %v3715_v6  ;;  %v3654_v13 = vpop.f32.mrf.mxu0 }
 0x13c   : > { %v2266_v14 = vadd.f32 %v3653_v10, %v4952_v37  ;;  %v3718_v15 = vpop.f32.mrf.mxu1 }
 0x13d   : > { %v3655_v18 = vpop.f32.mrf.mxu0 }
 0x13e   : > { %v5046_v19 = vadd.f32 %v3717_v12, %v2266_v14  ;;  %v3656_v20 = vadd.f32 %v3655_v18, %v3654_v13  ;;  %v3719_v21 = vpop.f32.mrf.mxu1 }
 0x13f   : > { %v3720_v22 = vadd.f32 %v3719_v21, %v3718_v15  ;;  %v3657_v23 = vpop.f32.mrf.mxu0 }
 0x140   : > { %v2271_v29 = vadd.f32 %v3656_v20, %v4966_v51  ;;  %v3721_v24 = vpop.f32.mrf.mxu1 }
 0x141   : > { %v3658_v26 = vpop.f32.mrf.mxu0 }
 0x142   : > { %v5049_v27 = vadd.f32 %v3720_v22, %v2271_v29  ;;  %v3659_v28 = vadd.f32 %v3658_v26, %v3657_v23  ;;  %v3722_v30 = vpop.f32.mrf.mxu1 }
 0x143   : > { %v3723_v31 = vadd.f32 %v3722_v30, %v3721_v24  ;;  %v3660_v33 = vpop.f32.mrf.mxu0 }
 0x144   : > { %v2274_v37 = vadd.f32 %v3659_v28, %v4968_v59  ;;  %v3724_v34 = vpop.f32.mrf.mxu1 }
 0x145   : > { %v3661_v35 = vpop.f32.mrf.mxu0 }
 0x146   : > { %v5052_v38 = vadd.f32 %v3723_v31, %v2274_v37  ;;  %v3662_v39 = vadd.f32 %v3661_v35, %v3660_v33  ;;  %v3725_v40 = vpop.f32.mrf.mxu1 }
 0x147   : > { %v3726_v42 = vadd.f32 %v3725_v40, %v3724_v34  ;;  %v3663_v43 = vpop.f32.mrf.mxu0 }
 0x148   : > { %v2279_v51 = vadd.f32 %v3662_v39, %v4982_v9  ;;  %v3727_v44 = vpop.f32.mrf.mxu1 }
 0x149   : > { %v3664_v46 = vpop.f32.mrf.mxu0 }
 0x14a   : > { %v5055_v47 = vadd.f32 %v3726_v42, %v2279_v51  ;;  %v3665_v48 = vadd.f32 %v3664_v46, %v3663_v43  ;;  %v3728_v49 = vpop.f32.mrf.mxu1 }
 0x14b   : > { %v3729_v50 = vadd.f32 %v3728_v49, %v3727_v44  ;;  %v3666_v52 = vpop.f32.mrf.mxu0 }
 0x14c   : > { %v2282_v59 = vadd.f32 %v3665_v48, %v4984_v17  ;;  %v3730_v54 = vpop.f32.mrf.mxu1 }
 0x14d   : > { %v3667_v55 = vpop.f32.mrf.mxu0 }
 0x14e   : > { %v5058_v57 = vadd.f32 %v3729_v50, %v2282_v59  ;;  %v3668_v58 = vadd.f32 %v3667_v55, %v3666_v52  ;;  %v3731_v60 = vpop.f32.mrf.mxu1 }
 0x14f   : > { %v3732_v61 = vadd.f32 %v3731_v60, %v3730_v54  ;;  %v3669_v63 = vpop.f32.mrf.mxu0 }
 0x150   : > { %v2287_v9 = vadd.f32 %v3668_v58, %v4998_v32  ;;  %v3733_v0 = vpop.f32.mrf.mxu1 }
 0x151   : > { %v3670_v2 = vpop.f32.mrf.mxu0 }
 0x152   : > { %v5061_v3 = vadd.f32 %v3732_v61, %v2287_v9  ;;  %v3671_v4 = vadd.f32 %v3670_v2, %v3669_v63  ;;  %v3734_v5 = vpop.f32.mrf.mxu1 }
 0x153   : > { %v3735_v6 = vadd.f32 %v3734_v5, %v3733_v0  ;;  %v3672_v7 = vpop.f32.mrf.mxu0 }
 0x154   : > { %v2290_v17 = vadd.f32 %v3671_v4, %v5000_v41  ;;  %v3736_v10 = vpop.f32.mrf.mxu1 }
 0x155   : > { %v3673_v11 = vpop.f32.mrf.mxu0 }
 0x156   : > { %v5064_v12 = vadd.f32 %v3735_v6, %v2290_v17  ;;  %v3674_v13 = vadd.f32 %v3673_v11, %v3672_v7  ;;  %v3737_v14 = vpop.f32.mrf.mxu1 }
 0x157   : > { %v3738_v15 = vadd.f32 %v3737_v14, %v3736_v10  ;;  %v3675_v18 = vpop.f32.mrf.mxu0 }
 0x158   : > { %v2295_v32 = vadd.f32 %v3674_v13, %v5014_v56  ;;  %v3739_v20 = vpop.f32.mrf.mxu1 }
 0x159   : > { %v3676_v21 = vpop.f32.mrf.mxu0 }
 0x15a   : > { %v5067_v22 = vadd.f32 %v3738_v15, %v2295_v32  ;;  %v3677_v23 = vadd.f32 %v3676_v21, %v3675_v18  ;;  %v3740_v29 = vpop.f32.mrf.mxu1 }
 0x15b   : > { %v3741_v24 = vadd.f32 %v3740_v29, %v3739_v20  ;;  %v3678_v26 = vpop.f32.mrf.mxu0 }
 0x15c   : > { %v2298_v41 = vadd.f32 %v3677_v23, %v5016_v1  ;;  %v3742_v28 = vpop.f32.mrf.mxu1 }
 0x15d   : > { %v3679_v30 = vpop.f32.mrf.mxu0 }
 0x15e   : > { %v5070_v31 = vadd.f32 %v3741_v24, %v2298_v41  ;;  %v3680_v33 = vadd.f32 %v3679_v30, %v3678_v26  ;;  %v3743_v37 = vpop.f32.mrf.mxu1 }
 0x15f   : > { %v3744_v34 = vadd.f32 %v3743_v37, %v3742_v28  ;;  %v3681_v35 = vpop.f32.mrf.mxu0 }
 0x160   : > { %v2303_v56 = vadd.f32 %v3680_v33, %v5030_v16  ;;  %v3745_v39 = vpop.f32.mrf.mxu1 }
 0x161   : > { %v3682_v40 = vpop.f32.mrf.mxu0 }
 0x162   : > { %v5073_v42 = vadd.f32 %v3744_v34, %v2303_v56  ;;  %v3683_v43 = vadd.f32 %v3682_v40, %v3681_v35  ;;  %v3746_v51 = vpop.f32.mrf.mxu1 }
 0x163   : > { %v3747_v44 = vadd.f32 %v3746_v51, %v3745_v39  ;;  %v3684_v46 = vpop.f32.mrf.mxu0 }
 0x164   : > { %5334 = vst [vmem:[#allocation7_spill] sm:$0xff] %v5073_v42  ;;  %v2306_v1 = vadd.f32 %v3683_v43, %v5032_v25  ;;  %v3748_v48 = vpop.f32.mrf.mxu1 }
 0x165   : > { %v3685_v49 = vpop.f32.mrf.mxu0 }
 0x166   : > { %v5076_v50 = vadd.f32 %v3747_v44, %v2306_v1  ;;  %v3686_v52 = vadd.f32 %v3685_v49, %v3684_v46  ;;  %v3749_v59 = vpop.f32.mrf.mxu1 }
 0x167   : > { %v3750_v54 = vadd.f32 %v3749_v59, %v3748_v48  ;;  %v3687_v55 = vpop.f32.mrf.mxu0 }
 0x168   : > { %5335 = vst [vmem:[#allocation8_spill] sm:$0xff] %v5076_v50  ;;  %v2311_v16 = vadd.f32 %v3686_v52, %v5034_v36  ;;  %v3751_v58 = vpop.f32.mrf.mxu1 }
 0x169   : > { %v3688_v60 = vpop.f32.mrf.mxu0 }
 0x16a   : > { %v5079_v61 = vadd.f32 %v3750_v54, %v2311_v16  ;;  %v3689_v63 = vadd.f32 %v3688_v60, %v3687_v55  ;;  %v3752_v9 = vpop.f32.mrf.mxu1 }
 0x16b   : > { %v3753_v0 = vadd.f32 %v3752_v9, %v3751_v58  ;;  %v3690_v2 = vpop.f32.mrf.mxu0 }
 0x16c   : > { %5336 = vst [vmem:[#allocation9_spill] sm:$0xff] %v5079_v61  ;;  %v2314_v25 = vadd.f32 %v3689_v63, %v5036_v45  ;;  %v3754_v4 = vpop.f32.mrf.mxu1 }
 0x16d   : > { %v3691_v5 = vpop.f32.mrf.mxu0 }
 0x16e   : > { %v5082_v6 = vadd.f32 %v3753_v0, %v2314_v25  ;;  %v3692_v7 = vadd.f32 %v3691_v5, %v3690_v2  ;;  %v3755_v17 = vpop.f32.mrf.mxu1 }
 0x16f   : > { %v3756_v10 = vadd.f32 %v3755_v17, %v3754_v4  ;;  %v3693_v11 = vpop.f32.mrf.mxu0 }
 0x170   : > { %5337 = vst [vmem:[#allocation10_spill] sm:$0xff] %v5082_v6  ;;  %v2319_v36 = vadd.f32 %v3692_v7, %v5038_v53  ;;  %v3757_v13 = vpop.f32.mrf.mxu1  ;;  %v4195_v53 = vmov 0.0  }
 0x171   : > { %v3694_v14 = vpop.f32.mrf.mxu0  ;;  %240 = vst [vmem:[#allocation3] sm:$0x1] %v4195_v53  ;;  %241 = vst [vmem:[#allocation4] sm:$0x1] %v4195_v53 }
 0x172   : > { %v5085_v15 = vadd.f32 %v3756_v10, %v2319_v36  ;;  %v3695_v18 = vadd.f32 %v3694_v14, %v3693_v11  ;;  %v3758_v32 = vpop.f32.mrf.mxu1 }
 0x173   : > { %v3759_v20 = vadd.f32 %v3758_v32, %v3757_v13  ;;  %v5087_v21 = vpop.f32.mrf.mxu0 }
 0x174   : > { %5338 = vst [vmem:[#allocation11_spill] sm:$0xff] %v5085_v15  ;;  %v2322_v45 = vadd.f32 %v3695_v18, %v5040_v62  ;;  %v5090_v23 = vpop.f32.mrf.mxu1 }
 0x175   : > { %v3777_v29 = vpop.f32.mrf.mxu0 }
 0x176   : > { %v5092_v24 = vadd.f32 %v3759_v20, %v2322_v45  ;;  %v5094_v26 = vpop.f32.mrf.mxu1 }
 0x177   : > { %v3779_v41 = vpop.f32.mrf.mxu0 }
 0x178   : > { %5339 = vst [vmem:[#allocation12_spill] sm:$0xff] %v5092_v24  ;;  %v5096_v28 = vpop.f32.mrf.mxu1 }
 0x179   : > { %v3780_v30 = vpop.f32.mrf.mxu0 }
 0x17a   : > { %v5098_v33 = vpop.f32.mrf.mxu1 }
 0x17b   : > { %v5100_v37 = vpop.f32.mrf.mxu0 }
 0x17c   : > { %v5102_v34 = vpop.f32.mrf.mxu1 }
 0x17d   : > { %v5104_v62 = vpop.f32.mrf.mxu0 }
 0x17e   : > { %v5106_v35 = vpop.f32.mrf.mxu1 }
 0x17f   : > { %v5108_v56 = vpop.f32.mrf.mxu0 }
 0x180   : > { %v5110_v39 = vpop.f32.mrf.mxu1 }
 0x181   : > { %v5112_v40 = vpop.f32.mrf.mxu0 }
 0x182   : > { %v5114_v43 = vpop.f32.mrf.mxu1 }
 0x183   : > { %v5116_v51 = vpop.f32.mrf.mxu0 }
 0x184   : > { %v5118_v44 = vpop.f32.mrf.mxu1 }
 0x185   : > { %v5120_v46 = vpop.f32.mrf.mxu0 }
 0x186   : > { %v5122_v1 = vpop.f32.mrf.mxu1 }
 0x187   : > { %v5124_v48 = vpop.f32.mrf.mxu0 }
 0x188   : > { %v5126_v49 = vpop.f32.mrf.mxu1 }
 0x189   : > { %v5128_v52 = vpop.f32.mrf.mxu0 }
 0x18a   : > { %v5130_v59 = vpop.f32.mrf.mxu1 }
 0x18b   : > { %v5132_v54 = vpop.f32.mrf.mxu0 }
 0x18c   : > { %v5134_v55 = vpop.f32.mrf.mxu1 }
 0x18d   : > { %v5136_v16 = vpop.f32.mrf.mxu0 }
 0x18e   : > { %v5138_v58 = vpop.f32.mrf.mxu1 }
 0x18f   : > { %v5140_v60 = vpop.f32.mrf.mxu0 }
 0x190   : > { %v5142_v63 = vpop.f32.mrf.mxu1 }
 0x191   : > { %v5144_v9 = vpop.f32.mrf.mxu0 }
 0x192   : > { %v5146_v0 = vpop.f32.mrf.mxu1 }
 0x193   : > { %v5148_v2 = vpop.f32.mrf.mxu0 }
 0x194   : > { %v5150_v25 = vpop.f32.mrf.mxu1 }
 0x195   : > { %v5152_v4 = vpop.f32.mrf.mxu0 }
 0x196   : > { %v5154_v5 = vpop.f32.mrf.mxu1 }
 0x197   : > { %v5156_v7 = vpop.f32.mrf.mxu0 }
 0x198   : > { %v5158_v17 = vpop.f32.mrf.mxu1 }
 0x199   : > { %v5160_v10 = vpop.f32.mrf.mxu0 }
 0x19a   : > { %v5162_v11 = vpop.f32.mrf.mxu1 }
 0x19b   : > { %5340 = vst [vmem:[#allocation13_spill] sm:$0xff] %v5162_v11  ;;  %v5164_v36 = vpop.f32.mrf.mxu0 }
 0x19c   : > { %v5166_v13 = vpop.f32.mrf.mxu1 }
 0x19d   : > { %5341 = vst [vmem:[#allocation14_spill] sm:$0xff] %v5166_v13  ;;  %v5168_v14 = vpop.f32.mrf.mxu0 }
 0x19e   : > { %v5170_v18 = vpop.f32.mrf.mxu1 }
 0x19f   : > { %5342 = vst [vmem:[#allocation15_spill] sm:$0xff] %v5170_v18  ;;  %v5172_v32 = vpop.f32.mrf.mxu0 }
 0x1a0   : > { %5343 = vst [vmem:[#allocation16_spill] sm:$0xff] %v5172_v32  ;;  %v5174_v20 = vpop.f32.mrf.mxu1 }
 0x1a1   : > { %5344 = vst [vmem:[#allocation17_spill] sm:$0xff] %v5174_v20  ;;  %v5176_v45 = vpop.f32.mrf.mxu0 }
 0x1a2   : > { %5345 = vst [vmem:[#allocation18_spill] sm:$0xff] %v5176_v45  ;;  %v5178_v53 = vpop.f32.mrf.mxu1 }
 0x1a3   : > { %5346 = vst [vmem:[#allocation19_spill] sm:$0xff] %v5178_v53  ;;  %v5180_v24 = vpop.f32.mrf.mxu0 }
 0x1a4   : > { %5347 = vst [vmem:[#allocation20_spill] sm:$0xff] %v5180_v24  ;;  %v5182_v15 = vpop.f32.mrf.mxu1 }
 0x1a5   : > { %5348 = vst [vmem:[#allocation21_spill] sm:$0xff] %v5182_v15  ;;  %v5184_v6 = vpop.f32.mrf.mxu0  ;;  %v3778_v15 = vadd.f32 %v3777_v29, %v5087_v21 }
 0x1a6   : > { %5349 = vst [vmem:[#allocation22_spill] sm:$0xff] %v5184_v6  ;;  %v5186_v61 = vpop.f32.mrf.mxu1 }
 0x1a7   : > { %5350 = vst [vmem:[#allocation23_spill] sm:$0xff] %v5186_v61  ;;  %v5188_v50 = vpop.f32.mrf.mxu0 }
 0x1a8   : > { %5351 = vst [vmem:[#allocation24_spill] sm:$0xff] %v5188_v50  ;;  %v5190_v13 = vpop.f32.mrf.mxu1  ;;  %v3781_v50 = vadd.f32 %v3780_v30, %v3779_v41  ;;  %v3845_v30 = vadd.f32 %v5098_v33, %v5096_v28 }
 0x1a9   : > { %5352 = vst [vmem:[#allocation25_spill] sm:$0xff] %v5190_v13  ;;  %v5192_v18 = vpop.f32.mrf.mxu0 }
 0x1aa   : > { %5353 = vst [vmem:[#allocation26_spill] sm:$0xff] %v5192_v18  ;;  %v5194_v32 = vpop.f32.mrf.mxu1  ;;  %v2457_v18 = vadd.f32 %v3778_v15, %v5043_v8  ;;  %v2460_v21 = vadd.f32 %v3781_v50, %v5046_v19  ;;  %v3787_v19 = vadd.f32 %v5112_v40, %v5108_v56 }
 0x1ab   : > { %5354 = vst [vmem:[#allocation27_spill] sm:$0xff] %v5194_v32  ;;  %v5196_v20 = vpop.f32.mrf.mxu0 }
 0x1ac   : > { %5355 = vst [vmem:[#allocation28_spill] sm:$0xff] %v5196_v20  ;;  %v5198_v45 = vpop.f32.mrf.mxu1  ;;  %v2557_v42 = vadd.f32 %v3845_v30, %v2460_v21 }
 0x1ad   : > { %5356 = vst [vmem:[#allocation29_spill] sm:$0xff] %v5198_v45  ;;  %v5200_v53 = vpop.f32.mrf.mxu0  ;;  %v3842_v45 = vadd.f32 %v5094_v26, %v5090_v23 }
 0x1ae   : > { %5357 = vst [vmem:[#allocation30_spill] sm:$0xff] %v5200_v53  ;;  %v5203_v24 = vpop.f32.mrf.mxu1 }
 0x1af   : > { %5358 = vst [vmem:[#allocation31_spill] sm:$0xff] %v5203_v24  ;;  %v5205_v6 = vpop.f32.mrf.mxu0  ;;  %v2554_v24 = vadd.f32 %v3842_v45, %v2457_v18 }
 0x1b0   : > { %5359 = vst [vmem:[#allocation32_spill] sm:$0xff] %v5205_v6  ;;  %v5207_v61 = vpop.f32.mrf.mxu1  ;;  %v3784_v6 = vadd.f32 %v5104_v62, %v5100_v37  ;;  %v3848_v62 = vadd.f32 %v5106_v35, %v5102_v34 }
 0x1b1   : > { %5360 = vst [vmem:[#allocation33_spill] sm:$0xff] %v5207_v61  ;;  %v5209_v13 = vpop.f32.mrf.mxu0 }
 0x1b2   : > { %5361 = vst [vmem:[#allocation34_spill] sm:$0xff] %v5209_v13  ;;  %v5212_v32 = vpop.f32.mrf.mxu1  ;;  %v2465_v23 = vadd.f32 %v3784_v6, %v5049_v27  ;;  %v2468_v27 = vadd.f32 %v3787_v19, %v5052_v38 }
 0x1b3   : > { %5362 = vst [vmem:[#allocation35_spill] sm:$0xff] %v5212_v32  ;;  %v3904_v20 = vpop.f32.mrf.mxu0 }
 0x1b4   : > { %v3968_v53 = vpop.f32.mrf.mxu1  ;;  %v2562_v45 = vadd.f32 %v3848_v62, %v2465_v23 }
 0x1b5   : > { %v3905_v29 = vpop.f32.mrf.mxu0 }
 0x1b6   : > { %v3906_v61 = vadd.f32 %v3905_v29, %v3904_v20  ;;  %v3969_v41 = vpop.f32.mrf.mxu1 }
 0x1b7   : > { %v3907_v8 = vpop.f32.mrf.mxu0  ;;  %v3970_v32 = vadd.f32 %v3969_v41, %v3968_v53 }
 0x1b8   : > { %v2651_v15 = vadd.f32 %v3906_v61, %v2554_v24  ;;  %v3971_v13 = vpop.f32.mrf.mxu1  ;;  %v3790_v24 = vadd.f32 %v5120_v46, %v5116_v51  ;;  %v3793_v46 = vadd.f32 %v5128_v52, %v5124_v48  ;;  %v3796_v52 = vadd.f32 %v5136_v16, %v5132_v54 }
 0x1b9   : > { %v3908_v11 = vpop.f32.mrf.mxu0 }
 0x1ba   : > { %v2748_v50 = vadd.f32 %v3970_v32, %v2651_v15  ;;  %v3909_v26 = vadd.f32 %v3908_v11, %v3907_v8  ;;  %v3972_v18 = vpop.f32.mrf.mxu1  ;;  %v3851_v11 = vadd.f32 %v5114_v43, %v5110_v39  ;;  %v2473_v51 = vadd.f32 %v3790_v24, %v5055_v47 }
 0x1bb   : > { %v3910_v37 = vpop.f32.mrf.mxu0  ;;  %v3973_v33 = vadd.f32 %v3972_v18, %v3971_v13  ;;  %v3854_v39 = vadd.f32 %v5122_v1, %v5118_v44  ;;  %v3857_v44 = vadd.f32 %v5130_v59, %v5126_v49  ;;  %v2481_v54 = vadd.f32 %v3796_v52, %v5061_v3 }
 0x1bc   : > { %2811 = vst [vmem:[#allocation2 + $0x30] sm:$0xff] %v2748_v50  ;;  %v2654_v28 = vadd.f32 %v3909_v26, %v2557_v42  ;;  %v3974_v61 = vpop.f32.mrf.mxu1  ;;  %v2852_v32 = vmul.f32 %v2748_v50, %v2748_v50  ;;  %v2565_v29 = vadd.f32 %v3851_v11, %v2468_v27  ;;  %v3860_v49 = vadd.f32 %v5138_v58, %v5134_v55 }
 0x1bd   : > { %v3911_v20 = vpop.f32.mrf.mxu0  ;;  %v2570_v47 = vadd.f32 %v3854_v39, %v2473_v51  ;;  %v3863_v55 = vadd.f32 %v5146_v0, %v5142_v63  ;;  %v3866_v63 = vadd.f32 %v5154_v5, %v5150_v25  ;;  %v5363_v25 = vld [vmem:[#allocation13_spill] sm:$0xff] }
 0x1be   : > { %v2751_v6 = vadd.f32 %v3973_v33, %v2654_v28  ;;  %v3912_v56 = vadd.f32 %v3911_v20, %v3910_v37  ;;  %v3975_v40 = vpop.f32.mrf.mxu1  ;;  %v2476_v37 = vadd.f32 %v3793_v46, %v5058_v57  ;;  %v3799_v57 = vadd.f32 %v5144_v9, %v5140_v60 }
 0x1bf   : > { %v3913_v53 = vpop.f32.mrf.mxu0  ;;  %v3976_v13 = vadd.f32 %v3975_v40, %v3974_v61  ;;  %v3802_v60 = vadd.f32 %v5152_v4, %v5148_v2  ;;  %v2578_v9 = vadd.f32 %v3860_v49, %v2481_v54  ;;  %v3805_v4 = vadd.f32 %v5160_v10, %v5156_v7 }
 0x1c0   : > { %2812 = vst [vmem:[#allocation2] sm:$0xff] %v2751_v6  ;;  %v2828_v34 = vadd.f32 %v2751_v6, %v2748_v50  ;;  %v2853_v42 = vmul.f32 %v2751_v6, %v2751_v6  ;;  %v2659_v35 = vadd.f32 %v3912_v56, %v2562_v45  ;;  %v3977_v21 = vpop.f32.mrf.mxu1  ;;  %v2573_v56 = vadd.f32 %v3857_v44, %v2476_v37 }
 0x1c1   : > { %v3914_v38 = vpop.f32.mrf.mxu0  ;;  %v2484_v51 = vadd.f32 %v3799_v57, %v5064_v12  ;;  %v2492_v7 = vadd.f32 %v3805_v4, %v5070_v31  ;;  %v3869_v5 = vadd.f32 %v5363_v25, %v5158_v17  ;;  %v5364_v57 = vld [vmem:[#allocation7_spill] sm:$0xff] }
 0x1c2   : > { %v2868_v41 = vadd.f32 %v2853_v42, %v2852_v32  ;;  %v2756_v30 = vadd.f32 %v3976_v13, %v2659_v35  ;;  %v3915_v8 = vadd.f32 %v3914_v38, %v3913_v53  ;;  %v3978_v15 = vpop.f32.mrf.mxu1  ;;  %v5368_v17 = vld [vmem:[#allocation15_spill] sm:$0xff] }
 0x1c3   : > { %v3916_v43 = vpop.f32.mrf.mxu0  ;;  %v3979_v26 = vadd.f32 %v3978_v15, %v3977_v21  ;;  %v2581_v12 = vadd.f32 %v3863_v55, %v2484_v51 }
 0x1c4   : > { %2813 = vst [vmem:[#allocation2 + $0x58] sm:$0xff] %v2756_v30  ;;  %v2829_v23 = vadd.f32 %v2828_v34, %v2756_v30  ;;  %v2854_v19 = vmul.f32 %v2756_v30, %v2756_v30  ;;  %v2662_v50 = vadd.f32 %v3915_v8, %v2565_v29  ;;  %v3980_v18 = vpop.f32.mrf.mxu1 }
 0x1c5   : > { %v3917_v48 = vpop.f32.mrf.mxu0 }
 0x1c6   : > { %v2869_v62 = vadd.f32 %v2868_v41, %v2854_v19  ;;  %v2759_v28 = vadd.f32 %v3979_v26, %v2662_v50  ;;  %v3918_v33 = vadd.f32 %v3917_v48, %v3916_v43  ;;  %v3981_v61 = vpop.f32.mrf.mxu1 }
 0x1c7   : > { %v3919_v1 = vpop.f32.mrf.mxu0  ;;  %v3982_v27 = vadd.f32 %v3981_v61, %v3980_v18 }
 0x1c8   : > { %2814 = vst [vmem:[#allocation2 + $0x18] sm:$0xff] %v2759_v28  ;;  %v2830_v24 = vadd.f32 %v2829_v23, %v2759_v28  ;;  %v2855_v20 = vmul.f32 %v2759_v28, %v2759_v28  ;;  %v2667_v45 = vadd.f32 %v3918_v33, %v2570_v47  ;;  %v3983_v6 = vpop.f32.mrf.mxu1  ;;  %v2489_v23 = vadd.f32 %v3802_v60, %v5067_v22 }
 0x1c9   : > { %v3920_v40 = vpop.f32.mrf.mxu0  ;;  %v3808_v22 = vadd.f32 %v5168_v14, %v5164_v36  ;;  %v5365_v36 = vld [vmem:[#allocation16_spill] sm:$0xff]  ;;  %v5366_v14 = vld [vmem:[#allocation18_spill] sm:$0xff] }
 0x1ca   : > { %v2870_v16 = vadd.f32 %v2869_v62, %v2855_v20  ;;  %v2764_v11 = vadd.f32 %v3982_v27, %v2667_v45  ;;  %v3921_v32 = vadd.f32 %v3920_v40, %v3919_v1  ;;  %v3984_v53 = vpop.f32.mrf.mxu1  ;;  %v2586_v28 = vadd.f32 %v3866_v63, %v2489_v23  ;;  %v5374_v63 = vld [vmem:[#allocation24_spill] sm:$0xff] }
 0x1cb   : > { %v3922_v59 = vpop.f32.mrf.mxu0  ;;  %v3985_v13 = vadd.f32 %v3984_v53, %v3983_v6  ;;  %v2497_v40 = vadd.f32 %v3808_v22, %v5364_v57  ;;  %v3811_v54 = vadd.f32 %v5366_v14, %v5365_v36 }
 0x1cc   : > { %2815 = vst [vmem:[#allocation2 + $0x50] sm:$0xff] %v2764_v11  ;;  %v2831_v34 = vadd.f32 %v2830_v24, %v2764_v11  ;;  %v2856_v42 = vmul.f32 %v2764_v11, %v2764_v11  ;;  %v2670_v35 = vadd.f32 %v3921_v32, %v2573_v56  ;;  %v3986_v21 = vpop.f32.mrf.mxu1 }
 0x1cd   : > { %v3923_v3 = vpop.f32.mrf.mxu0 }
 0x1ce   : > { %v2871_v46 = vadd.f32 %v2870_v16, %v2856_v42  ;;  %v2767_v38 = vadd.f32 %v3985_v13, %v2670_v35  ;;  %v3924_v29 = vadd.f32 %v3923_v3, %v3922_v59  ;;  %v3987_v41 = vpop.f32.mrf.mxu1  ;;  %v2589_v16 = vadd.f32 %v3869_v5, %v2492_v7  ;;  %v5367_v59 = vld [vmem:[#allocation14_spill] sm:$0xff]  ;;  %v5377_v7 = vld [vmem:[#allocation21_spill] sm:$0xff] }
 0x1cf   : > { %v3925_v58 = vpop.f32.mrf.mxu0  ;;  %v3988_v39 = vadd.f32 %v3987_v41, %v3986_v21  ;;  %v5371_v41 = vld [vmem:[#allocation22_spill] sm:$0xff] }
 0x1d0   : > { %2816 = vst [vmem:[#allocation2 + $0x68] sm:$0xff] %v2767_v38  ;;  %v2832_v30 = vadd.f32 %v2831_v34, %v2767_v38  ;;  %v2857_v8 = vmul.f32 %v2767_v38, %v2767_v38  ;;  %v2675_v15 = vadd.f32 %v3924_v29, %v2578_v9  ;;  %v3989_v43 = vpop.f32.mrf.mxu1  ;;  %v3872_v34 = vadd.f32 %v5368_v17, %v5367_v59  ;;  %v5369_v9 = vld [vmem:[#allocation8_spill] sm:$0xff] }
 0x1d1   : > { %v3926_v2 = vpop.f32.mrf.mxu0  ;;  %v5370_v29 = vld [vmem:[#allocation20_spill] sm:$0xff] }
 0x1d2   : > { %v2872_v19 = vadd.f32 %v2871_v46, %v2857_v8  ;;  %v2772_v50 = vadd.f32 %v3988_v39, %v2675_v15  ;;  %v3927_v26 = vadd.f32 %v3926_v2, %v3925_v58  ;;  %v3990_v18 = vpop.f32.mrf.mxu1  ;;  %v2594_v3 = vadd.f32 %v3872_v34, %v2497_v40  ;;  %v5372_v39 = vld [vmem:[#allocation17_spill] sm:$0xff] }
 0x1d3   : > { %v3928_v0 = vpop.f32.mrf.mxu0  ;;  %v3991_v52 = vadd.f32 %v3990_v18, %v3989_v43  ;;  %v2500_v46 = vadd.f32 %v3811_v54, %v5369_v9  ;;  %v3814_v55 = vadd.f32 %v5371_v41, %v5370_v29  ;;  %v5373_v43 = vld [vmem:[#allocation19_spill] sm:$0xff]  ;;  %v5386_v9 = vld [vmem:[#allocation34_spill] sm:$0xff] }
 0x1d4   : > { %2817 = vst [vmem:[#allocation2 + $0x8] sm:$0xff] %v2772_v50  ;;  %v2833_v47 = vadd.f32 %v2832_v30, %v2772_v50  ;;  %v2858_v37 = vmul.f32 %v2772_v50, %v2772_v50  ;;  %v2678_v48 = vadd.f32 %v3927_v26, %v2581_v12  ;;  %v3992_v62 = vpop.f32.mrf.mxu1  ;;  %v3875_v12 = vadd.f32 %v5373_v43, %v5372_v39 }
 0x1d5   : > { %v3929_v33 = vpop.f32.mrf.mxu0 }
 0x1d6   : > { %v2873_v10 = vadd.f32 %v2872_v19, %v2858_v37  ;;  %v2775_v61 = vadd.f32 %v3991_v52, %v2678_v48  ;;  %v3930_v44 = vadd.f32 %v3929_v33, %v3928_v0  ;;  %v3993_v1 = vpop.f32.mrf.mxu1  ;;  %v2597_v18 = vadd.f32 %v3875_v12, %v2500_v46  ;;  %v5375_v0 = vld [vmem:[#allocation26_spill] sm:$0xff]  ;;  %v5376_v48 = vld [vmem:[#allocation9_spill] sm:$0xff] }
 0x1d7   : > { %v3931_v24 = vpop.f32.mrf.mxu0  ;;  %v3994_v6 = vadd.f32 %v3993_v1, %v3992_v62  ;;  %v2505_v52 = vadd.f32 %v3814_v55, %v5376_v48  ;;  %v5391_v48 = vld [vmem:[#allocation35_spill] sm:$0xff] }
 0x1d8   : > { %2818 = vst [vmem:[#allocation2 + $0x48] sm:$0xff] %v2775_v61  ;;  %v2834_v20 = vadd.f32 %v2833_v47, %v2775_v61  ;;  %v2859_v45 = vmul.f32 %v2775_v61, %v2775_v61  ;;  %v2683_v27 = vadd.f32 %v3930_v44, %v2586_v28  ;;  %v3995_v56 = vpop.f32.mrf.mxu1  ;;  %v3817_v47 = vadd.f32 %v5375_v0, %v5374_v63 }
 0x1d9   : > { %v3932_v31 = vpop.f32.mrf.mxu0 }
 0x1da   : > { %v2874_v11 = vadd.f32 %v2873_v10, %v2859_v45  ;;  %v2780_v32 = vadd.f32 %v3994_v6, %v2683_v27  ;;  %v3933_v53 = vadd.f32 %v3932_v31, %v3931_v24  ;;  %v3996_v49 = vpop.f32.mrf.mxu1  ;;  %v5378_v10 = vld [vmem:[#allocation23_spill] sm:$0xff]  ;;  %v5379_v45 = vld [vmem:[#allocation10_spill] sm:$0xff]  ;;  %v5380_v6 = vld [vmem:[#allocation28_spill] sm:$0xff] }
 0x1db   : > { %v3934_v42 = vpop.f32.mrf.mxu0  ;;  %v3997_v51 = vadd.f32 %v3996_v49, %v3995_v56  ;;  %v3878_v61 = vadd.f32 %v5378_v10, %v5377_v7  ;;  %v2508_v27 = vadd.f32 %v3817_v47, %v5379_v45  ;;  %v5381_v56 = vld [vmem:[#allocation30_spill] sm:$0xff] }
 0x1dc   : > { %2819 = vst [vmem:[#allocation2 + $0x40] sm:$0xff] %v2780_v32  ;;  %v2835_v35 = vadd.f32 %v2834_v20, %v2780_v32  ;;  %v2860_v13 = vmul.f32 %v2780_v32, %v2780_v32  ;;  %v2686_v21 = vadd.f32 %v3933_v53, %v2589_v16  ;;  %v3998_v60 = vpop.f32.mrf.mxu1  ;;  %v3820_v57 = vadd.f32 %v5381_v56, %v5380_v6  ;;  %v5383_v32 = vld [vmem:[#allocation27_spill] sm:$0xff] }
 0x1dd   : > { %v3935_v38 = vpop.f32.mrf.mxu0  ;;  %v2602_v36 = vadd.f32 %v3878_v61, %v2505_v52 }
 0x1de   : > { %v2875_v58 = vadd.f32 %v2874_v11, %v2860_v13  ;;  %v2783_v30 = vadd.f32 %v3997_v51, %v2686_v21  ;;  %v3936_v8 = vadd.f32 %v3935_v38, %v3934_v42  ;;  %v3999_v15 = vpop.f32.mrf.mxu1  ;;  %v5382_v11 = vld [vmem:[#allocation25_spill] sm:$0xff]  ;;  %v5384_v21 = vld [vmem:[#allocation11_spill] sm:$0xff] }
 0x1df   : > { %v3937_v23 = vpop.f32.mrf.mxu0  ;;  %v4000_v50 = vadd.f32 %v3999_v15, %v3998_v60  ;;  %v3881_v53 = vadd.f32 %v5383_v32, %v5382_v11  ;;  %v2513_v51 = vadd.f32 %v3820_v57, %v5384_v21 }
 0x1e0   : > { %2820 = vst [vmem:[#allocation2 + $0x20] sm:$0xff] %v2783_v30  ;;  %v2836_v2 = vadd.f32 %v2835_v35, %v2783_v30  ;;  %v2861_v4 = vmul.f32 %v2783_v30, %v2783_v30  ;;  %v2691_v19 = vadd.f32 %v3936_v8, %v2594_v3  ;;  %v4001_v26 = vpop.f32.mrf.mxu1  ;;  %v5385_v3 = vld [vmem:[#allocation32_spill] sm:$0xff]  ;;  %v5388_v30 = vld [vmem:[#allocation31_spill] sm:$0xff] }
 0x1e1   : > { %v3938_v37 = vpop.f32.mrf.mxu0  ;;  %v2605_v13 = vadd.f32 %v3881_v53, %v2508_v27  ;;  %v3823_v46 = vadd.f32 %v5386_v9, %v5385_v3 }
 0x1e2   : > { %v2876_v62 = vadd.f32 %v2875_v58, %v2861_v4  ;;  %v2788_v28 = vadd.f32 %v4000_v50, %v2691_v19  ;;  %v3939_v22 = vadd.f32 %v3938_v37, %v3937_v23  ;;  %v4002_v33 = vpop.f32.mrf.mxu1  ;;  %v5387_v58 = vld [vmem:[#allocation29_spill] sm:$0xff]  ;;  %v5389_v50 = vld [vmem:[#allocation12_spill] sm:$0xff] }
 0x1e3   : > { %v3940_v44 = vpop.f32.mrf.mxu0  ;;  %v4003_v24 = vadd.f32 %v4002_v33, %v4001_v26  ;;  %v3884_v8 = vadd.f32 %v5388_v30, %v5387_v58  ;;  %v2516_v26 = vadd.f32 %v3823_v46, %v5389_v50  ;;  %v5390_v37 = vld [vmem:[#allocation33_spill] sm:$0xff] }
 0x1e4   : > { %2821 = vst [vmem:[#allocation2 + $0x10] sm:$0xff] %v2788_v28  ;;  %v2837_v1 = vadd.f32 %v2836_v2, %v2788_v28  ;;  %v2862_v25 = vmul.f32 %v2788_v28, %v2788_v28  ;;  %v2694_v5 = vadd.f32 %v3939_v22, %v2597_v18  ;;  %v4004_v20 = vpop.f32.mrf.mxu1  ;;  %v3887_v52 = vadd.f32 %v5391_v48, %v5390_v37 }
 0x1e5   : > { %v3941_v40 = vpop.f32.mrf.mxu0  ;;  %v2610_v4 = vadd.f32 %v3884_v8, %v2513_v51 }
 0x1e6   : > { %v2877_v14 = vadd.f32 %v2876_v62, %v2862_v25  ;;  %v2791_v54 = vadd.f32 %v4003_v24, %v2694_v5  ;;  %v3942_v31 = vadd.f32 %v3941_v40, %v3940_v44  ;;  %v4005_v16 = vpop.f32.mrf.mxu1  ;;  %v2613_v44 = vadd.f32 %v3887_v52, %v2516_v26 }
 0x1e7   : > { %v3943_v49 = vpop.f32.mrf.mxu0  ;;  %v4006_v42 = vadd.f32 %v4005_v16, %v4004_v20 }
 0x1e8   : > { %2822 = vst [vmem:[#allocation2 + $0x38] sm:$0xff] %v2791_v54  ;;  %v2838_v59 = vadd.f32 %v2837_v1, %v2791_v54  ;;  %v2863_v17 = vmul.f32 %v2791_v54, %v2791_v54  ;;  %v2699_v34 = vadd.f32 %v3942_v31, %v2602_v36  ;;  %v4007_v35 = vpop.f32.mrf.mxu1 }
 0x1e9   : > { %v3944_v60 = vpop.f32.mrf.mxu0 }
 0x1ea   : > { %v2878_v38 = vadd.f32 %v2877_v14, %v2863_v17  ;;  %v2796_v29 = vadd.f32 %v4006_v42, %v2699_v34  ;;  %v3945_v41 = vadd.f32 %v3944_v60, %v3943_v49  ;;  %v4008_v55 = vpop.f32.mrf.mxu1  ;;  %v2827_v34 = vld [vmem:[#allocation3] sm:$0x1] }
 0x1eb   : > { %v3946_v15 = vpop.f32.mrf.mxu0  ;;  %v4009_v23 = vadd.f32 %v4008_v55, %v4007_v35 }
 0x1ec   : > { %2823 = vst [vmem:[#allocation2 + $0x60] sm:$0xff] %v2796_v29  ;;  %v2839_v39 = vadd.f32 %v2838_v59, %v2796_v29  ;;  %v2864_v43 = vmul.f32 %v2796_v29, %v2796_v29  ;;  %v2702_v12 = vadd.f32 %v3945_v41, %v2605_v13  ;;  %v4010_v2 = vpop.f32.mrf.mxu1  ;;  %v2851_v13 = vld [vmem:[#allocation4] sm:$0x1] }
 0x1ed   : > { %v3947_v19 = vpop.f32.mrf.mxu0 }
 0x1ee   : > { %v2879_v18 = vadd.f32 %v2878_v38, %v2864_v43  ;;  %v2799_v63 = vadd.f32 %v4009_v23, %v2702_v12  ;;  %v3948_v0 = vadd.f32 %v3947_v19, %v3946_v15  ;;  %v4011_v47 = vpop.f32.mrf.mxu1 }
 0x1ef   : > { %v3949_v62 = vpop.f32.mrf.mxu0  ;;  %v4012_v7 = vadd.f32 %v4011_v47, %v4010_v2 }
 0x1f0   : > { %2824 = vst [vmem:[#allocation2 + $0x70] sm:$0xff] %v2799_v63  ;;  %v2840_v28 = vadd.f32 %v2839_v39, %v2799_v63  ;;  %v2865_v22 = vmul.f32 %v2799_v63, %v2799_v63  ;;  %v2707_v33 = vadd.f32 %v3948_v0, %v2610_v4  ;;  %v4013_v10 = vpop.f32.mrf.mxu1 }
 0x1f1   : > { %v3950_v61 = vpop.f32.mrf.mxu0 }
 0x1f2   : > { %v2880_v1 = vadd.f32 %v2879_v18, %v2865_v22  ;;  %v2804_v25 = vadd.f32 %v4012_v7, %v2707_v33  ;;  %v3951_v5 = vadd.f32 %v3950_v61, %v3949_v62  ;;  %v4014_v24 = vpop.f32.mrf.mxu1 }
 0x1f3   : > { %v4015_v6 = vadd.f32 %v4014_v24, %v4013_v10 }
 0x1f4   : > { %2825 = vst [vmem:[#allocation2 + $0x78] sm:$0xff] %v2804_v25  ;;  %v2841_v20 = vadd.f32 %v2840_v28, %v2804_v25  ;;  %v2866_v45 = vmul.f32 %v2804_v25, %v2804_v25  ;;  %v2710_v27 = vadd.f32 %v3951_v5, %v2613_v44 }
 0x1f6   : > { %v2881_v56 = vadd.f32 %v2880_v1, %v2866_v45  ;;  %v2807_v57 = vadd.f32 %v4015_v6, %v2710_v27 }
 0x1f8   : > { %2826 = vst [vmem:[#allocation2 + $0x28] sm:$0xff] %v2807_v57  ;;  %v2842_v40 = vadd.f32 %v2841_v20, %v2807_v57  ;;  %v2867_v36 = vmul.f32 %v2807_v57, %v2807_v57 }
 0x1fa   : > { %v2843_v14 = vrot.slane %v2842_v40, 4  ;;  %v2882_v54 = vadd.f32 %v2881_v56, %v2867_v36 }
 0x1fc   : > { %v2844_v31 = vadd.f32 %v2843_v14, %v2842_v40  ;;  %v2883_v16 = vrot.slane %v2882_v54, 4 }
 0x1fe   : > { %v2845_v11 = vrot.slane %v2844_v31, 2  ;;  %v2884_v32 = vadd.f32 %v2883_v16, %v2882_v54 }
 0x200   : > { %v2846_v53 = vadd.f32 %v2845_v11, %v2844_v31  ;;  %v2885_v49 = vrot.slane %v2884_v32, 2 }
 0x202   : > { %v2847_v59 = vrot.slane %v2846_v53, 1  ;;  %v2886_v17 = vadd.f32 %v2885_v49, %v2884_v32 }
 0x204   : > { %v2848_v42 = vadd.f32 %v2847_v59, %v2846_v53  ;;  %v2887_v35 = vrot.slane %v2886_v17, 1 }
 0x206   : > { %v2849_v21 = vadd.f32 %v2848_v42, %v2827_v34  ;;  %v2888_v51 = vadd.f32 %v2887_v35, %v2886_v17 }
 0x208   : > { %2850 = vst [vmem:[#allocation3] sm:$0x1] %v2849_v21  ;;  %v2889_v60 = vadd.f32 %v2888_v51, %v2851_v13 }
 0x20a   : > { %2890 = vst [vmem:[#allocation4] sm:$0x1] %v2889_v60 }
 0x20b PF: > { %p3418_p5 = scmp.ne.s32.totalorder %s4185_s15, 1 }
 0x20d   : > { %2894 = sbr.rel (%p3418_p5) target bundleno = 588 (0x24c), region = 48 }
 0x212   : > { %v2899_v3 = vld [vmem:[#allocation3] sm:$0x1]  ;;  %v2901_v9 = vld [vmem:[#allocation4] sm:$0x1]  ;;  %v2916_v23 = vld [vmem:[#allocation2 + $0x30] sm:$0xff] }
 0x213   : > { %v2900_v46 = vmul.f32 0.0078125, %v2899_v3  ;;  %v2902_v38 = vmul.f32 0.0078125, %v2901_v9  ;;  %v2906_v30 = vld [vmem:[%s5331_s2] sm:$0x1]  ;;  %v2918_v4 = vld [vmem:[#allocation2 + $0x58] sm:$0xff]  ;;  %v2920_v50 = vld [vmem:[#allocation2 + $0x50] sm:$0xff] }
 0x214   : > { %v2911_v39 = vld [vmem:[%s5332_s3] sm:$0x1]  ;;  %v2919_v19 = vld [vmem:[#allocation2 + $0x18] sm:$0xff]  ;;  %v2921_v26 = vld [vmem:[#allocation2 + $0x68] sm:$0xff] }
 0x215   : > { %v2903_v29 = vmul.f32 %v2900_v46, %v2900_v46  ;;  %v2917_v2 = vld [vmem:[#allocation2] sm:$0xff]  ;;  %v2922_v18 = vld [vmem:[#allocation2 + $0x8] sm:$0xff]  ;;  %v2926_v37 = vld [vmem:[#allocation2 + $0x10] sm:$0xff] }
 0x216   : > { %v2923_v63 = vld [vmem:[#allocation2 + $0x48] sm:$0xff]  ;;  %v2924_v0 = vld [vmem:[#allocation2 + $0x40] sm:$0xff]  ;;  %v2927_v52 = vld [vmem:[#allocation2 + $0x38] sm:$0xff] }
 0x217   : > { %v2904_v41 = vsub.f32 %v2902_v38, %v2903_v29  ;;  %v2925_v47 = vld [vmem:[#allocation2 + $0x20] sm:$0xff]  ;;  %v2929_v10 = vld [vmem:[#allocation2 + $0x70] sm:$0xff]  ;;  %v2930_v61 = vld [vmem:[#allocation2 + $0x78] sm:$0xff] }
 0x218   : > { %v2928_v62 = vld [vmem:[#allocation2 + $0x60] sm:$0xff]  ;;  %v2931_v44 = vld [vmem:[#allocation2 + $0x28] sm:$0xff] }
 0x219   : > { %v2905_v55 = vmax.f32 %v2904_v41, 0.0 }
 0x21b   : > { %v2907_v58 = vadd.f32 1e-05, %v2905_v55 }
 0x21d   : > { %4169 = vrsqrt.f32 %v2907_v58 }
 0x22a   : > { %v4170_v8 = vpop.eup %4169 }
 0x22b   : > { %v2909_v15 = vmul.f32 %v4170_v8, %v2906_v30 }
 0x22d   : > { %2910 = vst [vmem:[#allocation5] sm:$0x1] %v2909_v15  ;;  %v2912_v43 = vmul.f32 %v2909_v15, %v2900_v46 }
 0x22f   : > { %v2913_v12 = vsub.f32 %v2911_v39, %v2912_v43 }
 0x231   : > { %2914 = vst [vmem:[#allocation6] sm:$0x1] %v2913_v12 }
 0x234   : > { %v3419_v48 = vld [vmem:[#allocation5] ss:$0 sm:$0xff] }
 0x235   : > { %v2939_v28 = vmul.f32 %v3419_v48, %v2916_v23  ;;  %v2940_v22 = vmul.f32 %v3419_v48, %v2917_v2  ;;  %v2941_v33 = vmul.f32 %v3419_v48, %v2918_v4  ;;  %v2942_v7 = vmul.f32 %v3419_v48, %v2919_v19 }
 0x236   : > { %v2943_v1 = vmul.f32 %v3419_v48, %v2920_v50  ;;  %v2944_v25 = vmul.f32 %v3419_v48, %v2921_v26  ;;  %v2945_v5 = vmul.f32 %v3419_v48, %v2922_v18  ;;  %v2946_v24 = vmul.f32 %v3419_v48, %v2923_v63 }
 0x237   : > { %v2947_v20 = vmul.f32 %v3419_v48, %v2924_v0  ;;  %v2948_v45 = vmul.f32 %v3419_v48, %v2925_v47  ;;  %v2949_v27 = vmul.f32 %v3419_v48, %v2926_v37  ;;  %v2950_v6 = vmul.f32 %v3419_v48, %v2927_v52 }
 0x238   : > { %v3420_v56 = vld [vmem:[#allocation6] ss:$0 sm:$0xff]  ;;  %v2951_v57 = vmul.f32 %v3419_v48, %v2928_v62  ;;  %v2952_v40 = vmul.f32 %v3419_v48, %v2929_v10  ;;  %v2953_v36 = vmul.f32 %v3419_v48, %v2930_v61  ;;  %v2954_v14 = vmul.f32 %v3419_v48, %v2931_v44 }
 0x239   : > { %v2962_v54 = vadd.f32 %v3420_v56, %v2939_v28  ;;  %v2963_v31 = vadd.f32 %v3420_v56, %v2940_v22  ;;  %v2964_v16 = vadd.f32 %v3420_v56, %v2941_v33  ;;  %v2965_v11 = vadd.f32 %v3420_v56, %v2942_v7 }
 0x23a   : > { %v2966_v32 = vadd.f32 %v3420_v56, %v2943_v1  ;;  %v2967_v53 = vadd.f32 %v3420_v56, %v2944_v25  ;;  %v2968_v49 = vadd.f32 %v3420_v56, %v2945_v5  ;;  %v2969_v59 = vadd.f32 %v3420_v56, %v2946_v24 }
 0x23b   : > { %v2978_v17 = vmul.f32 0.1, %v2962_v54  ;;  %v2979_v34 = vmul.f32 0.1, %v2963_v31  ;;  %v2980_v42 = vmul.f32 0.1, %v2964_v16  ;;  %v2970_v35 = vadd.f32 %v3420_v56, %v2947_v20 }
 0x23c   : > { %v2981_v13 = vmul.f32 0.1, %v2965_v11  ;;  %v2982_v21 = vmul.f32 0.1, %v2966_v32  ;;  %v2983_v51 = vmul.f32 0.1, %v2967_v53  ;;  %v2971_v60 = vadd.f32 %v3420_v56, %v2948_v45 }
 0x23d   : > { %v2994_v3 = vmax.f32 %v2962_v54, %v2978_v17  ;;  %v2995_v9 = vmax.f32 %v2963_v31, %v2979_v34  ;;  %v2996_v46 = vmax.f32 %v2964_v16, %v2980_v42  ;;  %v2984_v38 = vmul.f32 0.1, %v2968_v49 }
 0x23e   : > { %v2997_v29 = vmax.f32 %v2965_v11, %v2981_v13  ;;  %v2998_v41 = vmax.f32 %v2966_v32, %v2982_v21  ;;  %v2999_v55 = vmax.f32 %v2967_v53, %v2983_v51  ;;  %v2985_v58 = vmul.f32 0.1, %v2969_v59 }
 0x23f   : > { %v3460_v30 = vpack.c.bf16 %v2995_v9, %v2994_v3  ;;  %v3000_v8 = vmax.f32 %v2968_v49, %v2984_v38  ;;  %v2986_v15 = vmul.f32 0.1, %v2970_v35  ;;  %v2987_v39 = vmul.f32 0.1, %v2971_v60 }
 0x240   : > { %v3465_v43 = vpack.c.bf16 %v2997_v29, %v2996_v46  ;;  %v3470_v12 = vpack.c.bf16 %v2999_v55, %v2998_v41  ;;  %v3001_v23 = vmax.f32 %v2969_v59, %v2985_v58  ;;  %v2972_v2 = vadd.f32 %v3420_v56, %v2949_v27 }
 0x241   : > { %3461 = vst [vmem:[%s5333_s4] sm:$0xff] %v3460_v30   ;;  %v3002_v4 = vmax.f32 %v2970_v35, %v2986_v15  ;;  %v3003_v19 = vmax.f32 %v2971_v60, %v2987_v39  ;;  %v2973_v50 = vadd.f32 %v3420_v56, %v2950_v6  ;;  %v2974_v26 = vadd.f32 %v3420_v56, %v2951_v57 }
 0x242   : > { %3497 = vst [vmem:[%s5333_s4 + $0x8] sm:$0xff] %v3465_v43   ;;  %3498 = vst [vmem:[%s5333_s4 + $0x10] sm:$0xff] %v3470_v12   ;;  %v3475_v18 = vpack.c.bf16 %v3001_v23, %v3000_v8  ;;  %v2988_v63 = vmul.f32 0.1, %v2972_v2  ;;  %v2975_v0 = vadd.f32 %v3420_v56, %v2952_v40  ;;  %v2976_v47 = vadd.f32 %v3420_v56, %v2953_v36 }
 0x243   : > { %v3480_v37 = vpack.c.bf16 %v3003_v19, %v3002_v4  ;;  %v2989_v48 = vmul.f32 0.1, %v2973_v50  ;;  %v2990_v52 = vmul.f32 0.1, %v2974_v26  ;;  %v2977_v62 = vadd.f32 %v3420_v56, %v2954_v14 }
 0x244   : > { %3499 = vst [vmem:[%s5333_s4 + $0x18] sm:$0xff] %v3475_v18   ;;  %v3004_v28 = vmax.f32 %v2972_v2, %v2988_v63  ;;  %v2991_v22 = vmul.f32 0.1, %v2975_v0  ;;  %v2992_v33 = vmul.f32 0.1, %v2976_v47 }
 0x245   : > { %3500 = vst [vmem:[%s5333_s4 + $0x20] sm:$0xff] %v3480_v37   ;;  %v3005_v7 = vmax.f32 %v2973_v50, %v2989_v48  ;;  %v3006_v10 = vmax.f32 %v2974_v26, %v2990_v52  ;;  %v2993_v61 = vmul.f32 0.1, %v2977_v62 }
 0x246   : > { %v3007_v44 = vmax.f32 %v2975_v0, %v2991_v22  ;;  %v3008_v1 = vmax.f32 %v2976_v47, %v2992_v33 }
 0x247   : > { %v3485_v25 = vpack.c.bf16 %v3005_v7, %v3004_v28  ;;  %v3009_v5 = vmax.f32 %v2977_v62, %v2993_v61 }
 0x248   : > { %v3490_v24 = vpack.c.bf16 %v3007_v44, %v3006_v10 }
 0x249   : > { %3501 = vst [vmem:[%s5333_s4 + $0x28] sm:$0xff] %v3485_v25   ;;  %v3495_v20 = vpack.c.bf16 %v3009_v5, %v3008_v1 }
 0x24a   : > { %3502 = vst [vmem:[%s5333_s4 + $0x30] sm:$0xff] %v3490_v24  }
 0x24b   : > { %3503 = vst [vmem:[%s5333_s4 + $0x38] sm:$0xff] %v3495_v20  }
 0x24c PF: > { %s14_s17 = sadd.s32 1, %s4193_s17   ;;  %s5392_s15 = smov %s4189_s16 }
 0x24d   : > { %p11_p6 = scmp.ge.s32.totalorder %s14_s17, 4   ;;  %s5393_s16 = smov %s5395_s18 }
 0x24f   :  { %13 = sbr.rel (!%p11_p6) target bundleno = 2 (0x2), region = 84 }

// kernel: discriminator_cifar_forward.7
= control target key start
LH: loop header
LB: loop body
LE: loop exit
PB: predicated region body
PF: predicated region fallthrough
CT: control target
= control target key end

     0   :  { %s2649_s15 = smov 0   ;;  %s2651_s16 = smov 0   ;;  %s3172_s0 = inlined_call_operand.vmem [shape: bf16[32,2048], index: 0, kind: input, shape index: {}]   ;;  %s3173_s1 = inlined_call_operand.vmem [shape: bf16[2048,128], index: 1, kind: input, shape index: {}]   ;;  %s3174_s2 = inlined_call_operand.vmem [shape: f32[1,128], index: 2, kind: input, shape index: {}]   ;;  %s3175_s3 = inlined_call_operand.vmem [shape: f32[1,128], index: 3, kind: input, shape index: {}]   ;;  %s3176_s4 = inlined_call_operand.vmem [shape: bf16[32,128], index: 4, kind: output, shape index: {}]  }
   0x1   :  { %s2653_s17 = smov 0  }
   0x2 LB: > { %s26_s18 = sadd.s32 1, %s2617_s16  ;;  %p2032_p0 = scmp.ge.s32.totalorder %s2621_s17, 1  ;;  %s2621_s17 = sphi %s2653_s17, %s14_s17   ;;  %s2617_s16 = sphi %s2651_s16, %s3178_s16   ;;  %s2613_s15 = sphi %s2649_s15, %s3177_s15  }
   0x3   : > { %p28_p1 = scmp.ge.s32.totalorder %s26_s18, 2  ;;  %p184_p2 = scmp.lt.s32.totalorder %s2621_s17, 3 }
   0x5   : > { %s3180_s18 = smov (%p28_p1, %s26_s18), 0  ;;  %p185_p3 = pnand %p2032_p0, %p184_p2 }
   0x6   : > { %p2033_p4 = scmp.ne.s32.totalorder (!%p185_p3), %s2613_s15, 0 }
   0x7   : > { %188 = sbr.rel (%p185_p3) target bundleno = 435 (0x1b3), region = 36 }
   0xc   : > { %235 = sbr.rel (%p2033_p4) target bundleno = 379 (0x17b), region = 40 }
  0x11   : > { %v2469_v0 = vld [vmem:[%s3173_s1 + $0x78] sm:$0xff]   ;;  %v2473_v4 = vld [vmem:[%s3173_s1 + $0x70] sm:$0xff]   ;;  %v2477_v8 = vld [vmem:[%s3173_s1 + $0x68] sm:$0xff]  }
  0x12   : > { %v2470_v1 = vld [vmem:[%s3173_s1 + $0xf8] sm:$0xff]   ;;  %2220 = vmatprep.subr.bf16.mxu0 %v2469_v0  ;;  %v2474_v5 = vld [vmem:[%s3173_s1 + $0xf0] sm:$0xff]   ;;  %v2478_v9 = vld [vmem:[%s3173_s1 + $0xe8] sm:$0xff]  }
  0x13   : > { %v2471_v2 = vld [vmem:[%s3173_s1 + $0x38] sm:$0xff]   ;;  %2248 = vmatprep.subr.bf16.mxu1 %v2470_v1  ;;  %v2475_v6 = vld [vmem:[%s3173_s1 + $0x30] sm:$0xff]   ;;  %v2479_v10 = vld [vmem:[%s3173_s1 + $0x28] sm:$0xff]  }
  0x14   : > { %v2472_v3 = vld [vmem:[%s3173_s1 + $0xb8] sm:$0xff]   ;;  %2221 = vmatpush3.bf16.msra.mxu0 %v2471_v2  ;;  %v2476_v7 = vld [vmem:[%s3173_s1 + $0xb0] sm:$0xff]   ;;  %v2480_v11 = vld [vmem:[%s3173_s1 + $0xa8] sm:$0xff]  }
  0x15   : > { %2249 = vmatpush3.bf16.msra.mxu1 %v2472_v3  ;;  %2222 = vmatprep.subr.bf16.mxu0 %v2473_v4  ;;  %v2481_v12 = vld [vmem:[%s3173_s1 + $0x60] sm:$0xff]   ;;  %v2485_v16 = vld [vmem:[%s3173_s1 + $0x58] sm:$0xff]   ;;  %v2489_v20 = vld [vmem:[%s3173_s1 + $0x50] sm:$0xff]  }
  0x16   : > { %2250 = vmatprep.subr.bf16.mxu1 %v2474_v5  ;;  %v2482_v13 = vld [vmem:[%s3173_s1 + $0xe0] sm:$0xff]   ;;  %v2486_v17 = vld [vmem:[%s3173_s1 + $0xd8] sm:$0xff]   ;;  %v2490_v21 = vld [vmem:[%s3173_s1 + $0xd0] sm:$0xff]  }
  0x17   : > { %v2483_v14 = vld [vmem:[%s3173_s1 + $0x20] sm:$0xff]   ;;  %v2487_v18 = vld [vmem:[%s3173_s1 + $0x18] sm:$0xff]   ;;  %v2491_v22 = vld [vmem:[%s3173_s1 + $0x10] sm:$0xff]  }
  0x18   : > { %2223 = vmatpush3.bf16.msra.mxu0 %v2475_v6  ;;  %v2484_v15 = vld [vmem:[%s3173_s1 + $0xa0] sm:$0xff]   ;;  %v2488_v19 = vld [vmem:[%s3173_s1 + $0x98] sm:$0xff]   ;;  %v2492_v23 = vld [vmem:[%s3173_s1 + $0x90] sm:$0xff]  }
  0x19   : > { %2251 = vmatpush3.bf16.msra.mxu1 %v2476_v7  ;;  %2224 = vmatprep.subr.bf16.mxu0 %v2477_v8  ;;  %v2493_v24 = vld [vmem:[%s3173_s1 + $0x48] sm:$0xff]   ;;  %v2497_v28 = vld [vmem:[%s3173_s1 + $0x40] sm:$0xff]   ;;  %v2501_v40 = vld [vmem:[%s3173_s1 + $0x178] sm:$0xff]  }
  0x1a   : > { %2252 = vmatprep.subr.bf16.mxu1 %v2478_v9  ;;  %v2494_v25 = vld [vmem:[%s3173_s1 + $0xc8] sm:$0xff]   ;;  %v2498_v29 = vld [vmem:[%s3173_s1 + $0xc0] sm:$0xff]   ;;  %v2502_v41 = vld [vmem:[%s3173_s1 + $0x1f8] sm:$0xff]  }
  0x1b   : > { %v2495_v26 = vld [vmem:[%s3173_s1 + $0x8] sm:$0xff]   ;;  %v2499_v30 = vld [vmem:[%s3173_s1] sm:$0xff]   ;;  %v2503_v42 = vld [vmem:[%s3173_s1 + $0x138] sm:$0xff]  }
  0x1c   : > { %2225 = vmatpush3.bf16.msra.mxu0 %v2479_v10  ;;  %v2496_v27 = vld [vmem:[%s3173_s1 + $0x88] sm:$0xff]   ;;  %v2500_v31 = vld [vmem:[%s3173_s1 + $0x80] sm:$0xff]   ;;  %v2504_v43 = vld [vmem:[%s3173_s1 + $0x1b8] sm:$0xff]  }
  0x1d   : > { %2253 = vmatpush3.bf16.msra.mxu1 %v2480_v11  ;;  %2226 = vmatprep.subr.bf16.mxu0 %v2481_v12  ;;  %v242_v32 = vld [vmem:[%s3172_s0] sm:$0xff]  ;;  %v243_v34 = vld [vmem:[%s3172_s0 + $0x8] sm:$0xff]  ;;  %v2505_v44 = vld [vmem:[%s3173_s1 + $0x170] sm:$0xff]  }
  0x1e   : > { %2254 = vmatprep.subr.bf16.mxu1 %v2482_v13  ;;  %v250_v33 = vld [vmem:[%s3172_s0 + $0x40] sm:$0xff]  ;;  %v251_v37 = vld [vmem:[%s3172_s0 + $0x48] sm:$0xff]  ;;  %v2506_v45 = vld [vmem:[%s3173_s1 + $0x1f0] sm:$0xff]  }
  0x1f   : > { %v2034_v35 = vcombine.low %v242_v32, %v250_v33  ;;  %v2035_v36 = vcombine.high %v242_v32, %v250_v33  ;;  %v2036_v38 = vcombine.low %v243_v34, %v251_v37  ;;  %v2037_v39 = vcombine.high %v243_v34, %v251_v37  ;;  %v2507_v46 = vld [vmem:[%s3173_s1 + $0x130] sm:$0xff]   ;;  %v2509_v48 = vld [vmem:[%s3173_s1 + $0x168] sm:$0xff]   ;;  %v2513_v52 = vld [vmem:[%s3173_s1 + $0x160] sm:$0xff]  }
  0x20   : > { %2227 = vmatpush3.bf16.msra.mxu0 %v2483_v14  ;;  %v2508_v47 = vld [vmem:[%s3173_s1 + $0x1b0] sm:$0xff]   ;;  %v2510_v49 = vld [vmem:[%s3173_s1 + $0x1e8] sm:$0xff]   ;;  %v2514_v53 = vld [vmem:[%s3173_s1 + $0x1e0] sm:$0xff]  }
  0x21   : > { %2255 = vmatpush3.bf16.msra.mxu1 %v2484_v15  ;;  %2228 = vmatprep.subr.bf16.mxu0 %v2485_v16  ;;  %v2511_v50 = vld [vmem:[%s3173_s1 + $0x128] sm:$0xff]   ;;  %v2515_v54 = vld [vmem:[%s3173_s1 + $0x120] sm:$0xff]   ;;  %v2517_v56 = vld [vmem:[%s3173_s1 + $0x158] sm:$0xff]  }
  0x22   : > { %2256 = vmatprep.subr.bf16.mxu1 %v2486_v17  ;;  %1490 = vmatprep.mubr.bf16.mxu0 %v2035_v36  ;;  %v2512_v51 = vld [vmem:[%s3173_s1 + $0x1a8] sm:$0xff]   ;;  %v2516_v55 = vld [vmem:[%s3173_s1 + $0x1a0] sm:$0xff]   ;;  %v2518_v57 = vld [vmem:[%s3173_s1 + $0x1d8] sm:$0xff]  }
  0x23   : > { %1539 = vmatprep.mubr.bf16.mxu1 %v2037_v39  ;;  %v2519_v58 = vld [vmem:[%s3173_s1 + $0x118] sm:$0xff]   ;;  %v258_v60 = vld [vmem:[%s3172_s0 + $0x80] sm:$0xff]  ;;  %v259_v63 = vld [vmem:[%s3172_s0 + $0x88] sm:$0xff] }
  0x24   : > { %2229 = vmatpush3.bf16.msra.mxu0 %v2487_v18  ;;  %v2520_v59 = vld [vmem:[%s3173_s1 + $0x198] sm:$0xff]   ;;  %v266_v61 = vld [vmem:[%s3172_s0 + $0xc0] sm:$0xff]  ;;  %v267_v0 = vld [vmem:[%s3172_s0 + $0xc8] sm:$0xff] }
  0x25   : > { %2257 = vmatpush3.bf16.msra.mxu1 %v2488_v19  ;;  %2230 = vmatprep.subr.bf16.mxu0 %v2489_v20  ;;  %v2051_v62 = vcombine.high %v258_v60, %v266_v61  ;;  %v2050_v1 = vcombine.low %v258_v60, %v266_v61  ;;  %v2053_v2 = vcombine.high %v259_v63, %v267_v0  ;;  %v2521_v4 = vld [vmem:[%s3173_s1 + $0x150] sm:$0xff]   ;;  %v2525_v8 = vld [vmem:[%s3173_s1 + $0x148] sm:$0xff]   ;;  %v2529_v12 = vld [vmem:[%s3173_s1 + $0x140] sm:$0xff]  }
  0x26   : > { %2258 = vmatprep.subr.bf16.mxu1 %v2490_v21  ;;  %v2052_v3 = vcombine.low %v259_v63, %v267_v0  ;;  %v2522_v5 = vld [vmem:[%s3173_s1 + $0x1d0] sm:$0xff]   ;;  %v2526_v9 = vld [vmem:[%s3173_s1 + $0x1c8] sm:$0xff]   ;;  %v2530_v13 = vld [vmem:[%s3173_s1 + $0x1c0] sm:$0xff]  }
  0x27   : > { %v2523_v6 = vld [vmem:[%s3173_s1 + $0x110] sm:$0xff]   ;;  %v2527_v10 = vld [vmem:[%s3173_s1 + $0x108] sm:$0xff]   ;;  %v2531_v14 = vld [vmem:[%s3173_s1 + $0x100] sm:$0xff]  }
  0x28   : > { %2231 = vmatpush3.bf16.msra.mxu0 %v2491_v22  ;;  %v2524_v7 = vld [vmem:[%s3173_s1 + $0x190] sm:$0xff]   ;;  %v2528_v11 = vld [vmem:[%s3173_s1 + $0x188] sm:$0xff]   ;;  %v2532_v15 = vld [vmem:[%s3173_s1 + $0x180] sm:$0xff]  }
  0x29   : > { %2259 = vmatpush3.bf16.msra.mxu1 %v2492_v23  ;;  %2232 = vmatprep.subr.bf16.mxu0 %v2493_v24  ;;  %v244_v16 = vld [vmem:[%s3172_s0 + $0x10] sm:$0xff]  ;;  %v245_v18 = vld [vmem:[%s3172_s0 + $0x18] sm:$0xff]  ;;  %v2541_v36 = vld [vmem:[%s3173_s1 + $0x268] sm:$0xff]  }
  0x2a   : > { %2260 = vmatprep.subr.bf16.mxu1 %v2494_v25  ;;  %v252_v17 = vld [vmem:[%s3172_s0 + $0x50] sm:$0xff]  ;;  %v253_v19 = vld [vmem:[%s3172_s0 + $0x58] sm:$0xff]  ;;  %v2542_v37 = vld [vmem:[%s3173_s1 + $0x2e8] sm:$0xff]  }
  0x2b   : > { %v2038_v20 = vcombine.low %v244_v16, %v252_v17  ;;  %v2039_v21 = vcombine.high %v244_v16, %v252_v17  ;;  %v2040_v22 = vcombine.low %v245_v18, %v253_v19  ;;  %v2041_v23 = vcombine.high %v245_v18, %v253_v19  ;;  %v2533_v24 = vld [vmem:[%s3173_s1 + $0x278] sm:$0xff]   ;;  %v260_v32 = vld [vmem:[%s3172_s0 + $0x90] sm:$0xff]  ;;  %v2561_v60 = vld [vmem:[%s3173_s1 + $0x240] sm:$0xff]  }
  0x2c   : > { %2233 = vmatpush3.bf16.msra.mxu0 %v2495_v26  ;;  %v2534_v25 = vld [vmem:[%s3173_s1 + $0x2f8] sm:$0xff]   ;;  %v268_v33 = vld [vmem:[%s3172_s0 + $0xd0] sm:$0xff]  ;;  %v2562_v61 = vld [vmem:[%s3173_s1 + $0x2c0] sm:$0xff]  }
  0x2d   : > { %2261 = vmatpush3.bf16.msra.mxu1 %v2496_v27  ;;  %2234 = vmatprep.subr.bf16.mxu0 %v2497_v28  ;;  %v2535_v26 = vld [vmem:[%s3173_s1 + $0x238] sm:$0xff]   ;;  %v2537_v28 = vld [vmem:[%s3173_s1 + $0x270] sm:$0xff]   ;;  %v2055_v34 = vcombine.high %v260_v32, %v268_v33  ;;  %v2564_v63 = vld [vmem:[%s3173_s1 + $0x280] sm:$0xff]  }
  0x2e   : > { %2262 = vmatprep.subr.bf16.mxu1 %v2498_v29  ;;  %v2536_v27 = vld [vmem:[%s3173_s1 + $0x2b8] sm:$0xff]   ;;  %v2538_v29 = vld [vmem:[%s3173_s1 + $0x2f0] sm:$0xff]   ;;  %v246_v0 = vld [vmem:[%s3172_s0 + $0x20] sm:$0xff] }
  0x2f   : > { %v269_v39 = vld [vmem:[%s3172_s0 + $0xd8] sm:$0xff]  ;;  %v262_v16 = vld [vmem:[%s3172_s0 + $0xa0] sm:$0xff] }
  0x30   : > { %2235 = vmatpush3.bf16.msra.mxu0 %v2499_v30  ;;  %v2539_v30 = vld [vmem:[%s3173_s1 + $0x230] sm:$0xff]   ;;  %v270_v17 = vld [vmem:[%s3172_s0 + $0xe0] sm:$0xff] }
  0x31   : > { %2263 = vmatpush3.bf16.msra.mxu1 %v2500_v31  ;;  %2276 = vmatprep.subr.bf16.mxu0 %v2501_v40  ;;  %v2540_v31 = vld [vmem:[%s3173_s1 + $0x2b0] sm:$0xff]   ;;  %v2059_v18 = vcombine.high %v262_v16, %v270_v17  ;;  %v2058_v19 = vcombine.low %v262_v16, %v270_v17 }
  0x32   : > { %2304 = vmatprep.subr.bf16.mxu1 %v2502_v41  ;;  %v2543_v41 = vld [vmem:[%s3173_s1 + $0x228] sm:$0xff]  }
  0x33   : > { %1491 = vmatmul.mubr.bf16.vlgmr.msra.gmra.mxu0 %v2034_v35  ;;  %v2054_v35 = vcombine.low %v260_v32, %v268_v33  ;;  %v2581_v32 = vld [vmem:[%s3173_s1 + $0x358] sm:$0xff]  }
  0x34   : > { %1540 = vmatmul.mubr.bf16.vlgmr.msra.gmra.mxu1 %v2036_v38  ;;  %2277 = vmatpush3.bf16.msra.mxu0 %v2503_v42  ;;  %v261_v38 = vld [vmem:[%s3172_s0 + $0x98] sm:$0xff] }
  0x35   : > { %2305 = vmatpush3.bf16.msra.mxu1 %v2504_v43  ;;  %2278 = vmatprep.subr.bf16.mxu0 %v2505_v44  ;;  %v2057_v40 = vcombine.high %v261_v38, %v269_v39  ;;  %v2056_v42 = vcombine.low %v261_v38, %v269_v39  ;;  %v2544_v43 = vld [vmem:[%s3173_s1 + $0x2a8] sm:$0xff]   ;;  %v2545_v44 = vld [vmem:[%s3173_s1 + $0x260] sm:$0xff]   ;;  %v2582_v33 = vld [vmem:[%s3173_s1 + $0x3d8] sm:$0xff]  }
  0x36   : > { %2306 = vmatprep.subr.bf16.mxu1 %v2506_v45  ;;  %1498 = vmatprep.mubr.bf16.mxu0 %v2051_v62  ;;  %v2546_v45 = vld [vmem:[%s3173_s1 + $0x2e0] sm:$0xff]   ;;  %v2587_v38 = vld [vmem:[%s3173_s1 + $0x310] sm:$0xff]  }
  0x37   : > { %1547 = vmatprep.mubr.bf16.mxu1 %v2053_v2  ;;  %v2563_v62 = vld [vmem:[%s3173_s1 + $0x200] sm:$0xff]   ;;  %v2588_v39 = vld [vmem:[%s3173_s1 + $0x390] sm:$0xff]  }
  0x38   : > { %2279 = vmatpush3.bf16.msra.mxu0 %v2507_v46  ;;  %v2547_v46 = vld [vmem:[%s3173_s1 + $0x220] sm:$0xff]  }
  0x39   : > { %2307 = vmatpush3.bf16.msra.mxu1 %v2508_v47  ;;  %2280 = vmatprep.subr.bf16.mxu0 %v2509_v48  ;;  %v2548_v47 = vld [vmem:[%s3173_s1 + $0x2a0] sm:$0xff]   ;;  %v2549_v48 = vld [vmem:[%s3173_s1 + $0x258] sm:$0xff]  }
  0x3a   : > { %2308 = vmatprep.subr.bf16.mxu1 %v2510_v49  ;;  %v2550_v49 = vld [vmem:[%s3173_s1 + $0x2d8] sm:$0xff]  }
  0x3b   : > { %1499 = vmatmul.mubr.bf16.gmra.mxu0 %v2050_v1  ;;  %v254_v1 = vld [vmem:[%s3172_s0 + $0x60] sm:$0xff] }
  0x3c   : > { %2281 = vmatpush3.bf16.msra.mxu0 %v2511_v50  ;;  %1548 = vmatmul.mubr.bf16.gmra.mxu1 %v2052_v3  ;;  %v2551_v50 = vld [vmem:[%s3173_s1 + $0x218] sm:$0xff]   ;;  %v2042_v2 = vcombine.low %v246_v0, %v254_v1  ;;  %v2043_v3 = vcombine.high %v246_v0, %v254_v1  ;;  %v2623_v0 = vmov 0.0  }
  0x3d   : > { %2309 = vmatpush3.bf16.msra.mxu1 %v2512_v51  ;;  %2282 = vmatprep.subr.bf16.mxu0 %v2513_v52  ;;  %v2552_v51 = vld [vmem:[%s3173_s1 + $0x298] sm:$0xff]   ;;  %v2553_v52 = vld [vmem:[%s3173_s1 + $0x250] sm:$0xff]   ;;  %240 = vst [vmem:[#allocation3] sm:$0x1] %v2623_v0  ;;  %241 = vst [vmem:[#allocation4] sm:$0x1] %v2623_v0 }
  0x3e   : > { %2310 = vmatprep.subr.bf16.mxu1 %v2514_v53  ;;  %1588 = vmatprep.mubr.bf16.mxu0 %v2039_v21  ;;  %v2554_v53 = vld [vmem:[%s3173_s1 + $0x2d0] sm:$0xff]   ;;  %v2574_v21 = vld [vmem:[%s3173_s1 + $0x3e8] sm:$0xff]  }
  0x3f   : > { %1637 = vmatprep.mubr.bf16.mxu1 %v2041_v23  ;;  %v271_v23 = vld [vmem:[%s3172_s0 + $0xe8] sm:$0xff] }
  0x40   : > { %2283 = vmatpush3.bf16.msra.mxu0 %v2515_v54  ;;  %v2555_v54 = vld [vmem:[%s3173_s1 + $0x210] sm:$0xff]  }
  0x41   : > { %2311 = vmatpush3.bf16.msra.mxu1 %v2516_v55  ;;  %2284 = vmatprep.subr.bf16.mxu0 %v2517_v56  ;;  %v2556_v55 = vld [vmem:[%s3173_s1 + $0x290] sm:$0xff]   ;;  %v2557_v56 = vld [vmem:[%s3173_s1 + $0x248] sm:$0xff]  }
  0x42   : > { %2312 = vmatprep.subr.bf16.mxu1 %v2518_v57  ;;  %v2558_v57 = vld [vmem:[%s3173_s1 + $0x2c8] sm:$0xff]  }
  0x44   : > { %2285 = vmatpush3.bf16.msra.mxu0 %v2519_v58  ;;  %v2559_v58 = vld [vmem:[%s3173_s1 + $0x208] sm:$0xff]  }
  0x45   : > { %2313 = vmatpush3.bf16.msra.mxu1 %v2520_v59  ;;  %2286 = vmatprep.subr.bf16.mxu0 %v2521_v4  ;;  %v2560_v59 = vld [vmem:[%s3173_s1 + $0x288] sm:$0xff]  }
  0x46   : > { %2314 = vmatprep.subr.bf16.mxu1 %v2522_v5  ;;  %v247_v4 = vld [vmem:[%s3172_s0 + $0x28] sm:$0xff] }
  0x47   : > { %v255_v5 = vld [vmem:[%s3172_s0 + $0x68] sm:$0xff] }
  0x48   : > { %2287 = vmatpush3.bf16.msra.mxu0 %v2523_v6  ;;  %v2044_v6 = vcombine.low %v247_v4, %v255_v5 }
  0x49   : > { %2315 = vmatpush3.bf16.msra.mxu1 %v2524_v7  ;;  %2288 = vmatprep.subr.bf16.mxu0 %v2525_v8  ;;  %v2045_v7 = vcombine.high %v247_v4, %v255_v5  ;;  %v2565_v8 = vld [vmem:[%s3173_s1 + $0x378] sm:$0xff]  }
  0x4a   : > { %2316 = vmatprep.subr.bf16.mxu1 %v2526_v9  ;;  %v2566_v9 = vld [vmem:[%s3173_s1 + $0x3f8] sm:$0xff]  }
  0x4c   : > { %2289 = vmatpush3.bf16.msra.mxu0 %v2527_v10  ;;  %v2567_v10 = vld [vmem:[%s3173_s1 + $0x338] sm:$0xff]  }
  0x4d   : > { %2317 = vmatpush3.bf16.msra.mxu1 %v2528_v11  ;;  %2290 = vmatprep.subr.bf16.mxu0 %v2529_v12  ;;  %v2568_v11 = vld [vmem:[%s3173_s1 + $0x3b8] sm:$0xff]   ;;  %v2569_v12 = vld [vmem:[%s3173_s1 + $0x370] sm:$0xff]  }
  0x4e   : > { %2318 = vmatprep.subr.bf16.mxu1 %v2530_v13  ;;  %v2570_v13 = vld [vmem:[%s3173_s1 + $0x3f0] sm:$0xff]  }
  0x50   : > { %2291 = vmatpush3.bf16.msra.mxu0 %v2531_v14  ;;  %v2571_v14 = vld [vmem:[%s3173_s1 + $0x330] sm:$0xff]  }
  0x51   : > { %2319 = vmatpush3.bf16.msra.mxu1 %v2532_v15  ;;  %2332 = vmatprep.subr.bf16.mxu0 %v2533_v24  ;;  %v2572_v15 = vld [vmem:[%s3173_s1 + $0x3b0] sm:$0xff]  }
  0x52   : > { %2360 = vmatprep.subr.bf16.mxu1 %v2534_v25  ;;  %v2575_v25 = vld [vmem:[%s3173_s1 + $0x328] sm:$0xff]  }
  0x53   : > { %1589 = vmatmul.mubr.bf16.vlgmr.msra.gmra.mxu0 %v2038_v20  ;;  %v2573_v20 = vld [vmem:[%s3173_s1 + $0x368] sm:$0xff]  }
  0x54   : > { %1638 = vmatmul.mubr.bf16.vlgmr.msra.gmra.mxu1 %v2040_v22  ;;  %2333 = vmatpush3.bf16.msra.mxu0 %v2535_v26  ;;  %v263_v22 = vld [vmem:[%s3172_s0 + $0xa8] sm:$0xff] }
  0x55   : > { %2361 = vmatpush3.bf16.msra.mxu1 %v2536_v27  ;;  %2334 = vmatprep.subr.bf16.mxu0 %v2537_v28  ;;  %v2061_v24 = vcombine.high %v263_v22, %v271_v23  ;;  %v2060_v26 = vcombine.low %v263_v22, %v271_v23  ;;  %v2576_v27 = vld [vmem:[%s3173_s1 + $0x3a8] sm:$0xff]   ;;  %v2577_v28 = vld [vmem:[%s3173_s1 + $0x360] sm:$0xff]  }
  0x56   : > { %2362 = vmatprep.subr.bf16.mxu1 %v2538_v29  ;;  %1596 = vmatprep.mubr.bf16.mxu0 %v2055_v34  ;;  %v2578_v29 = vld [vmem:[%s3173_s1 + $0x3e0] sm:$0xff]   ;;  %v2583_v34 = vld [vmem:[%s3173_s1 + $0x318] sm:$0xff]  }
  0x57   : > { %1645 = vmatprep.mubr.bf16.mxu1 %v2057_v40  ;;  %v2589_v40 = vld [vmem:[%s3173_s1 + $0x348] sm:$0xff]  }
  0x58   : > { %2335 = vmatpush3.bf16.msra.mxu0 %v2539_v30  ;;  %v2579_v30 = vld [vmem:[%s3173_s1 + $0x320] sm:$0xff]  }
  0x59   : > { %2363 = vmatpush3.bf16.msra.mxu1 %v2540_v31  ;;  %2336 = vmatprep.subr.bf16.mxu0 %v2541_v36  ;;  %v2580_v31 = vld [vmem:[%s3173_s1 + $0x3a0] sm:$0xff]   ;;  %v2585_v36 = vld [vmem:[%s3173_s1 + $0x350] sm:$0xff]  }
  0x5a   : > { %2364 = vmatprep.subr.bf16.mxu1 %v2542_v37  ;;  %v2586_v37 = vld [vmem:[%s3173_s1 + $0x3d0] sm:$0xff]  }
  0x5b   : > { %1597 = vmatmul.mubr.bf16.gmra.mxu0 %v2054_v35  ;;  %v2584_v35 = vld [vmem:[%s3173_s1 + $0x398] sm:$0xff]  }
  0x5c   : > { %2337 = vmatpush3.bf16.msra.mxu0 %v2543_v41  ;;  %1646 = vmatmul.mubr.bf16.gmra.mxu1 %v2056_v42  ;;  %v2590_v41 = vld [vmem:[%s3173_s1 + $0x3c8] sm:$0xff]  }
  0x5d   : > { %2365 = vmatpush3.bf16.msra.mxu1 %v2544_v43  ;;  %2338 = vmatprep.subr.bf16.mxu0 %v2545_v44  ;;  %v2591_v42 = vld [vmem:[%s3173_s1 + $0x308] sm:$0xff]   ;;  %v2593_v44 = vld [vmem:[%s3173_s1 + $0x340] sm:$0xff]  }
  0x5e   : > { %2366 = vmatprep.subr.bf16.mxu1 %v2546_v45  ;;  %1686 = vmatprep.mubr.bf16.mxu0 %v2043_v3  ;;  %v2592_v43 = vld [vmem:[%s3173_s1 + $0x388] sm:$0xff]   ;;  %v2594_v45 = vld [vmem:[%s3173_s1 + $0x3c0] sm:$0xff]  }
  0x5f   : > { %1735 = vmatprep.mubr.bf16.mxu1 %v2045_v7 }
  0x60   : > { %2339 = vmatpush3.bf16.msra.mxu0 %v2547_v46  ;;  %v2595_v46 = vld [vmem:[%s3173_s1 + $0x300] sm:$0xff]  }
  0x61   : > { %2367 = vmatpush3.bf16.msra.mxu1 %v2548_v47  ;;  %2340 = vmatprep.subr.bf16.mxu0 %v2549_v48  ;;  %v2596_v47 = vld [vmem:[%s3173_s1 + $0x380] sm:$0xff]   ;;  %v248_v48 = vld [vmem:[%s3172_s0 + $0x30] sm:$0xff] }
  0x62   : > { %2368 = vmatprep.subr.bf16.mxu1 %v2550_v49  ;;  %v256_v49 = vld [vmem:[%s3172_s0 + $0x70] sm:$0xff] }
  0x64   : > { %2341 = vmatpush3.bf16.msra.mxu0 %v2551_v50  ;;  %v249_v50 = vld [vmem:[%s3172_s0 + $0x38] sm:$0xff] }
  0x65   : > { %2369 = vmatpush3.bf16.msra.mxu1 %v2552_v51  ;;  %2342 = vmatprep.subr.bf16.mxu0 %v2553_v52  ;;  %v2046_v51 = vcombine.low %v248_v48, %v256_v49  ;;  %v2047_v52 = vcombine.high %v248_v48, %v256_v49 }
  0x66   : > { %2370 = vmatprep.subr.bf16.mxu1 %v2554_v53  ;;  %v257_v53 = vld [vmem:[%s3172_s0 + $0x78] sm:$0xff] }
  0x68   : > { %2343 = vmatpush3.bf16.msra.mxu0 %v2555_v54  ;;  %v264_v54 = vld [vmem:[%s3172_s0 + $0xb0] sm:$0xff] }
  0x69   : > { %2371 = vmatpush3.bf16.msra.mxu1 %v2556_v55  ;;  %2344 = vmatprep.subr.bf16.mxu0 %v2557_v56  ;;  %v272_v55 = vld [vmem:[%s3172_s0 + $0xf0] sm:$0xff]  ;;  %v2048_v56 = vcombine.low %v249_v50, %v257_v53 }
  0x6a   : > { %2372 = vmatprep.subr.bf16.mxu1 %v2558_v57  ;;  %v2049_v57 = vcombine.high %v249_v50, %v257_v53 }
  0x6c   : > { %2345 = vmatpush3.bf16.msra.mxu0 %v2559_v58  ;;  %v2063_v58 = vcombine.high %v264_v54, %v272_v55 }
  0x6d   : > { %2373 = vmatpush3.bf16.msra.mxu1 %v2560_v59  ;;  %2346 = vmatprep.subr.bf16.mxu0 %v2561_v60  ;;  %v265_v59 = vld [vmem:[%s3172_s0 + $0xb8] sm:$0xff] }
  0x6e   : > { %2374 = vmatprep.subr.bf16.mxu1 %v2562_v61  ;;  %v273_v60 = vld [vmem:[%s3172_s0 + $0xf8] sm:$0xff] }
  0x6f   : > { %v2065_v61 = vcombine.high %v265_v59, %v273_v60 }
  0x70   : > { %2347 = vmatpush3.bf16.msra.mxu0 %v2563_v62  ;;  %v2062_v62 = vcombine.low %v264_v54, %v272_v55 }
  0x71   : > { %2375 = vmatpush3.bf16.msra.mxu1 %v2564_v63  ;;  %2388 = vmatprep.subr.bf16.mxu0 %v2565_v8  ;;  %v2064_v63 = vcombine.low %v265_v59, %v273_v60 }
  0x72   : > { %2416 = vmatprep.subr.bf16.mxu1 %v2566_v9 }
  0x73   : > { %1687 = vmatmul.mubr.bf16.vlgmr.msra.gmra.mxu0 %v2042_v2 }
  0x74   : > { %1736 = vmatmul.mubr.bf16.vlgmr.msra.gmra.mxu1 %v2044_v6  ;;  %2389 = vmatpush3.bf16.msra.mxu0 %v2567_v10 }
  0x75   : > { %2417 = vmatpush3.bf16.msra.mxu1 %v2568_v11  ;;  %2390 = vmatprep.subr.bf16.mxu0 %v2569_v12 }
  0x76   : > { %2418 = vmatprep.subr.bf16.mxu1 %v2570_v13  ;;  %1694 = vmatprep.mubr.bf16.mxu0 %v2059_v18 }
  0x77   : > { %1743 = vmatprep.mubr.bf16.mxu1 %v2061_v24 }
  0x78   : > { %2391 = vmatpush3.bf16.msra.mxu0 %v2571_v14 }
  0x79   : > { %2419 = vmatpush3.bf16.msra.mxu1 %v2572_v15  ;;  %2392 = vmatprep.subr.bf16.mxu0 %v2573_v20 }
  0x7a   : > { %2420 = vmatprep.subr.bf16.mxu1 %v2574_v21 }
  0x7b   : > { %1695 = vmatmul.mubr.bf16.gmra.mxu0 %v2058_v19 }
  0x7c   : > { %2393 = vmatpush3.bf16.msra.mxu0 %v2575_v25  ;;  %1744 = vmatmul.mubr.bf16.gmra.mxu1 %v2060_v26 }
  0x7d   : > { %2421 = vmatpush3.bf16.msra.mxu1 %v2576_v27  ;;  %2394 = vmatprep.subr.bf16.mxu0 %v2577_v28 }
  0x7e   : > { %2422 = vmatprep.subr.bf16.mxu1 %v2578_v29  ;;  %1784 = vmatprep.mubr.bf16.mxu0 %v2047_v52 }
  0x7f   : > { %1833 = vmatprep.mubr.bf16.mxu1 %v2049_v57 }
  0x80   : > { %2395 = vmatpush3.bf16.msra.mxu0 %v2579_v30 }
  0x81   : > { %2423 = vmatpush3.bf16.msra.mxu1 %v2580_v31  ;;  %2396 = vmatprep.subr.bf16.mxu0 %v2581_v32 }
  0x82   : > { %2424 = vmatprep.subr.bf16.mxu1 %v2582_v33 }
  0x84   : > { %2397 = vmatpush3.bf16.msra.mxu0 %v2583_v34 }
  0x85   : > { %2425 = vmatpush3.bf16.msra.mxu1 %v2584_v35  ;;  %2398 = vmatprep.subr.bf16.mxu0 %v2585_v36 }
  0x86   : > { %2426 = vmatprep.subr.bf16.mxu1 %v2586_v37 }
  0x88   : > { %2399 = vmatpush3.bf16.msra.mxu0 %v2587_v38 }
  0x89   : > { %2427 = vmatpush3.bf16.msra.mxu1 %v2588_v39  ;;  %2400 = vmatprep.subr.bf16.mxu0 %v2589_v40 }
  0x8a   : > { %2428 = vmatprep.subr.bf16.mxu1 %v2590_v41 }
  0x8c   : > { %2401 = vmatpush3.bf16.msra.mxu0 %v2591_v42 }
  0x8d   : > { %2429 = vmatpush3.bf16.msra.mxu1 %v2592_v43  ;;  %2402 = vmatprep.subr.bf16.mxu0 %v2593_v44 }
  0x8e   : > { %2430 = vmatprep.subr.bf16.mxu1 %v2594_v45 }
  0x90   : > { %2403 = vmatpush3.bf16.msra.mxu0 %v2595_v46 }
  0x91   : > { %2431 = vmatpush3.bf16.msra.mxu1 %v2596_v47 }
  0x93   : > { %1785 = vmatmul.mubr.bf16.vlgmr.msra.gmra.mxu0 %v2046_v51 }
  0x94   : > { %1834 = vmatmul.mubr.bf16.vlgmr.msra.gmra.mxu1 %v2048_v56  ;;  %1792 = vmatprep.mubr.bf16.mxu0 %v2063_v58 }
  0x95   : > { %1841 = vmatprep.mubr.bf16.mxu1 %v2065_v61 }
  0x9b   : > { %1793 = vmatmul.mubr.bf16.gmra.mxu0 %v2062_v62 }
  0x9c   : > { %1842 = vmatmul.mubr.bf16.gmra.mxu1 %v2064_v63 }
  0xf3   : > { %v2236_v1 = vpop.f32.mrf.mxu0 }
  0xf4   : > { %v2264_v3 = vpop.f32.mrf.mxu1 }
  0xf5   : > { %v2237_v2 = vpop.f32.mrf.mxu0 }
  0xf6   : > { %v2265_v5 = vpop.f32.mrf.mxu1  ;;  %v2238_v42 = vadd.f32 %v2237_v2, %v2236_v1 }
  0xf7   : > { %v2239_v4 = vpop.f32.mrf.mxu0  ;;  %v2266_v43 = vadd.f32 %v2265_v5, %v2264_v3 }
  0xf8   : > { %v2267_v7 = vpop.f32.mrf.mxu1 }
  0xf9   : > { %v2240_v6 = vpop.f32.mrf.mxu0  ;;  %v1542_v47 = vadd.f32 %v2266_v43, %v2238_v42 }
  0xfa   : > { %v2268_v9 = vpop.f32.mrf.mxu1  ;;  %v2241_v48 = vadd.f32 %v2240_v6, %v2239_v4 }
  0xfb   : > { %v2242_v8 = vpop.f32.mrf.mxu0  ;;  %v2269_v49 = vadd.f32 %v2268_v9, %v2267_v7 }
  0xfc   : > { %v2270_v11 = vpop.f32.mrf.mxu1 }
  0xfd   : > { %v2243_v10 = vpop.f32.mrf.mxu0  ;;  %v1545_v57 = vadd.f32 %v2269_v49, %v2241_v48 }
  0xfe   : > { %v2271_v13 = vpop.f32.mrf.mxu1  ;;  %v2244_v54 = vadd.f32 %v2243_v10, %v2242_v8 }
  0xff   : > { %v2245_v12 = vpop.f32.mrf.mxu0  ;;  %v2272_v55 = vadd.f32 %v2271_v13, %v2270_v11 }
 0x100   : > { %v2273_v15 = vpop.f32.mrf.mxu1 }
 0x101   : > { %v2246_v14 = vpop.f32.mrf.mxu0  ;;  %v1550_v63 = vadd.f32 %v2272_v55, %v2244_v54 }
 0x102   : > { %v2274_v17 = vpop.f32.mrf.mxu1  ;;  %v2247_v0 = vadd.f32 %v2246_v14, %v2245_v12 }
 0x103   : > { %v2275_v1 = vadd.f32 %v2274_v17, %v2273_v15 }
 0x113   : > { %v2292_v16 = vpop.f32.mrf.mxu0 }
 0x114   : > { %v2320_v19 = vpop.f32.mrf.mxu1 }
 0x115   : > { %v2293_v18 = vpop.f32.mrf.mxu0 }
 0x116   : > { %v2321_v21 = vpop.f32.mrf.mxu1  ;;  %v2294_v45 = vadd.f32 %v2293_v18, %v2292_v16  ;;  %v1553_v18 = vadd.f32 %v2275_v1, %v2247_v0 }
 0x117   : > { %v2295_v20 = vpop.f32.mrf.mxu0  ;;  %v2322_v52 = vadd.f32 %v2321_v21, %v2320_v19 }
 0x118   : > { %v2323_v23 = vpop.f32.mrf.mxu1  ;;  %v1591_v51 = vadd.f32 %v2294_v45, %v1542_v47 }
 0x119   : > { %v2296_v22 = vpop.f32.mrf.mxu0 }
 0x11a   : > { %v2324_v25 = vpop.f32.mrf.mxu1  ;;  %v2297_v53 = vadd.f32 %v2296_v22, %v2295_v20  ;;  %v1640_v61 = vadd.f32 %v2322_v52, %v1591_v51 }
 0x11b   : > { %v2298_v24 = vpop.f32.mrf.mxu0  ;;  %v2325_v3 = vadd.f32 %v2324_v25, %v2323_v23 }
 0x11c   : > { %v2326_v26 = vpop.f32.mrf.mxu1  ;;  %v1594_v62 = vadd.f32 %v2297_v53, %v1545_v57 }
 0x11d   : > { %v2299_v27 = vpop.f32.mrf.mxu0 }
 0x11e   : > { %v2327_v28 = vpop.f32.mrf.mxu1  ;;  %v2300_v60 = vadd.f32 %v2299_v27, %v2298_v24  ;;  %v1643_v11 = vadd.f32 %v2325_v3, %v1594_v62 }
 0x11f   : > { %v2301_v29 = vpop.f32.mrf.mxu0  ;;  %v2328_v16 = vadd.f32 %v2327_v28, %v2326_v26 }
 0x120   : > { %v2329_v30 = vpop.f32.mrf.mxu1  ;;  %v1599_v9 = vadd.f32 %v2300_v60, %v1550_v63 }
 0x121   : > { %v2302_v31 = vpop.f32.mrf.mxu0 }
 0x122   : > { %v2330_v33 = vpop.f32.mrf.mxu1  ;;  %v2303_v8 = vadd.f32 %v2302_v31, %v2301_v29  ;;  %v1648_v14 = vadd.f32 %v2328_v16, %v1599_v9 }
 0x123   : > { %v2331_v23 = vadd.f32 %v2330_v33, %v2329_v30 }
 0x124   : > { %v1602_v15 = vadd.f32 %v2303_v8, %v1553_v18 }
 0x126   : > { %v1651_v42 = vadd.f32 %v2331_v23, %v1602_v15 }
 0x133   : > { %v2348_v32 = vpop.f32.mrf.mxu0 }
 0x134   : > { %v2376_v34 = vpop.f32.mrf.mxu1 }
 0x135   : > { %v2349_v35 = vpop.f32.mrf.mxu0 }
 0x136   : > { %v2377_v36 = vpop.f32.mrf.mxu1  ;;  %v2350_v58 = vadd.f32 %v2349_v35, %v2348_v32 }
 0x137   : > { %v2351_v37 = vpop.f32.mrf.mxu0  ;;  %v2378_v5 = vadd.f32 %v2377_v36, %v2376_v34 }
 0x138   : > { %v2379_v38 = vpop.f32.mrf.mxu1  ;;  %v1689_v4 = vadd.f32 %v2350_v58, %v1640_v61 }
 0x139   : > { %v2352_v39 = vpop.f32.mrf.mxu0 }
 0x13a   : > { %v2380_v40 = vpop.f32.mrf.mxu1  ;;  %v2353_v6 = vadd.f32 %v2352_v39, %v2351_v37  ;;  %v1738_v21 = vadd.f32 %v2378_v5, %v1689_v4 }
 0x13b   : > { %v2354_v41 = vpop.f32.mrf.mxu0  ;;  %v2381_v25 = vadd.f32 %v2380_v40, %v2379_v38 }
 0x13c   : > { %v2382_v44 = vpop.f32.mrf.mxu1  ;;  %v1692_v22 = vadd.f32 %v2353_v6, %v1643_v11 }
 0x13d   : > { %v2355_v46 = vpop.f32.mrf.mxu0 }
 0x13e   : > { %v2383_v50 = vpop.f32.mrf.mxu1  ;;  %v2356_v19 = vadd.f32 %v2355_v46, %v2354_v41  ;;  %v1741_v31 = vadd.f32 %v2381_v25, %v1692_v22 }
 0x13f   : > { %v2357_v56 = vpop.f32.mrf.mxu0  ;;  %v2384_v28 = vadd.f32 %v2383_v50, %v2382_v44 }
 0x140   : > { %v2385_v59 = vpop.f32.mrf.mxu1  ;;  %v1697_v26 = vadd.f32 %v2356_v19, %v1648_v14 }
 0x141   : > { %v2358_v2 = vpop.f32.mrf.mxu0 }
 0x142   : > { %v2386_v7 = vpop.f32.mrf.mxu1  ;;  %v2359_v35 = vadd.f32 %v2358_v2, %v2357_v56  ;;  %v1746_v47 = vadd.f32 %v2384_v28, %v1697_v26 }
 0x143   : > { %v2387_v38 = vadd.f32 %v2386_v7, %v2385_v59 }
 0x144   : > { %v1700_v33 = vadd.f32 %v2359_v35, %v1651_v42 }
 0x146   : > { %v1749_v54 = vadd.f32 %v2387_v38, %v1700_v33 }
 0x153   : > { %v2404_v10 = vpop.f32.mrf.mxu0 }
 0x154   : > { %v2432_v13 = vpop.f32.mrf.mxu1 }
 0x155   : > { %v2405_v20 = vpop.f32.mrf.mxu0 }
 0x156   : > { %v2406_v24 = vadd.f32 %v2405_v20, %v2404_v10  ;;  %v2433_v12 = vpop.f32.mrf.mxu1  ;;  %v1855_v20 = vld [vmem:[#allocation3] sm:$0x1] }
 0x157   : > { %v2407_v17 = vpop.f32.mrf.mxu0  ;;  %v2434_v32 = vadd.f32 %v2433_v12, %v2432_v13 }
 0x158   : > { %v1787_v27 = vadd.f32 %v2406_v24, %v1738_v21  ;;  %v2435_v34 = vpop.f32.mrf.mxu1  ;;  %v1867_v24 = vld [vmem:[#allocation4] sm:$0x1] }
 0x159   : > { %v2408_v29 = vpop.f32.mrf.mxu0 }
 0x15a   : > { %v1836_v36 = vadd.f32 %v2434_v32, %v1787_v27  ;;  %v2409_v37 = vadd.f32 %v2408_v29, %v2407_v17  ;;  %v2436_v39 = vpop.f32.mrf.mxu1 }
 0x15b   : > { %v2410_v41 = vpop.f32.mrf.mxu0  ;;  %v2437_v45 = vadd.f32 %v2436_v39, %v2435_v34 }
 0x15c   : > { %1851 = vst [vmem:[#allocation2 + $0x10] sm:$0xff] %v1836_v36  ;;  %v1790_v43 = vadd.f32 %v2409_v37, %v1741_v31  ;;  %v2438_v46 = vpop.f32.mrf.mxu1  ;;  %v1868_v60 = vmul.f32 %v1836_v36, %v1836_v36 }
 0x15d   : > { %v2411_v30 = vpop.f32.mrf.mxu0 }
 0x15e   : > { %v1839_v40 = vadd.f32 %v2437_v45, %v1790_v43  ;;  %v2412_v48 = vadd.f32 %v2411_v30, %v2410_v41  ;;  %v2439_v49 = vpop.f32.mrf.mxu1 }
 0x15f   : > { %v2413_v44 = vpop.f32.mrf.mxu0  ;;  %v2440_v51 = vadd.f32 %v2439_v49, %v2438_v46 }
 0x160   : > { %1852 = vst [vmem:[#allocation2] sm:$0xff] %v1839_v40  ;;  %v1795_v50 = vadd.f32 %v2412_v48, %v1746_v47  ;;  %v2441_v52 = vpop.f32.mrf.mxu1  ;;  %v1869_v55 = vmul.f32 %v1839_v40, %v1839_v40  ;;  %v1856_v61 = vadd.f32 %v1839_v40, %v1836_v36 }
 0x161   : > { %v2414_v53 = vpop.f32.mrf.mxu0 }
 0x162   : > { %v1844_v56 = vadd.f32 %v2440_v51, %v1795_v50  ;;  %v2415_v57 = vadd.f32 %v2414_v53, %v2413_v44  ;;  %v2442_v58 = vpop.f32.mrf.mxu1  ;;  %v1872_v0 = vadd.f32 %v1869_v55, %v1868_v60 }
 0x163   : > { %v2443_v59 = vadd.f32 %v2442_v58, %v2441_v52 }
 0x164   : > { %1853 = vst [vmem:[#allocation2 + $0x18] sm:$0xff] %v1844_v56  ;;  %v1870_v62 = vmul.f32 %v1844_v56, %v1844_v56  ;;  %v1798_v63 = vadd.f32 %v2415_v57, %v1749_v54  ;;  %v1857_v1 = vadd.f32 %v1856_v61, %v1844_v56 }
 0x166   : > { %v1847_v2 = vadd.f32 %v2443_v59, %v1798_v63  ;;  %v1873_v3 = vadd.f32 %v1872_v0, %v1870_v62 }
 0x168   : > { %1854 = vst [vmem:[#allocation2 + $0x8] sm:$0xff] %v1847_v2  ;;  %v1858_v4 = vadd.f32 %v1857_v1, %v1847_v2  ;;  %v1871_v5 = vmul.f32 %v1847_v2, %v1847_v2 }
 0x16a   : > { %v1859_v6 = vrot.slane %v1858_v4, 4  ;;  %v1874_v7 = vadd.f32 %v1873_v3, %v1871_v5 }
 0x16c   : > { %v1860_v9 = vadd.f32 %v1859_v6, %v1858_v4  ;;  %v1875_v16 = vrot.slane %v1874_v7, 4 }
 0x16e   : > { %v1861_v8 = vrot.slane %v1860_v9, 2  ;;  %v1876_v10 = vadd.f32 %v1875_v16, %v1874_v7 }
 0x170   : > { %v1862_v11 = vadd.f32 %v1861_v8, %v1860_v9  ;;  %v1877_v13 = vrot.slane %v1876_v10, 2 }
 0x172   : > { %v1863_v18 = vrot.slane %v1862_v11, 1  ;;  %v1878_v19 = vadd.f32 %v1877_v13, %v1876_v10 }
 0x174   : > { %v1864_v21 = vadd.f32 %v1863_v18, %v1862_v11  ;;  %v1879_v22 = vrot.slane %v1878_v19, 1 }
 0x176   : > { %v1865_v12 = vadd.f32 %v1864_v21, %v1855_v20  ;;  %v1880_v14 = vadd.f32 %v1879_v22, %v1878_v19 }
 0x178   : > { %1866 = vst [vmem:[#allocation3] sm:$0x1] %v1865_v12  ;;  %v1881_v15 = vadd.f32 %v1880_v14, %v1867_v24 }
 0x17a   : > { %1882 = vst [vmem:[#allocation4] sm:$0x1] %v1881_v15 }
 0x17b PF: > { %p2194_p5 = scmp.ne.s32.totalorder %s2613_s15, 1 }
 0x17d   : > { %1886 = sbr.rel (%p2194_p5) target bundleno = 435 (0x1b3), region = 48 }
 0x182   : > { %v1891_v17 = vld [vmem:[#allocation3] sm:$0x1]  ;;  %v1893_v23 = vld [vmem:[#allocation4] sm:$0x1]  ;;  %v1908_v41 = vld [vmem:[#allocation2 + $0x10] sm:$0xff] }
 0x183   : > { %v1892_v25 = vmul.f32 0.03125, %v1891_v17  ;;  %v1894_v27 = vmul.f32 0.03125, %v1893_v23  ;;  %v1898_v29 = vld [vmem:[%s3174_s2] sm:$0x1]  ;;  %v1910_v43 = vld [vmem:[#allocation2 + $0x18] sm:$0xff]  ;;  %v1911_v45 = vld [vmem:[#allocation2 + $0x8] sm:$0xff] }
 0x184   : > { %v1903_v36 = vld [vmem:[%s3175_s3] sm:$0x1] }
 0x185   : > { %v1895_v32 = vmul.f32 %v1892_v25, %v1892_v25  ;;  %v1909_v42 = vld [vmem:[#allocation2] sm:$0xff] }
 0x187   : > { %v1896_v34 = vsub.f32 %v1894_v27, %v1895_v32 }
 0x189   : > { %v1897_v26 = vmax.f32 %v1896_v34, 0.0 }
 0x18b   : > { %v1899_v28 = vadd.f32 1e-05, %v1897_v26 }
 0x18d   : > { %2597 = vrsqrt.f32 %v1899_v28 }
 0x19a   : > { %v2598_v31 = vpop.eup %2597 }
 0x19b   : > { %v1901_v35 = vmul.f32 %v2598_v31, %v1898_v29 }
 0x19d   : > { %1902 = vst [vmem:[#allocation5] sm:$0x1] %v1901_v35  ;;  %v1904_v37 = vmul.f32 %v1901_v35, %v1892_v25 }
 0x19f   : > { %v1905_v39 = vsub.f32 %v1903_v36, %v1904_v37 }
 0x1a1   : > { %1906 = vst [vmem:[#allocation6] sm:$0x1] %v1905_v39 }
 0x1a4   : > { %v2195_v46 = vld [vmem:[#allocation5] ss:$0 sm:$0xff] }
 0x1a5   : > { %v1919_v47 = vmul.f32 %v2195_v46, %v1908_v41  ;;  %v1920_v30 = vmul.f32 %v2195_v46, %v1909_v42  ;;  %v1921_v33 = vmul.f32 %v2195_v46, %v1910_v43  ;;  %v1922_v38 = vmul.f32 %v2195_v46, %v1911_v45 }
 0x1a8   : > { %v2196_v40 = vld [vmem:[#allocation6] ss:$0 sm:$0xff] }
 0x1a9   : > { %v1930_v48 = vadd.f32 %v2196_v40, %v1919_v47  ;;  %v1931_v49 = vadd.f32 %v2196_v40, %v1920_v30  ;;  %v1932_v44 = vadd.f32 %v2196_v40, %v1921_v33  ;;  %v1933_v50 = vadd.f32 %v2196_v40, %v1922_v38 }
 0x1ab   : > { %v1934_v51 = vmul.f32 0.1, %v1930_v48  ;;  %v1935_v52 = vmul.f32 0.1, %v1931_v49  ;;  %v1936_v53 = vmul.f32 0.1, %v1932_v44 }
 0x1ac   : > { %v1937_v54 = vmul.f32 0.1, %v1933_v50 }
 0x1ad   : > { %v1938_v55 = vmax.f32 %v1930_v48, %v1934_v51  ;;  %v1939_v56 = vmax.f32 %v1931_v49, %v1935_v52  ;;  %v1940_v57 = vmax.f32 %v1932_v44, %v1936_v53 }
 0x1ae   : > { %v1941_v58 = vmax.f32 %v1933_v50, %v1937_v54 }
 0x1af   : > { %v2212_v60 = vpack.c.bf16 %v1939_v56, %v1938_v55 }
 0x1b0   : > { %v2217_v61 = vpack.c.bf16 %v1941_v58, %v1940_v57 }
 0x1b1   : > { %2213 = vst [vmem:[%s3176_s4] sm:$0xff] %v2212_v60  }
 0x1b2   : > { %2219 = vst [vmem:[%s3176_s4 + $0x8] sm:$0xff] %v2217_v61  }
 0x1b3 PF: > { %s14_s17 = sadd.s32 1, %s2621_s17   ;;  %s3177_s15 = smov %s2617_s16 }
 0x1b4   : > { %p11_p6 = scmp.ge.s32.totalorder %s14_s17, 4   ;;  %s3178_s16 = smov %s3180_s18 }
 0x1b6   :  { %13 = sbr.rel (!%p11_p6) target bundleno = 2 (0x2), region = 84 }

// kernel: discriminator_cifar_forward.8
= control target key start
LH: loop header
LB: loop body
LE: loop exit
PB: predicated region body
PF: predicated region fallthrough
CT: control target
= control target key end

     0   :  { %s2325_s15 = smov 0   ;;  %s2327_s16 = smov 0   ;;  %s2773_s0 = inlined_call_operand.vmem [shape: bf16[8,2048], index: 0, kind: input, shape index: {}]   ;;  %s2774_s1 = inlined_call_operand.vmem [shape: bf16[2048,128], index: 1, kind: input, shape index: {}]   ;;  %s2775_s2 = inlined_call_operand.vmem [shape: f32[1,128], index: 2, kind: input, shape index: {}]   ;;  %s2776_s3 = inlined_call_operand.vmem [shape: f32[1,128], index: 3, kind: input, shape index: {}]   ;;  %s2777_s4 = inlined_call_operand.vmem [shape: bf16[8,128], index: 4, kind: output, shape index: {}]  }
   0x1   :  { %s2329_s17 = smov 0  }
   0x2 LB: > { %s26_s18 = sadd.s32 1, %s2293_s16  ;;  %p1776_p0 = scmp.ge.s32.totalorder %s2297_s17, 1  ;;  %s2297_s17 = sphi %s2329_s17, %s14_s17   ;;  %s2293_s16 = sphi %s2327_s16, %s2779_s16   ;;  %s2289_s15 = sphi %s2325_s15, %s2778_s15  }
   0x3   : > { %p28_p1 = scmp.ge.s32.totalorder %s26_s18, 2  ;;  %p182_p2 = scmp.lt.s32.totalorder %s2297_s17, 3 }
   0x5   : > { %s2781_s18 = smov (%p28_p1, %s26_s18), 0  ;;  %p183_p3 = pnand %p1776_p0, %p182_p2 }
   0x6   : > { %p1777_p4 = scmp.ne.s32.totalorder (!%p183_p3), %s2289_s15, 0 }
   0x7   : > { %186 = sbr.rel (%p183_p3) target bundleno = 420 (0x1a4), region = 36 }
   0xc   : > { %227 = sbr.rel (%p1777_p4) target bundleno = 365 (0x16d), region = 40 }
  0x11   : > { %v2129_v0 = vld [vmem:[%s2774_s1 + $0x78] sm:$0xff]   ;;  %v2133_v4 = vld [vmem:[%s2774_s1 + $0x70] sm:$0xff]   ;;  %v2137_v8 = vld [vmem:[%s2774_s1 + $0x68] sm:$0xff]  }
  0x12   : > { %v2130_v1 = vld [vmem:[%s2774_s1 + $0xf8] sm:$0xff]   ;;  %1928 = vmatprep.subr.bf16.mxu0 %v2129_v0  ;;  %v2134_v5 = vld [vmem:[%s2774_s1 + $0xf0] sm:$0xff]   ;;  %v2138_v9 = vld [vmem:[%s2774_s1 + $0xe8] sm:$0xff]  }
  0x13   : > { %v2131_v2 = vld [vmem:[%s2774_s1 + $0x38] sm:$0xff]   ;;  %1950 = vmatprep.subr.bf16.mxu1 %v2130_v1  ;;  %v2135_v6 = vld [vmem:[%s2774_s1 + $0x30] sm:$0xff]   ;;  %v2139_v10 = vld [vmem:[%s2774_s1 + $0x28] sm:$0xff]  }
  0x14   : > { %v2132_v3 = vld [vmem:[%s2774_s1 + $0xb8] sm:$0xff]   ;;  %1929 = vmatpush3.bf16.msra.mxu0 %v2131_v2  ;;  %v2136_v7 = vld [vmem:[%s2774_s1 + $0xb0] sm:$0xff]   ;;  %v2140_v11 = vld [vmem:[%s2774_s1 + $0xa8] sm:$0xff]  }
  0x15   : > { %1951 = vmatpush3.bf16.msra.mxu1 %v2132_v3  ;;  %1930 = vmatprep.subr.bf16.mxu0 %v2133_v4  ;;  %v2141_v12 = vld [vmem:[%s2774_s1 + $0x60] sm:$0xff]   ;;  %v2145_v16 = vld [vmem:[%s2774_s1 + $0x58] sm:$0xff]   ;;  %v2149_v20 = vld [vmem:[%s2774_s1 + $0x50] sm:$0xff]  }
  0x16   : > { %1952 = vmatprep.subr.bf16.mxu1 %v2134_v5  ;;  %v2142_v13 = vld [vmem:[%s2774_s1 + $0xe0] sm:$0xff]   ;;  %v2146_v17 = vld [vmem:[%s2774_s1 + $0xd8] sm:$0xff]   ;;  %v2150_v21 = vld [vmem:[%s2774_s1 + $0xd0] sm:$0xff]  }
  0x17   : > { %v2143_v14 = vld [vmem:[%s2774_s1 + $0x20] sm:$0xff]   ;;  %v2147_v18 = vld [vmem:[%s2774_s1 + $0x18] sm:$0xff]   ;;  %v2151_v22 = vld [vmem:[%s2774_s1 + $0x10] sm:$0xff]  }
  0x18   : > { %1931 = vmatpush3.bf16.msra.mxu0 %v2135_v6  ;;  %v2144_v15 = vld [vmem:[%s2774_s1 + $0xa0] sm:$0xff]   ;;  %v2148_v19 = vld [vmem:[%s2774_s1 + $0x98] sm:$0xff]   ;;  %v2152_v23 = vld [vmem:[%s2774_s1 + $0x90] sm:$0xff]  }
  0x19   : > { %1953 = vmatpush3.bf16.msra.mxu1 %v2136_v7  ;;  %1932 = vmatprep.subr.bf16.mxu0 %v2137_v8  ;;  %v2153_v24 = vld [vmem:[%s2774_s1 + $0x48] sm:$0xff]   ;;  %v2157_v28 = vld [vmem:[%s2774_s1 + $0x40] sm:$0xff]   ;;  %v2165_v38 = vld [vmem:[%s2774_s1 + $0x178] sm:$0xff]  }
  0x1a   : > { %1954 = vmatprep.subr.bf16.mxu1 %v2138_v9  ;;  %v2154_v25 = vld [vmem:[%s2774_s1 + $0xc8] sm:$0xff]   ;;  %v2158_v29 = vld [vmem:[%s2774_s1 + $0xc0] sm:$0xff]   ;;  %v2166_v39 = vld [vmem:[%s2774_s1 + $0x1f8] sm:$0xff]  }
  0x1b   : > { %v2155_v26 = vld [vmem:[%s2774_s1 + $0x8] sm:$0xff]   ;;  %v2159_v30 = vld [vmem:[%s2774_s1] sm:$0xff]   ;;  %v2167_v40 = vld [vmem:[%s2774_s1 + $0x138] sm:$0xff]  }
  0x1c   : > { %1933 = vmatpush3.bf16.msra.mxu0 %v2139_v10  ;;  %v2156_v27 = vld [vmem:[%s2774_s1 + $0x88] sm:$0xff]   ;;  %v2160_v31 = vld [vmem:[%s2774_s1 + $0x80] sm:$0xff]   ;;  %v2168_v41 = vld [vmem:[%s2774_s1 + $0x1b8] sm:$0xff]  }
  0x1d   : > { %1955 = vmatpush3.bf16.msra.mxu1 %v2140_v11  ;;  %1934 = vmatprep.subr.bf16.mxu0 %v2141_v12  ;;  %v234_v32 = vld [vmem:[%s2773_s0] sm:$0xff]  ;;  %v235_v33 = vld [vmem:[%s2773_s0 + $0x8] sm:$0xff]  ;;  %v2169_v42 = vld [vmem:[%s2774_s1 + $0x170] sm:$0xff]  }
  0x1e   : > { %1956 = vmatprep.subr.bf16.mxu1 %v2142_v13  ;;  %v1778_v34 = vcombine.low %v234_v32, %v234_v32  ;;  %v1779_v35 = vcombine.high %v234_v32, %v234_v32  ;;  %v1780_v36 = vcombine.low %v235_v33, %v235_v33  ;;  %v1781_v37 = vcombine.high %v235_v33, %v235_v33  ;;  %v2170_v43 = vld [vmem:[%s2774_s1 + $0x1f0] sm:$0xff]   ;;  %v2173_v46 = vld [vmem:[%s2774_s1 + $0x168] sm:$0xff]   ;;  %v2177_v50 = vld [vmem:[%s2774_s1 + $0x160] sm:$0xff]  }
  0x1f   : > { %v2171_v44 = vld [vmem:[%s2774_s1 + $0x130] sm:$0xff]   ;;  %v2174_v47 = vld [vmem:[%s2774_s1 + $0x1e8] sm:$0xff]   ;;  %v2178_v51 = vld [vmem:[%s2774_s1 + $0x1e0] sm:$0xff]  }
  0x20   : > { %1935 = vmatpush3.bf16.msra.mxu0 %v2143_v14  ;;  %1354 = vmatprep.mubr.bf16.mxu0 %v1779_v35  ;;  %v2172_v45 = vld [vmem:[%s2774_s1 + $0x1b0] sm:$0xff]   ;;  %v2175_v48 = vld [vmem:[%s2774_s1 + $0x128] sm:$0xff]   ;;  %v2179_v52 = vld [vmem:[%s2774_s1 + $0x120] sm:$0xff]  }
  0x21   : > { %1957 = vmatpush3.bf16.msra.mxu1 %v2144_v15  ;;  %1936 = vmatprep.subr.bf16.mxu0 %v2145_v16  ;;  %v2176_v49 = vld [vmem:[%s2774_s1 + $0x1a8] sm:$0xff]   ;;  %v2180_v53 = vld [vmem:[%s2774_s1 + $0x1a0] sm:$0xff]   ;;  %v2181_v54 = vld [vmem:[%s2774_s1 + $0x158] sm:$0xff]  }
  0x22   : > { %1958 = vmatprep.subr.bf16.mxu1 %v2146_v17  ;;  %1394 = vmatprep.mubr.bf16.mxu1 %v1781_v37  ;;  %v2182_v55 = vld [vmem:[%s2774_s1 + $0x1d8] sm:$0xff]   ;;  %v2185_v58 = vld [vmem:[%s2774_s1 + $0x150] sm:$0xff]   ;;  %v2189_v62 = vld [vmem:[%s2774_s1 + $0x148] sm:$0xff]  }
  0x23   : > { %v2183_v56 = vld [vmem:[%s2774_s1 + $0x118] sm:$0xff]   ;;  %v2186_v59 = vld [vmem:[%s2774_s1 + $0x1d0] sm:$0xff]   ;;  %v2190_v63 = vld [vmem:[%s2774_s1 + $0x1c8] sm:$0xff]  }
  0x24   : > { %1937 = vmatpush3.bf16.msra.mxu0 %v2147_v18  ;;  %v2184_v57 = vld [vmem:[%s2774_s1 + $0x198] sm:$0xff]   ;;  %v2187_v60 = vld [vmem:[%s2774_s1 + $0x110] sm:$0xff]   ;;  %v2191_v0 = vld [vmem:[%s2774_s1 + $0x108] sm:$0xff]  }
  0x25   : > { %1959 = vmatpush3.bf16.msra.mxu1 %v2148_v19  ;;  %1938 = vmatprep.subr.bf16.mxu0 %v2149_v20  ;;  %v2188_v61 = vld [vmem:[%s2774_s1 + $0x190] sm:$0xff]   ;;  %v2192_v1 = vld [vmem:[%s2774_s1 + $0x188] sm:$0xff]   ;;  %v2193_v2 = vld [vmem:[%s2774_s1 + $0x140] sm:$0xff]  }
  0x26   : > { %1960 = vmatprep.subr.bf16.mxu1 %v2150_v21  ;;  %v2194_v3 = vld [vmem:[%s2774_s1 + $0x1c0] sm:$0xff]   ;;  %v236_v6 = vld [vmem:[%s2773_s0 + $0x10] sm:$0xff]  ;;  %v237_v9 = vld [vmem:[%s2773_s0 + $0x18] sm:$0xff] }
  0x27   : > { %v2195_v4 = vld [vmem:[%s2774_s1 + $0x100] sm:$0xff]   ;;  %v1782_v7 = vcombine.low %v236_v6, %v236_v6  ;;  %v1783_v8 = vcombine.high %v236_v6, %v236_v6  ;;  %v1784_v10 = vcombine.low %v237_v9, %v237_v9  ;;  %v1785_v11 = vcombine.high %v237_v9, %v237_v9  ;;  %v2201_v12 = vld [vmem:[%s2774_s1 + $0x278] sm:$0xff]   ;;  %v2205_v16 = vld [vmem:[%s2774_s1 + $0x270] sm:$0xff]  }
  0x28   : > { %1939 = vmatpush3.bf16.msra.mxu0 %v2151_v22  ;;  %v2196_v5 = vld [vmem:[%s2774_s1 + $0x180] sm:$0xff]   ;;  %v2202_v13 = vld [vmem:[%s2774_s1 + $0x2f8] sm:$0xff]   ;;  %v2206_v17 = vld [vmem:[%s2774_s1 + $0x2f0] sm:$0xff]  }
  0x29   : > { %1961 = vmatpush3.bf16.msra.mxu1 %v2152_v23  ;;  %1940 = vmatprep.subr.bf16.mxu0 %v2153_v24  ;;  %v2203_v14 = vld [vmem:[%s2774_s1 + $0x238] sm:$0xff]   ;;  %v2207_v18 = vld [vmem:[%s2774_s1 + $0x230] sm:$0xff]   ;;  %v2209_v20 = vld [vmem:[%s2774_s1 + $0x268] sm:$0xff]  }
  0x2a   : > { %1962 = vmatprep.subr.bf16.mxu1 %v2154_v25  ;;  %v2204_v15 = vld [vmem:[%s2774_s1 + $0x2b8] sm:$0xff]   ;;  %v2208_v19 = vld [vmem:[%s2774_s1 + $0x2b0] sm:$0xff]   ;;  %v2210_v21 = vld [vmem:[%s2774_s1 + $0x2e8] sm:$0xff]  }
  0x2b   : > { %v2211_v22 = vld [vmem:[%s2774_s1 + $0x228] sm:$0xff]   ;;  %v2213_v24 = vld [vmem:[%s2774_s1 + $0x260] sm:$0xff]   ;;  %v2221_v32 = vld [vmem:[%s2774_s1 + $0x250] sm:$0xff]  }
  0x2c   : > { %1941 = vmatpush3.bf16.msra.mxu0 %v2155_v26  ;;  %v2212_v23 = vld [vmem:[%s2774_s1 + $0x2a8] sm:$0xff]   ;;  %v2214_v25 = vld [vmem:[%s2774_s1 + $0x2e0] sm:$0xff]   ;;  %v2222_v33 = vld [vmem:[%s2774_s1 + $0x2d0] sm:$0xff]  }
  0x2d   : > { %1963 = vmatpush3.bf16.msra.mxu1 %v2156_v27  ;;  %1942 = vmatprep.subr.bf16.mxu0 %v2157_v28  ;;  %v2215_v26 = vld [vmem:[%s2774_s1 + $0x220] sm:$0xff]   ;;  %v2217_v28 = vld [vmem:[%s2774_s1 + $0x258] sm:$0xff]   ;;  %v2224_v35 = vld [vmem:[%s2774_s1 + $0x290] sm:$0xff]  }
  0x2e   : > { %1964 = vmatprep.subr.bf16.mxu1 %v2158_v29  ;;  %v2216_v27 = vld [vmem:[%s2774_s1 + $0x2a0] sm:$0xff]   ;;  %v2218_v29 = vld [vmem:[%s2774_s1 + $0x2d8] sm:$0xff]   ;;  %v2226_v37 = vld [vmem:[%s2774_s1 + $0x2c8] sm:$0xff]  }
  0x2f   : > { %v2257_v6 = vld [vmem:[%s2774_s1 + $0x350] sm:$0xff]  }
  0x30   : > { %1943 = vmatpush3.bf16.msra.mxu0 %v2159_v30  ;;  %v2219_v30 = vld [vmem:[%s2774_s1 + $0x218] sm:$0xff]   ;;  %v2260_v9 = vld [vmem:[%s2774_s1 + $0x390] sm:$0xff]  }
  0x31   : > { %1965 = vmatpush3.bf16.msra.mxu1 %v2160_v31  ;;  %1972 = vmatprep.subr.bf16.mxu0 %v2165_v38  ;;  %v2220_v31 = vld [vmem:[%s2774_s1 + $0x298] sm:$0xff]   ;;  %v2227_v38 = vld [vmem:[%s2774_s1 + $0x208] sm:$0xff]  }
  0x32   : > { %1994 = vmatprep.subr.bf16.mxu1 %v2166_v39  ;;  %v2228_v39 = vld [vmem:[%s2774_s1 + $0x288] sm:$0xff]  }
  0x33   : > { %1355 = vmatmul.mubr.bf16.vlgmr.msra.gmra.mxu0 %v1778_v34  ;;  %v2223_v34 = vld [vmem:[%s2774_s1 + $0x210] sm:$0xff]  }
  0x34   : > { %1395 = vmatmul.mubr.bf16.vlgmr.msra.gmra.mxu1 %v1780_v36  ;;  %1973 = vmatpush3.bf16.msra.mxu0 %v2167_v40  ;;  %v2225_v36 = vld [vmem:[%s2774_s1 + $0x248] sm:$0xff]   ;;  %v2229_v40 = vld [vmem:[%s2774_s1 + $0x240] sm:$0xff]  }
  0x35   : > { %1995 = vmatpush3.bf16.msra.mxu1 %v2168_v41  ;;  %1974 = vmatprep.subr.bf16.mxu0 %v2169_v42  ;;  %v2230_v41 = vld [vmem:[%s2774_s1 + $0x2c0] sm:$0xff]  }
  0x36   : > { %1996 = vmatprep.subr.bf16.mxu1 %v2170_v43  ;;  %1434 = vmatprep.mubr.bf16.mxu0 %v1783_v8  ;;  %v2231_v42 = vld [vmem:[%s2774_s1 + $0x200] sm:$0xff]   ;;  %v2259_v8 = vld [vmem:[%s2774_s1 + $0x310] sm:$0xff]  }
  0x37   : > { %1474 = vmatprep.mubr.bf16.mxu1 %v1785_v11  ;;  %v2232_v43 = vld [vmem:[%s2774_s1 + $0x280] sm:$0xff]   ;;  %v2262_v11 = vld [vmem:[%s2774_s1 + $0x3c8] sm:$0xff]  }
  0x38   : > { %1975 = vmatpush3.bf16.msra.mxu0 %v2171_v44  ;;  %v238_v44 = vld [vmem:[%s2773_s0 + $0x20] sm:$0xff] }
  0x39   : > { %1997 = vmatpush3.bf16.msra.mxu1 %v2172_v45  ;;  %1976 = vmatprep.subr.bf16.mxu0 %v2173_v46  ;;  %v239_v45 = vld [vmem:[%s2773_s0 + $0x28] sm:$0xff]  ;;  %v1786_v46 = vcombine.low %v238_v44, %v238_v44 }
  0x3a   : > { %1998 = vmatprep.subr.bf16.mxu1 %v2174_v47  ;;  %v1787_v47 = vcombine.high %v238_v44, %v238_v44 }
  0x3c   : > { %1977 = vmatpush3.bf16.msra.mxu0 %v2175_v48  ;;  %v1788_v48 = vcombine.low %v239_v45, %v239_v45 }
  0x3d   : > { %1999 = vmatpush3.bf16.msra.mxu1 %v2176_v49  ;;  %1978 = vmatprep.subr.bf16.mxu0 %v2177_v50  ;;  %v1789_v49 = vcombine.high %v239_v45, %v239_v45  ;;  %v2237_v50 = vld [vmem:[%s2774_s1 + $0x378] sm:$0xff]  }
  0x3e   : > { %2000 = vmatprep.subr.bf16.mxu1 %v2178_v51  ;;  %v2238_v51 = vld [vmem:[%s2774_s1 + $0x3f8] sm:$0xff]  }
  0x40   : > { %1979 = vmatpush3.bf16.msra.mxu0 %v2179_v52  ;;  %v2239_v52 = vld [vmem:[%s2774_s1 + $0x338] sm:$0xff]  }
  0x41   : > { %2001 = vmatpush3.bf16.msra.mxu1 %v2180_v53  ;;  %1980 = vmatprep.subr.bf16.mxu0 %v2181_v54  ;;  %v2240_v53 = vld [vmem:[%s2774_s1 + $0x3b8] sm:$0xff]   ;;  %v2241_v54 = vld [vmem:[%s2774_s1 + $0x370] sm:$0xff]  }
  0x42   : > { %2002 = vmatprep.subr.bf16.mxu1 %v2182_v55  ;;  %v2242_v55 = vld [vmem:[%s2774_s1 + $0x3f0] sm:$0xff]  }
  0x44   : > { %1981 = vmatpush3.bf16.msra.mxu0 %v2183_v56  ;;  %v2243_v56 = vld [vmem:[%s2774_s1 + $0x330] sm:$0xff]  }
  0x45   : > { %2003 = vmatpush3.bf16.msra.mxu1 %v2184_v57  ;;  %1982 = vmatprep.subr.bf16.mxu0 %v2185_v58  ;;  %v2244_v57 = vld [vmem:[%s2774_s1 + $0x3b0] sm:$0xff]   ;;  %v2245_v58 = vld [vmem:[%s2774_s1 + $0x368] sm:$0xff]  }
  0x46   : > { %2004 = vmatprep.subr.bf16.mxu1 %v2186_v59  ;;  %v2246_v59 = vld [vmem:[%s2774_s1 + $0x3e8] sm:$0xff]  }
  0x48   : > { %1983 = vmatpush3.bf16.msra.mxu0 %v2187_v60  ;;  %v2247_v60 = vld [vmem:[%s2774_s1 + $0x328] sm:$0xff]  }
  0x49   : > { %2005 = vmatpush3.bf16.msra.mxu1 %v2188_v61  ;;  %1984 = vmatprep.subr.bf16.mxu0 %v2189_v62  ;;  %v2248_v61 = vld [vmem:[%s2774_s1 + $0x3a8] sm:$0xff]   ;;  %v2249_v62 = vld [vmem:[%s2774_s1 + $0x360] sm:$0xff]  }
  0x4a   : > { %2006 = vmatprep.subr.bf16.mxu1 %v2190_v63  ;;  %v2250_v63 = vld [vmem:[%s2774_s1 + $0x3e0] sm:$0xff]  }
  0x4c   : > { %1985 = vmatpush3.bf16.msra.mxu0 %v2191_v0  ;;  %v2251_v0 = vld [vmem:[%s2774_s1 + $0x320] sm:$0xff]  }
  0x4d   : > { %2007 = vmatpush3.bf16.msra.mxu1 %v2192_v1  ;;  %1986 = vmatprep.subr.bf16.mxu0 %v2193_v2  ;;  %v2252_v1 = vld [vmem:[%s2774_s1 + $0x3a0] sm:$0xff]   ;;  %v2253_v2 = vld [vmem:[%s2774_s1 + $0x358] sm:$0xff]  }
  0x4e   : > { %2008 = vmatprep.subr.bf16.mxu1 %v2194_v3  ;;  %v2254_v3 = vld [vmem:[%s2774_s1 + $0x3d8] sm:$0xff]  }
  0x50   : > { %1987 = vmatpush3.bf16.msra.mxu0 %v2195_v4  ;;  %v2255_v4 = vld [vmem:[%s2774_s1 + $0x318] sm:$0xff]  }
  0x51   : > { %2009 = vmatpush3.bf16.msra.mxu1 %v2196_v5  ;;  %2016 = vmatprep.subr.bf16.mxu0 %v2201_v12  ;;  %v2256_v5 = vld [vmem:[%s2774_s1 + $0x398] sm:$0xff]   ;;  %v2263_v12 = vld [vmem:[%s2774_s1 + $0x308] sm:$0xff]  }
  0x52   : > { %2038 = vmatprep.subr.bf16.mxu1 %v2202_v13  ;;  %v2264_v13 = vld [vmem:[%s2774_s1 + $0x388] sm:$0xff]  }
  0x53   : > { %1435 = vmatmul.mubr.bf16.vlgmr.msra.gmra.mxu0 %v1782_v7  ;;  %v2258_v7 = vld [vmem:[%s2774_s1 + $0x3d0] sm:$0xff]  }
  0x54   : > { %1475 = vmatmul.mubr.bf16.vlgmr.msra.gmra.mxu1 %v1784_v10  ;;  %2017 = vmatpush3.bf16.msra.mxu0 %v2203_v14  ;;  %v2261_v10 = vld [vmem:[%s2774_s1 + $0x348] sm:$0xff]   ;;  %v2265_v14 = vld [vmem:[%s2774_s1 + $0x340] sm:$0xff]  }
  0x55   : > { %2039 = vmatpush3.bf16.msra.mxu1 %v2204_v15  ;;  %2018 = vmatprep.subr.bf16.mxu0 %v2205_v16  ;;  %v2266_v15 = vld [vmem:[%s2774_s1 + $0x3c0] sm:$0xff]  }
  0x56   : > { %2040 = vmatprep.subr.bf16.mxu1 %v2206_v17  ;;  %1514 = vmatprep.mubr.bf16.mxu0 %v1787_v47  ;;  %v2267_v16 = vld [vmem:[%s2774_s1 + $0x300] sm:$0xff]  }
  0x57   : > { %1554 = vmatprep.mubr.bf16.mxu1 %v1789_v49  ;;  %v2268_v17 = vld [vmem:[%s2774_s1 + $0x380] sm:$0xff]  }
  0x58   : > { %2019 = vmatpush3.bf16.msra.mxu0 %v2207_v18  ;;  %v240_v18 = vld [vmem:[%s2773_s0 + $0x30] sm:$0xff] }
  0x59   : > { %2041 = vmatpush3.bf16.msra.mxu1 %v2208_v19  ;;  %2020 = vmatprep.subr.bf16.mxu0 %v2209_v20  ;;  %v241_v19 = vld [vmem:[%s2773_s0 + $0x38] sm:$0xff]  ;;  %v1790_v20 = vcombine.low %v240_v18, %v240_v18 }
  0x5a   : > { %2042 = vmatprep.subr.bf16.mxu1 %v2210_v21  ;;  %v1791_v21 = vcombine.high %v240_v18, %v240_v18 }
  0x5c   : > { %2021 = vmatpush3.bf16.msra.mxu0 %v2211_v22  ;;  %v1792_v22 = vcombine.low %v241_v19, %v241_v19 }
  0x5d   : > { %2043 = vmatpush3.bf16.msra.mxu1 %v2212_v23  ;;  %2022 = vmatprep.subr.bf16.mxu0 %v2213_v24  ;;  %v1793_v23 = vcombine.high %v241_v19, %v241_v19  ;;  %v2299_v24 = vmov 0.0  }
  0x5e   : > { %2044 = vmatprep.subr.bf16.mxu1 %v2214_v25  ;;  %232 = vst [vmem:[#allocation3] sm:$0x1] %v2299_v24  ;;  %233 = vst [vmem:[#allocation4] sm:$0x1] %v2299_v24 }
  0x60   : > { %2023 = vmatpush3.bf16.msra.mxu0 %v2215_v26 }
  0x61   : > { %2045 = vmatpush3.bf16.msra.mxu1 %v2216_v27  ;;  %2024 = vmatprep.subr.bf16.mxu0 %v2217_v28 }
  0x62   : > { %2046 = vmatprep.subr.bf16.mxu1 %v2218_v29 }
  0x64   : > { %2025 = vmatpush3.bf16.msra.mxu0 %v2219_v30 }
  0x65   : > { %2047 = vmatpush3.bf16.msra.mxu1 %v2220_v31  ;;  %2026 = vmatprep.subr.bf16.mxu0 %v2221_v32  ;;  %v1644_v18 = vld [vmem:[#allocation3] sm:$0x1] }
  0x66   : > { %2048 = vmatprep.subr.bf16.mxu1 %v2222_v33 }
  0x68   : > { %2027 = vmatpush3.bf16.msra.mxu0 %v2223_v34 }
  0x69   : > { %2049 = vmatpush3.bf16.msra.mxu1 %v2224_v35  ;;  %2028 = vmatprep.subr.bf16.mxu0 %v2225_v36 }
  0x6a   : > { %2050 = vmatprep.subr.bf16.mxu1 %v2226_v37 }
  0x6c   : > { %2029 = vmatpush3.bf16.msra.mxu0 %v2227_v38 }
  0x6d   : > { %2051 = vmatpush3.bf16.msra.mxu1 %v2228_v39  ;;  %2030 = vmatprep.subr.bf16.mxu0 %v2229_v40 }
  0x6e   : > { %2052 = vmatprep.subr.bf16.mxu1 %v2230_v41 }
  0x70   : > { %2031 = vmatpush3.bf16.msra.mxu0 %v2231_v42 }
  0x71   : > { %2053 = vmatpush3.bf16.msra.mxu1 %v2232_v43  ;;  %2060 = vmatprep.subr.bf16.mxu0 %v2237_v50 }
  0x72   : > { %2082 = vmatprep.subr.bf16.mxu1 %v2238_v51 }
  0x73   : > { %1515 = vmatmul.mubr.bf16.vlgmr.msra.gmra.mxu0 %v1786_v46 }
  0x74   : > { %1555 = vmatmul.mubr.bf16.vlgmr.msra.gmra.mxu1 %v1788_v48  ;;  %2061 = vmatpush3.bf16.msra.mxu0 %v2239_v52 }
  0x75   : > { %2083 = vmatpush3.bf16.msra.mxu1 %v2240_v53  ;;  %2062 = vmatprep.subr.bf16.mxu0 %v2241_v54 }
  0x76   : > { %2084 = vmatprep.subr.bf16.mxu1 %v2242_v55  ;;  %1594 = vmatprep.mubr.bf16.mxu0 %v1791_v21  ;;  %v1653_v21 = vld [vmem:[#allocation4] sm:$0x1] }
  0x77   : > { %1634 = vmatprep.mubr.bf16.mxu1 %v1793_v23 }
  0x78   : > { %2063 = vmatpush3.bf16.msra.mxu0 %v2243_v56 }
  0x79   : > { %2085 = vmatpush3.bf16.msra.mxu1 %v2244_v57  ;;  %2064 = vmatprep.subr.bf16.mxu0 %v2245_v58 }
  0x7a   : > { %2086 = vmatprep.subr.bf16.mxu1 %v2246_v59 }
  0x7c   : > { %2065 = vmatpush3.bf16.msra.mxu0 %v2247_v60 }
  0x7d   : > { %2087 = vmatpush3.bf16.msra.mxu1 %v2248_v61  ;;  %2066 = vmatprep.subr.bf16.mxu0 %v2249_v62 }
  0x7e   : > { %2088 = vmatprep.subr.bf16.mxu1 %v2250_v63 }
  0x80   : > { %2067 = vmatpush3.bf16.msra.mxu0 %v2251_v0 }
  0x81   : > { %2089 = vmatpush3.bf16.msra.mxu1 %v2252_v1  ;;  %2068 = vmatprep.subr.bf16.mxu0 %v2253_v2 }
  0x82   : > { %2090 = vmatprep.subr.bf16.mxu1 %v2254_v3 }
  0x84   : > { %2069 = vmatpush3.bf16.msra.mxu0 %v2255_v4 }
  0x85   : > { %2091 = vmatpush3.bf16.msra.mxu1 %v2256_v5  ;;  %2070 = vmatprep.subr.bf16.mxu0 %v2257_v6 }
  0x86   : > { %2092 = vmatprep.subr.bf16.mxu1 %v2258_v7 }
  0x88   : > { %2071 = vmatpush3.bf16.msra.mxu0 %v2259_v8 }
  0x89   : > { %2093 = vmatpush3.bf16.msra.mxu1 %v2260_v9  ;;  %2072 = vmatprep.subr.bf16.mxu0 %v2261_v10 }
  0x8a   : > { %2094 = vmatprep.subr.bf16.mxu1 %v2262_v11 }
  0x8c   : > { %2073 = vmatpush3.bf16.msra.mxu0 %v2263_v12 }
  0x8d   : > { %2095 = vmatpush3.bf16.msra.mxu1 %v2264_v13  ;;  %2074 = vmatprep.subr.bf16.mxu0 %v2265_v14 }
  0x8e   : > { %2096 = vmatprep.subr.bf16.mxu1 %v2266_v15 }
  0x90   : > { %2075 = vmatpush3.bf16.msra.mxu0 %v2267_v16 }
  0x91   : > { %2097 = vmatpush3.bf16.msra.mxu1 %v2268_v17 }
  0x93   : > { %1595 = vmatmul.mubr.bf16.vlgmr.msra.gmra.mxu0 %v1790_v20 }
  0x94   : > { %1635 = vmatmul.mubr.bf16.vlgmr.msra.gmra.mxu1 %v1792_v22 }
  0xf3   : > { %v1944_v25 = vpop.f32.mrf.mxu0 }
  0xf4   : > { %v1966_v26 = vpop.f32.mrf.mxu1 }
  0xf5   : > { %v1945_v27 = vpop.f32.mrf.mxu0 }
  0xf6   : > { %v1967_v28 = vpop.f32.mrf.mxu1  ;;  %v1946_v29 = vadd.f32 %v1945_v27, %v1944_v25 }
  0xf7   : > { %v1968_v30 = vadd.f32 %v1967_v28, %v1966_v26  ;;  %v1947_v31 = vpop.f32.mrf.mxu0 }
  0xf8   : > { %v1969_v32 = vpop.f32.mrf.mxu1 }
  0xf9   : > { %v1397_v33 = vadd.f32 %v1968_v30, %v1946_v29  ;;  %v1948_v34 = vpop.f32.mrf.mxu0 }
  0xfa   : > { %v1970_v35 = vpop.f32.mrf.mxu1 }
 0x113   : > { %v1988_v36 = vpop.f32.mrf.mxu0 }
 0x114   : > { %v2010_v37 = vpop.f32.mrf.mxu1 }
 0x115   : > { %v1989_v38 = vpop.f32.mrf.mxu0 }
 0x116   : > { %v2011_v39 = vpop.f32.mrf.mxu1  ;;  %v1990_v52 = vadd.f32 %v1989_v38, %v1988_v36 }
 0x117   : > { %v1991_v40 = vpop.f32.mrf.mxu0  ;;  %v2012_v54 = vadd.f32 %v2011_v39, %v2010_v37 }
 0x118   : > { %v2013_v41 = vpop.f32.mrf.mxu1  ;;  %v1437_v53 = vadd.f32 %v1990_v52, %v1397_v33 }
 0x119   : > { %v1992_v42 = vpop.f32.mrf.mxu0 }
 0x11a   : > { %v2014_v43 = vpop.f32.mrf.mxu1  ;;  %v1477_v56 = vadd.f32 %v2012_v54, %v1437_v53 }
 0x133   : > { %v2032_v44 = vpop.f32.mrf.mxu0 }
 0x134   : > { %v2054_v45 = vpop.f32.mrf.mxu1 }
 0x135   : > { %v2033_v46 = vpop.f32.mrf.mxu0 }
 0x136   : > { %v2055_v47 = vpop.f32.mrf.mxu1  ;;  %v2034_v55 = vadd.f32 %v2033_v46, %v2032_v44 }
 0x137   : > { %v2035_v48 = vpop.f32.mrf.mxu0  ;;  %v2056_v58 = vadd.f32 %v2055_v47, %v2054_v45 }
 0x138   : > { %v2057_v49 = vpop.f32.mrf.mxu1  ;;  %v1517_v57 = vadd.f32 %v2034_v55, %v1477_v56 }
 0x139   : > { %v2036_v50 = vpop.f32.mrf.mxu0 }
 0x13a   : > { %v2058_v51 = vpop.f32.mrf.mxu1  ;;  %v1557_v62 = vadd.f32 %v2056_v58, %v1517_v57 }
 0x153   : > { %v2076_v59 = vpop.f32.mrf.mxu0 }
 0x154   : > { %v2098_v60 = vpop.f32.mrf.mxu1 }
 0x155   : > { %v2077_v61 = vpop.f32.mrf.mxu0 }
 0x156   : > { %v2078_v63 = vadd.f32 %v2077_v61, %v2076_v59  ;;  %v2099_v0 = vpop.f32.mrf.mxu1 }
 0x157   : > { %v2079_v1 = vpop.f32.mrf.mxu0  ;;  %v2100_v3 = vadd.f32 %v2099_v0, %v2098_v60 }
 0x158   : > { %v1597_v2 = vadd.f32 %v2078_v63, %v1557_v62  ;;  %v2101_v4 = vpop.f32.mrf.mxu1 }
 0x159   : > { %v2080_v5 = vpop.f32.mrf.mxu0 }
 0x15a   : > { %v1637_v6 = vadd.f32 %v2100_v3, %v1597_v2  ;;  %v2102_v7 = vpop.f32.mrf.mxu1 }
 0x15c   : > { %1643 = vst [vmem:[#allocation2] sm:$0xff] %v1637_v6  ;;  %v1645_v8 = vrot.slane %v1637_v6, 4  ;;  %v1654_v9 = vmul.f32 %v1637_v6, %v1637_v6 }
 0x15e   : > { %v1646_v10 = vadd.f32 %v1645_v8, %v1637_v6  ;;  %v1655_v11 = vrot.slane %v1654_v9, 4 }
 0x160   : > { %v1647_v12 = vrot.slane %v1646_v10, 2  ;;  %v1656_v13 = vadd.f32 %v1655_v11, %v1654_v9 }
 0x162   : > { %v1648_v14 = vadd.f32 %v1647_v12, %v1646_v10  ;;  %v1657_v15 = vrot.slane %v1656_v13, 2 }
 0x164   : > { %v1649_v16 = vrot.slane %v1648_v14, 1  ;;  %v1658_v17 = vadd.f32 %v1657_v15, %v1656_v13 }
 0x166   : > { %v1650_v19 = vadd.f32 %v1649_v16, %v1648_v14  ;;  %v1659_v20 = vrot.slane %v1658_v17, 1 }
 0x168   : > { %v1651_v22 = vadd.f32 %v1650_v19, %v1644_v18  ;;  %v1660_v23 = vadd.f32 %v1659_v20, %v1658_v17 }
 0x16a   : > { %1652 = vst [vmem:[#allocation3] sm:$0x1] %v1651_v22  ;;  %v1661_v24 = vadd.f32 %v1660_v23, %v1653_v21 }
 0x16c   : > { %1662 = vst [vmem:[#allocation4] sm:$0x1] %v1661_v24 }
 0x16d PF: > { %p1922_p5 = scmp.ne.s32.totalorder %s2289_s15, 1 }
 0x16f   : > { %1666 = sbr.rel (%p1922_p5) target bundleno = 420 (0x1a4), region = 48 }
 0x174   : > { %v1671_v25 = vld [vmem:[#allocation3] sm:$0x1]  ;;  %v1673_v26 = vld [vmem:[#allocation4] sm:$0x1]  ;;  %v1678_v33 = vld [vmem:[%s2775_s2] sm:$0x1] }
 0x175   : > { %v1672_v27 = vmul.f32 0.125, %v1671_v25  ;;  %v1674_v28 = vmul.f32 0.125, %v1673_v26  ;;  %v1683_v36 = vld [vmem:[%s2776_s3] sm:$0x1] }
 0x176   : > { %v1688_v39 = vld [vmem:[#allocation2] sm:$0xff] }
 0x177   : > { %v1675_v29 = vmul.f32 %v1672_v27, %v1672_v27 }
 0x179   : > { %v1676_v30 = vsub.f32 %v1674_v28, %v1675_v29 }
 0x17b   : > { %v1677_v31 = vmax.f32 %v1676_v30, 0.0 }
 0x17d   : > { %v1679_v32 = vadd.f32 1e-05, %v1677_v31 }
 0x17f   : > { %2273 = vrsqrt.f32 %v1679_v32 }
 0x18c   : > { %v2274_v34 = vpop.eup %2273 }
 0x18d   : > { %v1681_v35 = vmul.f32 %v2274_v34, %v1678_v33 }
 0x18f   : > { %1682 = vst [vmem:[#allocation5] sm:$0x1] %v1681_v35  ;;  %v1684_v37 = vmul.f32 %v1681_v35, %v1672_v27 }
 0x191   : > { %v1685_v38 = vsub.f32 %v1683_v36, %v1684_v37 }
 0x193   : > { %1686 = vst [vmem:[#allocation6] sm:$0x1] %v1685_v38 }
 0x196   : > { %v1923_v40 = vld [vmem:[#allocation5] ss:$0 sm:$0xff] }
 0x197   : > { %v1696_v41 = vmul.f32 %v1923_v40, %v1688_v39 }
 0x19a   : > { %v1924_v42 = vld [vmem:[#allocation6] ss:$0 sm:$0xff] }
 0x19b   : > { %v1704_v43 = vadd.f32 %v1924_v42, %v1696_v41 }
 0x19d   : > { %v1705_v44 = vmul.f32 0.1, %v1704_v43 }
 0x19f   : > { %v1706_v45 = vmax.f32 %v1704_v43, %v1705_v44 }
 0x1a1   : > { %v1707_v46 = vpack.c.bf16 %v1706_v45, %v1706_v45 }
 0x1a3   : > { %1708 = vst [vmem:[%s2777_s4] sm:$0xf] %v1707_v46 }
 0x1a4 PF: > { %s14_s17 = sadd.s32 1, %s2297_s17   ;;  %s2778_s15 = smov %s2293_s16 }
 0x1a5   : > { %p11_p6 = scmp.ge.s32.totalorder %s14_s17, 4   ;;  %s2779_s16 = smov %s2781_s18 }
 0x1a7   :  { %13 = sbr.rel (!%p11_p6) target bundleno = 2 (0x2), region = 84 }

// kernel: discriminator_cifar_forward.9
= control target key start
LH: loop header
LB: loop body
LE: loop exit
PB: predicated region body
PF: predicated region fallthrough
CT: control target
= control target key end

     0   :  { %v280_v35 = vlaneseq  ;;  %v3170_v36 = vmov 1966171168   ;;  %vm2664_vm3 = vcmask 1041408   ;;  %s4233_s1 = inlined_call_operand.vmem [shape: bf16[512,1024], index: 1, kind: input, shape index: {}]   ;;  %s4234_s0 = inlined_call_operand.vmem [shape: bf16[2,512], index: 0, kind: input, shape index: {}]   ;;  %s4235_s3 = inlined_call_operand.vmem [shape: bf16[1024,128], index: 3, kind: input, shape index: {}]   ;;  %s4236_s2 = inlined_call_operand.vmem [shape: f32[1,1024], index: 2, kind: input, shape index: {}]   ;;  %s4237_s4 = inlined_call_operand.vmem [shape: f32[1,128], index: 4, kind: input, shape index: {}]   ;;  %s4238_s5 = inlined_call_operand.vmem [shape: f32[2,128], index: 5, kind: output, shape index: {}]  }
   0x1   :  { %v78_v0 = vld [vmem:[%s4233_s1 + $0x1c0] sm:$0xff]  ;;  %v330_v37 = vunpack.c.l.s4 %v3170_v36 }
   0x2   :  { %v82_v1 = vld [vmem:[%s4233_s1 + $0x1e0] sm:$0xff]  ;;  %v3274_v46 = vshrl.u32 %v280_v35, 7 }
   0x3   :  { %v206_v2 = vld [vmem:[%s4233_s1 + $0x5c0] sm:$0xff]  ;;  %v2745_v3 = vcombine.high %v78_v0, %v82_v1  ;;  %v2744_v5 = vcombine.low %v78_v0, %v82_v1  ;;  %v331_v47 = vunpack.c.0.s8 %v330_v37 }
   0x4   :  { %v210_v4 = vld [vmem:[%s4233_s1 + $0x5e0] sm:$0xff] }
   0x5   :  { %v70_v6 = vld [vmem:[%s4233_s1 + $0x180] sm:$0xff]  ;;  %v2873_v8 = vcombine.high %v206_v2, %v210_v4  ;;  %v2872_v9 = vcombine.low %v206_v2, %v210_v4  ;;  %1629 = vmatprep.subr.bf16.mxu0 %v2745_v3  ;;  %v3289_v56 = vsub.s32 %v331_v47, %v3274_v46 }
   0x6   :  { %v74_v7 = vld [vmem:[%s4233_s1 + $0x1a0] sm:$0xff]  ;;  %1630 = vmatpush1.bf16.msra.mxu0 %v2744_v5 }
   0x7   :  { %v2737_v10 = vcombine.high %v70_v6, %v74_v7  ;;  %v198_v11 = vld [vmem:[%s4233_s1 + $0x580] sm:$0xff]  ;;  %1670 = vmatprep.subr.bf16.mxu1 %v2873_v8  ;;  %v2736_v18 = vcombine.low %v70_v6, %v74_v7 }
   0x8   :  { %v202_v12 = vld [vmem:[%s4233_s1 + $0x5a0] sm:$0xff]  ;;  %1671 = vmatpush1.bf16.msra.mxu1 %v2872_v9 }
   0x9   :  { %v62_v13 = vld [vmem:[%s4233_s1 + $0x140] sm:$0xff]  ;;  %v2865_v14 = vcombine.high %v198_v11, %v202_v12  ;;  %1631 = vmatprep.subr.bf16.mxu0 %v2737_v10  ;;  %v2864_v19 = vcombine.low %v198_v11, %v202_v12 }
   0xa   :  { %v66_v15 = vld [vmem:[%s4233_s1 + $0x160] sm:$0xff]  ;;  %1632 = vmatpush1.bf16.msra.mxu0 %v2736_v18 }
   0xb   :  { %v190_v16 = vld [vmem:[%s4233_s1 + $0x540] sm:$0xff]  ;;  %v2729_v20 = vcombine.high %v62_v13, %v66_v15  ;;  %1672 = vmatprep.subr.bf16.mxu1 %v2865_v14  ;;  %v2728_v26 = vcombine.low %v62_v13, %v66_v15 }
   0xc   :  { %v194_v17 = vld [vmem:[%s4233_s1 + $0x560] sm:$0xff]  ;;  %1673 = vmatpush1.bf16.msra.mxu1 %v2864_v19 }
   0xd   :  { %v2857_v21 = vcombine.high %v190_v16, %v194_v17  ;;  %v54_v22 = vld [vmem:[%s4233_s1 + $0x100] sm:$0xff]  ;;  %1633 = vmatprep.subr.bf16.mxu0 %v2729_v20  ;;  %v2856_v27 = vcombine.low %v190_v16, %v194_v17 }
   0xe   :  { %v58_v23 = vld [vmem:[%s4233_s1 + $0x120] sm:$0xff]  ;;  %1634 = vmatpush1.bf16.msra.mxu0 %v2728_v26 }
   0xf   :  { %v182_v24 = vld [vmem:[%s4233_s1 + $0x500] sm:$0xff]  ;;  %v2721_v28 = vcombine.high %v54_v22, %v58_v23  ;;  %1674 = vmatprep.subr.bf16.mxu1 %v2857_v21  ;;  %v2720_v34 = vcombine.low %v54_v22, %v58_v23 }
  0x10   :  { %v186_v25 = vld [vmem:[%s4233_s1 + $0x520] sm:$0xff]  ;;  %1675 = vmatpush1.bf16.msra.mxu1 %v2856_v27 }
  0x11   :  { %v2849_v29 = vcombine.high %v182_v24, %v186_v25  ;;  %v46_v30 = vld [vmem:[%s4233_s1 + $0xc0] sm:$0xff]  ;;  %1635 = vmatprep.subr.bf16.mxu0 %v2721_v28  ;;  %v2848_v38 = vcombine.low %v182_v24, %v186_v25 }
  0x12   :  { %v50_v31 = vld [vmem:[%s4233_s1 + $0xe0] sm:$0xff]  ;;  %1636 = vmatpush1.bf16.msra.mxu0 %v2720_v34 }
  0x13   :  { %v174_v32 = vld [vmem:[%s4233_s1 + $0x4c0] sm:$0xff]  ;;  %v2713_v39 = vcombine.high %v46_v30, %v50_v31  ;;  %1676 = vmatprep.subr.bf16.mxu1 %v2849_v29  ;;  %v2712_v45 = vcombine.low %v46_v30, %v50_v31 }
  0x14   :  { %v178_v33 = vld [vmem:[%s4233_s1 + $0x4e0] sm:$0xff]  ;;  %1677 = vmatpush1.bf16.msra.mxu1 %v2848_v38 }
  0x15   :  { %v2841_v40 = vcombine.high %v174_v32, %v178_v33  ;;  %v38_v41 = vld [vmem:[%s4233_s1 + $0x80] sm:$0xff]  ;;  %1637 = vmatprep.subr.bf16.mxu0 %v2713_v39  ;;  %v2840_v48 = vcombine.low %v174_v32, %v178_v33 }
  0x16   :  { %v42_v42 = vld [vmem:[%s4233_s1 + $0xa0] sm:$0xff]  ;;  %1638 = vmatpush1.bf16.msra.mxu0 %v2712_v45 }
  0x17   :  { %v166_v43 = vld [vmem:[%s4233_s1 + $0x480] sm:$0xff]  ;;  %v2705_v49 = vcombine.high %v38_v41, %v42_v42  ;;  %1678 = vmatprep.subr.bf16.mxu1 %v2841_v40  ;;  %v2704_v55 = vcombine.low %v38_v41, %v42_v42 }
  0x18   :  { %v170_v44 = vld [vmem:[%s4233_s1 + $0x4a0] sm:$0xff]  ;;  %1679 = vmatpush1.bf16.msra.mxu1 %v2840_v48 }
  0x19   :  { %v2833_v50 = vcombine.high %v166_v43, %v170_v44  ;;  %v30_v51 = vld [vmem:[%s4233_s1 + $0x40] sm:$0xff]  ;;  %1639 = vmatprep.subr.bf16.mxu0 %v2705_v49  ;;  %v2832_v57 = vcombine.low %v166_v43, %v170_v44 }
  0x1a   :  { %v34_v52 = vld [vmem:[%s4233_s1 + $0x60] sm:$0xff]  ;;  %1640 = vmatpush1.bf16.msra.mxu0 %v2704_v55 }
  0x1b   :  { %v158_v53 = vld [vmem:[%s4233_s1 + $0x440] sm:$0xff]  ;;  %v2697_v58 = vcombine.high %v30_v51, %v34_v52  ;;  %1680 = vmatprep.subr.bf16.mxu1 %v2833_v50  ;;  %v2696_v2 = vcombine.low %v30_v51, %v34_v52 }
  0x1c   :  { %v162_v54 = vld [vmem:[%s4233_s1 + $0x460] sm:$0xff]  ;;  %1681 = vmatpush1.bf16.msra.mxu1 %v2832_v57 }
  0x1d   :  { %v3294_v59 = vld.sshfl [vmem:[%s4234_s0] sm:$0x33 pattern:$0x75316420]  ;;  %v2825_v60 = vcombine.high %v158_v53, %v162_v54  ;;  %1641 = vmatprep.subr.bf16.mxu0 %v2697_v58  ;;  %v2824_v4 = vcombine.low %v158_v53, %v162_v54 }
  0x1e   :  { %v22_v61 = vld [vmem:[%s4233_s1] sm:$0xff]  ;;  %v328_v63 = vcombine.high %v3294_v59, %v3294_v59  ;;  %1642 = vmatpush1.bf16.msra.mxu0 %v2696_v2 }
  0x1f   :  { %v26_v62 = vld [vmem:[%s4233_s1 + $0x20] sm:$0xff]  ;;  %1682 = vmatprep.subr.bf16.mxu1 %v2825_v60 }
  0x20   :  { %v150_v0 = vld [vmem:[%s4233_s1 + $0x400] sm:$0xff]  ;;  %v3311_v3 = vrot.slane %v328_v63, %v3289_v56  ;;  %v2689_v5 = vcombine.high %v22_v61, %v26_v62  ;;  %v2688_v12 = vcombine.low %v22_v61, %v26_v62  ;;  %1683 = vmatpush1.bf16.msra.mxu1 %v2824_v4 }
  0x21   :  { %v154_v1 = vld [vmem:[%s4233_s1 + $0x420] sm:$0xff] }
  0x22   :  { %v2817_v6 = vcombine.high %v150_v0, %v154_v1  ;;  %v142_v7 = vld [vmem:[%s4233_s1 + $0x3c0] sm:$0xff]  ;;  %1661 = vmatprep.mubr.bf16.mxu0 %v3311_v3  ;;  %v3322_v9 = vcombine.high %v3311_v3, %v3311_v3  ;;  %1643 = vmatprep.subr.bf16.mxu0 %v2689_v5  ;;  %v2816_v13 = vcombine.low %v150_v0, %v154_v1 }
  0x23   :  { %v146_v8 = vld [vmem:[%s4233_s1 + $0x3e0] sm:$0xff]  ;;  %1644 = vmatpush1.bf16.msra.mxu0 %v2688_v12 }
  0x24   :  { %v270_v10 = vld [vmem:[%s4233_s1 + $0x7c0] sm:$0xff]  ;;  %1702 = vmatprep.mubr.bf16.mxu1 %v3322_v9  ;;  %v2809_v14 = vcombine.high %v142_v7, %v146_v8  ;;  %1684 = vmatprep.subr.bf16.mxu1 %v2817_v6  ;;  %v2808_v20 = vcombine.low %v142_v7, %v146_v8 }
  0x25   :  { %v274_v11 = vld [vmem:[%s4233_s1 + $0x7e0] sm:$0xff]  ;;  %1685 = vmatpush1.bf16.msra.mxu1 %v2816_v13 }
  0x26   :  { %v2937_v15 = vcombine.high %v270_v10, %v274_v11  ;;  %v134_v16 = vld [vmem:[%s4233_s1 + $0x380] sm:$0xff]  ;;  %1645 = vmatprep.subr.bf16.mxu0 %v2809_v14  ;;  %v2936_v21 = vcombine.low %v270_v10, %v274_v11  ;;  %v79_v14 = vld [vmem:[%s4233_s1 + $0x1c8] sm:$0xff] }
  0x27   :  { %v138_v17 = vld [vmem:[%s4233_s1 + $0x3a0] sm:$0xff]  ;;  %1646 = vmatpush2.bf16.msra.mxu0 %v2808_v20 }
  0x28   :  { %v262_v18 = vld [vmem:[%s4233_s1 + $0x780] sm:$0xff]  ;;  %v2801_v22 = vcombine.high %v134_v16, %v138_v17  ;;  %1686 = vmatprep.subr.bf16.mxu1 %v2937_v15  ;;  %v2800_v28 = vcombine.low %v134_v16, %v138_v17  ;;  %v83_v15 = vld [vmem:[%s4233_s1 + $0x1e8] sm:$0xff] }
  0x29   :  { %v266_v19 = vld [vmem:[%s4233_s1 + $0x7a0] sm:$0xff]  ;;  %1687 = vmatpush2.bf16.msra.mxu1 %v2936_v21  ;;  %v207_v16 = vld [vmem:[%s4233_s1 + $0x5c8] sm:$0xff]  ;;  %v2747_v21 = vcombine.high %v79_v14, %v83_v15 }
  0x2a   :  { %v2929_v23 = vcombine.high %v262_v18, %v266_v19  ;;  %v126_v24 = vld [vmem:[%s4233_s1 + $0x340] sm:$0xff]  ;;  %1647 = vmatprep.subr.bf16.mxu0 %v2801_v22  ;;  %v2928_v29 = vcombine.low %v262_v18, %v266_v19  ;;  %v211_v17 = vld [vmem:[%s4233_s1 + $0x5e8] sm:$0xff]  ;;  %v3429_v19 = vrot.slane %v3294_v59, %v3289_v56 }
  0x2b   :  { %v130_v25 = vld [vmem:[%s4233_s1 + $0x360] sm:$0xff]  ;;  %1648 = vmatpush2.bf16.msra.mxu0 %v2800_v28  ;;  %v2875_v22 = vcombine.high %v207_v16, %v211_v17  ;;  %v203_v56 = vld [vmem:[%s4233_s1 + $0x5a8] sm:$0xff] }
  0x2c   :  { %v254_v26 = vld [vmem:[%s4233_s1 + $0x740] sm:$0xff]  ;;  %v2793_v30 = vcombine.high %v126_v24, %v130_v25  ;;  %1688 = vmatprep.subr.bf16.mxu1 %v2929_v23  ;;  %v2792_v37 = vcombine.low %v126_v24, %v130_v25  ;;  %v71_v23 = vld [vmem:[%s4233_s1 + $0x188] sm:$0xff]  ;;  %v3445_v59 = vcombine.high %v3429_v19, %v3429_v19 }
  0x2d   :  { %v258_v27 = vld [vmem:[%s4233_s1 + $0x760] sm:$0xff]  ;;  %1689 = vmatpush2.bf16.msra.mxu1 %v2928_v29  ;;  %v75_v24 = vld [vmem:[%s4233_s1 + $0x1a8] sm:$0xff] }
  0x2e   :  { %v2921_v31 = vcombine.high %v254_v26, %v258_v27  ;;  %v118_v32 = vld [vmem:[%s4233_s1 + $0x300] sm:$0xff]  ;;  %1649 = vmatprep.subr.bf16.mxu0 %v2793_v30  ;;  %v2920_v38 = vcombine.low %v254_v26, %v258_v27  ;;  %v199_v25 = vld [vmem:[%s4233_s1 + $0x588] sm:$0xff]  ;;  %v2746_v26 = vcombine.low %v79_v14, %v83_v15  ;;  %v2874_v27 = vcombine.low %v207_v16, %v211_v17 }
  0x2f   :  { %v122_v33 = vld [vmem:[%s4233_s1 + $0x320] sm:$0xff]  ;;  %1650 = vmatpush2.bf16.msra.mxu0 %v2792_v37  ;;  %v2739_v28 = vcombine.high %v71_v23, %v75_v24  ;;  %v2867_v29 = vcombine.high %v199_v25, %v203_v56  ;;  %v63_v30 = vld [vmem:[%s4233_s1 + $0x148] sm:$0xff] }
  0x30   :  { %v246_v34 = vld [vmem:[%s4233_s1 + $0x700] sm:$0xff]  ;;  %v2785_v39 = vcombine.high %v118_v32, %v122_v33  ;;  %1690 = vmatprep.subr.bf16.mxu1 %v2921_v31  ;;  %v2784_v45 = vcombine.low %v118_v32, %v122_v33  ;;  %v67_v31 = vld [vmem:[%s4233_s1 + $0x168] sm:$0xff] }
  0x31   :  { %v250_v36 = vld [vmem:[%s4233_s1 + $0x720] sm:$0xff]  ;;  %1691 = vmatpush2.bf16.msra.mxu1 %v2920_v38  ;;  %v191_v32 = vld [vmem:[%s4233_s1 + $0x548] sm:$0xff]  ;;  %v2731_v37 = vcombine.high %v63_v30, %v67_v31 }
  0x32   :  { %v2913_v40 = vcombine.high %v246_v34, %v250_v36  ;;  %v110_v41 = vld [vmem:[%s4233_s1 + $0x2c0] sm:$0xff]  ;;  %1651 = vmatprep.subr.bf16.mxu0 %v2785_v39  ;;  %v2912_v47 = vcombine.low %v246_v34, %v250_v36  ;;  %v195_v33 = vld [vmem:[%s4233_s1 + $0x568] sm:$0xff]  ;;  %v2738_v34 = vcombine.low %v71_v23, %v75_v24  ;;  %v2866_v36 = vcombine.low %v199_v25, %v203_v56 }
  0x33   :  { %v114_v42 = vld [vmem:[%s4233_s1 + $0x2e0] sm:$0xff]  ;;  %1652 = vmatpush2.bf16.msra.mxu0 %v2784_v45  ;;  %v2859_v38 = vcombine.high %v191_v32, %v195_v33  ;;  %v55_v39 = vld [vmem:[%s4233_s1 + $0x108] sm:$0xff] }
  0x34   :  { %v238_v43 = vld [vmem:[%s4233_s1 + $0x6c0] sm:$0xff]  ;;  %v2777_v48 = vcombine.high %v110_v41, %v114_v42  ;;  %1692 = vmatprep.subr.bf16.mxu1 %v2913_v40  ;;  %v2776_v54 = vcombine.low %v110_v41, %v114_v42  ;;  %v59_v40 = vld [vmem:[%s4233_s1 + $0x128] sm:$0xff] }
  0x35   :  { %v242_v44 = vld [vmem:[%s4233_s1 + $0x6e0] sm:$0xff]  ;;  %1693 = vmatpush2.bf16.msra.mxu1 %v2912_v47  ;;  %v183_v41 = vld [vmem:[%s4233_s1 + $0x508] sm:$0xff]  ;;  %v2723_v45 = vcombine.high %v55_v39, %v59_v40 }
  0x36   :  { %v2905_v49 = vcombine.high %v238_v43, %v242_v44  ;;  %v102_v50 = vld [vmem:[%s4233_s1 + $0x280] sm:$0xff]  ;;  %1653 = vmatprep.subr.bf16.mxu0 %v2777_v48  ;;  %v2904_v55 = vcombine.low %v238_v43, %v242_v44  ;;  %v187_v42 = vld [vmem:[%s4233_s1 + $0x528] sm:$0xff]  ;;  %v2730_v43 = vcombine.low %v63_v30, %v67_v31  ;;  %v2858_v44 = vcombine.low %v191_v32, %v195_v33 }
  0x37   :  { %v106_v51 = vld [vmem:[%s4233_s1 + $0x2a0] sm:$0xff]  ;;  %1654 = vmatpush2.bf16.msra.mxu0 %v2776_v54  ;;  %v2851_v47 = vcombine.high %v183_v41, %v187_v42  ;;  %v47_v48 = vld [vmem:[%s4233_s1 + $0xc8] sm:$0xff] }
  0x38   :  { %v230_v52 = vld [vmem:[%s4233_s1 + $0x680] sm:$0xff]  ;;  %v2769_v57 = vcombine.high %v102_v50, %v106_v51  ;;  %1694 = vmatprep.subr.bf16.mxu1 %v2905_v49  ;;  %v2768_v0 = vcombine.low %v102_v50, %v106_v51  ;;  %v51_v49 = vld [vmem:[%s4233_s1 + $0xe8] sm:$0xff] }
  0x39   :  { %v234_v53 = vld [vmem:[%s4233_s1 + $0x6a0] sm:$0xff]  ;;  %1695 = vmatpush2.bf16.msra.mxu1 %v2904_v55  ;;  %v175_v50 = vld [vmem:[%s4233_s1 + $0x4c8] sm:$0xff]  ;;  %v2715_v54 = vcombine.high %v47_v48, %v51_v49 }
  0x3a   :  { %v2897_v58 = vcombine.high %v230_v52, %v234_v53  ;;  %v94_v60 = vld [vmem:[%s4233_s1 + $0x240] sm:$0xff]  ;;  %1655 = vmatprep.subr.bf16.mxu0 %v2769_v57  ;;  %v2896_v1 = vcombine.low %v230_v52, %v234_v53  ;;  %v179_v51 = vld [vmem:[%s4233_s1 + $0x4e8] sm:$0xff]  ;;  %v2722_v52 = vcombine.low %v55_v39, %v59_v40  ;;  %v2850_v53 = vcombine.low %v183_v41, %v187_v42 }
  0x3b   :  { %v98_v61 = vld [vmem:[%s4233_s1 + $0x260] sm:$0xff]  ;;  %1656 = vmatpush2.bf16.msra.mxu0 %v2768_v0  ;;  %v2843_v55 = vcombine.high %v175_v50, %v179_v51  ;;  %v39_v57 = vld [vmem:[%s4233_s1 + $0x88] sm:$0xff] }
  0x3c   :  { %v222_v62 = vld [vmem:[%s4233_s1 + $0x640] sm:$0xff]  ;;  %v2761_v2 = vcombine.high %v94_v60, %v98_v61  ;;  %1696 = vmatprep.subr.bf16.mxu1 %v2897_v58  ;;  %v2760_v10 = vcombine.low %v94_v60, %v98_v61  ;;  %v43_v58 = vld [vmem:[%s4233_s1 + $0xa8] sm:$0xff] }
  0x3d   :  { %v226_v63 = vld [vmem:[%s4233_s1 + $0x660] sm:$0xff]  ;;  %1697 = vmatpush2.bf16.msra.mxu1 %v2896_v1  ;;  %v167_v60 = vld [vmem:[%s4233_s1 + $0x488] sm:$0xff]  ;;  %v2707_v0 = vcombine.high %v39_v57, %v43_v58 }
  0x3e   :  { %v2889_v4 = vcombine.high %v222_v62, %v226_v63  ;;  %v86_v5 = vld [vmem:[%s4233_s1 + $0x200] sm:$0xff]  ;;  %1657 = vmatprep.subr.bf16.mxu0 %v2761_v2  ;;  %v2888_v11 = vcombine.low %v222_v62, %v226_v63  ;;  %v171_v61 = vld [vmem:[%s4233_s1 + $0x4a8] sm:$0xff]  ;;  %v2714_v62 = vcombine.low %v47_v48, %v51_v49  ;;  %v2842_v63 = vcombine.low %v175_v50, %v179_v51 }
  0x3f   :  { %v90_v6 = vld [vmem:[%s4233_s1 + $0x220] sm:$0xff]  ;;  %1658 = vmatpush2.bf16.msra.mxu0 %v2760_v10  ;;  %v2835_v1 = vcombine.high %v167_v60, %v171_v61  ;;  %v31_v2 = vld [vmem:[%s4233_s1 + $0x48] sm:$0xff] }
  0x40   :  { %v214_v7 = vld [vmem:[%s4233_s1 + $0x600] sm:$0xff]  ;;  %v2753_v12 = vcombine.high %v86_v5, %v90_v6  ;;  %1698 = vmatprep.subr.bf16.mxu1 %v2889_v4  ;;  %v2752_v18 = vcombine.low %v86_v5, %v90_v6  ;;  %v35_v4 = vld [vmem:[%s4233_s1 + $0x68] sm:$0xff] }
  0x41   :  { %v218_v8 = vld [vmem:[%s4233_s1 + $0x620] sm:$0xff]  ;;  %1699 = vmatpush2.bf16.msra.mxu1 %v2888_v11  ;;  %v159_v5 = vld [vmem:[%s4233_s1 + $0x448] sm:$0xff]  ;;  %v2699_v10 = vcombine.high %v31_v2, %v35_v4  ;;  %v2698_v16 = vcombine.low %v31_v2, %v35_v4 }
  0x42   :  { %v2881_v13 = vcombine.high %v214_v7, %v218_v8  ;;  %1659 = vmatprep.subr.bf16.mxu0 %v2753_v12  ;;  %v2880_v20 = vcombine.low %v214_v7, %v218_v8  ;;  %v163_v6 = vld [vmem:[%s4233_s1 + $0x468] sm:$0xff]  ;;  %v2706_v7 = vcombine.low %v39_v57, %v43_v58  ;;  %v2834_v8 = vcombine.low %v167_v60, %v171_v61 }
  0x43   :  { %1660 = vmatpush2.bf16.msra.mxu0 %v2752_v18  ;;  %v2827_v11 = vcombine.high %v159_v5, %v163_v6  ;;  %v23_v12 = vld [vmem:[%s4233_s1 + $0x8] sm:$0xff]  ;;  %v2826_v17 = vcombine.low %v159_v5, %v163_v6 }
  0x44   :  { %1700 = vmatprep.subr.bf16.mxu1 %v2881_v13  ;;  %1711 = vmatprep.subr.bf16.mxu0 %v2747_v21  ;;  %v27_v13 = vld [vmem:[%s4233_s1 + $0x28] sm:$0xff] }
  0x45   :  { %1701 = vmatpush2.bf16.msra.mxu1 %v2880_v20  ;;  %v151_v14 = vld [vmem:[%s4233_s1 + $0x408] sm:$0xff]  ;;  %v2691_v18 = vcombine.high %v23_v12, %v27_v13  ;;  %v2690_v25 = vcombine.low %v23_v12, %v27_v13 }
  0x46   :  { %1752 = vmatprep.subr.bf16.mxu1 %v2875_v22  ;;  %1662 = vmatmul.mubr.bf16.vlgmr.msra.gmra.mxu0 %v3429_v19  ;;  %v155_v15 = vld [vmem:[%s4233_s1 + $0x428] sm:$0xff] }
  0x47   :  { %1712 = vmatpush1.bf16.msra.mxu0 %v2746_v26  ;;  %1743 = vmatprep.mubr.bf16.mxu0 %v3311_v3  ;;  %v2819_v20 = vcombine.high %v151_v14, %v155_v15  ;;  %v143_v21 = vld [vmem:[%s4233_s1 + $0x3c8] sm:$0xff]  ;;  %v2818_v56 = vcombine.low %v151_v14, %v155_v15 }
  0x48   :  { %1703 = vmatmul.mubr.bf16.vlgmr.msra.gmra.mxu1 %v3445_v59  ;;  %1713 = vmatprep.subr.bf16.mxu0 %v2739_v28  ;;  %v147_v22 = vld [vmem:[%s4233_s1 + $0x3e8] sm:$0xff] }
  0x49   :  { %1753 = vmatpush1.bf16.msra.mxu1 %v2874_v27  ;;  %1784 = vmatprep.mubr.bf16.mxu1 %v3322_v9  ;;  %v271_v23 = vld [vmem:[%s4233_s1 + $0x7c8] sm:$0xff]  ;;  %v2811_v26 = vcombine.high %v143_v21, %v147_v22  ;;  %v2810_v32 = vcombine.low %v143_v21, %v147_v22 }
  0x4a   :  { %1754 = vmatprep.subr.bf16.mxu1 %v2867_v29  ;;  %v275_v24 = vld [vmem:[%s4233_s1 + $0x7e8] sm:$0xff] }
  0x4b   :  { %1714 = vmatpush1.bf16.msra.mxu0 %v2738_v34  ;;  %v2939_v27 = vcombine.high %v271_v23, %v275_v24  ;;  %v135_v28 = vld [vmem:[%s4233_s1 + $0x388] sm:$0xff]  ;;  %v2938_v33 = vcombine.low %v271_v23, %v275_v24 }
  0x4c   :  { %1715 = vmatprep.subr.bf16.mxu0 %v2731_v37  ;;  %v139_v29 = vld [vmem:[%s4233_s1 + $0x3a8] sm:$0xff] }
  0x4d   :  { %1755 = vmatpush1.bf16.msra.mxu1 %v2866_v36  ;;  %v263_v30 = vld [vmem:[%s4233_s1 + $0x788] sm:$0xff]  ;;  %v2803_v34 = vcombine.high %v135_v28, %v139_v29  ;;  %v2802_v41 = vcombine.low %v135_v28, %v139_v29  ;;  %v208_v28 = vld [vmem:[%s4233_s1 + $0x5d0] sm:$0xff] }
  0x4e   :  { %1756 = vmatprep.subr.bf16.mxu1 %v2859_v38  ;;  %v267_v31 = vld [vmem:[%s4233_s1 + $0x7a8] sm:$0xff]  ;;  %v212_v29 = vld [vmem:[%s4233_s1 + $0x5f0] sm:$0xff] }
  0x4f   :  { %1716 = vmatpush1.bf16.msra.mxu0 %v2730_v43  ;;  %v2931_v36 = vcombine.high %v263_v30, %v267_v31  ;;  %v127_v37 = vld [vmem:[%s4233_s1 + $0x348] sm:$0xff]  ;;  %v2930_v42 = vcombine.low %v263_v30, %v267_v31 }
  0x50   :  { %1717 = vmatprep.subr.bf16.mxu0 %v2723_v45  ;;  %v131_v38 = vld [vmem:[%s4233_s1 + $0x368] sm:$0xff] }
  0x51   :  { %1757 = vmatpush1.bf16.msra.mxu1 %v2858_v44  ;;  %v255_v39 = vld [vmem:[%s4233_s1 + $0x748] sm:$0xff]  ;;  %v2795_v43 = vcombine.high %v127_v37, %v131_v38  ;;  %v2794_v50 = vcombine.low %v127_v37, %v131_v38  ;;  %v200_v37 = vld [vmem:[%s4233_s1 + $0x590] sm:$0xff] }
  0x52   :  { %1758 = vmatprep.subr.bf16.mxu1 %v2851_v47  ;;  %v259_v40 = vld [vmem:[%s4233_s1 + $0x768] sm:$0xff]  ;;  %v204_v38 = vld [vmem:[%s4233_s1 + $0x5b0] sm:$0xff] }
  0x53   :  { %1718 = vmatpush1.bf16.msra.mxu0 %v2722_v52  ;;  %v2923_v44 = vcombine.high %v255_v39, %v259_v40  ;;  %v119_v45 = vld [vmem:[%s4233_s1 + $0x308] sm:$0xff]  ;;  %v2922_v51 = vcombine.low %v255_v39, %v259_v40  ;;  %v2876_v40 = vcombine.low %v208_v28, %v212_v29 }
  0x54   :  { %1719 = vmatprep.subr.bf16.mxu0 %v2715_v54  ;;  %v123_v47 = vld [vmem:[%s4233_s1 + $0x328] sm:$0xff] }
  0x55   :  { %1759 = vmatpush1.bf16.msra.mxu1 %v2850_v53  ;;  %v247_v48 = vld [vmem:[%s4233_s1 + $0x708] sm:$0xff]  ;;  %v2787_v52 = vcombine.high %v119_v45, %v123_v47  ;;  %v2786_v60 = vcombine.low %v119_v45, %v123_v47  ;;  %v192_v45 = vld [vmem:[%s4233_s1 + $0x550] sm:$0xff] }
  0x56   :  { %1760 = vmatprep.subr.bf16.mxu1 %v2843_v55  ;;  %v251_v49 = vld [vmem:[%s4233_s1 + $0x728] sm:$0xff]  ;;  %v196_v47 = vld [vmem:[%s4233_s1 + $0x570] sm:$0xff] }
  0x57   :  { %1720 = vmatpush1.bf16.msra.mxu0 %v2714_v62  ;;  %v2915_v53 = vcombine.high %v247_v48, %v251_v49  ;;  %v111_v54 = vld [vmem:[%s4233_s1 + $0x2c8] sm:$0xff]  ;;  %v2914_v61 = vcombine.low %v247_v48, %v251_v49  ;;  %v56_v49 = vld [vmem:[%s4233_s1 + $0x110] sm:$0xff] }
  0x58   :  { %1721 = vmatprep.subr.bf16.mxu0 %v2707_v0  ;;  %v115_v55 = vld [vmem:[%s4233_s1 + $0x2e8] sm:$0xff] }
  0x59   :  { %1761 = vmatpush1.bf16.msra.mxu1 %v2842_v63  ;;  %v239_v57 = vld [vmem:[%s4233_s1 + $0x6c8] sm:$0xff]  ;;  %v2779_v62 = vcombine.high %v111_v54, %v115_v55  ;;  %v2778_v5 = vcombine.low %v111_v54, %v115_v55  ;;  %v184_v54 = vld [vmem:[%s4233_s1 + $0x510] sm:$0xff] }
  0x5a   :  { %1762 = vmatprep.subr.bf16.mxu1 %v2835_v1  ;;  %v243_v58 = vld [vmem:[%s4233_s1 + $0x6e8] sm:$0xff]  ;;  %v188_v55 = vld [vmem:[%s4233_s1 + $0x530] sm:$0xff] }
  0x5b   :  { %1722 = vmatpush1.bf16.msra.mxu0 %v2706_v7  ;;  %v2907_v63 = vcombine.high %v239_v57, %v243_v58  ;;  %v103_v0 = vld [vmem:[%s4233_s1 + $0x288] sm:$0xff]  ;;  %v2906_v6 = vcombine.low %v239_v57, %v243_v58  ;;  %v48_v58 = vld [vmem:[%s4233_s1 + $0xd0] sm:$0xff] }
  0x5c   :  { %1723 = vmatprep.subr.bf16.mxu0 %v2699_v10  ;;  %v107_v1 = vld [vmem:[%s4233_s1 + $0x2a8] sm:$0xff] }
  0x5d   :  { %1763 = vmatpush1.bf16.msra.mxu1 %v2834_v8  ;;  %v231_v2 = vld [vmem:[%s4233_s1 + $0x688] sm:$0xff]  ;;  %v2771_v7 = vcombine.high %v103_v0, %v107_v1  ;;  %v2770_v14 = vcombine.low %v103_v0, %v107_v1  ;;  %v176_v0 = vld [vmem:[%s4233_s1 + $0x4d0] sm:$0xff] }
  0x5e   :  { %1764 = vmatprep.subr.bf16.mxu1 %v2827_v11  ;;  %v235_v4 = vld [vmem:[%s4233_s1 + $0x6a8] sm:$0xff]  ;;  %v180_v1 = vld [vmem:[%s4233_s1 + $0x4f0] sm:$0xff] }
  0x5f   :  { %1724 = vmatpush1.bf16.msra.mxu0 %v2698_v16  ;;  %v2899_v8 = vcombine.high %v231_v2, %v235_v4  ;;  %v95_v10 = vld [vmem:[%s4233_s1 + $0x248] sm:$0xff]  ;;  %v2898_v15 = vcombine.low %v231_v2, %v235_v4  ;;  %v40_v4 = vld [vmem:[%s4233_s1 + $0x90] sm:$0xff] }
  0x60   :  { %1725 = vmatprep.subr.bf16.mxu0 %v2691_v18  ;;  %v99_v11 = vld [vmem:[%s4233_s1 + $0x268] sm:$0xff] }
  0x61   :  { %1765 = vmatpush1.bf16.msra.mxu1 %v2826_v17  ;;  %v223_v12 = vld [vmem:[%s4233_s1 + $0x648] sm:$0xff]  ;;  %v2763_v16 = vcombine.high %v95_v10, %v99_v11  ;;  %v2762_v23 = vcombine.low %v95_v10, %v99_v11  ;;  %v168_v10 = vld [vmem:[%s4233_s1 + $0x490] sm:$0xff] }
  0x62   :  { %1766 = vmatprep.subr.bf16.mxu1 %v2819_v20  ;;  %v227_v13 = vld [vmem:[%s4233_s1 + $0x668] sm:$0xff]  ;;  %v172_v11 = vld [vmem:[%s4233_s1 + $0x4b0] sm:$0xff] }
  0x63   :  { %1726 = vmatpush1.bf16.msra.mxu0 %v2690_v25  ;;  %v2891_v17 = vcombine.high %v223_v12, %v227_v13  ;;  %v87_v18 = vld [vmem:[%s4233_s1 + $0x208] sm:$0xff]  ;;  %v2890_v24 = vcombine.low %v223_v12, %v227_v13  ;;  %v32_v13 = vld [vmem:[%s4233_s1 + $0x50] sm:$0xff] }
  0x64   :  { %1727 = vmatprep.subr.bf16.mxu0 %v2811_v26  ;;  %v91_v20 = vld [vmem:[%s4233_s1 + $0x228] sm:$0xff]  ;;  %v80_v26 = vld [vmem:[%s4233_s1 + $0x1d0] sm:$0xff] }
  0x65   :  { %1767 = vmatpush1.bf16.msra.mxu1 %v2818_v56  ;;  %v215_v21 = vld [vmem:[%s4233_s1 + $0x608] sm:$0xff]  ;;  %v2755_v25 = vcombine.high %v87_v18, %v91_v20  ;;  %v2754_v30 = vcombine.low %v87_v18, %v91_v20  ;;  %v164_v18 = vld [vmem:[%s4233_s1 + $0x470] sm:$0xff]  ;;  %v2837_v20 = vcombine.high %v168_v10, %v172_v11 }
  0x66   :  { %1768 = vmatprep.subr.bf16.mxu1 %v2939_v27  ;;  %v219_v22 = vld [vmem:[%s4233_s1 + $0x628] sm:$0xff]  ;;  %v84_v27 = vld [vmem:[%s4233_s1 + $0x1f0] sm:$0xff] }
  0x67   :  { %1728 = vmatpush2.bf16.msra.mxu0 %v2810_v32  ;;  %v2883_v56 = vcombine.high %v215_v21, %v219_v22  ;;  %v2882_v31 = vcombine.low %v215_v21, %v219_v22  ;;  %v2749_v32 = vcombine.high %v80_v26, %v84_v27  ;;  %v2748_v39 = vcombine.low %v80_v26, %v84_v27  ;;  %v24_v22 = vld [vmem:[%s4233_s1 + $0x10] sm:$0xff] }
  0x68   :  { %1729 = vmatprep.subr.bf16.mxu0 %v2803_v34  ;;  %v72_v34 = vld [vmem:[%s4233_s1 + $0x190] sm:$0xff] }
  0x69   :  { %1769 = vmatpush2.bf16.msra.mxu1 %v2938_v33  ;;  %v2877_v33 = vcombine.high %v208_v28, %v212_v29  ;;  %v156_v26 = vld [vmem:[%s4233_s1 + $0x430] sm:$0xff] }
  0x6a   :  { %1770 = vmatprep.subr.bf16.mxu1 %v2931_v36  ;;  %v76_v36 = vld [vmem:[%s4233_s1 + $0x1b0] sm:$0xff] }
  0x6b   :  { %1730 = vmatpush2.bf16.msra.mxu0 %v2802_v41  ;;  %v2741_v41 = vcombine.high %v72_v34, %v76_v36  ;;  %v2740_v48 = vcombine.low %v72_v34, %v76_v36  ;;  %v144_v29 = vld [vmem:[%s4233_s1 + $0x3d0] sm:$0xff] }
  0x6c   :  { %1731 = vmatprep.subr.bf16.mxu0 %v2795_v43  ;;  %v68_v43 = vld [vmem:[%s4233_s1 + $0x170] sm:$0xff] }
  0x6d   :  { %1771 = vmatpush2.bf16.msra.mxu1 %v2930_v42  ;;  %v64_v42 = vld [vmem:[%s4233_s1 + $0x150] sm:$0xff] }
  0x6e   :  { %1772 = vmatprep.subr.bf16.mxu1 %v2923_v44  ;;  %v2869_v44 = vcombine.high %v200_v37, %v204_v38  ;;  %v2732_v57 = vcombine.low %v64_v42, %v68_v43  ;;  %v276_v34 = vld [vmem:[%s4233_s1 + $0x7f0] sm:$0xff] }
  0x6f   :  { %1732 = vmatpush2.bf16.msra.mxu0 %v2794_v50  ;;  %v60_v50 = vld [vmem:[%s4233_s1 + $0x130] sm:$0xff] }
  0x70   :  { %1733 = vmatprep.subr.bf16.mxu0 %v2787_v52  ;;  %v2733_v52 = vcombine.high %v64_v42, %v68_v43  ;;  %v2724_v2 = vcombine.low %v56_v49, %v60_v50  ;;  %v264_v42 = vld [vmem:[%s4233_s1 + $0x790] sm:$0xff] }
  0x71   :  { %1773 = vmatpush2.bf16.msra.mxu1 %v2922_v51  ;;  %v2868_v51 = vcombine.low %v200_v37, %v204_v38  ;;  %v136_v38 = vld [vmem:[%s4233_s1 + $0x390] sm:$0xff] }
  0x72   :  { %1774 = vmatprep.subr.bf16.mxu1 %v2915_v53  ;;  %v2861_v53 = vcombine.high %v192_v45, %v196_v47  ;;  %v268_v43 = vld [vmem:[%s4233_s1 + $0x7b0] sm:$0xff] }
  0x73   :  { %1734 = vmatpush2.bf16.msra.mxu0 %v2786_v60  ;;  %v52_v60 = vld [vmem:[%s4233_s1 + $0xf0] sm:$0xff] }
  0x74   :  { %1735 = vmatprep.subr.bf16.mxu0 %v2779_v62  ;;  %v2725_v62 = vcombine.high %v56_v49, %v60_v50  ;;  %v2716_v12 = vcombine.low %v48_v58, %v52_v60 }
  0x75   :  { %1775 = vmatpush2.bf16.msra.mxu1 %v2914_v61  ;;  %v2860_v61 = vcombine.low %v192_v45, %v196_v47  ;;  %v128_v47 = vld [vmem:[%s4233_s1 + $0x350] sm:$0xff] }
  0x76   :  { %1776 = vmatprep.subr.bf16.mxu1 %v2907_v63  ;;  %v2853_v63 = vcombine.high %v184_v54, %v188_v55 }
  0x77   :  { %1736 = vmatpush2.bf16.msra.mxu0 %v2778_v5  ;;  %v44_v5 = vld [vmem:[%s4233_s1 + $0xb0] sm:$0xff] }
  0x78   :  { %1737 = vmatprep.subr.bf16.mxu0 %v2771_v7  ;;  %v2717_v7 = vcombine.high %v48_v58, %v52_v60  ;;  %v2708_v21 = vcombine.low %v40_v4, %v44_v5  ;;  %v120_v58 = vld [vmem:[%s4233_s1 + $0x310] sm:$0xff] }
  0x79   :  { %1777 = vmatpush2.bf16.msra.mxu1 %v2906_v6  ;;  %v2852_v6 = vcombine.low %v184_v54, %v188_v55  ;;  %v2932_v55 = vcombine.low %v264_v42, %v268_v43  ;;  %v124_v60 = vld [vmem:[%s4233_s1 + $0x330] sm:$0xff] }
  0x7a   :  { %1778 = vmatprep.subr.bf16.mxu1 %v2899_v8  ;;  %v2845_v8 = vcombine.high %v176_v0, %v180_v1 }
  0x7b   :  { %1738 = vmatpush2.bf16.msra.mxu0 %v2770_v14  ;;  %v36_v14 = vld [vmem:[%s4233_s1 + $0x70] sm:$0xff] }
  0x7c   :  { %1739 = vmatprep.subr.bf16.mxu0 %v2763_v16  ;;  %v2709_v16 = vcombine.high %v40_v4, %v44_v5  ;;  %v2700_v28 = vcombine.low %v32_v13, %v36_v14  ;;  %v2789_v5 = vcombine.high %v120_v58, %v124_v60 }
  0x7d   :  { %1779 = vmatpush2.bf16.msra.mxu1 %v2898_v15  ;;  %v2844_v15 = vcombine.low %v176_v0, %v180_v1  ;;  %v112_v1 = vld [vmem:[%s4233_s1 + $0x2d0] sm:$0xff] }
  0x7e   :  { %1780 = vmatprep.subr.bf16.mxu1 %v2891_v17  ;;  %v160_v17 = vld [vmem:[%s4233_s1 + $0x450] sm:$0xff] }
  0x7f   :  { %1740 = vmatpush2.bf16.msra.mxu0 %v2762_v23  ;;  %v28_v23 = vld [vmem:[%s4233_s1 + $0x30] sm:$0xff]  ;;  %v2829_v27 = vcombine.high %v160_v17, %v164_v18 }
  0x80   :  { %1741 = vmatprep.subr.bf16.mxu0 %v2755_v25  ;;  %v2701_v25 = vcombine.high %v32_v13, %v36_v14  ;;  %v2692_v37 = vcombine.low %v24_v22, %v28_v23 }
  0x81   :  { %1781 = vmatpush2.bf16.msra.mxu1 %v2890_v24  ;;  %v2836_v24 = vcombine.low %v168_v10, %v172_v11  ;;  %v2788_v10 = vcombine.low %v120_v58, %v124_v60  ;;  %v104_v11 = vld [vmem:[%s4233_s1 + $0x290] sm:$0xff]  ;;  %v69_v58 = vld [vmem:[%s4233_s1 + $0x178] sm:$0xff] }
  0x82   :  { %1782 = vmatprep.subr.bf16.mxu1 %v2883_v56  ;;  %v152_v56 = vld [vmem:[%s4233_s1 + $0x410] sm:$0xff]  ;;  %v193_v60 = vld [vmem:[%s4233_s1 + $0x558] sm:$0xff] }
  0x83   :  { %1742 = vmatpush2.bf16.msra.mxu0 %v2754_v30  ;;  %v148_v30 = vld [vmem:[%s4233_s1 + $0x3f0] sm:$0xff]  ;;  %v2821_v36 = vcombine.high %v152_v56, %v156_v26 }
  0x84   :  { %1793 = vmatprep.subr.bf16.mxu0 %v2749_v32  ;;  %v2693_v32 = vcombine.high %v24_v22, %v28_v23  ;;  %v2812_v45 = vcombine.low %v144_v29, %v148_v30 }
  0x85   :  { %1783 = vmatpush2.bf16.msra.mxu1 %v2882_v31  ;;  %v2828_v31 = vcombine.low %v160_v17, %v164_v18 }
  0x86   :  { %1834 = vmatprep.subr.bf16.mxu1 %v2877_v33  ;;  %1744 = vmatmul.mubr.bf16.vlgmr.msra.gmra.mxu0 %v3429_v19  ;;  %v272_v33 = vld [vmem:[%s4233_s1 + $0x7d0] sm:$0xff] }
  0x87   :  { %1794 = vmatpush1.bf16.msra.mxu0 %v2748_v39  ;;  %1825 = vmatprep.mubr.bf16.mxu0 %v3311_v3  ;;  %v140_v39 = vld [vmem:[%s4233_s1 + $0x3b0] sm:$0xff]  ;;  %v2940_v49 = vcombine.low %v272_v33, %v276_v34 }
  0x88   :  { %1785 = vmatmul.mubr.bf16.vlgmr.msra.gmra.mxu1 %v3445_v59  ;;  %1795 = vmatprep.subr.bf16.mxu0 %v2741_v41  ;;  %v2813_v41 = vcombine.high %v144_v29, %v148_v30  ;;  %v2805_v50 = vcombine.high %v136_v38, %v140_v39  ;;  %v2804_v54 = vcombine.low %v136_v38, %v140_v39  ;;  %v88_v30 = vld [vmem:[%s4233_s1 + $0x210] sm:$0xff]  ;;  %v81_v39 = vld [vmem:[%s4233_s1 + $0x1d8] sm:$0xff] }
  0x89   :  { %1835 = vmatpush1.bf16.msra.mxu1 %v2876_v40  ;;  %1866 = vmatprep.mubr.bf16.mxu1 %v3322_v9  ;;  %v2820_v40 = vcombine.low %v152_v56, %v156_v26 }
  0x8a   :  { %1836 = vmatprep.subr.bf16.mxu1 %v2869_v44  ;;  %v2941_v44 = vcombine.high %v272_v33, %v276_v34  ;;  %v220_v33 = vld [vmem:[%s4233_s1 + $0x630] sm:$0xff] }
  0x8b   :  { %1796 = vmatpush1.bf16.msra.mxu0 %v2740_v48  ;;  %v132_v48 = vld [vmem:[%s4233_s1 + $0x370] sm:$0xff] }
  0x8c   :  { %1797 = vmatprep.subr.bf16.mxu0 %v2733_v52  ;;  %v256_v52 = vld [vmem:[%s4233_s1 + $0x750] sm:$0xff]  ;;  %v2796_v0 = vcombine.low %v128_v47, %v132_v48 }
  0x8d   :  { %1837 = vmatpush1.bf16.msra.mxu1 %v2868_v51  ;;  %v2933_v51 = vcombine.high %v264_v42, %v268_v43  ;;  %v213_v42 = vld [vmem:[%s4233_s1 + $0x5f8] sm:$0xff] }
  0x8e   :  { %1838 = vmatprep.subr.bf16.mxu1 %v2861_v53  ;;  %v260_v53 = vld [vmem:[%s4233_s1 + $0x770] sm:$0xff] }
  0x8f   :  { %1798 = vmatpush1.bf16.msra.mxu0 %v2732_v57  ;;  %v2797_v57 = vcombine.high %v128_v47, %v132_v48  ;;  %v2924_v4 = vcombine.low %v256_v52, %v260_v53  ;;  %v73_v48 = vld [vmem:[%s4233_s1 + $0x198] sm:$0xff] }
  0x90   :  { %1799 = vmatprep.subr.bf16.mxu0 %v2725_v62  ;;  %v2925_v62 = vcombine.high %v256_v52, %v260_v53 }
  0x91   :  { %1839 = vmatpush1.bf16.msra.mxu1 %v2860_v61  ;;  %v248_v61 = vld [vmem:[%s4233_s1 + $0x710] sm:$0xff] }
  0x92   :  { %1840 = vmatprep.subr.bf16.mxu1 %v2853_v63  ;;  %v252_v63 = vld [vmem:[%s4233_s1 + $0x730] sm:$0xff] }
  0x93   :  { %1800 = vmatpush1.bf16.msra.mxu0 %v2724_v2  ;;  %v116_v2 = vld [vmem:[%s4233_s1 + $0x2f0] sm:$0xff]  ;;  %v2916_v13 = vcombine.low %v248_v61, %v252_v63 }
  0x94   :  { %1801 = vmatprep.subr.bf16.mxu0 %v2717_v7  ;;  %v244_v7 = vld [vmem:[%s4233_s1 + $0x6f0] sm:$0xff]  ;;  %v2781_v14 = vcombine.high %v112_v1, %v116_v2  ;;  %v2780_v18 = vcombine.low %v112_v1, %v116_v2  ;;  %v57_v2 = vld [vmem:[%s4233_s1 + $0x118] sm:$0xff] }
  0x95   :  { %1841 = vmatpush1.bf16.msra.mxu1 %v2852_v6  ;;  %v240_v6 = vld [vmem:[%s4233_s1 + $0x6d0] sm:$0xff] }
  0x96   :  { %1842 = vmatprep.subr.bf16.mxu1 %v2845_v8  ;;  %v2917_v8 = vcombine.high %v248_v61, %v252_v63  ;;  %v2909_v17 = vcombine.high %v240_v6, %v244_v7  ;;  %v2908_v22 = vcombine.low %v240_v6, %v244_v7  ;;  %v197_v61 = vld [vmem:[%s4233_s1 + $0x578] sm:$0xff] }
  0x97   :  { %1802 = vmatpush1.bf16.msra.mxu0 %v2716_v12  ;;  %v108_v12 = vld [vmem:[%s4233_s1 + $0x2b0] sm:$0xff]  ;;  %v2863_v1 = vcombine.high %v193_v60, %v197_v61  ;;  %v189_v6 = vld [vmem:[%s4233_s1 + $0x538] sm:$0xff] }
  0x98   :  { %1803 = vmatprep.subr.bf16.mxu0 %v2709_v16  ;;  %v236_v16 = vld [vmem:[%s4233_s1 + $0x6b0] sm:$0xff]  ;;  %v2773_v23 = vcombine.high %v104_v11, %v108_v12  ;;  %v2772_v26 = vcombine.low %v104_v11, %v108_v12  ;;  %v53_v12 = vld [vmem:[%s4233_s1 + $0xf8] sm:$0xff] }
  0x99   :  { %1843 = vmatpush1.bf16.msra.mxu1 %v2844_v15  ;;  %v232_v15 = vld [vmem:[%s4233_s1 + $0x690] sm:$0xff] }
  0x9a   :  { %1844 = vmatprep.subr.bf16.mxu1 %v2837_v20  ;;  %v96_v20 = vld [vmem:[%s4233_s1 + $0x250] sm:$0xff]  ;;  %v2901_v56 = vcombine.high %v232_v15, %v236_v16 }
  0x9b   :  { %1804 = vmatpush1.bf16.msra.mxu0 %v2708_v21  ;;  %v100_v21 = vld [vmem:[%s4233_s1 + $0x270] sm:$0xff] }
  0x9c   :  { %1805 = vmatprep.subr.bf16.mxu0 %v2701_v25  ;;  %v228_v25 = vld [vmem:[%s4233_s1 + $0x670] sm:$0xff]  ;;  %v2764_v34 = vcombine.low %v96_v20, %v100_v21 }
  0x9d   :  { %1845 = vmatpush1.bf16.msra.mxu1 %v2836_v24  ;;  %v224_v24 = vld [vmem:[%s4233_s1 + $0x650] sm:$0xff] }
  0x9e   :  { %1846 = vmatprep.subr.bf16.mxu1 %v2829_v27  ;;  %v2900_v27 = vcombine.low %v232_v15, %v236_v16  ;;  %v2893_v29 = vcombine.high %v224_v24, %v228_v25 }
  0x9f   :  { %1806 = vmatpush1.bf16.msra.mxu0 %v2700_v28  ;;  %v2765_v28 = vcombine.high %v96_v20, %v100_v21  ;;  %v45_v20 = vld [vmem:[%s4233_s1 + $0xb8] sm:$0xff] }
  0xa0   :  { %1807 = vmatprep.subr.bf16.mxu0 %v2693_v32  ;;  %v216_v32 = vld [vmem:[%s4233_s1 + $0x610] sm:$0xff]  ;;  %v169_v21 = vld [vmem:[%s4233_s1 + $0x498] sm:$0xff] }
  0xa1   :  { %1847 = vmatpush1.bf16.msra.mxu1 %v2828_v31  ;;  %v92_v31 = vld [vmem:[%s4233_s1 + $0x230] sm:$0xff]  ;;  %v2885_v38 = vcombine.high %v216_v32, %v220_v33 }
  0xa2   :  { %1848 = vmatprep.subr.bf16.mxu1 %v2821_v36  ;;  %v2892_v36 = vcombine.low %v224_v24, %v228_v25  ;;  %v2756_v43 = vcombine.low %v88_v30, %v92_v31 }
  0xa3   :  { %1808 = vmatpush1.bf16.msra.mxu0 %v2692_v37  ;;  %v2757_v37 = vcombine.high %v88_v30, %v92_v31 }
  0xa4   :  { %1809 = vmatprep.subr.bf16.mxu0 %v2813_v41  ;;  %v209_v41 = vld [vmem:[%s4233_s1 + $0x5d8] sm:$0xff] }
  0xa5   :  { %1849 = vmatpush1.bf16.msra.mxu1 %v2820_v40  ;;  %v85_v40 = vld [vmem:[%s4233_s1 + $0x1f8] sm:$0xff]  ;;  %v2879_v47 = vcombine.high %v209_v41, %v213_v42  ;;  %v2878_v53 = vcombine.low %v209_v41, %v213_v42 }
  0xa6   :  { %1850 = vmatprep.subr.bf16.mxu1 %v2941_v44  ;;  %v2884_v44 = vcombine.low %v216_v32, %v220_v33  ;;  %v2750_v52 = vcombine.low %v81_v39, %v85_v40 }
  0xa7   :  { %1810 = vmatpush2.bf16.msra.mxu0 %v2812_v45  ;;  %v2751_v45 = vcombine.high %v81_v39, %v85_v40 }
  0xa8   :  { %1811 = vmatprep.subr.bf16.mxu0 %v2805_v50  ;;  %v201_v50 = vld [vmem:[%s4233_s1 + $0x598] sm:$0xff] }
  0xa9   :  { %1851 = vmatpush2.bf16.msra.mxu1 %v2940_v49  ;;  %v77_v49 = vld [vmem:[%s4233_s1 + $0x1b8] sm:$0xff] }
  0xaa   :  { %1852 = vmatprep.subr.bf16.mxu1 %v2933_v51  ;;  %v205_v51 = vld [vmem:[%s4233_s1 + $0x5b8] sm:$0xff] }
  0xab   :  { %1812 = vmatpush2.bf16.msra.mxu0 %v2804_v54  ;;  %v2743_v54 = vcombine.high %v73_v48, %v77_v49  ;;  %v2870_v63 = vcombine.low %v201_v50, %v205_v51 }
  0xac   :  { %1813 = vmatprep.subr.bf16.mxu0 %v2797_v57  ;;  %v65_v57 = vld [vmem:[%s4233_s1 + $0x158] sm:$0xff] }
  0xad   :  { %1853 = vmatpush2.bf16.msra.mxu1 %v2932_v55  ;;  %v2871_v55 = vcombine.high %v201_v50, %v205_v51  ;;  %v2734_v7 = vcombine.low %v65_v57, %v69_v58 }
  0xae   :  { %1854 = vmatprep.subr.bf16.mxu1 %v2925_v62  ;;  %v2742_v62 = vcombine.low %v73_v48, %v77_v49 }
  0xaf   :  { %1814 = vmatpush2.bf16.msra.mxu0 %v2796_v0  ;;  %v2735_v0 = vcombine.high %v65_v57, %v69_v58 }
  0xb0   :  { %1815 = vmatprep.subr.bf16.mxu0 %v2789_v5  ;;  %v185_v5 = vld [vmem:[%s4233_s1 + $0x518] sm:$0xff] }
  0xb1   :  { %1855 = vmatpush2.bf16.msra.mxu1 %v2924_v4  ;;  %v61_v4 = vld [vmem:[%s4233_s1 + $0x138] sm:$0xff]  ;;  %v2855_v11 = vcombine.high %v185_v5, %v189_v6  ;;  %v2854_v15 = vcombine.low %v185_v5, %v189_v6 }
  0xb2   :  { %1856 = vmatprep.subr.bf16.mxu1 %v2917_v8  ;;  %v2862_v8 = vcombine.low %v193_v60, %v197_v61 }
  0xb3   :  { %1816 = vmatpush2.bf16.msra.mxu0 %v2788_v10  ;;  %v2727_v10 = vcombine.high %v57_v2, %v61_v4 }
  0xb4   :  { %1817 = vmatprep.subr.bf16.mxu0 %v2781_v14  ;;  %v2726_v14 = vcombine.low %v57_v2, %v61_v4 }
  0xb5   :  { %1857 = vmatpush2.bf16.msra.mxu1 %v2916_v13  ;;  %v181_v13 = vld [vmem:[%s4233_s1 + $0x4f8] sm:$0xff] }
  0xb6   :  { %1858 = vmatprep.subr.bf16.mxu1 %v2909_v17 }
  0xb7   :  { %1818 = vmatpush2.bf16.msra.mxu0 %v2780_v18  ;;  %v41_v18 = vld [vmem:[%s4233_s1 + $0x98] sm:$0xff] }
  0xb8   :  { %1819 = vmatprep.subr.bf16.mxu0 %v2773_v23  ;;  %v2711_v25 = vcombine.high %v41_v18, %v45_v20  ;;  %v2710_v30 = vcombine.low %v41_v18, %v45_v20 }
  0xb9   :  { %1859 = vmatpush2.bf16.msra.mxu1 %v2908_v22  ;;  %v173_v22 = vld [vmem:[%s4233_s1 + $0x4b8] sm:$0xff] }
  0xba   :  { %1860 = vmatprep.subr.bf16.mxu1 %v2901_v56  ;;  %v2839_v56 = vcombine.high %v169_v21, %v173_v22  ;;  %v2838_v31 = vcombine.low %v169_v21, %v173_v22 }
  0xbb   :  { %1820 = vmatpush2.bf16.msra.mxu0 %v2772_v26  ;;  %v33_v26 = vld [vmem:[%s4233_s1 + $0x58] sm:$0xff] }
  0xbc   :  { %1821 = vmatprep.subr.bf16.mxu0 %v2765_v28  ;;  %v161_v28 = vld [vmem:[%s4233_s1 + $0x458] sm:$0xff] }
  0xbd   :  { %1861 = vmatpush2.bf16.msra.mxu1 %v2900_v27  ;;  %v37_v27 = vld [vmem:[%s4233_s1 + $0x78] sm:$0xff] }
  0xbe   :  { %1862 = vmatprep.subr.bf16.mxu1 %v2893_v29  ;;  %v165_v29 = vld [vmem:[%s4233_s1 + $0x478] sm:$0xff]  ;;  %v2703_v32 = vcombine.high %v33_v26, %v37_v27  ;;  %v2702_v39 = vcombine.low %v33_v26, %v37_v27 }
  0xbf   :  { %1822 = vmatpush2.bf16.msra.mxu0 %v2764_v34  ;;  %v2831_v33 = vcombine.high %v161_v28, %v165_v29  ;;  %v25_v34 = vld [vmem:[%s4233_s1 + $0x18] sm:$0xff]  ;;  %v2830_v40 = vcombine.low %v161_v28, %v165_v29 }
  0xc0   :  { %1823 = vmatprep.subr.bf16.mxu0 %v2757_v37  ;;  %v153_v37 = vld [vmem:[%s4233_s1 + $0x418] sm:$0xff] }
  0xc1   :  { %1863 = vmatpush2.bf16.msra.mxu1 %v2892_v36  ;;  %v29_v36 = vld [vmem:[%s4233_s1 + $0x38] sm:$0xff] }
  0xc2   :  { %1864 = vmatprep.subr.bf16.mxu1 %v2885_v38  ;;  %v157_v38 = vld [vmem:[%s4233_s1 + $0x438] sm:$0xff]  ;;  %v2695_v41 = vcombine.high %v25_v34, %v29_v36  ;;  %v2694_v48 = vcombine.low %v25_v34, %v29_v36 }
  0xc3   :  { %1824 = vmatpush2.bf16.msra.mxu0 %v2756_v43  ;;  %v2823_v42 = vcombine.high %v153_v37, %v157_v38  ;;  %v145_v43 = vld [vmem:[%s4233_s1 + $0x3d8] sm:$0xff]  ;;  %v2822_v49 = vcombine.low %v153_v37, %v157_v38 }
  0xc4   :  { %1875 = vmatprep.subr.bf16.mxu0 %v2751_v45  ;;  %v273_v45 = vld [vmem:[%s4233_s1 + $0x7d8] sm:$0xff] }
  0xc5   :  { %1865 = vmatpush2.bf16.msra.mxu1 %v2884_v44  ;;  %v149_v44 = vld [vmem:[%s4233_s1 + $0x3f8] sm:$0xff] }
  0xc6   :  { %1916 = vmatprep.subr.bf16.mxu1 %v2879_v47  ;;  %1826 = vmatmul.mubr.bf16.vlgmr.msra.gmra.mxu0 %v3429_v19  ;;  %v277_v47 = vld [vmem:[%s4233_s1 + $0x7f8] sm:$0xff]  ;;  %v2815_v50 = vcombine.high %v145_v43, %v149_v44  ;;  %v2814_v57 = vcombine.low %v145_v43, %v149_v44 }
  0xc7   :  { %1876 = vmatpush1.bf16.msra.mxu0 %v2750_v52  ;;  %1907 = vmatprep.mubr.bf16.mxu0 %v3311_v3  ;;  %v49_v3 = vld [vmem:[%s4233_s1 + $0xd8] sm:$0xff]  ;;  %v2943_v51 = vcombine.high %v273_v45, %v277_v47  ;;  %v2942_v58 = vcombine.low %v273_v45, %v277_v47 }
  0xc8   :  { %1867 = vmatmul.mubr.bf16.vlgmr.msra.gmra.mxu1 %v3445_v59  ;;  %1877 = vmatprep.subr.bf16.mxu0 %v2743_v54  ;;  %v2719_v16 = vcombine.high %v49_v3, %v53_v12  ;;  %v2718_v23 = vcombine.low %v49_v3, %v53_v12  ;;  %v137_v52 = vld [vmem:[%s4233_s1 + $0x398] sm:$0xff] }
  0xc9   :  { %1917 = vmatpush1.bf16.msra.mxu1 %v2878_v53  ;;  %1948 = vmatprep.mubr.bf16.mxu1 %v3322_v9  ;;  %v177_v9 = vld [vmem:[%s4233_s1 + $0x4d8] sm:$0xff] }
  0xca   :  { %1918 = vmatprep.subr.bf16.mxu1 %v2871_v55  ;;  %v2847_v17 = vcombine.high %v177_v9, %v181_v13  ;;  %v2846_v24 = vcombine.low %v177_v9, %v181_v13  ;;  %v141_v53 = vld [vmem:[%s4233_s1 + $0x3b8] sm:$0xff] }
  0xcb   :  { %1878 = vmatpush1.bf16.msra.mxu0 %v2742_v62  ;;  %v265_v54 = vld [vmem:[%s4233_s1 + $0x798] sm:$0xff]  ;;  %v2807_v60 = vcombine.high %v137_v52, %v141_v53  ;;  %v2806_v2 = vcombine.low %v137_v52, %v141_v53  ;;  %v4021_v53 = vld [vmem:[%s4236_s2] sm:$0xff] }
  0xcc   :  { %1879 = vmatprep.subr.bf16.mxu0 %v2735_v0  ;;  %v269_v55 = vld [vmem:[%s4233_s1 + $0x7b8] sm:$0xff] }
  0xcd   :  { %1919 = vmatpush1.bf16.msra.mxu1 %v2870_v63  ;;  %v2935_v61 = vcombine.high %v265_v54, %v269_v55  ;;  %v129_v62 = vld [vmem:[%s4233_s1 + $0x358] sm:$0xff]  ;;  %v2934_v4 = vcombine.low %v265_v54, %v269_v55  ;;  %v3100_v55 = vld [vmem:[%s4235_s3 + $0x70] sm:$0xff]  }
  0xce   :  { %1920 = vmatprep.subr.bf16.mxu1 %v2863_v1  ;;  %v133_v63 = vld [vmem:[%s4233_s1 + $0x378] sm:$0xff] }
  0xcf   :  { %1880 = vmatpush1.bf16.msra.mxu0 %v2734_v7  ;;  %v257_v0 = vld [vmem:[%s4233_s1 + $0x758] sm:$0xff]  ;;  %v2799_v5 = vcombine.high %v129_v62, %v133_v63  ;;  %v2798_v3 = vcombine.low %v129_v62, %v133_v63  ;;  %v3101_v63 = vld [vmem:[%s4235_s3 + $0x30] sm:$0xff]  }
  0xd0   :  { %1881 = vmatprep.subr.bf16.mxu0 %v2727_v10  ;;  %v261_v1 = vld [vmem:[%s4233_s1 + $0x778] sm:$0xff] }
  0xd1   :  { %1921 = vmatpush1.bf16.msra.mxu1 %v2862_v8  ;;  %v2927_v6 = vcombine.high %v257_v0, %v261_v1  ;;  %v121_v7 = vld [vmem:[%s4233_s1 + $0x318] sm:$0xff]  ;;  %v2926_v12 = vcombine.low %v257_v0, %v261_v1  ;;  %v3102_v1 = vld [vmem:[%s4235_s3 + $0x68] sm:$0xff]  }
  0xd2   :  { %1922 = vmatprep.subr.bf16.mxu1 %v2855_v11  ;;  %v125_v8 = vld [vmem:[%s4233_s1 + $0x338] sm:$0xff] }
  0xd3   :  { %1882 = vmatpush1.bf16.msra.mxu0 %v2726_v14  ;;  %v249_v10 = vld [vmem:[%s4233_s1 + $0x718] sm:$0xff]  ;;  %v2791_v9 = vcombine.high %v121_v7, %v125_v8  ;;  %v2790_v18 = vcombine.low %v121_v7, %v125_v8  ;;  %v3103_v8 = vld [vmem:[%s4235_s3 + $0x28] sm:$0xff]  }
  0xd4   :  { %1883 = vmatprep.subr.bf16.mxu0 %v2719_v16  ;;  %v253_v11 = vld [vmem:[%s4233_s1 + $0x738] sm:$0xff] }
  0xd5   :  { %1923 = vmatpush1.bf16.msra.mxu1 %v2854_v15  ;;  %v2919_v13 = vcombine.high %v249_v10, %v253_v11  ;;  %v113_v14 = vld [vmem:[%s4233_s1 + $0x2d8] sm:$0xff]  ;;  %v2918_v20 = vcombine.low %v249_v10, %v253_v11  ;;  %v3104_v11 = vld [vmem:[%s4235_s3 + $0x60] sm:$0xff]  }
  0xd6   :  { %1924 = vmatprep.subr.bf16.mxu1 %v2847_v17  ;;  %v117_v15 = vld [vmem:[%s4233_s1 + $0x2f8] sm:$0xff] }
  0xd7   :  { %1884 = vmatpush1.bf16.msra.mxu0 %v2718_v23  ;;  %v241_v16 = vld [vmem:[%s4233_s1 + $0x6d8] sm:$0xff]  ;;  %v2783_v21 = vcombine.high %v113_v14, %v117_v15  ;;  %v2782_v26 = vcombine.low %v113_v14, %v117_v15  ;;  %v3105_v15 = vld [vmem:[%s4235_s3 + $0x20] sm:$0xff]  }
  0xd8   :  { %1885 = vmatprep.subr.bf16.mxu0 %v2711_v25  ;;  %v245_v17 = vld [vmem:[%s4233_s1 + $0x6f8] sm:$0xff] }
  0xd9   :  { %1925 = vmatpush1.bf16.msra.mxu1 %v2846_v24  ;;  %v2911_v22 = vcombine.high %v241_v16, %v245_v17  ;;  %v105_v23 = vld [vmem:[%s4233_s1 + $0x298] sm:$0xff]  ;;  %v2910_v27 = vcombine.low %v241_v16, %v245_v17  ;;  %v282_v16 = vsub.s32 0, %v3274_v46 }
  0xda   :  { %1926 = vmatprep.subr.bf16.mxu1 %v2839_v56  ;;  %v109_v24 = vld [vmem:[%s4233_s1 + $0x2b8] sm:$0xff] }
  0xdb   :  { %1886 = vmatpush1.bf16.msra.mxu0 %v2710_v30  ;;  %v233_v25 = vld [vmem:[%s4233_s1 + $0x698] sm:$0xff]  ;;  %v2775_v28 = vcombine.high %v105_v23, %v109_v24  ;;  %v2774_v34 = vcombine.low %v105_v23, %v109_v24  ;;  %v3108_v23 = vld [vmem:[%s4235_s3 + $0x50] sm:$0xff]  }
  0xdc   :  { %1887 = vmatprep.subr.bf16.mxu0 %v2703_v32  ;;  %v237_v56 = vld [vmem:[%s4233_s1 + $0x6b8] sm:$0xff] }
  0xdd   :  { %1927 = vmatpush1.bf16.msra.mxu1 %v2838_v31  ;;  %v2903_v29 = vcombine.high %v233_v25, %v237_v56  ;;  %v97_v30 = vld [vmem:[%s4233_s1 + $0x258] sm:$0xff]  ;;  %v2902_v36 = vcombine.low %v233_v25, %v237_v56  ;;  %v3124_v25 = vld [vmem:[%s4235_s3 + $0xd0] sm:$0xff]  }
  0xde   :  { %1928 = vmatprep.subr.bf16.mxu1 %v2831_v33  ;;  %v101_v31 = vld [vmem:[%s4233_s1 + $0x278] sm:$0xff]  ;;  %v3109_v56 = vld [vmem:[%s4235_s3 + $0x10] sm:$0xff]  }
  0xdf   :  { %1888 = vmatpush1.bf16.msra.mxu0 %v2702_v39  ;;  %v225_v32 = vld [vmem:[%s4233_s1 + $0x658] sm:$0xff]  ;;  %v2767_v37 = vcombine.high %v97_v30, %v101_v31  ;;  %v2766_v43 = vcombine.low %v97_v30, %v101_v31  ;;  %v3111_v30 = vld [vmem:[%s4235_s3 + $0x8] sm:$0xff]  }
  0xe0   :  { %1889 = vmatprep.subr.bf16.mxu0 %v2695_v41  ;;  %v229_v33 = vld [vmem:[%s4233_s1 + $0x678] sm:$0xff] }
  0xe1   :  { %1929 = vmatpush1.bf16.msra.mxu1 %v2830_v40  ;;  %v2895_v38 = vcombine.high %v225_v32, %v229_v33  ;;  %v89_v39 = vld [vmem:[%s4233_s1 + $0x218] sm:$0xff]  ;;  %v2894_v44 = vcombine.low %v225_v32, %v229_v33  ;;  %v3112_v32 = vld [vmem:[%s4235_s3 + $0x40] sm:$0xff]   ;;  %v3127_v33 = vld [vmem:[%s4235_s3 + $0x88] sm:$0xff]  }
  0xe2   :  { %1930 = vmatprep.subr.bf16.mxu1 %v2823_v42  ;;  %v93_v40 = vld [vmem:[%s4233_s1 + $0x238] sm:$0xff] }
  0xe3   :  { %1890 = vmatpush1.bf16.msra.mxu0 %v2694_v48  ;;  %v217_v41 = vld [vmem:[%s4233_s1 + $0x618] sm:$0xff]  ;;  %v2759_v45 = vcombine.high %v89_v39, %v93_v40  ;;  %v2758_v48 = vcombine.low %v89_v39, %v93_v40 }
  0xe4   :  { %1891 = vmatprep.subr.bf16.mxu0 %v2815_v50  ;;  %v221_v42 = vld [vmem:[%s4233_s1 + $0x638] sm:$0xff] }
  0xe5   :  { %1931 = vmatpush1.bf16.msra.mxu1 %v2822_v49  ;;  %v2887_v47 = vcombine.high %v217_v41, %v221_v42  ;;  %v2886_v49 = vcombine.low %v217_v41, %v221_v42  ;;  %v3098_v50 = vld [vmem:[%s4235_s3 + $0x78] sm:$0xff]  }
  0xe6   :  { %1932 = vmatprep.subr.bf16.mxu1 %v2943_v51  ;;  %v286_v51 = vsub.s32 1, %v3274_v46  ;;  %v3114_v52 = vld [vmem:[%s4235_s3 + $0xf8] sm:$0xff]  }
  0xe7   :  { %1892 = vmatpush2.bf16.msra.mxu0 %v2814_v57  ;;  %v3099_v54 = vld [vmem:[%s4235_s3 + $0x38] sm:$0xff]  }
  0xe8   :  { %1893 = vmatprep.subr.bf16.mxu0 %v2807_v60  ;;  %v3115_v57 = vld [vmem:[%s4235_s3 + $0xb8] sm:$0xff]   ;;  %v3116_v60 = vld [vmem:[%s4235_s3 + $0xf0] sm:$0xff]  }
  0xe9   :  { %1933 = vmatpush2.bf16.msra.mxu1 %v2942_v58  ;;  %v287_v58 = vrot.slane %v4021_v53, %v286_v51  ;;  %v3106_v17 = vld [vmem:[%s4235_s3 + $0x58] sm:$0xff]  }
  0xea   :  { %1934 = vmatprep.subr.bf16.mxu1 %v2935_v61  ;;  %v3123_v24 = vld [vmem:[%s4235_s3 + $0x98] sm:$0xff]  }
  0xeb   :  { %1894 = vmatpush2.bf16.msra.mxu0 %v2806_v2  ;;  %v3117_v2 = vld [vmem:[%s4235_s3 + $0xb0] sm:$0xff]   ;;  %v3130_v39 = vld [vmem:[%s4235_s3 + $0x178] sm:$0xff]  }
  0xec   :  { %1895 = vmatprep.subr.bf16.mxu0 %v2799_v5  ;;  %v3146_v40 = vld [vmem:[%s4235_s3 + $0x1f8] sm:$0xff]  }
  0xed   :  { %1935 = vmatpush2.bf16.msra.mxu1 %v2934_v4  ;;  %v3131_v41 = vld [vmem:[%s4235_s3 + $0x138] sm:$0xff]  }
  0xee   :  { %1936 = vmatprep.subr.bf16.mxu1 %v2927_v6  ;;  %v3139_v51 = vld [vmem:[%s4235_s3 + $0x118] sm:$0xff]  }
  0xef   :  { %1896 = vmatpush2.bf16.msra.mxu0 %v2798_v3  ;;  %v3119_v3 = vld [vmem:[%s4235_s3 + $0xa8] sm:$0xff]  }
  0xf0   :  { %1897 = vmatprep.subr.bf16.mxu0 %v2791_v9 }
  0xf1   :  { %1937 = vmatpush2.bf16.msra.mxu1 %v2926_v12 }
  0xf2   :  { %1938 = vmatprep.subr.bf16.mxu1 %v2919_v13  ;;  %v3120_v13 = vld [vmem:[%s4235_s3 + $0xe0] sm:$0xff]  }
  0xf3   :  { %1898 = vmatpush2.bf16.msra.mxu0 %v2790_v18  ;;  %v3121_v18 = vld [vmem:[%s4235_s3 + $0xa0] sm:$0xff]  }
  0xf4   :  { %1899 = vmatprep.subr.bf16.mxu0 %v2783_v21  ;;  %v3107_v21 = vld [vmem:[%s4235_s3 + $0x18] sm:$0xff]  }
  0xf5   :  { %1939 = vmatpush2.bf16.msra.mxu1 %v2918_v20  ;;  %v3122_v20 = vld [vmem:[%s4235_s3 + $0xd8] sm:$0xff]  }
  0xf6   :  { %1940 = vmatprep.subr.bf16.mxu1 %v2911_v22  ;;  %v283_v22 = vrot.slane %v4021_v53, %v282_v16  ;;  %v3148_v16 = vld [vmem:[%s4235_s3 + $0x1f0] sm:$0xff]  }
  0xf7   :  { %1900 = vmatpush2.bf16.msra.mxu0 %v2782_v26 }
  0xf8   :  { %1901 = vmatprep.subr.bf16.mxu0 %v2775_v28  ;;  %v3125_v28 = vld [vmem:[%s4235_s3 + $0x90] sm:$0xff]  }
  0xf9   :  { %1941 = vmatpush2.bf16.msra.mxu1 %v2910_v27  ;;  %v3110_v27 = vld [vmem:[%s4235_s3 + $0x48] sm:$0xff]  }
  0xfa   :  { %1942 = vmatprep.subr.bf16.mxu1 %v2903_v29  ;;  %v3126_v29 = vld [vmem:[%s4235_s3 + $0xc8] sm:$0xff]  }
  0xfb   :  { %1902 = vmatpush2.bf16.msra.mxu0 %v2774_v34  ;;  %v3128_v34 = vld [vmem:[%s4235_s3 + $0xc0] sm:$0xff]  }
  0xfc   :  { %1903 = vmatprep.subr.bf16.mxu0 %v2767_v37 }
  0xfd   :  { %1943 = vmatpush2.bf16.msra.mxu1 %v2902_v36  ;;  %v3113_v36 = vld [vmem:[%s4235_s3] sm:$0xff]  }
  0xfe   :  { %1944 = vmatprep.subr.bf16.mxu1 %v2895_v38  ;;  %v3129_v38 = vld [vmem:[%s4235_s3 + $0x80] sm:$0xff]  }
  0xff   :  { %1904 = vmatpush2.bf16.msra.mxu0 %v2766_v43  ;;  %v3132_v43 = vld [vmem:[%s4235_s3 + $0x170] sm:$0xff]  }
 0x100   :  { %1905 = vmatprep.subr.bf16.mxu0 %v2759_v45  ;;  %v3134_v45 = vld [vmem:[%s4235_s3 + $0x168] sm:$0xff]  }
 0x101   :  { %1945 = vmatpush2.bf16.msra.mxu1 %v2894_v44  ;;  %v3133_v44 = vld [vmem:[%s4235_s3 + $0x130] sm:$0xff]  }
 0x102   :  { %1946 = vmatprep.subr.bf16.mxu1 %v2887_v47  ;;  %v3135_v47 = vld [vmem:[%s4235_s3 + $0x128] sm:$0xff]  }
 0x103   :  { %1906 = vmatpush2.bf16.msra.mxu0 %v2758_v48  ;;  %v3136_v48 = vld [vmem:[%s4235_s3 + $0x160] sm:$0xff]  }
 0x104   :  { %3009 = vmatprep.subr.bf16.mxu0 %v3098_v50  ;;  %v3138_v50 = vld [vmem:[%s4235_s3 + $0x158] sm:$0xff]  }
 0x105   :  { %1947 = vmatpush2.bf16.msra.mxu1 %v2886_v49  ;;  %v3137_v49 = vld [vmem:[%s4235_s3 + $0x120] sm:$0xff]  }
 0x106   :  { %3031 = vmatprep.subr.bf16.mxu1 %v3114_v52  ;;  %v1663_v61 = vpop.f32.mrf.mxu0  ;;  %1908 = vmatmul.mubr.bf16.vlgmr.msra.gmra.mxu0 %v3429_v19  ;;  %v3140_v52 = vld [vmem:[%s4235_s3 + $0x150] sm:$0xff]  }
 0x107   :  { %3010 = vmatpush3.bf16.msra.mxu0 %v3099_v54  ;;  %v1664_v26 = vadd.f32 %v1663_v61, %v283_v22  ;;  %v3141_v54 = vld [vmem:[%s4235_s3 + $0x110] sm:$0xff]   ;;  %v3145_v61 = vld [vmem:[%s4235_s3 + $0x100] sm:$0xff]  }
 0x108   :  { %v1704_v62 = vpop.f32.mrf.mxu1  ;;  %1949 = vmatmul.mubr.bf16.vlgmr.msra.gmra.mxu1 %v3445_v59  ;;  %v1665_v0 = vpop.f32.mrf.mxu0  ;;  %3011 = vmatprep.subr.bf16.mxu0 %v3100_v55  ;;  %v3118_v59 = vld [vmem:[%s4235_s3 + $0xe8] sm:$0xff]   ;;  %v3153_v22 = vld [vmem:[%s4235_s3 + $0x1a0] sm:$0xff]  }
 0x109   :  { %3032 = vmatpush3.bf16.msra.mxu1 %v3115_v57  ;;  %v1666_v19 = vadd.f32 %v1665_v0, %v287_v58  ;;  %v1705_v31 = vadd.f32 %v1704_v62, %v1664_v26  ;;  %v3142_v55 = vld [vmem:[%s4235_s3 + $0x148] sm:$0xff]   ;;  %v3144_v58 = vld [vmem:[%s4235_s3 + $0x140] sm:$0xff]   ;;  %v294_v62 = vsub.s32 3, %v3274_v46 }
 0x10a   :  { %v1706_v4 = vpop.f32.mrf.mxu1  ;;  %3033 = vmatprep.subr.bf16.mxu1 %v3116_v60  ;;  %v1667_v5 = vpop.f32.mrf.mxu0  ;;  %v3143_v57 = vld [vmem:[%s4235_s3 + $0x108] sm:$0xff]   ;;  %v290_v60 = vsub.s32 2, %v3274_v46 }
 0x10b   :  { %v1707_v6 = vadd.f32 %v1706_v4, %v1666_v19  ;;  %3012 = vmatpush3.bf16.msra.mxu0 %v3101_v63  ;;  %v1957_v37 = vmax.f32 %v1705_v31, 0.0  ;;  %v295_v0 = vrot.slane %v4021_v53, %v294_v62  ;;  %v3158_v26 = vld [vmem:[%s4235_s3 + $0x1c8] sm:$0xff]   ;;  %v302_v31 = vsub.s32 5, %v3274_v46 }
 0x10c   :  { %v1708_v7 = vpop.f32.mrf.mxu1  ;;  %v1668_v10 = vpop.f32.mrf.mxu0  ;;  %3013 = vmatprep.subr.bf16.mxu0 %v3102_v1  ;;  %v291_v63 = vrot.slane %v4021_v53, %v290_v60 }
 0x10d   :  { %3034 = vmatpush3.bf16.msra.mxu1 %v3117_v2  ;;  %v1958_v12 = vmax.f32 %v1707_v6, 0.0  ;;  %v1965_v42 = vpack.c.bf16 %v1957_v37, %v1957_v37 }
 0x10e   :  { %v1709_v9 = vpop.f32.mrf.mxu1  ;;  %3035 = vmatprep.subr.bf16.mxu1 %v3118_v59 }
 0x10f   :  { %v1966_v14 = vpack.c.bf16 %v1958_v12, %v1958_v12  ;;  %3014 = vmatpush3.bf16.msra.mxu0 %v3103_v8 }
 0x110   :  { %3015 = vmatprep.subr.bf16.mxu0 %v3104_v11 }
 0x111   :  { %3036 = vmatpush3.bf16.msra.mxu1 %v3119_v3  ;;  %2524 = vmatprep.mubr.bf16.mxu0 %v1966_v14  ;;  %v3147_v14 = vld [vmem:[%s4235_s3 + $0x1b8] sm:$0xff]  }
 0x112   :  { %3037 = vmatprep.subr.bf16.mxu1 %v3120_v13 }
 0x113   :  { %3016 = vmatpush3.bf16.msra.mxu0 %v3105_v15 }
 0x114   :  { %3017 = vmatprep.subr.bf16.mxu0 %v3106_v17  ;;  %v3149_v17 = vld [vmem:[%s4235_s3 + $0x1b0] sm:$0xff]  }
 0x115   :  { %3038 = vmatpush3.bf16.msra.mxu1 %v3121_v18  ;;  %v3150_v18 = vld [vmem:[%s4235_s3 + $0x1e8] sm:$0xff]  }
 0x116   :  { %3039 = vmatprep.subr.bf16.mxu1 %v3122_v20  ;;  %v3151_v20 = vld [vmem:[%s4235_s3 + $0x1a8] sm:$0xff]  }
 0x117   :  { %3018 = vmatpush3.bf16.msra.mxu0 %v3107_v21  ;;  %v3152_v21 = vld [vmem:[%s4235_s3 + $0x1e0] sm:$0xff]  }
 0x118   :  { %3019 = vmatprep.subr.bf16.mxu0 %v3108_v23  ;;  %v3154_v23 = vld [vmem:[%s4235_s3 + $0x1d8] sm:$0xff]  }
 0x119   :  { %3040 = vmatpush3.bf16.msra.mxu1 %v3123_v24  ;;  %v3155_v24 = vld [vmem:[%s4235_s3 + $0x198] sm:$0xff]  }
 0x11a   :  { %3041 = vmatprep.subr.bf16.mxu1 %v3124_v25  ;;  %v3156_v25 = vld [vmem:[%s4235_s3 + $0x1d0] sm:$0xff]  }
 0x11b   :  { %3020 = vmatpush3.bf16.msra.mxu0 %v3109_v56  ;;  %v3157_v56 = vld [vmem:[%s4235_s3 + $0x190] sm:$0xff]  }
 0x11c   :  { %3021 = vmatprep.subr.bf16.mxu0 %v3110_v27  ;;  %v3159_v27 = vld [vmem:[%s4235_s3 + $0x188] sm:$0xff]  }
 0x11d   :  { %3042 = vmatpush3.bf16.msra.mxu1 %v3125_v28  ;;  %v3160_v28 = vld [vmem:[%s4235_s3 + $0x1c0] sm:$0xff]  }
 0x11e   :  { %3043 = vmatprep.subr.bf16.mxu1 %v3126_v29  ;;  %v3161_v29 = vld [vmem:[%s4235_s3 + $0x180] sm:$0xff]  }
 0x11f   :  { %3022 = vmatpush3.bf16.msra.mxu0 %v3111_v30  ;;  %v298_v30 = vsub.s32 4, %v3274_v46 }
 0x120   :  { %3023 = vmatprep.subr.bf16.mxu0 %v3112_v32 }
 0x121   :  { %3044 = vmatpush3.bf16.msra.mxu1 %v3127_v33  ;;  %v299_v32 = vrot.slane %v4021_v53, %v298_v30  ;;  %v303_v33 = vrot.slane %v4021_v53, %v302_v31 }
 0x122   :  { %3045 = vmatprep.subr.bf16.mxu1 %v3128_v34 }
 0x123   :  { %3024 = vmatpush3.bf16.msra.mxu0 %v3113_v36 }
 0x124   :  { %3053 = vmatprep.subr.bf16.mxu0 %v3130_v39 }
 0x125   :  { %3046 = vmatpush3.bf16.msra.mxu1 %v3129_v38 }
 0x126   :  { %3075 = vmatprep.subr.bf16.mxu1 %v3146_v40  ;;  %2525 = vmatmul.mubr.bf16.vlgmr.msra.gmra.mxu0 %v1965_v42 }
 0x127   :  { %3054 = vmatpush3.bf16.msra.mxu0 %v3131_v41 }
 0x128   :  { %3055 = vmatprep.subr.bf16.mxu0 %v3132_v43 }
 0x12b   :  { %3056 = vmatpush3.bf16.msra.mxu0 %v3133_v44 }
 0x12c   :  { %3057 = vmatprep.subr.bf16.mxu0 %v3134_v45 }
 0x12f   :  { %3058 = vmatpush3.bf16.msra.mxu0 %v3135_v47 }
 0x130   :  { %3059 = vmatprep.subr.bf16.mxu0 %v3136_v48 }
 0x133   :  { %3060 = vmatpush3.bf16.msra.mxu0 %v3137_v49 }
 0x134   :  { %3061 = vmatprep.subr.bf16.mxu0 %v3138_v50 }
 0x137   :  { %3062 = vmatpush3.bf16.msra.mxu0 %v3139_v51 }
 0x138   :  { %3063 = vmatprep.subr.bf16.mxu0 %v3140_v52  ;;  %v306_v52 = vsub.s32 6, %v3274_v46 }
 0x13b   :  { %3064 = vmatpush3.bf16.msra.mxu0 %v3141_v54  ;;  %v310_v54 = vsub.s32 7, %v3274_v46 }
 0x13c   :  { %3065 = vmatprep.subr.bf16.mxu0 %v3142_v55  ;;  %v307_v55 = vrot.slane %v4021_v53, %v306_v52 }
 0x13f   :  { %3066 = vmatpush3.bf16.msra.mxu0 %v3143_v57  ;;  %v311_v57 = vrot.slane %v4021_v53, %v310_v54 }
 0x140   :  { %3067 = vmatprep.subr.bf16.mxu0 %v3144_v58 }
 0x143   :  { %3068 = vmatpush3.bf16.msra.mxu0 %v3145_v61 }
 0x146   :  { %v1745_v1 = vpop.f32.mrf.mxu0 }
 0x147   :  { %v1746_v2 = vadd.f32 %v1745_v1, %v291_v63 }
 0x148   :  { %v1786_v19 = vpop.f32.mrf.mxu1  ;;  %v1747_v4 = vpop.f32.mrf.mxu0 }
 0x149   :  { %v1787_v59 = vadd.f32 %v1786_v19, %v1746_v2  ;;  %v1748_v5 = vadd.f32 %v1747_v4, %v295_v0 }
 0x14a   :  { %v1788_v6 = vpop.f32.mrf.mxu1  ;;  %v1749_v7 = vpop.f32.mrf.mxu0 }
 0x14b   :  { %v1789_v8 = vadd.f32 %v1788_v6, %v1748_v5  ;;  %v1959_v11 = vmax.f32 %v1787_v59, 0.0 }
 0x14c   :  { %v1790_v10 = vpop.f32.mrf.mxu1  ;;  %v1750_v3 = vpop.f32.mrf.mxu0 }
 0x14d   :  { %v1960_v12 = vmax.f32 %v1789_v8, 0.0  ;;  %v1967_v15 = vpack.c.bf16 %v1959_v11, %v1959_v11 }
 0x14e   :  { %v1791_v9 = vpop.f32.mrf.mxu1 }
 0x14f   :  { %v1968_v13 = vpack.c.bf16 %v1960_v12, %v1960_v12  ;;  %v2944_v9 = vld [vmem:[%s4237_s4] ss:$0 sm:$0xff] }
 0x151   :  { %2564 = vmatprep.mubr.bf16.mxu1 %v1968_v13 }
 0x152   :  { %2565 = vmatmul.mubr.bf16.vlgmr.msra.gmra.mxu1 %v1967_v15 }
 0x153   :  { %3076 = vmatpush3.bf16.msra.mxu1 %v3147_v14 }
 0x154   :  { %3077 = vmatprep.subr.bf16.mxu1 %v3148_v16 }
 0x157   :  { %3078 = vmatpush3.bf16.msra.mxu1 %v3149_v17 }
 0x158   :  { %3079 = vmatprep.subr.bf16.mxu1 %v3150_v18 }
 0x15b   :  { %3080 = vmatpush3.bf16.msra.mxu1 %v3151_v20 }
 0x15c   :  { %3081 = vmatprep.subr.bf16.mxu1 %v3152_v21 }
 0x15f   :  { %3082 = vmatpush3.bf16.msra.mxu1 %v3153_v22 }
 0x160   :  { %3083 = vmatprep.subr.bf16.mxu1 %v3154_v23 }
 0x163   :  { %3084 = vmatpush3.bf16.msra.mxu1 %v3155_v24 }
 0x164   :  { %3085 = vmatprep.subr.bf16.mxu1 %v3156_v25 }
 0x167   :  { %3086 = vmatpush3.bf16.msra.mxu1 %v3157_v56 }
 0x168   :  { %3087 = vmatprep.subr.bf16.mxu1 %v3158_v26  ;;  %v2653_v26 = vand.u32 127, %v280_v35 }
 0x16a   :  { %vm2660_vm0 = vcmp.ge.s32.totalorder %v2653_v26, 1  ;;  %vm2661_vm1 = vcmp.le.s32.totalorder %v2653_v26, 10  ;;  %vm2680_vm4 = vcmp.eq.s32.totalorder %v2653_v26, 0 }
 0x16b   :  { %3088 = vmatpush3.bf16.msra.mxu1 %v3159_v27  ;;  %vm2662_vm2 = vmand %vm2660_vm0, %vm2661_vm1 }
 0x16c   :  { %3089 = vmatprep.subr.bf16.mxu1 %v3160_v28 }
 0x16f   :  { %3090 = vmatpush3.bf16.msra.mxu1 %v3161_v29 }
 0x186   :  { %v1827_v34 = vpop.f32.mrf.mxu0 }
 0x187   :  { %v1828_v36 = vadd.f32 %v1827_v34, %v299_v32 }
 0x188   :  { %v1868_v37 = vpop.f32.mrf.mxu1  ;;  %v1829_v38 = vpop.f32.mrf.mxu0 }
 0x189   :  { %v1869_v39 = vadd.f32 %v1868_v37, %v1828_v36  ;;  %v1830_v40 = vadd.f32 %v1829_v38, %v303_v33 }
 0x18a   :  { %v1870_v41 = vpop.f32.mrf.mxu1  ;;  %v1831_v42 = vpop.f32.mrf.mxu0 }
 0x18b   :  { %v1871_v43 = vadd.f32 %v1870_v41, %v1830_v40  ;;  %v1961_v45 = vmax.f32 %v1869_v39, 0.0 }
 0x18c   :  { %v1872_v44 = vpop.f32.mrf.mxu1  ;;  %v1832_v47 = vpop.f32.mrf.mxu0 }
 0x18d   :  { %v1962_v48 = vmax.f32 %v1871_v43, 0.0  ;;  %v1969_v51 = vpack.c.bf16 %v1961_v45, %v1961_v45 }
 0x18e   :  { %v1873_v49 = vpop.f32.mrf.mxu1 }
 0x18f   :  { %v1970_v50 = vpack.c.bf16 %v1962_v48, %v1962_v48 }
 0x191   :  { %2604 = vmatprep.mubr.bf16.mxu0 %v1970_v50 }
 0x192   :  { %2605 = vmatmul.mubr.bf16.vlgmr.msra.gmra.mxu0 %v1969_v51 }
 0x1c6   :  { %v1909_v58 = vpop.f32.mrf.mxu0 }
 0x1c7   :  { %v1910_v60 = vadd.f32 %v1909_v58, %v307_v55 }
 0x1c8   :  { %v1950_v61 = vpop.f32.mrf.mxu1  ;;  %v1911_v62 = vpop.f32.mrf.mxu0 }
 0x1c9   :  { %v1951_v63 = vadd.f32 %v1950_v61, %v1910_v60  ;;  %v1912_v0 = vadd.f32 %v1911_v62, %v311_v57 }
 0x1ca   :  { %v1952_v1 = vpop.f32.mrf.mxu1  ;;  %v1913_v2 = vpop.f32.mrf.mxu0 }
 0x1cb   :  { %v1953_v19 = vadd.f32 %v1952_v1, %v1912_v0  ;;  %v1963_v59 = vmax.f32 %v1951_v63, 0.0 }
 0x1cc   :  { %v1954_v4 = vpop.f32.mrf.mxu1  ;;  %v1914_v5 = vpop.f32.mrf.mxu0 }
 0x1cd   :  { %v1964_v6 = vmax.f32 %v1953_v19, 0.0  ;;  %v1971_v46 = vpack.c.bf16 %v1963_v59, %v1963_v59 }
 0x1ce   :  { %v1955_v7 = vpop.f32.mrf.mxu1 }
 0x1cf   :  { %v1972_v8 = vpack.c.bf16 %v1964_v6, %v1964_v6 }
 0x1d1   :  { %2644 = vmatprep.mubr.bf16.mxu1 %v1972_v8 }
 0x1d2   :  { %2645 = vmatmul.mubr.bf16.vlgmr.msra.gmra.mxu1 %v1971_v46 }
 0x1e6   :  { %v3025_v10 = vpop.f32.mrf.mxu0 }
 0x1e8   :  { %v3026_v53 = vpop.f32.mrf.mxu0 }
 0x1e9   :  { %v3027_v11 = vadd.f32 %v3026_v53, %v3025_v10 }
 0x1ea   :  { %v3028_v3 = vpop.f32.mrf.mxu0 }
 0x1eb   :  { %v2527_v15 = vadd.f32 %v3027_v11, %v2944_v9 }
 0x1ec   :  { %v3029_v12 = vpop.f32.mrf.mxu0 }
 0x212   :  { %v3047_v13 = vpop.f32.mrf.mxu1 }
 0x214   :  { %v3048_v14 = vpop.f32.mrf.mxu1 }
 0x215   :  { %v3049_v16 = vadd.f32 %v3048_v14, %v3047_v13 }
 0x216   :  { %v3050_v17 = vpop.f32.mrf.mxu1 }
 0x217   :  { %v2567_v18 = vadd.f32 %v3049_v16, %v2527_v15 }
 0x218   :  { %v3051_v20 = vpop.f32.mrf.mxu1 }
 0x252   :  { %v3069_v21 = vpop.f32.mrf.mxu0 }
 0x254   :  { %v3070_v22 = vpop.f32.mrf.mxu0 }
 0x255   :  { %v3071_v23 = vadd.f32 %v3070_v22, %v3069_v21 }
 0x256   :  { %v3072_v24 = vpop.f32.mrf.mxu0 }
 0x257   :  { %v2607_v25 = vadd.f32 %v3071_v23, %v2567_v18 }
 0x258   :  { %v3073_v56 = vpop.f32.mrf.mxu0 }
 0x292   :  { %v3091_v27 = vpop.f32.mrf.mxu1 }
 0x294   :  { %v3092_v28 = vpop.f32.mrf.mxu1 }
 0x295   :  { %v3093_v29 = vadd.f32 %v3092_v28, %v3091_v27 }
 0x296   :  { %v3094_v30 = vpop.f32.mrf.mxu1 }
 0x297   :  { %v2647_v31 = vadd.f32 %v3093_v29, %v2607_v25 }
 0x298   :  { %v3095_v32 = vpop.f32.mrf.mxu1 }
 0x299   :  { %v2663_v33 = vsel %vm2662_vm2, %v2647_v31, -1e+30  ;;  %v2654_v41 = vsub.f32 0.0, %v2647_v31 }
 0x29a   :  { %v2665_v34 = vsel %vm2664_vm3, %v2663_v33, -inf }
 0x29b   :  { %2666 = vmax.xlane.f32.xlu0 %v2665_v34  ;;  %v2655_v42 = vmul.f32 1.442695, %v2654_v41 }
 0x324   :  { %v2667_v36 = vpop.xlane.xlu0 %2666 }
 0x325   :  { %v2668_v37 = vsub.f32 %v2663_v33, %v2667_v36 }
 0x327   :  { %v2669_v38 = vmul.f32 1.442695, %v2668_v37 }
 0x329   :  { %3162 = vpow2.f32 %v2669_v38 }
 0x32a   :  { %3164 = vpow2.f32 %v2655_v42 }
 0x336   :  { %v3163_v39 = vpop.eup %3162 }
 0x337   :  { %v2671_v40 = vsel %vm2662_vm2, %v3163_v39, 0.0  ;;  %v3165_v44 = vpop.eup %3164 }
 0x338   :  { %v2672_v35 = vsel %vm2664_vm3, %v2671_v40, 0.0  ;;  %v2657_v45 = vadd.f32 1.0, %v3165_v44 }
 0x339   :  { %2673 = vadd.xlane.f32.xlu0 %v2672_v35 }
 0x3c2   :  { %v2674_v43 = vpop.xlane.xlu0 %2673 }
 0x3c3   :  { %3166 = vrcp.f32 %v2674_v43 }
 0x3c4   :  { %3168 = vrcp.f32 %v2657_v45 }
 0x3d0   :  { %v3167_v47 = vpop.eup %3166 }
 0x3d1   :  { %v2676_v48 = vmul.f32 %v3167_v47, %v2674_v43  ;;  %v3169_v52 = vpop.eup %3168 }
 0x3d3   :  { %v2677_v49 = vsub.f32 2.0, %v2676_v48 }
 0x3d5   :  { %v2678_v50 = vmul.f32 %v3167_v47, %v2677_v49 }
 0x3d7   :  { %v2679_v51 = vmul.f32 %v2678_v50, %v2671_v40 }
 0x3d9   :  { %v2681_v54 = vsel %vm2680_vm4, %v3169_v52, %v2679_v51 }
 0x3da   :  { %2682 = vst [vmem:[%s4238_s5] sm:$0x3] %v2681_v54 }

</bundles_post_ra>
